<compile_context>
chip_gen: v7x
topology: tpu7x:2x2x1
jax: 0.10.0
libtpu: 0.0.40
codegen_flags: <defaults>
</compile_context>

<pallas_src>
import functools
import math

import jax
import jax.numpy as jnp
from jax import lax
from jax.experimental import pallas as pl
from jax.experimental.pallas import tpu as pltpu


_PARALLEL_1D = pltpu.CompilerParams(dimension_semantics=("parallel",))


# ----------------------------------------------------------------------------
# BlockSpec helpers (all grids here are 1-D)
# ----------------------------------------------------------------------------
def _bcast(shape):
    """Whole-array block, identical at every grid step (weights / small constants)."""
    n = len(shape)
    return pl.BlockSpec(tuple(shape), lambda *_: (0,) * n)


def _batched(shape):
    """Block along the leading (batch / stream) axis, full trailing dims."""
    n = len(shape)
    return pl.BlockSpec((1,) + tuple(shape[1:]), lambda b: (b,) + (0,) * (n - 1))


# ----------------------------------------------------------------------------
# In-kernel helpers (operate on values)
# ----------------------------------------------------------------------------
def _shift_rows(x, s, circular):
    """y[t] = x[t - s]; zero fill (causal) or wrap-around (circular).

    Implemented as a 0/1 permutation-matrix matmul so it maps onto the MXU and avoids
    sublane rolls / concatenates (robust lowering; the MXU has plenty of slack here).
    """
    L = x.shape[0]
    t = lax.broadcasted_iota(jnp.int32, (L, L), 0)
    u = lax.broadcasted_iota(jnp.int32, (L, L), 1)
    src = (t - s) % L if circular else (t - s)
    sel = jnp.where(u == src, 1.0, 0.0).astype(jnp.float32)
    return jnp.dot(sel, x, preferred_element_type=jnp.float32)


def _layernorm(x, g, b, eps=1e-5):
    mu = jnp.mean(x, axis=-1, keepdims=True)
    var = jnp.mean((x - mu) ** 2, axis=-1, keepdims=True)
    return (x - mu) * lax.rsqrt(var + eps) * g + b


def _mha(q, k, v, n_heads, scale, causal):
    """Dense multi-head softmax attention on a single (L, D) tile.

    Heads are sliced along the lane axis; per-head outputs are scattered back to their
    lane slots with 0/1 placement matrices (MXU) instead of a minor-dim concatenate.
    """
    Lq, D = q.shape
    Lk = k.shape[0]
    dh = D // n_heads
    if causal:
        qi = lax.broadcasted_iota(jnp.int32, (Lq, Lk), 0)
        ki = lax.broadcasted_iota(jnp.int32, (Lq, Lk), 1)
        keep = ki <= qi
    out = None
    for h in range(n_heads):
        sl = slice(h * dh, (h + 1) * dh)
        s = jnp.dot(q[:, sl], k[:, sl].T, preferred_element_type=jnp.float32) * scale
        if causal:
            s = jnp.where(keep, s, jnp.float32(-1e30))
        m = jnp.max(s, axis=-1, keepdims=True)
        p = jnp.exp(s - m)
        p = p * pl.reciprocal(jnp.sum(p, axis=-1, keepdims=True), approx=True)
        oh = jnp.dot(p, v[:, sl], preferred_element_type=jnp.float32)      # (Lq, dh)
        r = lax.broadcasted_iota(jnp.int32, (dh, D), 0)
        c = lax.broadcasted_iota(jnp.int32, (dh, D), 1)
        scat = jnp.where(c == r + h * dh, 1.0, 0.0).astype(jnp.float32)
        part = jnp.dot(oh, scat, preferred_element_type=jnp.float32)       # (Lq, D)
        out = part if out is None else out + part
    return out


# ----------------------------------------------------------------------------
# Pallas kernels
# ----------------------------------------------------------------------------
def _embed_kernel(x_ref, xm_ref, wtok_ref, wtime_ref, pos_ref, o_ref):
    """DataEmbedding: circular Conv1d(k=3) token embedding + time-feature linear
    + positional embedding (passed pre-built, zeros if disabled) — fused."""
    x = x_ref[0]
    wtok = wtok_ref[...]                                  # (3, C, D)
    out = jnp.dot(_shift_rows(x, 1, True), wtok[0], preferred_element_type=jnp.float32)
    out += jnp.dot(x, wtok[1], preferred_element_type=jnp.float32)
    out += jnp.dot(_shift_rows(x, -1, True), wtok[2], preferred_element_type=jnp.float32)
    out += jnp.dot(xm_ref[0], wtime_ref[...], preferred_element_type=jnp.float32)
    out += pos_ref[...]
    o_ref[0] = out.astype(o_ref.dtype)


def _fft_qkv_kernel(x_ref, c_ref, wq_ref, bq_ref, wkv_ref, bkv_ref, q_ref, kv_ref):
    """Fused Q projection and packed K|V projection (KV packed along N)."""
    q_ref[0] = (jnp.dot(x_ref[0], wq_ref[...], preferred_element_type=jnp.float32)
                + bq_ref[...]).astype(q_ref.dtype)
    kv_ref[0] = (jnp.dot(c_ref[0], wkv_ref[...], preferred_element_type=jnp.float32)
                 + bkv_ref[...]).astype(kv_ref.dtype)


def _attn_kv_kernel(q_ref, kv_ref, o_ref, *, n_heads, scale, causal):
    """All-heads attention for one batch tile; K|V arrive packed along lanes."""
    q = q_ref[0]
    kv = kv_ref[0]
    D = q.shape[-1]
    o_ref[0] = _mha(q, kv[:, :D], kv[:, D:], n_heads, scale, causal).astype(o_ref.dtype)


def _proj_res_ln_kernel(x_ref, a_ref, wo_ref, bo_ref, g_ref, b_ref, o_ref):
    """Output projection + residual add + LayerNorm — fused."""
    y = (x_ref[0]
         + jnp.dot(a_ref[0], wo_ref[...], preferred_element_type=jnp.float32)
         + bo_ref[...])
    o_ref[0] = _layernorm(y, g_ref[...], b_ref[...]).astype(o_ref.dtype)


def _ls_layer_kernel(x_ref, c_ref, wqc_ref, wkc_ref, wv_ref, bv_ref,
                     wo_ref, bo_ref, g_ref, b_ref, o_ref,
                     *, n_heads, scale, causal, qk_ker):
    """Entire LogSparse attention sub-layer in one kernel:
    causal-conv Q/K, linear V, MHA, out-proj, residual add, LayerNorm."""
    x = x_ref[0]
    c = c_ref[0]

    def causal_conv(inp, w):                              # w: (qk_ker, D, D)
        out = jnp.dot(inp, w[qk_ker - 1], preferred_element_type=jnp.float32)
        for s in range(1, qk_ker):
            out += jnp.dot(_shift_rows(inp, s, False), w[qk_ker - 1 - s],
                           preferred_element_type=jnp.float32)
        return out

    q = causal_conv(x, wqc_ref[...])
    k = causal_conv(c, wkc_ref[...])
    v = jnp.dot(c, wv_ref[...], preferred_element_type=jnp.float32) + bv_ref[...]
    att = _mha(q, k, v, n_heads, scale, causal)
    y = x + jnp.dot(att, wo_ref[...], preferred_element_type=jnp.float32) + bo_ref[...]
    o_ref[0] = _layernorm(y, g_ref[...], b_ref[...]).astype(o_ref.dtype)


def _ffn_res_ln_kernel(x_ref, w1_ref, b1_ref, w2_ref, b2_ref, g_ref, b_ref, o_ref):
    """Position-wise FFN + residual + LayerNorm; one grid step per stream (freq/trend)."""
    x = x_ref[0]
    h = jax.nn.gelu(jnp.dot(x, w1_ref[0], preferred_element_type=jnp.float32) + b1_ref[0],
                    approximate=True)
    y = x + jnp.dot(h, w2_ref[0], preferred_element_type=jnp.float32) + b2_ref[0]
    o_ref[0] = _layernorm(y, g_ref[0], b_ref[0]).astype(o_ref.dtype)


def _ln_stream_kernel(x_ref, g_ref, b_ref, o_ref):
    o_ref[0] = _layernorm(x_ref[0], g_ref[0], b_ref[0]).astype(o_ref.dtype)


def _head_kernel(df_ref, dt_ref, gf_ref, bf_ref, gt_ref, bt_ref,
                 w1_ref, b1_ref, w2_ref, b2_ref, wo_ref, bo_ref, o_ref):
    """Decoder head: per-stream output LayerNorms + stream sum + MLP-out (residual)
    + final output projection — all fused."""
    x = (_layernorm(df_ref[0], gf_ref[...], bf_ref[...])
         + _layernorm(dt_ref[0], gt_ref[...], bt_ref[...]))
    h = jax.nn.gelu(jnp.dot(x, w1_ref[...], preferred_element_type=jnp.float32) + b1_ref[...],
                    approximate=True)
    x = x + jnp.dot(h, w2_ref[...], preferred_element_type=jnp.float32) + b2_ref[...]
    o_ref[0] = (jnp.dot(x, wo_ref[...], preferred_element_type=jnp.float32)
                + bo_ref[...]).astype(o_ref.dtype)


# ----------------------------------------------------------------------------
# pallas_call wrappers
# ----------------------------------------------------------------------------
def data_embedding(x, x_mark, p, pos):
    B, L, _ = x.shape
    D = p['w_time'].shape[-1]
    return pl.pallas_call(
        _embed_kernel,
        out_shape=jax.ShapeDtypeStruct((B, L, D), jnp.float32),
        grid=(B,),
        in_specs=[_batched(x.shape), _batched(x_mark.shape),
                  _bcast(p['w_token'].shape), _bcast(p['w_time'].shape),
                  _bcast(pos.shape)],
        out_specs=_batched((B, L, D)),
        compiler_params=_PARALLEL_1D,
    )(x, x_mark, p['w_token'], p['w_time'], pos)


def fft_attention_layer(x, cross, p, n_heads):
    """FFTAttention sub-layer: 3 pallas_calls (QKV proj | attention on rFFT | proj+res+LN)."""
    B, Lq, D = x.shape
    Lk = cross.shape[1]
    q, kv = pl.pallas_call(
        _fft_qkv_kernel,
        out_shape=(jax.ShapeDtypeStruct((B, Lq, D), jnp.float32),
                   jax.ShapeDtypeStruct((B, Lk, 2 * D), jnp.float32)),
        grid=(B,),
        in_specs=[_batched(x.shape), _batched(cross.shape),
                  _bcast(p['wq'].shape), _bcast(p['bq'].shape),
                  _bcast(p['wkv'].shape), _bcast(p['bkv'].shape)],
        out_specs=(_batched((B, Lq, D)), _batched((B, Lk, 2 * D))),
        compiler_params=_PARALLEL_1D,
    )(x, cross, p['wq'], p['bq'], p['wkv'], p['bkv'])

    # TODO(synk): FFTAttention approximated — attention on rFFT(q/k/v) with real & imag
    # stacked along batch, then irFFT back (FFT itself runs in XLA, not Pallas).
    qf = jnp.fft.rfft(q, axis=1)
    kvf = jnp.fft.rfft(kv, axis=1)
    qs = jnp.concatenate([qf.real, qf.imag], axis=0)                 # (2B, Lfq, D)
    kvs = jnp.concatenate([kvf.real, kvf.imag], axis=0)              # (2B, Lfk, 2D)
    Lfq = qs.shape[1]
    scale = 1.0 / math.sqrt(D // n_heads)
    of = pl.pallas_call(
        functools.partial(_attn_kv_kernel, n_heads=n_heads, scale=scale, causal=False),
        out_shape=jax.ShapeDtypeStruct((2 * B, Lfq, D), jnp.float32),
        grid=(2 * B,),
        in_specs=[_batched(qs.shape), _batched(kvs.shape)],
        out_specs=_batched((2 * B, Lfq, D)),
        compiler_params=_PARALLEL_1D,
    )(qs, kvs)
    o = jnp.fft.irfft(of[:B] + 1j * of[B:], n=Lq, axis=1).astype(jnp.float32)

    return pl.pallas_call(
        _proj_res_ln_kernel,
        out_shape=jax.ShapeDtypeStruct((B, Lq, D), jnp.float32),
        grid=(B,),
        in_specs=[_batched(x.shape), _batched(o.shape),
                  _bcast(p['wo'].shape), _bcast(p['bo'].shape),
                  _bcast(p['g'].shape), _bcast(p['b'].shape)],
        out_specs=_batched((B, Lq, D)),
        compiler_params=_PARALLEL_1D,
    )(x, o, p['wo'], p['bo'], p['g'], p['b'])


def logsparse_layer(x, cross, p, n_heads, causal):
    """Whole LogSparse attention sub-layer as a single pallas_call."""
    B, Lq, D = x.shape
    scale = 1.0 / math.sqrt(D // n_heads)
    kern = functools.partial(_ls_layer_kernel, n_heads=n_heads, scale=scale,
                             causal=causal, qk_ker=p['wq_conv'].shape[0])
    return pl.pallas_call(
        kern,
        out_shape=jax.ShapeDtypeStruct((B, Lq, D), jnp.float32),
        grid=(B,),
        in_specs=[_batched(x.shape), _batched(cross.shape),
                  _bcast(p['wq_conv'].shape), _bcast(p['wk_conv'].shape),
                  _bcast(p['wv'].shape), _bcast(p['bv'].shape),
                  _bcast(p['wo'].shape), _bcast(p['bo'].shape),
                  _bcast(p['g'].shape), _bcast(p['b'].shape)],
        out_specs=_batched((B, Lq, D)),
        compiler_params=_PARALLEL_1D,
    )(x, cross, p['wq_conv'], p['wk_conv'], p['wv'], p['bv'],
      p['wo'], p['bo'], p['g'], p['b'])


def ffn_res_ln_dual(x_f, x_t, p):
    """FFN + residual + LayerNorm for BOTH streams in one pallas_call (grid over stream)."""
    B, L, D = x_f.shape
    x_st = jnp.stack([x_f.reshape(B * L, D), x_t.reshape(B * L, D)], axis=0)
    out = pl.pallas_call(
        _ffn_res_ln_kernel,
        out_shape=jax.ShapeDtypeStruct(x_st.shape, jnp.float32),
        grid=(2,),
        in_specs=[_batched(x_st.shape), _batched(p['w1'].shape), _batched(p['b1'].shape),
                  _batched(p['w2'].shape), _batched(p['b2'].shape),
                  _batched(p['g'].shape), _batched(p['b'].shape)],
        out_specs=_batched(x_st.shape),
        compiler_params=_PARALLEL_1D,
    )(x_st, p['w1'], p['b1'], p['w2'], p['b2'], p['g'], p['b'])
    return out[0].reshape(B, L, D), out[1].reshape(B, L, D)


def ln_dual(x_f, x_t, p):
    """Encoder output norms for both streams in one pallas_call."""
    B, L, D = x_f.shape
    x_st = jnp.stack([x_f.reshape(B * L, D), x_t.reshape(B * L, D)], axis=0)
    out = pl.pallas_call(
        _ln_stream_kernel,
        out_shape=jax.ShapeDtypeStruct(x_st.shape, jnp.float32),
        grid=(2,),
        in_specs=[_batched(x_st.shape), _batched(p['g'].shape), _batched(p['b'].shape)],
        out_specs=_batched(x_st.shape),
        compiler_params=_PARALLEL_1D,
    )(x_st, p['g'], p['b'])
    return out[0].reshape(B, L, D), out[1].reshape(B, L, D)


def decoder_head(df, dt, p):
    B, L, _ = df.shape
    Co = p['w_out'].shape[-1]
    return pl.pallas_call(
        _head_kernel,
        out_shape=jax.ShapeDtypeStruct((B, L, Co), jnp.float32),
        grid=(B,),
        in_specs=[_batched(df.shape), _batched(dt.shape),
                  _bcast(p['gf'].shape), _bcast(p['bf'].shape),
                  _bcast(p['gt'].shape), _bcast(p['bt'].shape),
                  _bcast(p['w1'].shape), _bcast(p['b1'].shape),
                  _bcast(p['w2'].shape), _bcast(p['b2'].shape),
                  _bcast(p['w_out'].shape), _bcast(p['b_out'].shape)],
        out_specs=_batched((B, L, Co)),
        compiler_params=_PARALLEL_1D,
    )(df, dt, p['gf'], p['bf'], p['gt'], p['bt'],
      p['w1'], p['b1'], p['w2'], p['b2'], p['w_out'], p['b_out'])


# ----------------------------------------------------------------------------
# Plain-JAX preprocessing (tiny)
# ----------------------------------------------------------------------------
def moving_avg(x, k):
    B, L, C = x.shape
    pad_l = (k - 1) // 2
    pad_r = k - 1 - pad_l
    parts = []
    if pad_l > 0:
        parts.append(jnp.repeat(x[:, :1], pad_l, axis=1))
    parts.append(x)
    if pad_r > 0:
        parts.append(jnp.repeat(x[:, -1:], pad_r, axis=1))
    xp = jnp.concatenate(parts, axis=1)
    return jnp.mean(jnp.stack([xp[:, i:i + L] for i in range(k)], axis=0), axis=0)


def get_wt(x, num_decomp):
    # TODO(synk): moving-average stand-in for the pywt stationary wavelet transform.
    trend = x
    details = []
    for j in range(num_decomp):
        new_trend = moving_avg(trend, 2 ** (j + 1))
        details.append(trend - new_trend)
        trend = new_trend
    return jnp.concatenate(details, axis=-1), trend


def positional_embedding(L, D):
    pos = jnp.arange(L, dtype=jnp.float32)[:, None]
    i = jnp.arange(0, D, 2, dtype=jnp.float32)
    div = jnp.exp(-i * (math.log(10000.0) / D))
    pe = jnp.zeros((L, D), jnp.float32)
    pe = pe.at[:, 0::2].set(jnp.sin(pos * div))
    pe = pe.at[:, 1::2].set(jnp.cos(pos * div))
    return pe


# ----------------------------------------------------------------------------
# Forward pass
# ----------------------------------------------------------------------------
def forward(params, cfg, x_enc, x_mark_enc, x_dec, x_mark_dec):
    nd, pred_len = cfg['num_decomp'], cfg['pred_len']
    nh, d = cfg['n_heads'], cfg['d_model']

    x_enc = x_enc.astype(jnp.float32)
    x_mark_enc = x_mark_enc.astype(jnp.float32)
    x_dec = x_dec.astype(jnp.float32)
    x_mark_dec = x_mark_dec.astype(jnp.float32)

    x_enc_freq, x_enc_trend = get_wt(x_enc, nd)
    x_dec_freq, x_dec_trend = get_wt(x_dec[:, :-pred_len, :], nd)
    dec_trend_place = jnp.repeat(jnp.mean(x_dec_trend, axis=1, keepdims=True), pred_len, axis=1)
    x_dec_trend = jnp.concatenate([x_dec_trend, dec_trend_place], axis=1)
    dec_freq_place = jnp.zeros((x_dec_freq.shape[0], pred_len, x_dec_freq.shape[2]),
                               x_dec_freq.dtype)
    x_dec_freq = jnp.concatenate([x_dec_freq, dec_freq_place], axis=1)

    Le, Ld = x_enc.shape[1], x_dec.shape[1]
    pe_enc, pe_dec = positional_embedding(Le, d), positional_embedding(Ld, d)
    no_pe_enc = jnp.zeros((Le, d), jnp.float32)
    no_pe_dec = jnp.zeros((Ld, d), jnp.float32)

    ef = data_embedding(x_enc_freq, x_mark_enc, params['emb_enc_f'], no_pe_enc)
    df = data_embedding(x_dec_freq, x_mark_dec, params['emb_dec_f'], no_pe_dec)
    et = data_embedding(x_enc_trend, x_mark_enc, params['emb_enc_t'], pe_enc)
    dt = data_embedding(x_dec_trend, x_mark_dec, params['emb_dec_t'], pe_dec)

    for lp in params['enc_layers']:
        ef = fft_attention_layer(ef, ef, lp['fft'], nh)
        et = logsparse_layer(et, et, lp['ls'], nh, causal=False)
        ef, et = ffn_res_ln_dual(ef, et, lp['ffn'])
    ef, et = ln_dual(ef, et, params['enc_norm'])

    for lp in params['dec_layers']:
        df = fft_attention_layer(df, df, lp['fft_self'], nh)
        dt = logsparse_layer(dt, dt, lp['ls_self'], nh, causal=True)
        df = fft_attention_layer(df, ef, lp['fft_cross'], nh)
        dt = logsparse_layer(dt, et, lp['ls_cross'], nh, causal=False)
        df, dt = ffn_res_ln_dual(df, dt, lp['ffn'])

    # TODO(synk): exact FFT.Decoder output recombination is approximated (sum of streams).
    out = decoder_head(df, dt, params['head'])
    return out[:, -pred_len:, :]


# ----------------------------------------------------------------------------
# Deterministic parameter initialization (pre-shaped / pre-packed for the kernels)
# ----------------------------------------------------------------------------
class KeyGen:
    def __init__(self, seed):
        self.key = jax.random.PRNGKey(seed)

    def __call__(self):
        self.key, sub = jax.random.split(self.key)
        return sub


def init_params(kg, cfg):
    d, d_ff = cfg['d_model'], cfg['d_ff']
    qk, mark = cfg['qk_ker'], cfg['mark_dim']
    nd = cfg['num_decomp']

    def rand(shape, scale):
        return jax.random.normal(kg(), shape, jnp.float32) * scale

    def dense(fi, fo):
        return rand((fi, fo), fi ** -0.5), jnp.zeros((1, fo), jnp.float32)

    def ones(shape):
        return jnp.ones(shape, jnp.float32)

    def zeros(shape):
        return jnp.zeros(shape, jnp.float32)

    def fft_attn():
        wq, bq = dense(d, d)
        wk, bk = dense(d, d)
        wv, bv = dense(d, d)
        wo, bo = dense(d, d)
        return dict(wq=wq, bq=bq,
                    wkv=jnp.concatenate([wk, wv], axis=1),
                    bkv=jnp.concatenate([bk, bv], axis=1),
                    wo=wo, bo=bo, g=ones((1, d)), b=zeros((1, d)))

    def ls_attn():
        wqc = rand((qk, d, d), (qk * d) ** -0.5)
        wkc = rand((qk, d, d), (qk * d) ** -0.5)
        wv, bv = dense(d, d)
        wo, bo = dense(d, d)
        return dict(wq_conv=wqc, wk_conv=wkc, wv=wv, bv=bv, wo=wo, bo=bo,
                    g=ones((1, d)), b=zeros((1, d)))

    def ffn_dual():
        w1f, b1f = dense(d, d_ff); w2f, b2f = dense(d_ff, d)
        w1t, b1t = dense(d, d_ff); w2t, b2t = dense(d_ff, d)
        return dict(w1=jnp.stack([w1f, w1t]), b1=jnp.stack([b1f, b1t]),
                    w2=jnp.stack([w2f, w2t]), b2=jnp.stack([b2f, b2t]),
                    g=ones((2, 1, d)), b=zeros((2, 1, d)))

    def embedding(c_in):
        w_tok = rand((3, c_in, d), (3 * c_in) ** -0.5)
        w_time = rand((mark, d), mark ** -0.5)
        return dict(w_token=w_tok, w_time=w_time)

    def enc_layer():
        return dict(fft=fft_attn(), ls=ls_attn(), ffn=ffn_dual())

    def dec_layer():
        return dict(fft_self=fft_attn(), ls_self=ls_attn(),
                    fft_cross=fft_attn(), ls_cross=ls_attn(), ffn=ffn_dual())

    w1, b1 = dense(d, d_ff)
    w2, b2 = dense(d_ff, d)
    w_out, b_out = dense(d, cfg['c_out'])
    head = dict(gf=ones((1, d)), bf=zeros((1, d)), gt=ones((1, d)), bt=zeros((1, d)),
                w1=w1, b1=b1, w2=w2, b2=b2, w_out=w_out, b_out=b_out)

    return dict(
        emb_enc_f=embedding(nd * cfg['enc_in']),
        emb_dec_f=embedding(nd * cfg['dec_in']),
        emb_enc_t=embedding(cfg['enc_in']),
        emb_dec_t=embedding(cfg['dec_in']),
        enc_layers=[enc_layer() for _ in range(cfg['e_layers'])],
        dec_layers=[dec_layer() for _ in range(cfg['d_layers'])],
        enc_norm=dict(g=ones((2, 1, d)), b=zeros((2, 1, d))),
        head=head,
    )


# ----------------------------------------------------------------------------
# Main
# ----------------------------------------------------------------------------
if __name__ == "__main__":
    cfg = dict(enc_in=4, dec_in=4, c_out=4, d_model=32, d_ff=64, n_heads=4,
               e_layers=1, d_layers=1, seq_len=16, label_len=8, pred_len=8,
               num_decomp=2, qk_ker=3, mark_dim=4)

    kg = KeyGen(0)
    params = init_params(kg, cfg)

    key = jax.random.PRNGKey(0)
    k1, k2, k3, k4 = jax.random.split(key, 4)
    B = 2
    dec_len = cfg['label_len'] + cfg['pred_len']
    x_enc = jax.random.normal(k1, (B, cfg['seq_len'], cfg['enc_in']), jnp.float32)
    x_mark_enc = jax.random.normal(k2, (B, cfg['seq_len'], cfg['mark_dim']), jnp.float32)
    x_dec = jax.random.normal(k3, (B, dec_len, cfg['dec_in']), jnp.float32)
    x_mark_dec = jax.random.normal(k4, (B, dec_len, cfg['mark_dim']), jnp.float32)

    fwd = jax.jit(lambda a, b, c, d: forward(params, cfg, a, b, c, d))
    out = fwd(x_enc, x_mark_enc, x_dec, x_mark_dec)
    out = jax.block_until_ready(out)

    assert out.shape == (B, cfg['pred_len'], cfg['c_out']), out.shape
    assert bool(jnp.all(jnp.isfinite(out)))
    print("KERNEL_OK")
</pallas_src>

<mosaic_0001>
module attributes {stable_mosaic.version = 11 : i64} {
  func.func @_embed_kernel(%arg0: i32, %arg1: memref<1x16x4xf32, #tpu.memory_space<vmem>>, %arg2: memref<1x16x4xf32, #tpu.memory_space<vmem>>, %arg3: memref<3x4x32xf32, #tpu.memory_space<vmem>>, %arg4: memref<4x32xf32, #tpu.memory_space<vmem>>, %arg5: memref<16x32xf32, #tpu.memory_space<vmem>>, %arg6: memref<1x16x32xf32, #tpu.memory_space<vmem>>) attributes {dimension_semantics = [#tpu.dimension_semantics<parallel>], iteration_bounds = array<i64: 2>, scalar_prefetch = 0 : i64, scratch_operands = 0 : i64, tpu.core_type = #tpu.core_type<tc>, window_params = [{transform_indices = @transform_0, window_bounds = array<i64: 1, 16, 4>}, {transform_indices = @transform_1, window_bounds = array<i64: 1, 16, 4>}, {pipeline_mode = #tpu.pipeline_mode<synchronous>, transform_indices = @transform_2, window_bounds = array<i64: 3, 4, 32>}, {pipeline_mode = #tpu.pipeline_mode<synchronous>, transform_indices = @transform_3, window_bounds = array<i64: 4, 32>}, {pipeline_mode = #tpu.pipeline_mode<synchronous>, transform_indices = @transform_4, window_bounds = array<i64: 16, 32>}, {transform_indices = @transform_5, window_bounds = array<i64: 1, 16, 32>}]} {
    %c0 = arith.constant 0 : index
    %c0_0 = arith.constant 0 : index
    %c0_1 = arith.constant 0 : index
    %0 = vector.load %arg1[%c0, %c0_0, %c0_1] : memref<1x16x4xf32, #tpu.memory_space<vmem>>, vector<1x16x4xf32>
    %1 = vector.shape_cast %0 : vector<1x16x4xf32> to vector<16x4xf32>
    %c0_2 = arith.constant 0 : index
    %c0_3 = arith.constant 0 : index
    %c0_4 = arith.constant 0 : index
    %2 = vector.load %arg3[%c0_2, %c0_3, %c0_4] : memref<3x4x32xf32, #tpu.memory_space<vmem>>, vector<3x4x32xf32>
    %3 = tpu.iota {dimensions = array<i32: 0>} : vector<16x16xi32>
    %4 = tpu.iota {dimensions = array<i32: 1>} : vector<16x16xi32>
    %c1_i32 = arith.constant 1 : i32
    %5 = vector.broadcast %c1_i32 : i32 to vector<16x16xi32>
    %6 = arith.subi %3, %5 : vector<16x16xi32>
    %c16_i32 = arith.constant 16 : i32
    %c0_i32 = arith.constant 0 : i32
    %7 = arith.cmpi eq, %c16_i32, %c0_i32 : i32
    %c1_i32_5 = arith.constant 1 : i32
    %8 = arith.select %7, %c1_i32_5, %c16_i32 : i32
    %9 = vector.broadcast %8 : i32 to vector<16x16xi32>
    %10 = arith.remsi %6, %9 : vector<16x16xi32>
    %c0_i32_6 = arith.constant 0 : i32
    %11 = vector.broadcast %c0_i32_6 : i32 to vector<16x16xi32>
    %12 = arith.cmpi ne, %10, %11 : vector<16x16xi32>
    %c0_i32_7 = arith.constant 0 : i32
    %13 = vector.broadcast %c0_i32_7 : i32 to vector<16x16xi32>
    %14 = arith.cmpi slt, %10, %13 : vector<16x16xi32>
    %c0_i32_8 = arith.constant 0 : i32
    %15 = arith.cmpi slt, %8, %c0_i32_8 : i32
    %16 = vector.broadcast %15 : i1 to vector<16x16xi1>
    %17 = vector.broadcast %16 : vector<16x16xi1> to vector<16x16xi1>
    %18 = arith.xori %14, %17 : vector<16x16xi1>
    %19 = arith.andi %18, %12 : vector<16x16xi1>
    %20 = vector.broadcast %8 : i32 to vector<16x16xi32>
    %21 = arith.addi %10, %20 : vector<16x16xi32>
    %22 = arith.select %19, %21, %10 : vector<16x16xi1>, vector<16x16xi32>
    %23 = arith.cmpi eq, %4, %22 : vector<16x16xi32>
    %cst = arith.constant 1.000000e+00 : f32
    %cst_9 = arith.constant 0.000000e+00 : f32
    %24 = vector.broadcast %cst : f32 to vector<16x16xf32>
    %25 = vector.broadcast %cst_9 : f32 to vector<16x16xf32>
    %26 = arith.select %23, %24, %25 : vector<16x16xi1>, vector<16x16xf32>
    %cst_10 = arith.constant dense<0.000000e+00> : vector<16x4xf32>
    %27 = tpu.matmul %26, %1, %cst_10 {dimension_numbers = #tpu.dot_dimension_numbers<[1], [0], [0], [1], [0, 0, 1, 1], [], []>} : vector<16x16xf32>, vector<16x4xf32>, vector<16x4xf32> -> vector<16x4xf32>
    %28 = vector.extract_strided_slice %2 {offsets = [0, 0, 0], sizes = [1, 4, 32], strides = [1, 1, 1]} : vector<3x4x32xf32> to vector<1x4x32xf32>
    %29 = vector.shape_cast %28 : vector<1x4x32xf32> to vector<4x32xf32>
    %cst_11 = arith.constant dense<0.000000e+00> : vector<16x32xf32>
    %30 = tpu.matmul %27, %29, %cst_11 {dimension_numbers = #tpu.dot_dimension_numbers<[1], [0], [0], [1], [0, 0, 1, 1], [], []>} : vector<16x4xf32>, vector<4x32xf32>, vector<16x32xf32> -> vector<16x32xf32>
    %31 = vector.extract_strided_slice %2 {offsets = [1, 0, 0], sizes = [1, 4, 32], strides = [1, 1, 1]} : vector<3x4x32xf32> to vector<1x4x32xf32>
    %32 = vector.shape_cast %31 : vector<1x4x32xf32> to vector<4x32xf32>
    %cst_12 = arith.constant dense<0.000000e+00> : vector<16x32xf32>
    %33 = tpu.matmul %1, %32, %cst_12 {dimension_numbers = #tpu.dot_dimension_numbers<[1], [0], [0], [1], [0, 0, 1, 1], [], []>} : vector<16x4xf32>, vector<4x32xf32>, vector<16x32xf32> -> vector<16x32xf32>
    %34 = arith.addf %30, %33 : vector<16x32xf32>
    %35 = tpu.iota {dimensions = array<i32: 0>} : vector<16x16xi32>
    %36 = tpu.iota {dimensions = array<i32: 1>} : vector<16x16xi32>
    %c-1_i32 = arith.constant -1 : i32
    %37 = vector.broadcast %c-1_i32 : i32 to vector<16x16xi32>
    %38 = arith.subi %35, %37 : vector<16x16xi32>
    %c16_i32_13 = arith.constant 16 : i32
    %c0_i32_14 = arith.constant 0 : i32
    %39 = arith.cmpi eq, %c16_i32_13, %c0_i32_14 : i32
    %c1_i32_15 = arith.constant 1 : i32
    %40 = arith.select %39, %c1_i32_15, %c16_i32_13 : i32
    %41 = vector.broadcast %40 : i32 to vector<16x16xi32>
    %42 = arith.remsi %38, %41 : vector<16x16xi32>
    %c0_i32_16 = arith.constant 0 : i32
    %43 = vector.broadcast %c0_i32_16 : i32 to vector<16x16xi32>
    %44 = arith.cmpi ne, %42, %43 : vector<16x16xi32>
    %c0_i32_17 = arith.constant 0 : i32
    %45 = vector.broadcast %c0_i32_17 : i32 to vector<16x16xi32>
    %46 = arith.cmpi slt, %42, %45 : vector<16x16xi32>
    %c0_i32_18 = arith.constant 0 : i32
    %47 = arith.cmpi slt, %40, %c0_i32_18 : i32
    %48 = vector.broadcast %47 : i1 to vector<16x16xi1>
    %49 = vector.broadcast %48 : vector<16x16xi1> to vector<16x16xi1>
    %50 = arith.xori %46, %49 : vector<16x16xi1>
    %51 = arith.andi %50, %44 : vector<16x16xi1>
    %52 = vector.broadcast %40 : i32 to vector<16x16xi32>
    %53 = arith.addi %42, %52 : vector<16x16xi32>
    %54 = arith.select %51, %53, %42 : vector<16x16xi1>, vector<16x16xi32>
    %55 = arith.cmpi eq, %36, %54 : vector<16x16xi32>
    %cst_19 = arith.constant 1.000000e+00 : f32
    %cst_20 = arith.constant 0.000000e+00 : f32
    %56 = vector.broadcast %cst_19 : f32 to vector<16x16xf32>
    %57 = vector.broadcast %cst_20 : f32 to vector<16x16xf32>
    %58 = arith.select %55, %56, %57 : vector<16x16xi1>, vector<16x16xf32>
    %cst_21 = arith.constant dense<0.000000e+00> : vector<16x4xf32>
    %59 = tpu.matmul %58, %1, %cst_21 {dimension_numbers = #tpu.dot_dimension_numbers<[1], [0], [0], [1], [0, 0, 1, 1], [], []>} : vector<16x16xf32>, vector<16x4xf32>, vector<16x4xf32> -> vector<16x4xf32>
    %60 = vector.extract_strided_slice %2 {offsets = [2, 0, 0], sizes = [1, 4, 32], strides = [1, 1, 1]} : vector<3x4x32xf32> to vector<1x4x32xf32>
    %61 = vector.shape_cast %60 : vector<1x4x32xf32> to vector<4x32xf32>
    %cst_22 = arith.constant dense<0.000000e+00> : vector<16x32xf32>
    %62 = tpu.matmul %59, %61, %cst_22 {dimension_numbers = #tpu.dot_dimension_numbers<[1], [0], [0], [1], [0, 0, 1, 1], [], []>} : vector<16x4xf32>, vector<4x32xf32>, vector<16x32xf32> -> vector<16x32xf32>
    %63 = arith.addf %34, %62 : vector<16x32xf32>
    %c0_23 = arith.constant 0 : index
    %c0_24 = arith.constant 0 : index
    %c0_25 = arith.constant 0 : index
    %64 = vector.load %arg2[%c0_23, %c0_24, %c0_25] : memref<1x16x4xf32, #tpu.memory_space<vmem>>, vector<1x16x4xf32>
    %65 = vector.shape_cast %64 : vector<1x16x4xf32> to vector<16x4xf32>
    %c0_26 = arith.constant 0 : index
    %c0_27 = arith.constant 0 : index
    %66 = vector.load %arg4[%c0_26, %c0_27] : memref<4x32xf32, #tpu.memory_space<vmem>>, vector<4x32xf32>
    %cst_28 = arith.constant dense<0.000000e+00> : vector<16x32xf32>
    %67 = tpu.matmul %65, %66, %cst_28 {dimension_numbers = #tpu.dot_dimension_numbers<[1], [0], [0], [1], [0, 0, 1, 1], [], []>} : vector<16x4xf32>, vector<4x32xf32>, vector<16x32xf32> -> vector<16x32xf32>
    %68 = arith.addf %63, %67 : vector<16x32xf32>
    %c0_29 = arith.constant 0 : index
    %c0_30 = arith.constant 0 : index
    %69 = vector.load %arg5[%c0_29, %c0_30] : memref<16x32xf32, #tpu.memory_space<vmem>>, vector<16x32xf32>
    %70 = arith.addf %68, %69 : vector<16x32xf32>
    %c0_31 = arith.constant 0 : index
    %c0_32 = arith.constant 0 : index
    %c0_33 = arith.constant 0 : index
    %71 = vector.load %arg6[%c0_31, %c0_32, %c0_33] : memref<1x16x32xf32, #tpu.memory_space<vmem>>, vector<1x16x32xf32>
    %72 = vector.shape_cast %71 : vector<1x16x32xf32> to vector<16x32xf32>
    %73 = vector.shape_cast %70 : vector<16x32xf32> to vector<1x16x32xf32>
    tpu.vector_store %arg6[%c0_31, %c0_32, %c0_33], %73 {strides = array<i32>} : memref<1x16x32xf32, #tpu.memory_space<vmem>>, vector<1x16x32xf32>,
    return
  }
  func.func @transform_0(%arg0: i32) -> (i32, i32, i32) {
    %c0_i32 = arith.constant 0 : i32
    %c0_i32_0 = arith.constant 0 : i32
    %c0_i32_1 = arith.constant 0 : i32
    return %arg0, %c0_i32, %c0_i32_0 : i32, i32, i32
  }
  func.func @transform_1(%arg0: i32) -> (i32, i32, i32) {
    %c0_i32 = arith.constant 0 : i32
    %c0_i32_0 = arith.constant 0 : i32
    %c0_i32_1 = arith.constant 0 : i32
    return %arg0, %c0_i32, %c0_i32_0 : i32, i32, i32
  }
  func.func @transform_2(%arg0: i32) -> (i32, i32, i32) {
    %c0_i32 = arith.constant 0 : i32
    %c0_i32_0 = arith.constant 0 : i32
    %c0_i32_1 = arith.constant 0 : i32
    %c0_i32_2 = arith.constant 0 : i32
    return %c0_i32, %c0_i32_0, %c0_i32_1 : i32, i32, i32
  }
  func.func @transform_3(%arg0: i32) -> (i32, i32) {
    %c0_i32 = arith.constant 0 : i32
    %c0_i32_0 = arith.constant 0 : i32
    %c0_i32_1 = arith.constant 0 : i32
    return %c0_i32, %c0_i32_0 : i32, i32
  }
  func.func @transform_4(%arg0: i32) -> (i32, i32) {
    %c0_i32 = arith.constant 0 : i32
    %c0_i32_0 = arith.constant 0 : i32
    %c0_i32_1 = arith.constant 0 : i32
    return %c0_i32, %c0_i32_0 : i32, i32
  }
  func.func @transform_5(%arg0: i32) -> (i32, i32, i32) {
    %c0_i32 = arith.constant 0 : i32
    %c0_i32_0 = arith.constant 0 : i32
    %c0_i32_1 = arith.constant 0 : i32
    return %arg0, %c0_i32, %c0_i32_0 : i32, i32, i32
  }
}

module attributes {stable_mosaic.version = 11 : i64} {
  func.func @_ls_layer_kernel(%arg0: i32, %arg1: memref<1x16x32xf32, #tpu.memory_space<vmem>>, %arg2: memref<1x16x32xf32, #tpu.memory_space<vmem>>, %arg3: memref<3x32x32xf32, #tpu.memory_space<vmem>>, %arg4: memref<3x32x32xf32, #tpu.memory_space<vmem>>, %arg5: memref<32x32xf32, #tpu.memory_space<vmem>>, %arg6: memref<1x32xf32, #tpu.memory_space<vmem>>, %arg7: memref<32x32xf32, #tpu.memory_space<vmem>>, %arg8: memref<1x32xf32, #tpu.memory_space<vmem>>, %arg9: memref<1x32xf32, #tpu.memory_space<vmem>>, %arg10: memref<1x32xf32, #tpu.memory_space<vmem>>, %arg11: memref<1x16x32xf32, #tpu.memory_space<vmem>>) attributes {dimension_semantics = [#tpu.dimension_semantics<parallel>], iteration_bounds = array<i64: 2>, scalar_prefetch = 0 : i64, scratch_operands = 0 : i64, tpu.core_type = #tpu.core_type<tc>, window_params = [{transform_indices = @transform_0, window_bounds = array<i64: 1, 16, 32>}, {transform_indices = @transform_1, window_bounds = array<i64: 1, 16, 32>}, {pipeline_mode = #tpu.pipeline_mode<synchronous>, transform_indices = @transform_2, window_bounds = array<i64: 3, 32, 32>}, {pipeline_mode = #tpu.pipeline_mode<synchronous>, transform_indices = @transform_3, window_bounds = array<i64: 3, 32, 32>}, {pipeline_mode = #tpu.pipeline_mode<synchronous>, transform_indices = @transform_4, window_bounds = array<i64: 32, 32>}, {pipeline_mode = #tpu.pipeline_mode<synchronous>, transform_indices = @transform_5, window_bounds = array<i64: 1, 32>}, {pipeline_mode = #tpu.pipeline_mode<synchronous>, transform_indices = @transform_6, window_bounds = array<i64: 32, 32>}, {pipeline_mode = #tpu.pipeline_mode<synchronous>, transform_indices = @transform_7, window_bounds = array<i64: 1, 32>}, {pipeline_mode = #tpu.pipeline_mode<synchronous>, transform_indices = @transform_8, window_bounds = array<i64: 1, 32>}, {pipeline_mode = #tpu.pipeline_mode<synchronous>, transform_indices = @transform_9, window_bounds = array<i64: 1, 32>}, {transform_indices = @transform_10, window_bounds = array<i64: 1, 16, 32>}]} {
    %c0 = arith.constant 0 : index
    %c0_0 = arith.constant 0 : index
    %c0_1 = arith.constant 0 : index
    %0 = vector.load %arg1[%c0, %c0_0, %c0_1] : memref<1x16x32xf32, #tpu.memory_space<vmem>>, vector<1x16x32xf32>
    %1 = vector.shape_cast %0 : vector<1x16x32xf32> to vector<16x32xf32>
    %c0_2 = arith.constant 0 : index
    %c0_3 = arith.constant 0 : index
    %c0_4 = arith.constant 0 : index
    %2 = vector.load %arg2[%c0_2, %c0_3, %c0_4] : memref<1x16x32xf32, #tpu.memory_space<vmem>>, vector<1x16x32xf32>
    %3 = vector.shape_cast %2 : vector<1x16x32xf32> to vector<16x32xf32>
    %c0_5 = arith.constant 0 : index
    %c0_6 = arith.constant 0 : index
    %c0_7 = arith.constant 0 : index
    %4 = vector.load %arg3[%c0_5, %c0_6, %c0_7] : memref<3x32x32xf32, #tpu.memory_space<vmem>>, vector<3x32x32xf32>
    %5 = vector.extract_strided_slice %4 {offsets = [2, 0, 0], sizes = [1, 32, 32], strides = [1, 1, 1]} : vector<3x32x32xf32> to vector<1x32x32xf32>
    %6 = vector.shape_cast %5 : vector<1x32x32xf32> to vector<32x32xf32>
    %cst = arith.constant dense<0.000000e+00> : vector<16x32xf32>
    %7 = tpu.matmul %1, %6, %cst {dimension_numbers = #tpu.dot_dimension_numbers<[1], [0], [0], [1], [0, 0, 1, 1], [], []>} : vector<16x32xf32>, vector<32x32xf32>, vector<16x32xf32> -> vector<16x32xf32>
    %8 = tpu.iota {dimensions = array<i32: 0>} : vector<16x16xi32>
    %9 = tpu.iota {dimensions = array<i32: 1>} : vector<16x16xi32>
    %c1_i32 = arith.constant 1 : i32
    %10 = vector.broadcast %c1_i32 : i32 to vector<16x16xi32>
    %11 = arith.subi %8, %10 : vector<16x16xi32>
    %12 = arith.cmpi eq, %9, %11 : vector<16x16xi32>
    %cst_8 = arith.constant 1.000000e+00 : f32
    %cst_9 = arith.constant 0.000000e+00 : f32
    %13 = vector.broadcast %cst_8 : f32 to vector<16x16xf32>
    %14 = vector.broadcast %cst_9 : f32 to vector<16x16xf32>
    %15 = arith.select %12, %13, %14 : vector<16x16xi1>, vector<16x16xf32>
    %cst_10 = arith.constant dense<0.000000e+00> : vector<16x32xf32>
    %16 = tpu.matmul %15, %1, %cst_10 {dimension_numbers = #tpu.dot_dimension_numbers<[1], [0], [0], [1], [0, 0, 1, 1], [], []>} : vector<16x16xf32>, vector<16x32xf32>, vector<16x32xf32> -> vector<16x32xf32>
    %17 = vector.extract_strided_slice %4 {offsets = [1, 0, 0], sizes = [1, 32, 32], strides = [1, 1, 1]} : vector<3x32x32xf32> to vector<1x32x32xf32>
    %18 = vector.shape_cast %17 : vector<1x32x32xf32> to vector<32x32xf32>
    %cst_11 = arith.constant dense<0.000000e+00> : vector<16x32xf32>
    %19 = tpu.matmul %16, %18, %cst_11 {dimension_numbers = #tpu.dot_dimension_numbers<[1], [0], [0], [1], [0, 0, 1, 1], [], []>} : vector<16x32xf32>, vector<32x32xf32>, vector<16x32xf32> -> vector<16x32xf32>
    %20 = arith.addf %7, %19 : vector<16x32xf32>
    %21 = tpu.iota {dimensions = array<i32: 0>} : vector<16x16xi32>
    %22 = tpu.iota {dimensions = array<i32: 1>} : vector<16x16xi32>
    %c2_i32 = arith.constant 2 : i32
    %23 = vector.broadcast %c2_i32 : i32 to vector<16x16xi32>
    %24 = arith.subi %21, %23 : vector<16x16xi32>
    %25 = arith.cmpi eq, %22, %24 : vector<16x16xi32>
    %cst_12 = arith.constant 1.000000e+00 : f32
    %cst_13 = arith.constant 0.000000e+00 : f32
    %26 = vector.broadcast %cst_12 : f32 to vector<16x16xf32>
    %27 = vector.broadcast %cst_13 : f32 to vector<16x16xf32>
    %28 = arith.select %25, %26, %27 : vector<16x16xi1>, vector<16x16xf32>
    %cst_14 = arith.constant dense<0.000000e+00> : vector<16x32xf32>
    %29 = tpu.matmul %28, %1, %cst_14 {dimension_numbers = #tpu.dot_dimension_numbers<[1], [0], [0], [1], [0, 0, 1, 1], [], []>} : vector<16x16xf32>, vector<16x32xf32>, vector<16x32xf32> -> vector<16x32xf32>
    %30 = vector.extract_strided_slice %4 {offsets = [0, 0, 0], sizes = [1, 32, 32], strides = [1, 1, 1]} : vector<3x32x32xf32> to vector<1x32x32xf32>
    %31 = vector.shape_cast %30 : vector<1x32x32xf32> to vector<32x32xf32>
    %cst_15 = arith.constant dense<0.000000e+00> : vector<16x32xf32>
    %32 = tpu.matmul %29, %31, %cst_15 {dimension_numbers = #tpu.dot_dimension_numbers<[1], [0], [0], [1], [0, 0, 1, 1], [], []>} : vector<16x32xf32>, vector<32x32xf32>, vector<16x32xf32> -> vector<16x32xf32>
    %33 = arith.addf %20, %32 : vector<16x32xf32>
    %c0_16 = arith.constant 0 : index
    %c0_17 = arith.constant 0 : index
    %c0_18 = arith.constant 0 : index
    %34 = vector.load %arg4[%c0_16, %c0_17, %c0_18] : memref<3x32x32xf32, #tpu.memory_space<vmem>>, vector<3x32x32xf32>
    %35 = vector.extract_strided_slice %34 {offsets = [2, 0, 0], sizes = [1, 32, 32], strides = [1, 1, 1]} : vector<3x32x32xf32> to vector<1x32x32xf32>
    %36 = vector.shape_cast %35 : vector<1x32x32xf32> to vector<32x32xf32>
    %cst_19 = arith.constant dense<0.000000e+00> : vector<16x32xf32>
    %37 = tpu.matmul %3, %36, %cst_19 {dimension_numbers = #tpu.dot_dimension_numbers<[1], [0], [0], [1], [0, 0, 1, 1], [], []>} : vector<16x32xf32>, vector<32x32xf32>, vector<16x32xf32> -> vector<16x32xf32>
    %38 = tpu.iota {dimensions = array<i32: 0>} : vector<16x16xi32>
    %39 = tpu.iota {dimensions = array<i32: 1>} : vector<16x16xi32>
    %c1_i32_20 = arith.constant 1 : i32
    %40 = vector.broadcast %c1_i32_20 : i32 to vector<16x16xi32>
    %41 = arith.subi %38, %40 : vector<16x16xi32>
    %42 = arith.cmpi eq, %39, %41 : vector<16x16xi32>
    %cst_21 = arith.constant 1.000000e+00 : f32
    %cst_22 = arith.constant 0.000000e+00 : f32
    %43 = vector.broadcast %cst_21 : f32 to vector<16x16xf32>
    %44 = vector.broadcast %cst_22 : f32 to vector<16x16xf32>
    %45 = arith.select %42, %43, %44 : vector<16x16xi1>, vector<16x16xf32>
    %cst_23 = arith.constant dense<0.000000e+00> : vector<16x32xf32>
    %46 = tpu.matmul %45, %3, %cst_23 {dimension_numbers = #tpu.dot_dimension_numbers<[1], [0], [0], [1], [0, 0, 1, 1], [], []>} : vector<16x16xf32>, vector<16x32xf32>, vector<16x32xf32> -> vector<16x32xf32>
    %47 = vector.extract_strided_slice %34 {offsets = [1, 0, 0], sizes = [1, 32, 32], strides = [1, 1, 1]} : vector<3x32x32xf32> to vector<1x32x32xf32>
    %48 = vector.shape_cast %47 : vector<1x32x32xf32> to vector<32x32xf32>
    %cst_24 = arith.constant dense<0.000000e+00> : vector<16x32xf32>
    %49 = tpu.matmul %46, %48, %cst_24 {dimension_numbers = #tpu.dot_dimension_numbers<[1], [0], [0], [1], [0, 0, 1, 1], [], []>} : vector<16x32xf32>, vector<32x32xf32>, vector<16x32xf32> -> vector<16x32xf32>
    %50 = arith.addf %37, %49 : vector<16x32xf32>
    %51 = tpu.iota {dimensions = array<i32: 0>} : vector<16x16xi32>
    %52 = tpu.iota {dimensions = array<i32: 1>} : vector<16x16xi32>
    %c2_i32_25 = arith.constant 2 : i32
    %53 = vector.broadcast %c2_i32_25 : i32 to vector<16x16xi32>
    %54 = arith.subi %51, %53 : vector<16x16xi32>
    %55 = arith.cmpi eq, %52, %54 : vector<16x16xi32>
    %cst_26 = arith.constant 1.000000e+00 : f32
    %cst_27 = arith.constant 0.000000e+00 : f32
    %56 = vector.broadcast %cst_26 : f32 to vector<16x16xf32>
    %57 = vector.broadcast %cst_27 : f32 to vector<16x16xf32>
    %58 = arith.select %55, %56, %57 : vector<16x16xi1>, vector<16x16xf32>
    %cst_28 = arith.constant dense<0.000000e+00> : vector<16x32xf32>
    %59 = tpu.matmul %58, %3, %cst_28 {dimension_numbers = #tpu.dot_dimension_numbers<[1], [0], [0], [1], [0, 0, 1, 1], [], []>} : vector<16x16xf32>, vector<16x32xf32>, vector<16x32xf32> -> vector<16x32xf32>
    %60 = vector.extract_strided_slice %34 {offsets = [0, 0, 0], sizes = [1, 32, 32], strides = [1, 1, 1]} : vector<3x32x32xf32> to vector<1x32x32xf32>
    %61 = vector.shape_cast %60 : vector<1x32x32xf32> to vector<32x32xf32>
    %cst_29 = arith.constant dense<0.000000e+00> : vector<16x32xf32>
    %62 = tpu.matmul %59, %61, %cst_29 {dimension_numbers = #tpu.dot_dimension_numbers<[1], [0], [0], [1], [0, 0, 1, 1], [], []>} : vector<16x32xf32>, vector<32x32xf32>, vector<16x32xf32> -> vector<16x32xf32>
    %63 = arith.addf %50, %62 : vector<16x32xf32>
    %c0_30 = arith.constant 0 : index
    %c0_31 = arith.constant 0 : index
    %64 = vector.load %arg5[%c0_30, %c0_31] : memref<32x32xf32, #tpu.memory_space<vmem>>, vector<32x32xf32>
    %cst_32 = arith.constant dense<0.000000e+00> : vector<16x32xf32>
    %65 = tpu.matmul %3, %64, %cst_32 {dimension_numbers = #tpu.dot_dimension_numbers<[1], [0], [0], [1], [0, 0, 1, 1], [], []>} : vector<16x32xf32>, vector<32x32xf32>, vector<16x32xf32> -> vector<16x32xf32>
    %c0_33 = arith.constant 0 : index
    %c0_34 = arith.constant 0 : index
    %66 = vector.load %arg6[%c0_33, %c0_34] : memref<1x32xf32, #tpu.memory_space<vmem>>, vector<1x32xf32>
    %67 = vector.broadcast %66 : vector<1x32xf32> to vector<16x32xf32>
    %68 = arith.addf %65, %67 : vector<16x32xf32>
    %69 = tpu.iota {dimensions = array<i32: 0>} : vector<16x16xi32>
    %70 = tpu.iota {dimensions = array<i32: 1>} : vector<16x16xi32>
    %71 = arith.cmpi sle, %70, %69 : vector<16x16xi32>
    %72 = vector.extract_strided_slice %33 {offsets = [0, 0], sizes = [16, 8], strides = [1, 1]} : vector<16x32xf32> to vector<16x8xf32>
    %73 = vector.extract_strided_slice %63 {offsets = [0, 0], sizes = [16, 8], strides = [1, 1]} : vector<16x32xf32> to vector<16x8xf32>
    %74 = tpu.transpose %73, [1, 0] : vector<16x8xf32> -> vector<8x16xf32>
    %cst_35 = arith.constant dense<0.000000e+00> : vector<16x16xf32>
    %75 = tpu.matmul %72, %74, %cst_35 {dimension_numbers = #tpu.dot_dimension_numbers<[1], [0], [0], [1], [0, 0, 1, 1], [], []>} : vector<16x8xf32>, vector<8x16xf32>, vector<16x16xf32> -> vector<16x16xf32>
    %cst_36 = arith.constant 0.353553385 : f32
    %76 = vector.broadcast %cst_36 : f32 to vector<16x16xf32>
    %77 = arith.mulf %75, %76 : vector<16x16xf32>
    %cst_37 = arith.constant -1.000000e+30 : f32
    %78 = vector.broadcast %cst_37 : f32 to vector<16x16xf32>
    %79 = arith.select %71, %77, %78 : vector<16x16xi1>, vector<16x16xf32>
    %cst_38 = arith.constant dense<0xFF800000> : vector<16xf32>
    %80 = vector.multi_reduction <maximumf>, %79, %cst_38 [1] : vector<16x16xf32> to vector<16xf32>
    %81 = vector.shape_cast %80 : vector<16xf32> to vector<16x1xf32>
    %82 = vector.broadcast %81 : vector<16x1xf32> to vector<16x16xf32>
    %83 = arith.subf %79, %82 : vector<16x16xf32>
    %84 = math.exp %83 : vector<16x16xf32>
    %cst_39 = arith.constant dense<0.000000e+00> : vector<16xf32>
    %85 = vector.multi_reduction <add>, %84, %cst_39 [1] : vector<16x16xf32> to vector<16xf32>
    %86 = vector.shape_cast %85 : vector<16xf32> to vector<16x1xf32>
    %87 = tpu.reciprocal %86 {approx = true} : vector<16x1xf32> -> vector<16x1xf32>
    %88 = vector.broadcast %87 : vector<16x1xf32> to vector<16x16xf32>
    %89 = arith.mulf %84, %88 : vector<16x16xf32>
    %90 = vector.extract_strided_slice %68 {offsets = [0, 0], sizes = [16, 8], strides = [1, 1]} : vector<16x32xf32> to vector<16x8xf32>
    %cst_40 = arith.constant dense<0.000000e+00> : vector<16x8xf32>
    %91 = tpu.matmul %89, %90, %cst_40 {dimension_numbers = #tpu.dot_dimension_numbers<[1], [0], [0], [1], [0, 0, 1, 1], [], []>} : vector<16x16xf32>, vector<16x8xf32>, vector<16x8xf32> -> vector<16x8xf32>
    %92 = tpu.iota {dimensions = array<i32: 0>} : vector<8x32xi32>
    %93 = tpu.iota {dimensions = array<i32: 1>} : vector<8x32xi32>
    %c0_i32 = arith.constant 0 : i32
    %94 = vector.broadcast %c0_i32 : i32 to vector<8x32xi32>
    %95 = arith.addi %92, %94 : vector<8x32xi32>
    %96 = arith.cmpi eq, %93, %95 : vector<8x32xi32>
    %cst_41 = arith.constant 1.000000e+00 : f32
    %cst_42 = arith.constant 0.000000e+00 : f32
    %97 = vector.broadcast %cst_41 : f32 to vector<8x32xf32>
    %98 = vector.broadcast %cst_42 : f32 to vector<8x32xf32>
    %99 = arith.select %96, %97, %98 : vector<8x32xi1>, vector<8x32xf32>
    %cst_43 = arith.constant dense<0.000000e+00> : vector<16x32xf32>
    %100 = tpu.matmul %91, %99, %cst_43 {dimension_numbers = #tpu.dot_dimension_numbers<[1], [0], [0], [1], [0, 0, 1, 1], [], []>} : vector<16x8xf32>, vector<8x32xf32>, vector<16x32xf32> -> vector<16x32xf32>
    %101 = vector.extract_strided_slice %33 {offsets = [0, 8], sizes = [16, 8], strides = [1, 1]} : vector<16x32xf32> to vector<16x8xf32>
    %102 = vector.extract_strided_slice %63 {offsets = [0, 8], sizes = [16, 8], strides = [1, 1]} : vector<16x32xf32> to vector<16x8xf32>
    %103 = tpu.transpose %102, [1, 0] : vector<16x8xf32> -> vector<8x16xf32>
    %cst_44 = arith.constant dense<0.000000e+00> : vector<16x16xf32>
    %104 = tpu.matmul %101, %103, %cst_44 {dimension_numbers = #tpu.dot_dimension_numbers<[1], [0], [0], [1], [0, 0, 1, 1], [], []>} : vector<16x8xf32>, vector<8x16xf32>, vector<16x16xf32> -> vector<16x16xf32>
    %cst_45 = arith.constant 0.353553385 : f32
    %105 = vector.broadcast %cst_45 : f32 to vector<16x16xf32>
    %106 = arith.mulf %104, %105 : vector<16x16xf32>
    %cst_46 = arith.constant -1.000000e+30 : f32
    %107 = vector.broadcast %cst_46 : f32 to vector<16x16xf32>
    %108 = arith.select %71, %106, %107 : vector<16x16xi1>, vector<16x16xf32>
    %cst_47 = arith.constant dense<0xFF800000> : vector<16xf32>
    %109 = vector.multi_reduction <maximumf>, %108, %cst_47 [1] : vector<16x16xf32> to vector<16xf32>
    %110 = vector.shape_cast %109 : vector<16xf32> to vector<16x1xf32>
    %111 = vector.broadcast %110 : vector<16x1xf32> to vector<16x16xf32>
    %112 = arith.subf %108, %111 : vector<16x16xf32>
    %113 = math.exp %112 : vector<16x16xf32>
    %cst_48 = arith.constant dense<0.000000e+00> : vector<16xf32>
    %114 = vector.multi_reduction <add>, %113, %cst_48 [1] : vector<16x16xf32> to vector<16xf32>
    %115 = vector.shape_cast %114 : vector<16xf32> to vector<16x1xf32>
    %116 = tpu.reciprocal %115 {approx = true} : vector<16x1xf32> -> vector<16x1xf32>
    %117 = vector.broadcast %116 : vector<16x1xf32> to vector<16x16xf32>
    %118 = arith.mulf %113, %117 : vector<16x16xf32>
    %119 = vector.extract_strided_slice %68 {offsets = [0, 8], sizes = [16, 8], strides = [1, 1]} : vector<16x32xf32> to vector<16x8xf32>
    %cst_49 = arith.constant dense<0.000000e+00> : vector<16x8xf32>
    %120 = tpu.matmul %118, %119, %cst_49 {dimension_numbers = #tpu.dot_dimension_numbers<[1], [0], [0], [1], [0, 0, 1, 1], [], []>} : vector<16x16xf32>, vector<16x8xf32>, vector<16x8xf32> -> vector<16x8xf32>
    %121 = tpu.iota {dimensions = array<i32: 0>} : vector<8x32xi32>
    %122 = tpu.iota {dimensions = array<i32: 1>} : vector<8x32xi32>
    %c8_i32 = arith.constant 8 : i32
    %123 = vector.broadcast %c8_i32 : i32 to vector<8x32xi32>
    %124 = arith.addi %121, %123 : vector<8x32xi32>
    %125 = arith.cmpi eq, %122, %124 : vector<8x32xi32>
    %cst_50 = arith.constant 1.000000e+00 : f32
    %cst_51 = arith.constant 0.000000e+00 : f32
    %126 = vector.broadcast %cst_50 : f32 to vector<8x32xf32>
    %127 = vector.broadcast %cst_51 : f32 to vector<8x32xf32>
    %128 = arith.select %125, %126, %127 : vector<8x32xi1>, vector<8x32xf32>
    %cst_52 = arith.constant dense<0.000000e+00> : vector<16x32xf32>
    %129 = tpu.matmul %120, %128, %cst_52 {dimension_numbers = #tpu.dot_dimension_numbers<[1], [0], [0], [1], [0, 0, 1, 1], [], []>} : vector<16x8xf32>, vector<8x32xf32>, vector<16x32xf32> -> vector<16x32xf32>
    %130 = arith.addf %100, %129 : vector<16x32xf32>
    %131 = vector.extract_strided_slice %33 {offsets = [0, 16], sizes = [16, 8], strides = [1, 1]} : vector<16x32xf32> to vector<16x8xf32>
    %132 = vector.extract_strided_slice %63 {offsets = [0, 16], sizes = [16, 8], strides = [1, 1]} : vector<16x32xf32> to vector<16x8xf32>
    %133 = tpu.transpose %132, [1, 0] : vector<16x8xf32> -> vector<8x16xf32>
    %cst_53 = arith.constant dense<0.000000e+00> : vector<16x16xf32>
    %134 = tpu.matmul %131, %133, %cst_53 {dimension_numbers = #tpu.dot_dimension_numbers<[1], [0], [0], [1], [0, 0, 1, 1], [], []>} : vector<16x8xf32>, vector<8x16xf32>, vector<16x16xf32> -> vector<16x16xf32>
    %cst_54 = arith.constant 0.353553385 : f32
    %135 = vector.broadcast %cst_54 : f32 to vector<16x16xf32>
    %136 = arith.mulf %134, %135 : vector<16x16xf32>
    %cst_55 = arith.constant -1.000000e+30 : f32
    %137 = vector.broadcast %cst_55 : f32 to vector<16x16xf32>
    %138 = arith.select %71, %136, %137 : vector<16x16xi1>, vector<16x16xf32>
    %cst_56 = arith.constant dense<0xFF800000> : vector<16xf32>
    %139 = vector.multi_reduction <maximumf>, %138, %cst_56 [1] : vector<16x16xf32> to vector<16xf32>
    %140 = vector.shape_cast %139 : vector<16xf32> to vector<16x1xf32>
    %141 = vector.broadcast %140 : vector<16x1xf32> to vector<16x16xf32>
    %142 = arith.subf %138, %141 : vector<16x16xf32>
    %143 = math.exp %142 : vector<16x16xf32>
    %cst_57 = arith.constant dense<0.000000e+00> : vector<16xf32>
    %144 = vector.multi_reduction <add>, %143, %cst_57 [1] : vector<16x16xf32> to vector<16xf32>
    %145 = vector.shape_cast %144 : vector<16xf32> to vector<16x1xf32>
    %146 = tpu.reciprocal %145 {approx = true} : vector<16x1xf32> -> vector<16x1xf32>
    %147 = vector.broadcast %146 : vector<16x1xf32> to vector<16x16xf32>
    %148 = arith.mulf %143, %147 : vector<16x16xf32>
    %149 = vector.extract_strided_slice %68 {offsets = [0, 16], sizes = [16, 8], strides = [1, 1]} : vector<16x32xf32> to vector<16x8xf32>
    %cst_58 = arith.constant dense<0.000000e+00> : vector<16x8xf32>
    %150 = tpu.matmul %148, %149, %cst_58 {dimension_numbers = #tpu.dot_dimension_numbers<[1], [0], [0], [1], [0, 0, 1, 1], [], []>} : vector<16x16xf32>, vector<16x8xf32>, vector<16x8xf32> -> vector<16x8xf32>
    %151 = tpu.iota {dimensions = array<i32: 0>} : vector<8x32xi32>
    %152 = tpu.iota {dimensions = array<i32: 1>} : vector<8x32xi32>
    %c16_i32 = arith.constant 16 : i32
    %153 = vector.broadcast %c16_i32 : i32 to vector<8x32xi32>
    %154 = arith.addi %151, %153 : vector<8x32xi32>
    %155 = arith.cmpi eq, %152, %154 : vector<8x32xi32>
    %cst_59 = arith.constant 1.000000e+00 : f32
    %cst_60 = arith.constant 0.000000e+00 : f32
    %156 = vector.broadcast %cst_59 : f32 to vector<8x32xf32>
    %157 = vector.broadcast %cst_60 : f32 to vector<8x32xf32>
    %158 = arith.select %155, %156, %157 : vector<8x32xi1>, vector<8x32xf32>
    %cst_61 = arith.constant dense<0.000000e+00> : vector<16x32xf32>
    %159 = tpu.matmul %150, %158, %cst_61 {dimension_numbers = #tpu.dot_dimension_numbers<[1], [0], [0], [1], [0, 0, 1, 1], [], []>} : vector<16x8xf32>, vector<8x32xf32>, vector<16x32xf32> -> vector<16x32xf32>
    %160 = arith.addf %130, %159 : vector<16x32xf32>
    %161 = vector.extract_strided_slice %33 {offsets = [0, 24], sizes = [16, 8], strides = [1, 1]} : vector<16x32xf32> to vector<16x8xf32>
    %162 = vector.extract_strided_slice %63 {offsets = [0, 24], sizes = [16, 8], strides = [1, 1]} : vector<16x32xf32> to vector<16x8xf32>
    %163 = tpu.transpose %162, [1, 0] : vector<16x8xf32> -> vector<8x16xf32>
    %cst_62 = arith.constant dense<0.000000e+00> : vector<16x16xf32>
    %164 = tpu.matmul %161, %163, %cst_62 {dimension_numbers = #tpu.dot_dimension_numbers<[1], [0], [0], [1], [0, 0, 1, 1], [], []>} : vector<16x8xf32>, vector<8x16xf32>, vector<16x16xf32> -> vector<16x16xf32>
    %cst_63 = arith.constant 0.353553385 : f32
    %165 = vector.broadcast %cst_63 : f32 to vector<16x16xf32>
    %166 = arith.mulf %164, %165 : vector<16x16xf32>
    %cst_64 = arith.constant -1.000000e+30 : f32
    %167 = vector.broadcast %cst_64 : f32 to vector<16x16xf32>
    %168 = arith.select %71, %166, %167 : vector<16x16xi1>, vector<16x16xf32>
    %cst_65 = arith.constant dense<0xFF800000> : vector<16xf32>
    %169 = vector.multi_reduction <maximumf>, %168, %cst_65 [1] : vector<16x16xf32> to vector<16xf32>
    %170 = vector.shape_cast %169 : vector<16xf32> to vector<16x1xf32>
    %171 = vector.broadcast %170 : vector<16x1xf32> to vector<16x16xf32>
    %172 = arith.subf %168, %171 : vector<16x16xf32>
    %173 = math.exp %172 : vector<16x16xf32>
    %cst_66 = arith.constant dense<0.000000e+00> : vector<16xf32>
    %174 = vector.multi_reduction <add>, %173, %cst_66 [1] : vector<16x16xf32> to vector<16xf32>
    %175 = vector.shape_cast %174 : vector<16xf32> to vector<16x1xf32>
    %176 = tpu.reciprocal %175 {approx = true} : vector<16x1xf32> -> vector<16x1xf32>
    %177 = vector.broadcast %176 : vector<16x1xf32> to vector<16x16xf32>
    %178 = arith.mulf %173, %177 : vector<16x16xf32>
    %179 = vector.extract_strided_slice %68 {offsets = [0, 24], sizes = [16, 8], strides = [1, 1]} : vector<16x32xf32> to vector<16x8xf32>
    %cst_67 = arith.constant dense<0.000000e+00> : vector<16x8xf32>
    %180 = tpu.matmul %178, %179, %cst_67 {dimension_numbers = #tpu.dot_dimension_numbers<[1], [0], [0], [1], [0, 0, 1, 1], [], []>} : vector<16x16xf32>, vector<16x8xf32>, vector<16x8xf32> -> vector<16x8xf32>
    %181 = tpu.iota {dimensions = array<i32: 0>} : vector<8x32xi32>
    %182 = tpu.iota {dimensions = array<i32: 1>} : vector<8x32xi32>
    %c24_i32 = arith.constant 24 : i32
    %183 = vector.broadcast %c24_i32 : i32 to vector<8x32xi32>
    %184 = arith.addi %181, %183 : vector<8x32xi32>
    %185 = arith.cmpi eq, %182, %184 : vector<8x32xi32>
    %cst_68 = arith.constant 1.000000e+00 : f32
    %cst_69 = arith.constant 0.000000e+00 : f32
    %186 = vector.broadcast %cst_68 : f32 to vector<8x32xf32>
    %187 = vector.broadcast %cst_69 : f32 to vector<8x32xf32>
    %188 = arith.select %185, %186, %187 : vector<8x32xi1>, vector<8x32xf32>
    %cst_70 = arith.constant dense<0.000000e+00> : vector<16x32xf32>
    %189 = tpu.matmul %180, %188, %cst_70 {dimension_numbers = #tpu.dot_dimension_numbers<[1], [0], [0], [1], [0, 0, 1, 1], [], []>} : vector<16x8xf32>, vector<8x32xf32>, vector<16x32xf32> -> vector<16x32xf32>
    %190 = arith.addf %160, %189 : vector<16x32xf32>
    %c0_71 = arith.constant 0 : index
    %c0_72 = arith.constant 0 : index
    %191 = vector.load %arg7[%c0_71, %c0_72] : memref<32x32xf32, #tpu.memory_space<vmem>>, vector<32x32xf32>
    %cst_73 = arith.constant dense<0.000000e+00> : vector<16x32xf32>
    %192 = tpu.matmul %190, %191, %cst_73 {dimension_numbers = #tpu.dot_dimension_numbers<[1], [0], [0], [1], [0, 0, 1, 1], [], []>} : vector<16x32xf32>, vector<32x32xf32>, vector<16x32xf32> -> vector<16x32xf32>
    %193 = arith.addf %1, %192 : vector<16x32xf32>
    %c0_74 = arith.constant 0 : index
    %c0_75 = arith.constant 0 : index
    %194 = vector.load %arg8[%c0_74, %c0_75] : memref<1x32xf32, #tpu.memory_space<vmem>>, vector<1x32xf32>
    %195 = vector.broadcast %194 : vector<1x32xf32> to vector<16x32xf32>
    %196 = arith.addf %193, %195 : vector<16x32xf32>
    %c0_76 = arith.constant 0 : index
    %c0_77 = arith.constant 0 : index
    %197 = vector.load %arg9[%c0_76, %c0_77] : memref<1x32xf32, #tpu.memory_space<vmem>>, vector<1x32xf32>
    %c0_78 = arith.constant 0 : index
    %c0_79 = arith.constant 0 : index
    %198 = vector.load %arg10[%c0_78, %c0_79] : memref<1x32xf32, #tpu.memory_space<vmem>>, vector<1x32xf32>
    %cst_80 = arith.constant dense<0.000000e+00> : vector<16xf32>
    %199 = vector.multi_reduction <add>, %196, %cst_80 [1] : vector<16x32xf32> to vector<16xf32>
    %200 = vector.shape_cast %199 : vector<16xf32> to vector<16x1xf32>
    %cst_81 = arith.constant 3.200000e+01 : f32
    %201 = vector.broadcast %cst_81 : f32 to vector<16x1xf32>
    %202 = arith.divf %200, %201 : vector<16x1xf32>
    %203 = vector.broadcast %202 : vector<16x1xf32> to vector<16x32xf32>
    %204 = arith.subf %196, %203 : vector<16x32xf32>
    %205 = arith.mulf %204, %204 : vector<16x32xf32>
    %cst_82 = arith.constant dense<0.000000e+00> : vector<16xf32>
    %206 = vector.multi_reduction <add>, %205, %cst_82 [1] : vector<16x32xf32> to vector<16xf32>
    %207 = vector.shape_cast %206 : vector<16xf32> to vector<16x1xf32>
    %cst_83 = arith.constant 3.200000e+01 : f32
    %208 = vector.broadcast %cst_83 : f32 to vector<16x1xf32>
    %209 = arith.divf %207, %208 : vector<16x1xf32>
    %210 = vector.broadcast %202 : vector<16x1xf32> to vector<16x32xf32>
    %211 = arith.subf %196, %210 : vector<16x32xf32>
    %cst_84 = arith.constant 9.99999974E-6 : f32
    %212 = vector.broadcast %cst_84 : f32 to vector<16x1xf32>
    %213 = arith.addf %209, %212 : vector<16x1xf32>
    %214 = math.rsqrt %213 : vector<16x1xf32>
    %215 = vector.broadcast %214 : vector<16x1xf32> to vector<16x32xf32>
    %216 = arith.mulf %211, %215 : vector<16x32xf32>
    %217 = vector.broadcast %197 : vector<1x32xf32> to vector<16x32xf32>
    %218 = arith.mulf %216, %217 : vector<16x32xf32>
    %219 = vector.broadcast %198 : vector<1x32xf32> to vector<16x32xf32>
    %220 = arith.addf %218, %219 : vector<16x32xf32>
    %c0_85 = arith.constant 0 : index
    %c0_86 = arith.constant 0 : index
    %c0_87 = arith.constant 0 : index
    %221 = vector.load %arg11[%c0_85, %c0_86, %c0_87] : memref<1x16x32xf32, #tpu.memory_space<vmem>>, vector<1x16x32xf32>
    %222 = vector.shape_cast %221 : vector<1x16x32xf32> to vector<16x32xf32>
    %223 = vector.shape_cast %220 : vector<16x32xf32> to vector<1x16x32xf32>
    tpu.vector_store %arg11[%c0_85, %c0_86, %c0_87], %223 {strides = array<i32>} : memref<1x16x32xf32, #tpu.memory_space<vmem>>, vector<1x16x32xf32>,
    return
  }
  func.func @transform_0(%arg0: i32) -> (i32, i32, i32) {
    %c0_i32 = arith.constant 0 : i32
    %c0_i32_0 = arith.constant 0 : i32
    %c0_i32_1 = arith.constant 0 : i32
    return %arg0, %c0_i32, %c0_i32_0 : i32, i32, i32
  }
  func.func @transform_1(%arg0: i32) -> (i32, i32, i32) {
    %c0_i32 = arith.constant 0 : i32
    %c0_i32_0 = arith.constant 0 : i32
    %c0_i32_1 = arith.constant 0 : i32
    return %arg0, %c0_i32, %c0_i32_0 : i32, i32, i32
  }
  func.func @transform_2(%arg0: i32) -> (i32, i32, i32) {
    %c0_i32 = arith.constant 0 : i32
    %c0_i32_0 = arith.constant 0 : i32
    %c0_i32_1 = arith.constant 0 : i32
    %c0_i32_2 = arith.constant 0 : i32
    return %c0_i32, %c0_i32_0, %c0_i32_1 : i32, i32, i32
  }
  func.func @transform_3(%arg0: i32) -> (i32, i32, i32) {
    %c0_i32 = arith.constant 0 : i32
    %c0_i32_0 = arith.constant 0 : i32
    %c0_i32_1 = arith.constant 0 : i32
    %c0_i32_2 = arith.constant 0 : i32
    return %c0_i32, %c0_i32_0, %c0_i32_1 : i32, i32, i32
  }
  func.func @transform_4(%arg0: i32) -> (i32, i32) {
    %c0_i32 = arith.constant 0 : i32
    %c0_i32_0 = arith.constant 0 : i32
    %c0_i32_1 = arith.constant 0 : i32
    return %c0_i32, %c0_i32_0 : i32, i32
  }
  func.func @transform_5(%arg0: i32) -> (i32, i32) {
    %c0_i32 = arith.constant 0 : i32
    %c0_i32_0 = arith.constant 0 : i32
    %c0_i32_1 = arith.constant 0 : i32
    return %c0_i32, %c0_i32_0 : i32, i32
  }
  func.func @transform_6(%arg0: i32) -> (i32, i32) {
    %c0_i32 = arith.constant 0 : i32
    %c0_i32_0 = arith.constant 0 : i32
    %c0_i32_1 = arith.constant 0 : i32
    return %c0_i32, %c0_i32_0 : i32, i32
  }
  func.func @transform_7(%arg0: i32) -> (i32, i32) {
    %c0_i32 = arith.constant 0 : i32
    %c0_i32_0 = arith.constant 0 : i32
    %c0_i32_1 = arith.constant 0 : i32
    return %c0_i32, %c0_i32_0 : i32, i32
  }
  func.func @transform_8(%arg0: i32) -> (i32, i32) {
    %c0_i32 = arith.constant 0 : i32
    %c0_i32_0 = arith.constant 0 : i32
    %c0_i32_1 = arith.constant 0 : i32
    return %c0_i32, %c0_i32_0 : i32, i32
  }
  func.func @transform_9(%arg0: i32) -> (i32, i32) {
    %c0_i32 = arith.constant 0 : i32
    %c0_i32_0 = arith.constant 0 : i32
    %c0_i32_1 = arith.constant 0 : i32
    return %c0_i32, %c0_i32_0 : i32, i32
  }
  func.func @transform_10(%arg0: i32) -> (i32, i32, i32) {
    %c0_i32 = arith.constant 0 : i32
    %c0_i32_0 = arith.constant 0 : i32
    %c0_i32_1 = arith.constant 0 : i32
    return %arg0, %c0_i32, %c0_i32_0 : i32, i32, i32
  }
}

module attributes {stable_mosaic.version = 11 : i64} {
  func.func @_ls_layer_kernel(%arg0: i32, %arg1: memref<1x16x32xf32, #tpu.memory_space<vmem>>, %arg2: memref<1x16x32xf32, #tpu.memory_space<vmem>>, %arg3: memref<3x32x32xf32, #tpu.memory_space<vmem>>, %arg4: memref<3x32x32xf32, #tpu.memory_space<vmem>>, %arg5: memref<32x32xf32, #tpu.memory_space<vmem>>, %arg6: memref<1x32xf32, #tpu.memory_space<vmem>>, %arg7: memref<32x32xf32, #tpu.memory_space<vmem>>, %arg8: memref<1x32xf32, #tpu.memory_space<vmem>>, %arg9: memref<1x32xf32, #tpu.memory_space<vmem>>, %arg10: memref<1x32xf32, #tpu.memory_space<vmem>>, %arg11: memref<1x16x32xf32, #tpu.memory_space<vmem>>) attributes {dimension_semantics = [#tpu.dimension_semantics<parallel>], iteration_bounds = array<i64: 2>, scalar_prefetch = 0 : i64, scratch_operands = 0 : i64, tpu.core_type = #tpu.core_type<tc>, window_params = [{transform_indices = @transform_0, window_bounds = array<i64: 1, 16, 32>}, {transform_indices = @transform_1, window_bounds = array<i64: 1, 16, 32>}, {pipeline_mode = #tpu.pipeline_mode<synchronous>, transform_indices = @transform_2, window_bounds = array<i64: 3, 32, 32>}, {pipeline_mode = #tpu.pipeline_mode<synchronous>, transform_indices = @transform_3, window_bounds = array<i64: 3, 32, 32>}, {pipeline_mode = #tpu.pipeline_mode<synchronous>, transform_indices = @transform_4, window_bounds = array<i64: 32, 32>}, {pipeline_mode = #tpu.pipeline_mode<synchronous>, transform_indices = @transform_5, window_bounds = array<i64: 1, 32>}, {pipeline_mode = #tpu.pipeline_mode<synchronous>, transform_indices = @transform_6, window_bounds = array<i64: 32, 32>}, {pipeline_mode = #tpu.pipeline_mode<synchronous>, transform_indices = @transform_7, window_bounds = array<i64: 1, 32>}, {pipeline_mode = #tpu.pipeline_mode<synchronous>, transform_indices = @transform_8, window_bounds = array<i64: 1, 32>}, {pipeline_mode = #tpu.pipeline_mode<synchronous>, transform_indices = @transform_9, window_bounds = array<i64: 1, 32>}, {transform_indices = @transform_10, window_bounds = array<i64: 1, 16, 32>}]} {
    %c0 = arith.constant 0 : index
    %c0_0 = arith.constant 0 : index
    %c0_1 = arith.constant 0 : index
    %0 = vector.load %arg1[%c0, %c0_0, %c0_1] : memref<1x16x32xf32, #tpu.memory_space<vmem>>, vector<1x16x32xf32>
    %1 = vector.shape_cast %0 : vector<1x16x32xf32> to vector<16x32xf32>
    %c0_2 = arith.constant 0 : index
    %c0_3 = arith.constant 0 : index
    %c0_4 = arith.constant 0 : index
    %2 = vector.load %arg2[%c0_2, %c0_3, %c0_4] : memref<1x16x32xf32, #tpu.memory_space<vmem>>, vector<1x16x32xf32>
    %3 = vector.shape_cast %2 : vector<1x16x32xf32> to vector<16x32xf32>
    %c0_5 = arith.constant 0 : index
    %c0_6 = arith.constant 0 : index
    %c0_7 = arith.constant 0 : index
    %4 = vector.load %arg3[%c0_5, %c0_6, %c0_7] : memref<3x32x32xf32, #tpu.memory_space<vmem>>, vector<3x32x32xf32>
    %5 = vector.extract_strided_slice %4 {offsets = [2, 0, 0], sizes = [1, 32, 32], strides = [1, 1, 1]} : vector<3x32x32xf32> to vector<1x32x32xf32>
    %6 = vector.shape_cast %5 : vector<1x32x32xf32> to vector<32x32xf32>
    %cst = arith.constant dense<0.000000e+00> : vector<16x32xf32>
    %7 = tpu.matmul %1, %6, %cst {dimension_numbers = #tpu.dot_dimension_numbers<[1], [0], [0], [1], [0, 0, 1, 1], [], []>} : vector<16x32xf32>, vector<32x32xf32>, vector<16x32xf32> -> vector<16x32xf32>
    %8 = tpu.iota {dimensions = array<i32: 0>} : vector<16x16xi32>
    %9 = tpu.iota {dimensions = array<i32: 1>} : vector<16x16xi32>
    %c1_i32 = arith.constant 1 : i32
    %10 = vector.broadcast %c1_i32 : i32 to vector<16x16xi32>
    %11 = arith.subi %8, %10 : vector<16x16xi32>
    %12 = arith.cmpi eq, %9, %11 : vector<16x16xi32>
    %cst_8 = arith.constant 1.000000e+00 : f32
    %cst_9 = arith.constant 0.000000e+00 : f32
    %13 = vector.broadcast %cst_8 : f32 to vector<16x16xf32>
    %14 = vector.broadcast %cst_9 : f32 to vector<16x16xf32>
    %15 = arith.select %12, %13, %14 : vector<16x16xi1>, vector<16x16xf32>
    %cst_10 = arith.constant dense<0.000000e+00> : vector<16x32xf32>
    %16 = tpu.matmul %15, %1, %cst_10 {dimension_numbers = #tpu.dot_dimension_numbers<[1], [0], [0], [1], [0, 0, 1, 1], [], []>} : vector<16x16xf32>, vector<16x32xf32>, vector<16x32xf32> -> vector<16x32xf32>
    %17 = vector.extract_strided_slice %4 {offsets = [1, 0, 0], sizes = [1, 32, 32], strides = [1, 1, 1]} : vector<3x32x32xf32> to vector<1x32x32xf32>
    %18 = vector.shape_cast %17 : vector<1x32x32xf32> to vector<32x32xf32>
    %cst_11 = arith.constant dense<0.000000e+00> : vector<16x32xf32>
    %19 = tpu.matmul %16, %18, %cst_11 {dimension_numbers = #tpu.dot_dimension_numbers<[1], [0], [0], [1], [0, 0, 1, 1], [], []>} : vector<16x32xf32>, vector<32x32xf32>, vector<16x32xf32> -> vector<16x32xf32>
    %20 = arith.addf %7, %19 : vector<16x32xf32>
    %21 = tpu.iota {dimensions = array<i32: 0>} : vector<16x16xi32>
    %22 = tpu.iota {dimensions = array<i32: 1>} : vector<16x16xi32>
    %c2_i32 = arith.constant 2 : i32
    %23 = vector.broadcast %c2_i32 : i32 to vector<16x16xi32>
    %24 = arith.subi %21, %23 : vector<16x16xi32>
    %25 = arith.cmpi eq, %22, %24 : vector<16x16xi32>
    %cst_12 = arith.constant 1.000000e+00 : f32
    %cst_13 = arith.constant 0.000000e+00 : f32
    %26 = vector.broadcast %cst_12 : f32 to vector<16x16xf32>
    %27 = vector.broadcast %cst_13 : f32 to vector<16x16xf32>
    %28 = arith.select %25, %26, %27 : vector<16x16xi1>, vector<16x16xf32>
    %cst_14 = arith.constant dense<0.000000e+00> : vector<16x32xf32>
    %29 = tpu.matmul %28, %1, %cst_14 {dimension_numbers = #tpu.dot_dimension_numbers<[1], [0], [0], [1], [0, 0, 1, 1], [], []>} : vector<16x16xf32>, vector<16x32xf32>, vector<16x32xf32> -> vector<16x32xf32>
    %30 = vector.extract_strided_slice %4 {offsets = [0, 0, 0], sizes = [1, 32, 32], strides = [1, 1, 1]} : vector<3x32x32xf32> to vector<1x32x32xf32>
    %31 = vector.shape_cast %30 : vector<1x32x32xf32> to vector<32x32xf32>
    %cst_15 = arith.constant dense<0.000000e+00> : vector<16x32xf32>
    %32 = tpu.matmul %29, %31, %cst_15 {dimension_numbers = #tpu.dot_dimension_numbers<[1], [0], [0], [1], [0, 0, 1, 1], [], []>} : vector<16x32xf32>, vector<32x32xf32>, vector<16x32xf32> -> vector<16x32xf32>
    %33 = arith.addf %20, %32 : vector<16x32xf32>
    %c0_16 = arith.constant 0 : index
    %c0_17 = arith.constant 0 : index
    %c0_18 = arith.constant 0 : index
    %34 = vector.load %arg4[%c0_16, %c0_17, %c0_18] : memref<3x32x32xf32, #tpu.memory_space<vmem>>, vector<3x32x32xf32>
    %35 = vector.extract_strided_slice %34 {offsets = [2, 0, 0], sizes = [1, 32, 32], strides = [1, 1, 1]} : vector<3x32x32xf32> to vector<1x32x32xf32>
    %36 = vector.shape_cast %35 : vector<1x32x32xf32> to vector<32x32xf32>
    %cst_19 = arith.constant dense<0.000000e+00> : vector<16x32xf32>
    %37 = tpu.matmul %3, %36, %cst_19 {dimension_numbers = #tpu.dot_dimension_numbers<[1], [0], [0], [1], [0, 0, 1, 1], [], []>} : vector<16x32xf32>, vector<32x32xf32>, vector<16x32xf32> -> vector<16x32xf32>
    %38 = tpu.iota {dimensions = array<i32: 0>} : vector<16x16xi32>
    %39 = tpu.iota {dimensions = array<i32: 1>} : vector<16x16xi32>
    %c1_i32_20 = arith.constant 1 : i32
    %40 = vector.broadcast %c1_i32_20 : i32 to vector<16x16xi32>
    %41 = arith.subi %38, %40 : vector<16x16xi32>
    %42 = arith.cmpi eq, %39, %41 : vector<16x16xi32>
    %cst_21 = arith.constant 1.000000e+00 : f32
    %cst_22 = arith.constant 0.000000e+00 : f32
    %43 = vector.broadcast %cst_21 : f32 to vector<16x16xf32>
    %44 = vector.broadcast %cst_22 : f32 to vector<16x16xf32>
    %45 = arith.select %42, %43, %44 : vector<16x16xi1>, vector<16x16xf32>
    %cst_23 = arith.constant dense<0.000000e+00> : vector<16x32xf32>
    %46 = tpu.matmul %45, %3, %cst_23 {dimension_numbers = #tpu.dot_dimension_numbers<[1], [0], [0], [1], [0, 0, 1, 1], [], []>} : vector<16x16xf32>, vector<16x32xf32>, vector<16x32xf32> -> vector<16x32xf32>
    %47 = vector.extract_strided_slice %34 {offsets = [1, 0, 0], sizes = [1, 32, 32], strides = [1, 1, 1]} : vector<3x32x32xf32> to vector<1x32x32xf32>
    %48 = vector.shape_cast %47 : vector<1x32x32xf32> to vector<32x32xf32>
    %cst_24 = arith.constant dense<0.000000e+00> : vector<16x32xf32>
    %49 = tpu.matmul %46, %48, %cst_24 {dimension_numbers = #tpu.dot_dimension_numbers<[1], [0], [0], [1], [0, 0, 1, 1], [], []>} : vector<16x32xf32>, vector<32x32xf32>, vector<16x32xf32> -> vector<16x32xf32>
    %50 = arith.addf %37, %49 : vector<16x32xf32>
    %51 = tpu.iota {dimensions = array<i32: 0>} : vector<16x16xi32>
    %52 = tpu.iota {dimensions = array<i32: 1>} : vector<16x16xi32>
    %c2_i32_25 = arith.constant 2 : i32
    %53 = vector.broadcast %c2_i32_25 : i32 to vector<16x16xi32>
    %54 = arith.subi %51, %53 : vector<16x16xi32>
    %55 = arith.cmpi eq, %52, %54 : vector<16x16xi32>
    %cst_26 = arith.constant 1.000000e+00 : f32
    %cst_27 = arith.constant 0.000000e+00 : f32
    %56 = vector.broadcast %cst_26 : f32 to vector<16x16xf32>
    %57 = vector.broadcast %cst_27 : f32 to vector<16x16xf32>
    %58 = arith.select %55, %56, %57 : vector<16x16xi1>, vector<16x16xf32>
    %cst_28 = arith.constant dense<0.000000e+00> : vector<16x32xf32>
    %59 = tpu.matmul %58, %3, %cst_28 {dimension_numbers = #tpu.dot_dimension_numbers<[1], [0], [0], [1], [0, 0, 1, 1], [], []>} : vector<16x16xf32>, vector<16x32xf32>, vector<16x32xf32> -> vector<16x32xf32>
    %60 = vector.extract_strided_slice %34 {offsets = [0, 0, 0], sizes = [1, 32, 32], strides = [1, 1, 1]} : vector<3x32x32xf32> to vector<1x32x32xf32>
    %61 = vector.shape_cast %60 : vector<1x32x32xf32> to vector<32x32xf32>
    %cst_29 = arith.constant dense<0.000000e+00> : vector<16x32xf32>
    %62 = tpu.matmul %59, %61, %cst_29 {dimension_numbers = #tpu.dot_dimension_numbers<[1], [0], [0], [1], [0, 0, 1, 1], [], []>} : vector<16x32xf32>, vector<32x32xf32>, vector<16x32xf32> -> vector<16x32xf32>
    %63 = arith.addf %50, %62 : vector<16x32xf32>
    %c0_30 = arith.constant 0 : index
    %c0_31 = arith.constant 0 : index
    %64 = vector.load %arg5[%c0_30, %c0_31] : memref<32x32xf32, #tpu.memory_space<vmem>>, vector<32x32xf32>
    %cst_32 = arith.constant dense<0.000000e+00> : vector<16x32xf32>
    %65 = tpu.matmul %3, %64, %cst_32 {dimension_numbers = #tpu.dot_dimension_numbers<[1], [0], [0], [1], [0, 0, 1, 1], [], []>} : vector<16x32xf32>, vector<32x32xf32>, vector<16x32xf32> -> vector<16x32xf32>
    %c0_33 = arith.constant 0 : index
    %c0_34 = arith.constant 0 : index
    %66 = vector.load %arg6[%c0_33, %c0_34] : memref<1x32xf32, #tpu.memory_space<vmem>>, vector<1x32xf32>
    %67 = vector.broadcast %66 : vector<1x32xf32> to vector<16x32xf32>
    %68 = arith.addf %65, %67 : vector<16x32xf32>
    %69 = vector.extract_strided_slice %33 {offsets = [0, 0], sizes = [16, 8], strides = [1, 1]} : vector<16x32xf32> to vector<16x8xf32>
    %70 = vector.extract_strided_slice %63 {offsets = [0, 0], sizes = [16, 8], strides = [1, 1]} : vector<16x32xf32> to vector<16x8xf32>
    %71 = tpu.transpose %70, [1, 0] : vector<16x8xf32> -> vector<8x16xf32>
    %cst_35 = arith.constant dense<0.000000e+00> : vector<16x16xf32>
    %72 = tpu.matmul %69, %71, %cst_35 {dimension_numbers = #tpu.dot_dimension_numbers<[1], [0], [0], [1], [0, 0, 1, 1], [], []>} : vector<16x8xf32>, vector<8x16xf32>, vector<16x16xf32> -> vector<16x16xf32>
    %cst_36 = arith.constant 0.353553385 : f32
    %73 = vector.broadcast %cst_36 : f32 to vector<16x16xf32>
    %74 = arith.mulf %72, %73 : vector<16x16xf32>
    %cst_37 = arith.constant dense<0xFF800000> : vector<16xf32>
    %75 = vector.multi_reduction <maximumf>, %74, %cst_37 [1] : vector<16x16xf32> to vector<16xf32>
    %76 = vector.shape_cast %75 : vector<16xf32> to vector<16x1xf32>
    %77 = vector.broadcast %76 : vector<16x1xf32> to vector<16x16xf32>
    %78 = arith.subf %74, %77 : vector<16x16xf32>
    %79 = math.exp %78 : vector<16x16xf32>
    %cst_38 = arith.constant dense<0.000000e+00> : vector<16xf32>
    %80 = vector.multi_reduction <add>, %79, %cst_38 [1] : vector<16x16xf32> to vector<16xf32>
    %81 = vector.shape_cast %80 : vector<16xf32> to vector<16x1xf32>
    %82 = tpu.reciprocal %81 {approx = true} : vector<16x1xf32> -> vector<16x1xf32>
    %83 = vector.broadcast %82 : vector<16x1xf32> to vector<16x16xf32>
    %84 = arith.mulf %79, %83 : vector<16x16xf32>
    %85 = vector.extract_strided_slice %68 {offsets = [0, 0], sizes = [16, 8], strides = [1, 1]} : vector<16x32xf32> to vector<16x8xf32>
    %cst_39 = arith.constant dense<0.000000e+00> : vector<16x8xf32>
    %86 = tpu.matmul %84, %85, %cst_39 {dimension_numbers = #tpu.dot_dimension_numbers<[1], [0], [0], [1], [0, 0, 1, 1], [], []>} : vector<16x16xf32>, vector<16x8xf32>, vector<16x8xf32> -> vector<16x8xf32>
    %87 = tpu.iota {dimensions = array<i32: 0>} : vector<8x32xi32>
    %88 = tpu.iota {dimensions = array<i32: 1>} : vector<8x32xi32>
    %c0_i32 = arith.constant 0 : i32
    %89 = vector.broadcast %c0_i32 : i32 to vector<8x32xi32>
    %90 = arith.addi %87, %89 : vector<8x32xi32>
    %91 = arith.cmpi eq, %88, %90 : vector<8x32xi32>
    %cst_40 = arith.constant 1.000000e+00 : f32
    %cst_41 = arith.constant 0.000000e+00 : f32
    %92 = vector.broadcast %cst_40 : f32 to vector<8x32xf32>
    %93 = vector.broadcast %cst_41 : f32 to vector<8x32xf32>
    %94 = arith.select %91, %92, %93 : vector<8x32xi1>, vector<8x32xf32>
    %cst_42 = arith.constant dense<0.000000e+00> : vector<16x32xf32>
    %95 = tpu.matmul %86, %94, %cst_42 {dimension_numbers = #tpu.dot_dimension_numbers<[1], [0], [0], [1], [0, 0, 1, 1], [], []>} : vector<16x8xf32>, vector<8x32xf32>, vector<16x32xf32> -> vector<16x32xf32>
    %96 = vector.extract_strided_slice %33 {offsets = [0, 8], sizes = [16, 8], strides = [1, 1]} : vector<16x32xf32> to vector<16x8xf32>
    %97 = vector.extract_strided_slice %63 {offsets = [0, 8], sizes = [16, 8], strides = [1, 1]} : vector<16x32xf32> to vector<16x8xf32>
    %98 = tpu.transpose %97, [1, 0] : vector<16x8xf32> -> vector<8x16xf32>
    %cst_43 = arith.constant dense<0.000000e+00> : vector<16x16xf32>
    %99 = tpu.matmul %96, %98, %cst_43 {dimension_numbers = #tpu.dot_dimension_numbers<[1], [0], [0], [1], [0, 0, 1, 1], [], []>} : vector<16x8xf32>, vector<8x16xf32>, vector<16x16xf32> -> vector<16x16xf32>
    %cst_44 = arith.constant 0.353553385 : f32
    %100 = vector.broadcast %cst_44 : f32 to vector<16x16xf32>
    %101 = arith.mulf %99, %100 : vector<16x16xf32>
    %cst_45 = arith.constant dense<0xFF800000> : vector<16xf32>
    %102 = vector.multi_reduction <maximumf>, %101, %cst_45 [1] : vector<16x16xf32> to vector<16xf32>
    %103 = vector.shape_cast %102 : vector<16xf32> to vector<16x1xf32>
    %104 = vector.broadcast %103 : vector<16x1xf32> to vector<16x16xf32>
    %105 = arith.subf %101, %104 : vector<16x16xf32>
    %106 = math.exp %105 : vector<16x16xf32>
    %cst_46 = arith.constant dense<0.000000e+00> : vector<16xf32>
    %107 = vector.multi_reduction <add>, %106, %cst_46 [1] : vector<16x16xf32> to vector<16xf32>
    %108 = vector.shape_cast %107 : vector<16xf32> to vector<16x1xf32>
    %109 = tpu.reciprocal %108 {approx = true} : vector<16x1xf32> -> vector<16x1xf32>
    %110 = vector.broadcast %109 : vector<16x1xf32> to vector<16x16xf32>
    %111 = arith.mulf %106, %110 : vector<16x16xf32>
    %112 = vector.extract_strided_slice %68 {offsets = [0, 8], sizes = [16, 8], strides = [1, 1]} : vector<16x32xf32> to vector<16x8xf32>
    %cst_47 = arith.constant dense<0.000000e+00> : vector<16x8xf32>
    %113 = tpu.matmul %111, %112, %cst_47 {dimension_numbers = #tpu.dot_dimension_numbers<[1], [0], [0], [1], [0, 0, 1, 1], [], []>} : vector<16x16xf32>, vector<16x8xf32>, vector<16x8xf32> -> vector<16x8xf32>
    %114 = tpu.iota {dimensions = array<i32: 0>} : vector<8x32xi32>
    %115 = tpu.iota {dimensions = array<i32: 1>} : vector<8x32xi32>
    %c8_i32 = arith.constant 8 : i32
    %116 = vector.broadcast %c8_i32 : i32 to vector<8x32xi32>
    %117 = arith.addi %114, %116 : vector<8x32xi32>
    %118 = arith.cmpi eq, %115, %117 : vector<8x32xi32>
    %cst_48 = arith.constant 1.000000e+00 : f32
    %cst_49 = arith.constant 0.000000e+00 : f32
    %119 = vector.broadcast %cst_48 : f32 to vector<8x32xf32>
    %120 = vector.broadcast %cst_49 : f32 to vector<8x32xf32>
    %121 = arith.select %118, %119, %120 : vector<8x32xi1>, vector<8x32xf32>
    %cst_50 = arith.constant dense<0.000000e+00> : vector<16x32xf32>
    %122 = tpu.matmul %113, %121, %cst_50 {dimension_numbers = #tpu.dot_dimension_numbers<[1], [0], [0], [1], [0, 0, 1, 1], [], []>} : vector<16x8xf32>, vector<8x32xf32>, vector<16x32xf32> -> vector<16x32xf32>
    %123 = arith.addf %95, %122 : vector<16x32xf32>
    %124 = vector.extract_strided_slice %33 {offsets = [0, 16], sizes = [16, 8], strides = [1, 1]} : vector<16x32xf32> to vector<16x8xf32>
    %125 = vector.extract_strided_slice %63 {offsets = [0, 16], sizes = [16, 8], strides = [1, 1]} : vector<16x32xf32> to vector<16x8xf32>
    %126 = tpu.transpose %125, [1, 0] : vector<16x8xf32> -> vector<8x16xf32>
    %cst_51 = arith.constant dense<0.000000e+00> : vector<16x16xf32>
    %127 = tpu.matmul %124, %126, %cst_51 {dimension_numbers = #tpu.dot_dimension_numbers<[1], [0], [0], [1], [0, 0, 1, 1], [], []>} : vector<16x8xf32>, vector<8x16xf32>, vector<16x16xf32> -> vector<16x16xf32>
    %cst_52 = arith.constant 0.353553385 : f32
    %128 = vector.broadcast %cst_52 : f32 to vector<16x16xf32>
    %129 = arith.mulf %127, %128 : vector<16x16xf32>
    %cst_53 = arith.constant dense<0xFF800000> : vector<16xf32>
    %130 = vector.multi_reduction <maximumf>, %129, %cst_53 [1] : vector<16x16xf32> to vector<16xf32>
    %131 = vector.shape_cast %130 : vector<16xf32> to vector<16x1xf32>
    %132 = vector.broadcast %131 : vector<16x1xf32> to vector<16x16xf32>
    %133 = arith.subf %129, %132 : vector<16x16xf32>
    %134 = math.exp %133 : vector<16x16xf32>
    %cst_54 = arith.constant dense<0.000000e+00> : vector<16xf32>
    %135 = vector.multi_reduction <add>, %134, %cst_54 [1] : vector<16x16xf32> to vector<16xf32>
    %136 = vector.shape_cast %135 : vector<16xf32> to vector<16x1xf32>
    %137 = tpu.reciprocal %136 {approx = true} : vector<16x1xf32> -> vector<16x1xf32>
    %138 = vector.broadcast %137 : vector<16x1xf32> to vector<16x16xf32>
    %139 = arith.mulf %134, %138 : vector<16x16xf32>
    %140 = vector.extract_strided_slice %68 {offsets = [0, 16], sizes = [16, 8], strides = [1, 1]} : vector<16x32xf32> to vector<16x8xf32>
    %cst_55 = arith.constant dense<0.000000e+00> : vector<16x8xf32>
    %141 = tpu.matmul %139, %140, %cst_55 {dimension_numbers = #tpu.dot_dimension_numbers<[1], [0], [0], [1], [0, 0, 1, 1], [], []>} : vector<16x16xf32>, vector<16x8xf32>, vector<16x8xf32> -> vector<16x8xf32>
    %142 = tpu.iota {dimensions = array<i32: 0>} : vector<8x32xi32>
    %143 = tpu.iota {dimensions = array<i32: 1>} : vector<8x32xi32>
    %c16_i32 = arith.constant 16 : i32
    %144 = vector.broadcast %c16_i32 : i32 to vector<8x32xi32>
    %145 = arith.addi %142, %144 : vector<8x32xi32>
    %146 = arith.cmpi eq, %143, %145 : vector<8x32xi32>
    %cst_56 = arith.constant 1.000000e+00 : f32
    %cst_57 = arith.constant 0.000000e+00 : f32
    %147 = vector.broadcast %cst_56 : f32 to vector<8x32xf32>
    %148 = vector.broadcast %cst_57 : f32 to vector<8x32xf32>
    %149 = arith.select %146, %147, %148 : vector<8x32xi1>, vector<8x32xf32>
    %cst_58 = arith.constant dense<0.000000e+00> : vector<16x32xf32>
    %150 = tpu.matmul %141, %149, %cst_58 {dimension_numbers = #tpu.dot_dimension_numbers<[1], [0], [0], [1], [0, 0, 1, 1], [], []>} : vector<16x8xf32>, vector<8x32xf32>, vector<16x32xf32> -> vector<16x32xf32>
    %151 = arith.addf %123, %150 : vector<16x32xf32>
    %152 = vector.extract_strided_slice %33 {offsets = [0, 24], sizes = [16, 8], strides = [1, 1]} : vector<16x32xf32> to vector<16x8xf32>
    %153 = vector.extract_strided_slice %63 {offsets = [0, 24], sizes = [16, 8], strides = [1, 1]} : vector<16x32xf32> to vector<16x8xf32>
    %154 = tpu.transpose %153, [1, 0] : vector<16x8xf32> -> vector<8x16xf32>
    %cst_59 = arith.constant dense<0.000000e+00> : vector<16x16xf32>
    %155 = tpu.matmul %152, %154, %cst_59 {dimension_numbers = #tpu.dot_dimension_numbers<[1], [0], [0], [1], [0, 0, 1, 1], [], []>} : vector<16x8xf32>, vector<8x16xf32>, vector<16x16xf32> -> vector<16x16xf32>
    %cst_60 = arith.constant 0.353553385 : f32
    %156 = vector.broadcast %cst_60 : f32 to vector<16x16xf32>
    %157 = arith.mulf %155, %156 : vector<16x16xf32>
    %cst_61 = arith.constant dense<0xFF800000> : vector<16xf32>
    %158 = vector.multi_reduction <maximumf>, %157, %cst_61 [1] : vector<16x16xf32> to vector<16xf32>
    %159 = vector.shape_cast %158 : vector<16xf32> to vector<16x1xf32>
    %160 = vector.broadcast %159 : vector<16x1xf32> to vector<16x16xf32>
    %161 = arith.subf %157, %160 : vector<16x16xf32>
    %162 = math.exp %161 : vector<16x16xf32>
    %cst_62 = arith.constant dense<0.000000e+00> : vector<16xf32>
    %163 = vector.multi_reduction <add>, %162, %cst_62 [1] : vector<16x16xf32> to vector<16xf32>
    %164 = vector.shape_cast %163 : vector<16xf32> to vector<16x1xf32>
    %165 = tpu.reciprocal %164 {approx = true} : vector<16x1xf32> -> vector<16x1xf32>
    %166 = vector.broadcast %165 : vector<16x1xf32> to vector<16x16xf32>
    %167 = arith.mulf %162, %166 : vector<16x16xf32>
    %168 = vector.extract_strided_slice %68 {offsets = [0, 24], sizes = [16, 8], strides = [1, 1]} : vector<16x32xf32> to vector<16x8xf32>
    %cst_63 = arith.constant dense<0.000000e+00> : vector<16x8xf32>
    %169 = tpu.matmul %167, %168, %cst_63 {dimension_numbers = #tpu.dot_dimension_numbers<[1], [0], [0], [1], [0, 0, 1, 1], [], []>} : vector<16x16xf32>, vector<16x8xf32>, vector<16x8xf32> -> vector<16x8xf32>
    %170 = tpu.iota {dimensions = array<i32: 0>} : vector<8x32xi32>
    %171 = tpu.iota {dimensions = array<i32: 1>} : vector<8x32xi32>
    %c24_i32 = arith.constant 24 : i32
    %172 = vector.broadcast %c24_i32 : i32 to vector<8x32xi32>
    %173 = arith.addi %170, %172 : vector<8x32xi32>
    %174 = arith.cmpi eq, %171, %173 : vector<8x32xi32>
    %cst_64 = arith.constant 1.000000e+00 : f32
    %cst_65 = arith.constant 0.000000e+00 : f32
    %175 = vector.broadcast %cst_64 : f32 to vector<8x32xf32>
    %176 = vector.broadcast %cst_65 : f32 to vector<8x32xf32>
    %177 = arith.select %174, %175, %176 : vector<8x32xi1>, vector<8x32xf32>
    %cst_66 = arith.constant dense<0.000000e+00> : vector<16x32xf32>
    %178 = tpu.matmul %169, %177, %cst_66 {dimension_numbers = #tpu.dot_dimension_numbers<[1], [0], [0], [1], [0, 0, 1, 1], [], []>} : vector<16x8xf32>, vector<8x32xf32>, vector<16x32xf32> -> vector<16x32xf32>
    %179 = arith.addf %151, %178 : vector<16x32xf32>
    %c0_67 = arith.constant 0 : index
    %c0_68 = arith.constant 0 : index
    %180 = vector.load %arg7[%c0_67, %c0_68] : memref<32x32xf32, #tpu.memory_space<vmem>>, vector<32x32xf32>
    %cst_69 = arith.constant dense<0.000000e+00> : vector<16x32xf32>
    %181 = tpu.matmul %179, %180, %cst_69 {dimension_numbers = #tpu.dot_dimension_numbers<[1], [0], [0], [1], [0, 0, 1, 1], [], []>} : vector<16x32xf32>, vector<32x32xf32>, vector<16x32xf32> -> vector<16x32xf32>
    %182 = arith.addf %1, %181 : vector<16x32xf32>
    %c0_70 = arith.constant 0 : index
    %c0_71 = arith.constant 0 : index
    %183 = vector.load %arg8[%c0_70, %c0_71] : memref<1x32xf32, #tpu.memory_space<vmem>>, vector<1x32xf32>
    %184 = vector.broadcast %183 : vector<1x32xf32> to vector<16x32xf32>
    %185 = arith.addf %182, %184 : vector<16x32xf32>
    %c0_72 = arith.constant 0 : index
    %c0_73 = arith.constant 0 : index
    %186 = vector.load %arg9[%c0_72, %c0_73] : memref<1x32xf32, #tpu.memory_space<vmem>>, vector<1x32xf32>
    %c0_74 = arith.constant 0 : index
    %c0_75 = arith.constant 0 : index
    %187 = vector.load %arg10[%c0_74, %c0_75] : memref<1x32xf32, #tpu.memory_space<vmem>>, vector<1x32xf32>
    %cst_76 = arith.constant dense<0.000000e+00> : vector<16xf32>
    %188 = vector.multi_reduction <add>, %185, %cst_76 [1] : vector<16x32xf32> to vector<16xf32>
    %189 = vector.shape_cast %188 : vector<16xf32> to vector<16x1xf32>
    %cst_77 = arith.constant 3.200000e+01 : f32
    %190 = vector.broadcast %cst_77 : f32 to vector<16x1xf32>
    %191 = arith.divf %189, %190 : vector<16x1xf32>
    %192 = vector.broadcast %191 : vector<16x1xf32> to vector<16x32xf32>
    %193 = arith.subf %185, %192 : vector<16x32xf32>
    %194 = arith.mulf %193, %193 : vector<16x32xf32>
    %cst_78 = arith.constant dense<0.000000e+00> : vector<16xf32>
    %195 = vector.multi_reduction <add>, %194, %cst_78 [1] : vector<16x32xf32> to vector<16xf32>
    %196 = vector.shape_cast %195 : vector<16xf32> to vector<16x1xf32>
    %cst_79 = arith.constant 3.200000e+01 : f32
    %197 = vector.broadcast %cst_79 : f32 to vector<16x1xf32>
    %198 = arith.divf %196, %197 : vector<16x1xf32>
    %199 = vector.broadcast %191 : vector<16x1xf32> to vector<16x32xf32>
    %200 = arith.subf %185, %199 : vector<16x32xf32>
    %cst_80 = arith.constant 9.99999974E-6 : f32
    %201 = vector.broadcast %cst_80 : f32 to vector<16x1xf32>
    %202 = arith.addf %198, %201 : vector<16x1xf32>
    %203 = math.rsqrt %202 : vector<16x1xf32>
    %204 = vector.broadcast %203 : vector<16x1xf32> to vector<16x32xf32>
    %205 = arith.mulf %200, %204 : vector<16x32xf32>
    %206 = vector.broadcast %186 : vector<1x32xf32> to vector<16x32xf32>
    %207 = arith.mulf %205, %206 : vector<16x32xf32>
    %208 = vector.broadcast %187 : vector<1x32xf32> to vector<16x32xf32>
    %209 = arith.addf %207, %208 : vector<16x32xf32>
    %c0_81 = arith.constant 0 : index
    %c0_82 = arith.constant 0 : index
    %c0_83 = arith.constant 0 : index
    %210 = vector.load %arg11[%c0_81, %c0_82, %c0_83] : memref<1x16x32xf32, #tpu.memory_space<vmem>>, vector<1x16x32xf32>
    %211 = vector.shape_cast %210 : vector<1x16x32xf32> to vector<16x32xf32>
    %212 = vector.shape_cast %209 : vector<16x32xf32> to vector<1x16x32xf32>
    tpu.vector_store %arg11[%c0_81, %c0_82, %c0_83], %212 {strides = array<i32>} : memref<1x16x32xf32, #tpu.memory_space<vmem>>, vector<1x16x32xf32>,
    return
  }
  func.func @transform_0(%arg0: i32) -> (i32, i32, i32) {
    %c0_i32 = arith.constant 0 : i32
    %c0_i32_0 = arith.constant 0 : i32
    %c0_i32_1 = arith.constant 0 : i32
    return %arg0, %c0_i32, %c0_i32_0 : i32, i32, i32
  }
  func.func @transform_1(%arg0: i32) -> (i32, i32, i32) {
    %c0_i32 = arith.constant 0 : i32
    %c0_i32_0 = arith.constant 0 : i32
    %c0_i32_1 = arith.constant 0 : i32
    return %arg0, %c0_i32, %c0_i32_0 : i32, i32, i32
  }
  func.func @transform_2(%arg0: i32) -> (i32, i32, i32) {
    %c0_i32 = arith.constant 0 : i32
    %c0_i32_0 = arith.constant 0 : i32
    %c0_i32_1 = arith.constant 0 : i32
    %c0_i32_2 = arith.constant 0 : i32
    return %c0_i32, %c0_i32_0, %c0_i32_1 : i32, i32, i32
  }
  func.func @transform_3(%arg0: i32) -> (i32, i32, i32) {
    %c0_i32 = arith.constant 0 : i32
    %c0_i32_0 = arith.constant 0 : i32
    %c0_i32_1 = arith.constant 0 : i32
    %c0_i32_2 = arith.constant 0 : i32
    return %c0_i32, %c0_i32_0, %c0_i32_1 : i32, i32, i32
  }
  func.func @transform_4(%arg0: i32) -> (i32, i32) {
    %c0_i32 = arith.constant 0 : i32
    %c0_i32_0 = arith.constant 0 : i32
    %c0_i32_1 = arith.constant 0 : i32
    return %c0_i32, %c0_i32_0 : i32, i32
  }
  func.func @transform_5(%arg0: i32) -> (i32, i32) {
    %c0_i32 = arith.constant 0 : i32
    %c0_i32_0 = arith.constant 0 : i32
    %c0_i32_1 = arith.constant 0 : i32
    return %c0_i32, %c0_i32_0 : i32, i32
  }
  func.func @transform_6(%arg0: i32) -> (i32, i32) {
    %c0_i32 = arith.constant 0 : i32
    %c0_i32_0 = arith.constant 0 : i32
    %c0_i32_1 = arith.constant 0 : i32
    return %c0_i32, %c0_i32_0 : i32, i32
  }
  func.func @transform_7(%arg0: i32) -> (i32, i32) {
    %c0_i32 = arith.constant 0 : i32
    %c0_i32_0 = arith.constant 0 : i32
    %c0_i32_1 = arith.constant 0 : i32
    return %c0_i32, %c0_i32_0 : i32, i32
  }
  func.func @transform_8(%arg0: i32) -> (i32, i32) {
    %c0_i32 = arith.constant 0 : i32
    %c0_i32_0 = arith.constant 0 : i32
    %c0_i32_1 = arith.constant 0 : i32
    return %c0_i32, %c0_i32_0 : i32, i32
  }
  func.func @transform_9(%arg0: i32) -> (i32, i32) {
    %c0_i32 = arith.constant 0 : i32
    %c0_i32_0 = arith.constant 0 : i32
    %c0_i32_1 = arith.constant 0 : i32
    return %c0_i32, %c0_i32_0 : i32, i32
  }
  func.func @transform_10(%arg0: i32) -> (i32, i32, i32) {
    %c0_i32 = arith.constant 0 : i32
    %c0_i32_0 = arith.constant 0 : i32
    %c0_i32_1 = arith.constant 0 : i32
    return %arg0, %c0_i32, %c0_i32_0 : i32, i32, i32
  }
}

module attributes {stable_mosaic.version = 11 : i64} {
  func.func @_embed_kernel(%arg0: i32, %arg1: memref<1x16x8xf32, #tpu.memory_space<vmem>>, %arg2: memref<1x16x4xf32, #tpu.memory_space<vmem>>, %arg3: memref<3x8x32xf32, #tpu.memory_space<vmem>>, %arg4: memref<4x32xf32, #tpu.memory_space<vmem>>, %arg5: memref<16x32xf32, #tpu.memory_space<vmem>>, %arg6: memref<1x16x32xf32, #tpu.memory_space<vmem>>) attributes {dimension_semantics = [#tpu.dimension_semantics<parallel>], iteration_bounds = array<i64: 2>, scalar_prefetch = 0 : i64, scratch_operands = 0 : i64, tpu.core_type = #tpu.core_type<tc>, window_params = [{transform_indices = @transform_0, window_bounds = array<i64: 1, 16, 8>}, {transform_indices = @transform_1, window_bounds = array<i64: 1, 16, 4>}, {pipeline_mode = #tpu.pipeline_mode<synchronous>, transform_indices = @transform_2, window_bounds = array<i64: 3, 8, 32>}, {pipeline_mode = #tpu.pipeline_mode<synchronous>, transform_indices = @transform_3, window_bounds = array<i64: 4, 32>}, {pipeline_mode = #tpu.pipeline_mode<synchronous>, transform_indices = @transform_4, window_bounds = array<i64: 16, 32>}, {transform_indices = @transform_5, window_bounds = array<i64: 1, 16, 32>}]} {
    %c0 = arith.constant 0 : index
    %c0_0 = arith.constant 0 : index
    %c0_1 = arith.constant 0 : index
    %0 = vector.load %arg1[%c0, %c0_0, %c0_1] : memref<1x16x8xf32, #tpu.memory_space<vmem>>, vector<1x16x8xf32>
    %1 = vector.shape_cast %0 : vector<1x16x8xf32> to vector<16x8xf32>
    %c0_2 = arith.constant 0 : index
    %c0_3 = arith.constant 0 : index
    %c0_4 = arith.constant 0 : index
    %2 = vector.load %arg3[%c0_2, %c0_3, %c0_4] : memref<3x8x32xf32, #tpu.memory_space<vmem>>, vector<3x8x32xf32>
    %3 = tpu.iota {dimensions = array<i32: 0>} : vector<16x16xi32>
    %4 = tpu.iota {dimensions = array<i32: 1>} : vector<16x16xi32>
    %c1_i32 = arith.constant 1 : i32
    %5 = vector.broadcast %c1_i32 : i32 to vector<16x16xi32>
    %6 = arith.subi %3, %5 : vector<16x16xi32>
    %c16_i32 = arith.constant 16 : i32
    %c0_i32 = arith.constant 0 : i32
    %7 = arith.cmpi eq, %c16_i32, %c0_i32 : i32
    %c1_i32_5 = arith.constant 1 : i32
    %8 = arith.select %7, %c1_i32_5, %c16_i32 : i32
    %9 = vector.broadcast %8 : i32 to vector<16x16xi32>
    %10 = arith.remsi %6, %9 : vector<16x16xi32>
    %c0_i32_6 = arith.constant 0 : i32
    %11 = vector.broadcast %c0_i32_6 : i32 to vector<16x16xi32>
    %12 = arith.cmpi ne, %10, %11 : vector<16x16xi32>
    %c0_i32_7 = arith.constant 0 : i32
    %13 = vector.broadcast %c0_i32_7 : i32 to vector<16x16xi32>
    %14 = arith.cmpi slt, %10, %13 : vector<16x16xi32>
    %c0_i32_8 = arith.constant 0 : i32
    %15 = arith.cmpi slt, %8, %c0_i32_8 : i32
    %16 = vector.broadcast %15 : i1 to vector<16x16xi1>
    %17 = vector.broadcast %16 : vector<16x16xi1> to vector<16x16xi1>
    %18 = arith.xori %14, %17 : vector<16x16xi1>
    %19 = arith.andi %18, %12 : vector<16x16xi1>
    %20 = vector.broadcast %8 : i32 to vector<16x16xi32>
    %21 = arith.addi %10, %20 : vector<16x16xi32>
    %22 = arith.select %19, %21, %10 : vector<16x16xi1>, vector<16x16xi32>
    %23 = arith.cmpi eq, %4, %22 : vector<16x16xi32>
    %cst = arith.constant 1.000000e+00 : f32
    %cst_9 = arith.constant 0.000000e+00 : f32
    %24 = vector.broadcast %cst : f32 to vector<16x16xf32>
    %25 = vector.broadcast %cst_9 : f32 to vector<16x16xf32>
    %26 = arith.select %23, %24, %25 : vector<16x16xi1>, vector<16x16xf32>
    %cst_10 = arith.constant dense<0.000000e+00> : vector<16x8xf32>
    %27 = tpu.matmul %26, %1, %cst_10 {dimension_numbers = #tpu.dot_dimension_numbers<[1], [0], [0], [1], [0, 0, 1, 1], [], []>} : vector<16x16xf32>, vector<16x8xf32>, vector<16x8xf32> -> vector<16x8xf32>
    %28 = vector.extract_strided_slice %2 {offsets = [0, 0, 0], sizes = [1, 8, 32], strides = [1, 1, 1]} : vector<3x8x32xf32> to vector<1x8x32xf32>
    %29 = vector.shape_cast %28 : vector<1x8x32xf32> to vector<8x32xf32>
    %cst_11 = arith.constant dense<0.000000e+00> : vector<16x32xf32>
    %30 = tpu.matmul %27, %29, %cst_11 {dimension_numbers = #tpu.dot_dimension_numbers<[1], [0], [0], [1], [0, 0, 1, 1], [], []>} : vector<16x8xf32>, vector<8x32xf32>, vector<16x32xf32> -> vector<16x32xf32>
    %31 = vector.extract_strided_slice %2 {offsets = [1, 0, 0], sizes = [1, 8, 32], strides = [1, 1, 1]} : vector<3x8x32xf32> to vector<1x8x32xf32>
    %32 = vector.shape_cast %31 : vector<1x8x32xf32> to vector<8x32xf32>
    %cst_12 = arith.constant dense<0.000000e+00> : vector<16x32xf32>
    %33 = tpu.matmul %1, %32, %cst_12 {dimension_numbers = #tpu.dot_dimension_numbers<[1], [0], [0], [1], [0, 0, 1, 1], [], []>} : vector<16x8xf32>, vector<8x32xf32>, vector<16x32xf32> -> vector<16x32xf32>
    %34 = arith.addf %30, %33 : vector<16x32xf32>
    %35 = tpu.iota {dimensions = array<i32: 0>} : vector<16x16xi32>
    %36 = tpu.iota {dimensions = array<i32: 1>} : vector<16x16xi32>
    %c-1_i32 = arith.constant -1 : i32
    %37 = vector.broadcast %c-1_i32 : i32 to vector<16x16xi32>
    %38 = arith.subi %35, %37 : vector<16x16xi32>
    %c16_i32_13 = arith.constant 16 : i32
    %c0_i32_14 = arith.constant 0 : i32
    %39 = arith.cmpi eq, %c16_i32_13, %c0_i32_14 : i32
    %c1_i32_15 = arith.constant 1 : i32
    %40 = arith.select %39, %c1_i32_15, %c16_i32_13 : i32
    %41 = vector.broadcast %40 : i32 to vector<16x16xi32>
    %42 = arith.remsi %38, %41 : vector<16x16xi32>
    %c0_i32_16 = arith.constant 0 : i32
    %43 = vector.broadcast %c0_i32_16 : i32 to vector<16x16xi32>
    %44 = arith.cmpi ne, %42, %43 : vector<16x16xi32>
    %c0_i32_17 = arith.constant 0 : i32
    %45 = vector.broadcast %c0_i32_17 : i32 to vector<16x16xi32>
    %46 = arith.cmpi slt, %42, %45 : vector<16x16xi32>
    %c0_i32_18 = arith.constant 0 : i32
    %47 = arith.cmpi slt, %40, %c0_i32_18 : i32
    %48 = vector.broadcast %47 : i1 to vector<16x16xi1>
    %49 = vector.broadcast %48 : vector<16x16xi1> to vector<16x16xi1>
    %50 = arith.xori %46, %49 : vector<16x16xi1>
    %51 = arith.andi %50, %44 : vector<16x16xi1>
    %52 = vector.broadcast %40 : i32 to vector<16x16xi32>
    %53 = arith.addi %42, %52 : vector<16x16xi32>
    %54 = arith.select %51, %53, %42 : vector<16x16xi1>, vector<16x16xi32>
    %55 = arith.cmpi eq, %36, %54 : vector<16x16xi32>
    %cst_19 = arith.constant 1.000000e+00 : f32
    %cst_20 = arith.constant 0.000000e+00 : f32
    %56 = vector.broadcast %cst_19 : f32 to vector<16x16xf32>
    %57 = vector.broadcast %cst_20 : f32 to vector<16x16xf32>
    %58 = arith.select %55, %56, %57 : vector<16x16xi1>, vector<16x16xf32>
    %cst_21 = arith.constant dense<0.000000e+00> : vector<16x8xf32>
    %59 = tpu.matmul %58, %1, %cst_21 {dimension_numbers = #tpu.dot_dimension_numbers<[1], [0], [0], [1], [0, 0, 1, 1], [], []>} : vector<16x16xf32>, vector<16x8xf32>, vector<16x8xf32> -> vector<16x8xf32>
    %60 = vector.extract_strided_slice %2 {offsets = [2, 0, 0], sizes = [1, 8, 32], strides = [1, 1, 1]} : vector<3x8x32xf32> to vector<1x8x32xf32>
    %61 = vector.shape_cast %60 : vector<1x8x32xf32> to vector<8x32xf32>
    %cst_22 = arith.constant dense<0.000000e+00> : vector<16x32xf32>
    %62 = tpu.matmul %59, %61, %cst_22 {dimension_numbers = #tpu.dot_dimension_numbers<[1], [0], [0], [1], [0, 0, 1, 1], [], []>} : vector<16x8xf32>, vector<8x32xf32>, vector<16x32xf32> -> vector<16x32xf32>
    %63 = arith.addf %34, %62 : vector<16x32xf32>
    %c0_23 = arith.constant 0 : index
    %c0_24 = arith.constant 0 : index
    %c0_25 = arith.constant 0 : index
    %64 = vector.load %arg2[%c0_23, %c0_24, %c0_25] : memref<1x16x4xf32, #tpu.memory_space<vmem>>, vector<1x16x4xf32>
    %65 = vector.shape_cast %64 : vector<1x16x4xf32> to vector<16x4xf32>
    %c0_26 = arith.constant 0 : index
    %c0_27 = arith.constant 0 : index
    %66 = vector.load %arg4[%c0_26, %c0_27] : memref<4x32xf32, #tpu.memory_space<vmem>>, vector<4x32xf32>
    %cst_28 = arith.constant dense<0.000000e+00> : vector<16x32xf32>
    %67 = tpu.matmul %65, %66, %cst_28 {dimension_numbers = #tpu.dot_dimension_numbers<[1], [0], [0], [1], [0, 0, 1, 1], [], []>} : vector<16x4xf32>, vector<4x32xf32>, vector<16x32xf32> -> vector<16x32xf32>
    %68 = arith.addf %63, %67 : vector<16x32xf32>
    %c0_29 = arith.constant 0 : index
    %c0_30 = arith.constant 0 : index
    %69 = vector.load %arg5[%c0_29, %c0_30] : memref<16x32xf32, #tpu.memory_space<vmem>>, vector<16x32xf32>
    %70 = arith.addf %68, %69 : vector<16x32xf32>
    %c0_31 = arith.constant 0 : index
    %c0_32 = arith.constant 0 : index
    %c0_33 = arith.constant 0 : index
    %71 = vector.load %arg6[%c0_31, %c0_32, %c0_33] : memref<1x16x32xf32, #tpu.memory_space<vmem>>, vector<1x16x32xf32>
    %72 = vector.shape_cast %71 : vector<1x16x32xf32> to vector<16x32xf32>
    %73 = vector.shape_cast %70 : vector<16x32xf32> to vector<1x16x32xf32>
    tpu.vector_store %arg6[%c0_31, %c0_32, %c0_33], %73 {strides = array<i32>} : memref<1x16x32xf32, #tpu.memory_space<vmem>>, vector<1x16x32xf32>,
    return
  }
  func.func @transform_0(%arg0: i32) -> (i32, i32, i32) {
    %c0_i32 = arith.constant 0 : i32
    %c0_i32_0 = arith.constant 0 : i32
    %c0_i32_1 = arith.constant 0 : i32
    return %arg0, %c0_i32, %c0_i32_0 : i32, i32, i32
  }
  func.func @transform_1(%arg0: i32) -> (i32, i32, i32) {
    %c0_i32 = arith.constant 0 : i32
    %c0_i32_0 = arith.constant 0 : i32
    %c0_i32_1 = arith.constant 0 : i32
    return %arg0, %c0_i32, %c0_i32_0 : i32, i32, i32
  }
  func.func @transform_2(%arg0: i32) -> (i32, i32, i32) {
    %c0_i32 = arith.constant 0 : i32
    %c0_i32_0 = arith.constant 0 : i32
    %c0_i32_1 = arith.constant 0 : i32
    %c0_i32_2 = arith.constant 0 : i32
    return %c0_i32, %c0_i32_0, %c0_i32_1 : i32, i32, i32
  }
  func.func @transform_3(%arg0: i32) -> (i32, i32) {
    %c0_i32 = arith.constant 0 : i32
    %c0_i32_0 = arith.constant 0 : i32
    %c0_i32_1 = arith.constant 0 : i32
    return %c0_i32, %c0_i32_0 : i32, i32
  }
  func.func @transform_4(%arg0: i32) -> (i32, i32) {
    %c0_i32 = arith.constant 0 : i32
    %c0_i32_0 = arith.constant 0 : i32
    %c0_i32_1 = arith.constant 0 : i32
    return %c0_i32, %c0_i32_0 : i32, i32
  }
  func.func @transform_5(%arg0: i32) -> (i32, i32, i32) {
    %c0_i32 = arith.constant 0 : i32
    %c0_i32_0 = arith.constant 0 : i32
    %c0_i32_1 = arith.constant 0 : i32
    return %arg0, %c0_i32, %c0_i32_0 : i32, i32, i32
  }
}

module attributes {stable_mosaic.version = 11 : i64} {
  func.func @_fft_qkv_kernel(%arg0: i32, %arg1: memref<1x16x32xf32, #tpu.memory_space<vmem>>, %arg2: memref<1x16x32xf32, #tpu.memory_space<vmem>>, %arg3: memref<32x32xf32, #tpu.memory_space<vmem>>, %arg4: memref<1x32xf32, #tpu.memory_space<vmem>>, %arg5: memref<32x64xf32, #tpu.memory_space<vmem>>, %arg6: memref<1x64xf32, #tpu.memory_space<vmem>>, %arg7: memref<1x16x32xf32, #tpu.memory_space<vmem>>, %arg8: memref<1x16x64xf32, #tpu.memory_space<vmem>>) attributes {dimension_semantics = [#tpu.dimension_semantics<parallel>], iteration_bounds = array<i64: 2>, scalar_prefetch = 0 : i64, scratch_operands = 0 : i64, tpu.core_type = #tpu.core_type<tc>, window_params = [{transform_indices = @transform_0, window_bounds = array<i64: 1, 16, 32>}, {transform_indices = @transform_1, window_bounds = array<i64: 1, 16, 32>}, {pipeline_mode = #tpu.pipeline_mode<synchronous>, transform_indices = @transform_2, window_bounds = array<i64: 32, 32>}, {pipeline_mode = #tpu.pipeline_mode<synchronous>, transform_indices = @transform_3, window_bounds = array<i64: 1, 32>}, {pipeline_mode = #tpu.pipeline_mode<synchronous>, transform_indices = @transform_4, window_bounds = array<i64: 32, 64>}, {pipeline_mode = #tpu.pipeline_mode<synchronous>, transform_indices = @transform_5, window_bounds = array<i64: 1, 64>}, {transform_indices = @transform_6, window_bounds = array<i64: 1, 16, 32>}, {transform_indices = @transform_7, window_bounds = array<i64: 1, 16, 64>}]} {
    %c0 = arith.constant 0 : index
    %c0_0 = arith.constant 0 : index
    %c0_1 = arith.constant 0 : index
    %0 = vector.load %arg1[%c0, %c0_0, %c0_1] : memref<1x16x32xf32, #tpu.memory_space<vmem>>, vector<1x16x32xf32>
    %1 = vector.shape_cast %0 : vector<1x16x32xf32> to vector<16x32xf32>
    %c0_2 = arith.constant 0 : index
    %c0_3 = arith.constant 0 : index
    %2 = vector.load %arg3[%c0_2, %c0_3] : memref<32x32xf32, #tpu.memory_space<vmem>>, vector<32x32xf32>
    %cst = arith.constant dense<0.000000e+00> : vector<16x32xf32>
    %3 = tpu.matmul %1, %2, %cst {dimension_numbers = #tpu.dot_dimension_numbers<[1], [0], [0], [1], [0, 0, 1, 1], [], []>} : vector<16x32xf32>, vector<32x32xf32>, vector<16x32xf32> -> vector<16x32xf32>
    %c0_4 = arith.constant 0 : index
    %c0_5 = arith.constant 0 : index
    %4 = vector.load %arg4[%c0_4, %c0_5] : memref<1x32xf32, #tpu.memory_space<vmem>>, vector<1x32xf32>
    %5 = vector.broadcast %4 : vector<1x32xf32> to vector<16x32xf32>
    %6 = arith.addf %3, %5 : vector<16x32xf32>
    %c0_6 = arith.constant 0 : index
    %c0_7 = arith.constant 0 : index
    %c0_8 = arith.constant 0 : index
    %7 = vector.load %arg7[%c0_6, %c0_7, %c0_8] : memref<1x16x32xf32, #tpu.memory_space<vmem>>, vector<1x16x32xf32>
    %8 = vector.shape_cast %7 : vector<1x16x32xf32> to vector<16x32xf32>
    %9 = vector.shape_cast %6 : vector<16x32xf32> to vector<1x16x32xf32>
    tpu.vector_store %arg7[%c0_6, %c0_7, %c0_8], %9 {strides = array<i32>} : memref<1x16x32xf32, #tpu.memory_space<vmem>>, vector<1x16x32xf32>,
    %c0_9 = arith.constant 0 : index
    %c0_10 = arith.constant 0 : index
    %c0_11 = arith.constant 0 : index
    %10 = vector.load %arg2[%c0_9, %c0_10, %c0_11] : memref<1x16x32xf32, #tpu.memory_space<vmem>>, vector<1x16x32xf32>
    %11 = vector.shape_cast %10 : vector<1x16x32xf32> to vector<16x32xf32>
    %c0_12 = arith.constant 0 : index
    %c0_13 = arith.constant 0 : index
    %12 = vector.load %arg5[%c0_12, %c0_13] : memref<32x64xf32, #tpu.memory_space<vmem>>, vector<32x64xf32>
    %cst_14 = arith.constant dense<0.000000e+00> : vector<16x64xf32>
    %13 = tpu.matmul %11, %12, %cst_14 {dimension_numbers = #tpu.dot_dimension_numbers<[1], [0], [0], [1], [0, 0, 1, 1], [], []>} : vector<16x32xf32>, vector<32x64xf32>, vector<16x64xf32> -> vector<16x64xf32>
    %c0_15 = arith.constant 0 : index
    %c0_16 = arith.constant 0 : index
    %14 = vector.load %arg6[%c0_15, %c0_16] : memref<1x64xf32, #tpu.memory_space<vmem>>, vector<1x64xf32>
    %15 = vector.broadcast %14 : vector<1x64xf32> to vector<16x64xf32>
    %16 = arith.addf %13, %15 : vector<16x64xf32>
    %c0_17 = arith.constant 0 : index
    %c0_18 = arith.constant 0 : index
    %c0_19 = arith.constant 0 : index
    %17 = vector.load %arg8[%c0_17, %c0_18, %c0_19] : memref<1x16x64xf32, #tpu.memory_space<vmem>>, vector<1x16x64xf32>
    %18 = vector.shape_cast %17 : vector<1x16x64xf32> to vector<16x64xf32>
    %19 = vector.shape_cast %16 : vector<16x64xf32> to vector<1x16x64xf32>
    tpu.vector_store %arg8[%c0_17, %c0_18, %c0_19], %19 {strides = array<i32>} : memref<1x16x64xf32, #tpu.memory_space<vmem>>, vector<1x16x64xf32>,
    return
  }
  func.func @transform_0(%arg0: i32) -> (i32, i32, i32) {
    %c0_i32 = arith.constant 0 : i32
    %c0_i32_0 = arith.constant 0 : i32
    %c0_i32_1 = arith.constant 0 : i32
    return %arg0, %c0_i32, %c0_i32_0 : i32, i32, i32
  }
  func.func @transform_1(%arg0: i32) -> (i32, i32, i32) {
    %c0_i32 = arith.constant 0 : i32
    %c0_i32_0 = arith.constant 0 : i32
    %c0_i32_1 = arith.constant 0 : i32
    return %arg0, %c0_i32, %c0_i32_0 : i32, i32, i32
  }
  func.func @transform_2(%arg0: i32) -> (i32, i32) {
    %c0_i32 = arith.constant 0 : i32
    %c0_i32_0 = arith.constant 0 : i32
    %c0_i32_1 = arith.constant 0 : i32
    return %c0_i32, %c0_i32_0 : i32, i32
  }
  func.func @transform_3(%arg0: i32) -> (i32, i32) {
    %c0_i32 = arith.constant 0 : i32
    %c0_i32_0 = arith.constant 0 : i32
    %c0_i32_1 = arith.constant 0 : i32
    return %c0_i32, %c0_i32_0 : i32, i32
  }
  func.func @transform_4(%arg0: i32) -> (i32, i32) {
    %c0_i32 = arith.constant 0 : i32
    %c0_i32_0 = arith.constant 0 : i32
    %c0_i32_1 = arith.constant 0 : i32
    return %c0_i32, %c0_i32_0 : i32, i32
  }
  func.func @transform_5(%arg0: i32) -> (i32, i32) {
    %c0_i32 = arith.constant 0 : i32
    %c0_i32_0 = arith.constant 0 : i32
    %c0_i32_1 = arith.constant 0 : i32
    return %c0_i32, %c0_i32_0 : i32, i32
  }
  func.func @transform_6(%arg0: i32) -> (i32, i32, i32) {
    %c0_i32 = arith.constant 0 : i32
    %c0_i32_0 = arith.constant 0 : i32
    %c0_i32_1 = arith.constant 0 : i32
    return %arg0, %c0_i32, %c0_i32_0 : i32, i32, i32
  }
  func.func @transform_7(%arg0: i32) -> (i32, i32, i32) {
    %c0_i32 = arith.constant 0 : i32
    %c0_i32_0 = arith.constant 0 : i32
    %c0_i32_1 = arith.constant 0 : i32
    return %arg0, %c0_i32, %c0_i32_0 : i32, i32, i32
  }
}

module attributes {stable_mosaic.version = 11 : i64} {
  func.func @_attn_kv_kernel(%arg0: i32, %arg1: memref<1x9x32xf32, #tpu.memory_space<vmem>>, %arg2: memref<1x9x64xf32, #tpu.memory_space<vmem>>, %arg3: memref<1x9x32xf32, #tpu.memory_space<vmem>>) attributes {dimension_semantics = [#tpu.dimension_semantics<parallel>], iteration_bounds = array<i64: 4>, scalar_prefetch = 0 : i64, scratch_operands = 0 : i64, tpu.core_type = #tpu.core_type<tc>, window_params = [{transform_indices = @transform_0, window_bounds = array<i64: 1, 9, 32>}, {transform_indices = @transform_1, window_bounds = array<i64: 1, 9, 64>}, {transform_indices = @transform_2, window_bounds = array<i64: 1, 9, 32>}]} {
    %c0 = arith.constant 0 : index
    %c0_0 = arith.constant 0 : index
    %c0_1 = arith.constant 0 : index
    %0 = vector.load %arg1[%c0, %c0_0, %c0_1] : memref<1x9x32xf32, #tpu.memory_space<vmem>>, vector<1x9x32xf32>
    %1 = vector.shape_cast %0 : vector<1x9x32xf32> to vector<9x32xf32>
    %c0_2 = arith.constant 0 : index
    %c0_3 = arith.constant 0 : index
    %c0_4 = arith.constant 0 : index
    %2 = vector.load %arg2[%c0_2, %c0_3, %c0_4] : memref<1x9x64xf32, #tpu.memory_space<vmem>>, vector<1x9x64xf32>
    %3 = vector.shape_cast %2 : vector<1x9x64xf32> to vector<9x64xf32>
    %4 = vector.extract_strided_slice %3 {offsets = [0, 0], sizes = [9, 32], strides = [1, 1]} : vector<9x64xf32> to vector<9x32xf32>
    %5 = vector.extract_strided_slice %3 {offsets = [0, 32], sizes = [9, 32], strides = [1, 1]} : vector<9x64xf32> to vector<9x32xf32>
    %6 = vector.extract_strided_slice %1 {offsets = [0, 0], sizes = [9, 8], strides = [1, 1]} : vector<9x32xf32> to vector<9x8xf32>
    %7 = vector.extract_strided_slice %4 {offsets = [0, 0], sizes = [9, 8], strides = [1, 1]} : vector<9x32xf32> to vector<9x8xf32>
    %8 = tpu.transpose %7, [1, 0] : vector<9x8xf32> -> vector<8x9xf32>
    %cst = arith.constant dense<0.000000e+00> : vector<9x9xf32>
    %9 = tpu.matmul %6, %8, %cst {dimension_numbers = #tpu.dot_dimension_numbers<[1], [0], [0], [1], [0, 0, 1, 1], [], []>} : vector<9x8xf32>, vector<8x9xf32>, vector<9x9xf32> -> vector<9x9xf32>
    %cst_5 = arith.constant 0.353553385 : f32
    %10 = vector.broadcast %cst_5 : f32 to vector<9x9xf32>
    %11 = arith.mulf %9, %10 : vector<9x9xf32>
    %cst_6 = arith.constant dense<0xFF800000> : vector<9xf32>
    %12 = vector.multi_reduction <maximumf>, %11, %cst_6 [1] : vector<9x9xf32> to vector<9xf32>
    %13 = vector.shape_cast %12 : vector<9xf32> to vector<9x1xf32>
    %14 = vector.broadcast %13 : vector<9x1xf32> to vector<9x9xf32>
    %15 = arith.subf %11, %14 : vector<9x9xf32>
    %16 = math.exp %15 : vector<9x9xf32>
    %cst_7 = arith.constant dense<0.000000e+00> : vector<9xf32>
    %17 = vector.multi_reduction <add>, %16, %cst_7 [1] : vector<9x9xf32> to vector<9xf32>
    %18 = vector.shape_cast %17 : vector<9xf32> to vector<9x1xf32>
    %19 = tpu.reciprocal %18 {approx = true} : vector<9x1xf32> -> vector<9x1xf32>
    %20 = vector.broadcast %19 : vector<9x1xf32> to vector<9x9xf32>
    %21 = arith.mulf %16, %20 : vector<9x9xf32>
    %22 = vector.extract_strided_slice %5 {offsets = [0, 0], sizes = [9, 8], strides = [1, 1]} : vector<9x32xf32> to vector<9x8xf32>
    %cst_8 = arith.constant dense<0.000000e+00> : vector<9x8xf32>
    %23 = tpu.matmul %21, %22, %cst_8 {dimension_numbers = #tpu.dot_dimension_numbers<[1], [0], [0], [1], [0, 0, 1, 1], [], []>} : vector<9x9xf32>, vector<9x8xf32>, vector<9x8xf32> -> vector<9x8xf32>
    %24 = tpu.iota {dimensions = array<i32: 0>} : vector<8x32xi32>
    %25 = tpu.iota {dimensions = array<i32: 1>} : vector<8x32xi32>
    %c0_i32 = arith.constant 0 : i32
    %26 = vector.broadcast %c0_i32 : i32 to vector<8x32xi32>
    %27 = arith.addi %24, %26 : vector<8x32xi32>
    %28 = arith.cmpi eq, %25, %27 : vector<8x32xi32>
    %cst_9 = arith.constant 1.000000e+00 : f32
    %cst_10 = arith.constant 0.000000e+00 : f32
    %29 = vector.broadcast %cst_9 : f32 to vector<8x32xf32>
    %30 = vector.broadcast %cst_10 : f32 to vector<8x32xf32>
    %31 = arith.select %28, %29, %30 : vector<8x32xi1>, vector<8x32xf32>
    %cst_11 = arith.constant dense<0.000000e+00> : vector<9x32xf32>
    %32 = tpu.matmul %23, %31, %cst_11 {dimension_numbers = #tpu.dot_dimension_numbers<[1], [0], [0], [1], [0, 0, 1, 1], [], []>} : vector<9x8xf32>, vector<8x32xf32>, vector<9x32xf32> -> vector<9x32xf32>
    %33 = vector.extract_strided_slice %1 {offsets = [0, 8], sizes = [9, 8], strides = [1, 1]} : vector<9x32xf32> to vector<9x8xf32>
    %34 = vector.extract_strided_slice %4 {offsets = [0, 8], sizes = [9, 8], strides = [1, 1]} : vector<9x32xf32> to vector<9x8xf32>
    %35 = tpu.transpose %34, [1, 0] : vector<9x8xf32> -> vector<8x9xf32>
    %cst_12 = arith.constant dense<0.000000e+00> : vector<9x9xf32>
    %36 = tpu.matmul %33, %35, %cst_12 {dimension_numbers = #tpu.dot_dimension_numbers<[1], [0], [0], [1], [0, 0, 1, 1], [], []>} : vector<9x8xf32>, vector<8x9xf32>, vector<9x9xf32> -> vector<9x9xf32>
    %cst_13 = arith.constant 0.353553385 : f32
    %37 = vector.broadcast %cst_13 : f32 to vector<9x9xf32>
    %38 = arith.mulf %36, %37 : vector<9x9xf32>
    %cst_14 = arith.constant dense<0xFF800000> : vector<9xf32>
    %39 = vector.multi_reduction <maximumf>, %38, %cst_14 [1] : vector<9x9xf32> to vector<9xf32>
    %40 = vector.shape_cast %39 : vector<9xf32> to vector<9x1xf32>
    %41 = vector.broadcast %40 : vector<9x1xf32> to vector<9x9xf32>
    %42 = arith.subf %38, %41 : vector<9x9xf32>
    %43 = math.exp %42 : vector<9x9xf32>
    %cst_15 = arith.constant dense<0.000000e+00> : vector<9xf32>
    %44 = vector.multi_reduction <add>, %43, %cst_15 [1] : vector<9x9xf32> to vector<9xf32>
    %45 = vector.shape_cast %44 : vector<9xf32> to vector<9x1xf32>
    %46 = tpu.reciprocal %45 {approx = true} : vector<9x1xf32> -> vector<9x1xf32>
    %47 = vector.broadcast %46 : vector<9x1xf32> to vector<9x9xf32>
    %48 = arith.mulf %43, %47 : vector<9x9xf32>
    %49 = vector.extract_strided_slice %5 {offsets = [0, 8], sizes = [9, 8], strides = [1, 1]} : vector<9x32xf32> to vector<9x8xf32>
    %cst_16 = arith.constant dense<0.000000e+00> : vector<9x8xf32>
    %50 = tpu.matmul %48, %49, %cst_16 {dimension_numbers = #tpu.dot_dimension_numbers<[1], [0], [0], [1], [0, 0, 1, 1], [], []>} : vector<9x9xf32>, vector<9x8xf32>, vector<9x8xf32> -> vector<9x8xf32>
    %51 = tpu.iota {dimensions = array<i32: 0>} : vector<8x32xi32>
    %52 = tpu.iota {dimensions = array<i32: 1>} : vector<8x32xi32>
    %c8_i32 = arith.constant 8 : i32
    %53 = vector.broadcast %c8_i32 : i32 to vector<8x32xi32>
    %54 = arith.addi %51, %53 : vector<8x32xi32>
    %55 = arith.cmpi eq, %52, %54 : vector<8x32xi32>
    %cst_17 = arith.constant 1.000000e+00 : f32
    %cst_18 = arith.constant 0.000000e+00 : f32
    %56 = vector.broadcast %cst_17 : f32 to vector<8x32xf32>
    %57 = vector.broadcast %cst_18 : f32 to vector<8x32xf32>
    %58 = arith.select %55, %56, %57 : vector<8x32xi1>, vector<8x32xf32>
    %cst_19 = arith.constant dense<0.000000e+00> : vector<9x32xf32>
    %59 = tpu.matmul %50, %58, %cst_19 {dimension_numbers = #tpu.dot_dimension_numbers<[1], [0], [0], [1], [0, 0, 1, 1], [], []>} : vector<9x8xf32>, vector<8x32xf32>, vector<9x32xf32> -> vector<9x32xf32>
    %60 = arith.addf %32, %59 : vector<9x32xf32>
    %61 = vector.extract_strided_slice %1 {offsets = [0, 16], sizes = [9, 8], strides = [1, 1]} : vector<9x32xf32> to vector<9x8xf32>
    %62 = vector.extract_strided_slice %4 {offsets = [0, 16], sizes = [9, 8], strides = [1, 1]} : vector<9x32xf32> to vector<9x8xf32>
    %63 = tpu.transpose %62, [1, 0] : vector<9x8xf32> -> vector<8x9xf32>
    %cst_20 = arith.constant dense<0.000000e+00> : vector<9x9xf32>
    %64 = tpu.matmul %61, %63, %cst_20 {dimension_numbers = #tpu.dot_dimension_numbers<[1], [0], [0], [1], [0, 0, 1, 1], [], []>} : vector<9x8xf32>, vector<8x9xf32>, vector<9x9xf32> -> vector<9x9xf32>
    %cst_21 = arith.constant 0.353553385 : f32
    %65 = vector.broadcast %cst_21 : f32 to vector<9x9xf32>
    %66 = arith.mulf %64, %65 : vector<9x9xf32>
    %cst_22 = arith.constant dense<0xFF800000> : vector<9xf32>
    %67 = vector.multi_reduction <maximumf>, %66, %cst_22 [1] : vector<9x9xf32> to vector<9xf32>
    %68 = vector.shape_cast %67 : vector<9xf32> to vector<9x1xf32>
    %69 = vector.broadcast %68 : vector<9x1xf32> to vector<9x9xf32>
    %70 = arith.subf %66, %69 : vector<9x9xf32>
    %71 = math.exp %70 : vector<9x9xf32>
    %cst_23 = arith.constant dense<0.000000e+00> : vector<9xf32>
    %72 = vector.multi_reduction <add>, %71, %cst_23 [1] : vector<9x9xf32> to vector<9xf32>
    %73 = vector.shape_cast %72 : vector<9xf32> to vector<9x1xf32>
    %74 = tpu.reciprocal %73 {approx = true} : vector<9x1xf32> -> vector<9x1xf32>
    %75 = vector.broadcast %74 : vector<9x1xf32> to vector<9x9xf32>
    %76 = arith.mulf %71, %75 : vector<9x9xf32>
    %77 = vector.extract_strided_slice %5 {offsets = [0, 16], sizes = [9, 8], strides = [1, 1]} : vector<9x32xf32> to vector<9x8xf32>
    %cst_24 = arith.constant dense<0.000000e+00> : vector<9x8xf32>
    %78 = tpu.matmul %76, %77, %cst_24 {dimension_numbers = #tpu.dot_dimension_numbers<[1], [0], [0], [1], [0, 0, 1, 1], [], []>} : vector<9x9xf32>, vector<9x8xf32>, vector<9x8xf32> -> vector<9x8xf32>
    %79 = tpu.iota {dimensions = array<i32: 0>} : vector<8x32xi32>
    %80 = tpu.iota {dimensions = array<i32: 1>} : vector<8x32xi32>
    %c16_i32 = arith.constant 16 : i32
    %81 = vector.broadcast %c16_i32 : i32 to vector<8x32xi32>
    %82 = arith.addi %79, %81 : vector<8x32xi32>
    %83 = arith.cmpi eq, %80, %82 : vector<8x32xi32>
    %cst_25 = arith.constant 1.000000e+00 : f32
    %cst_26 = arith.constant 0.000000e+00 : f32
    %84 = vector.broadcast %cst_25 : f32 to vector<8x32xf32>
    %85 = vector.broadcast %cst_26 : f32 to vector<8x32xf32>
    %86 = arith.select %83, %84, %85 : vector<8x32xi1>, vector<8x32xf32>
    %cst_27 = arith.constant dense<0.000000e+00> : vector<9x32xf32>
    %87 = tpu.matmul %78, %86, %cst_27 {dimension_numbers = #tpu.dot_dimension_numbers<[1], [0], [0], [1], [0, 0, 1, 1], [], []>} : vector<9x8xf32>, vector<8x32xf32>, vector<9x32xf32> -> vector<9x32xf32>
    %88 = arith.addf %60, %87 : vector<9x32xf32>
    %89 = vector.extract_strided_slice %1 {offsets = [0, 24], sizes = [9, 8], strides = [1, 1]} : vector<9x32xf32> to vector<9x8xf32>
    %90 = vector.extract_strided_slice %4 {offsets = [0, 24], sizes = [9, 8], strides = [1, 1]} : vector<9x32xf32> to vector<9x8xf32>
    %91 = tpu.transpose %90, [1, 0] : vector<9x8xf32> -> vector<8x9xf32>
    %cst_28 = arith.constant dense<0.000000e+00> : vector<9x9xf32>
    %92 = tpu.matmul %89, %91, %cst_28 {dimension_numbers = #tpu.dot_dimension_numbers<[1], [0], [0], [1], [0, 0, 1, 1], [], []>} : vector<9x8xf32>, vector<8x9xf32>, vector<9x9xf32> -> vector<9x9xf32>
    %cst_29 = arith.constant 0.353553385 : f32
    %93 = vector.broadcast %cst_29 : f32 to vector<9x9xf32>
    %94 = arith.mulf %92, %93 : vector<9x9xf32>
    %cst_30 = arith.constant dense<0xFF800000> : vector<9xf32>
    %95 = vector.multi_reduction <maximumf>, %94, %cst_30 [1] : vector<9x9xf32> to vector<9xf32>
    %96 = vector.shape_cast %95 : vector<9xf32> to vector<9x1xf32>
    %97 = vector.broadcast %96 : vector<9x1xf32> to vector<9x9xf32>
    %98 = arith.subf %94, %97 : vector<9x9xf32>
    %99 = math.exp %98 : vector<9x9xf32>
    %cst_31 = arith.constant dense<0.000000e+00> : vector<9xf32>
    %100 = vector.multi_reduction <add>, %99, %cst_31 [1] : vector<9x9xf32> to vector<9xf32>
    %101 = vector.shape_cast %100 : vector<9xf32> to vector<9x1xf32>
    %102 = tpu.reciprocal %101 {approx = true} : vector<9x1xf32> -> vector<9x1xf32>
    %103 = vector.broadcast %102 : vector<9x1xf32> to vector<9x9xf32>
    %104 = arith.mulf %99, %103 : vector<9x9xf32>
    %105 = vector.extract_strided_slice %5 {offsets = [0, 24], sizes = [9, 8], strides = [1, 1]} : vector<9x32xf32> to vector<9x8xf32>
    %cst_32 = arith.constant dense<0.000000e+00> : vector<9x8xf32>
    %106 = tpu.matmul %104, %105, %cst_32 {dimension_numbers = #tpu.dot_dimension_numbers<[1], [0], [0], [1], [0, 0, 1, 1], [], []>} : vector<9x9xf32>, vector<9x8xf32>, vector<9x8xf32> -> vector<9x8xf32>
    %107 = tpu.iota {dimensions = array<i32: 0>} : vector<8x32xi32>
    %108 = tpu.iota {dimensions = array<i32: 1>} : vector<8x32xi32>
    %c24_i32 = arith.constant 24 : i32
    %109 = vector.broadcast %c24_i32 : i32 to vector<8x32xi32>
    %110 = arith.addi %107, %109 : vector<8x32xi32>
    %111 = arith.cmpi eq, %108, %110 : vector<8x32xi32>
    %cst_33 = arith.constant 1.000000e+00 : f32
    %cst_34 = arith.constant 0.000000e+00 : f32
    %112 = vector.broadcast %cst_33 : f32 to vector<8x32xf32>
    %113 = vector.broadcast %cst_34 : f32 to vector<8x32xf32>
    %114 = arith.select %111, %112, %113 : vector<8x32xi1>, vector<8x32xf32>
    %cst_35 = arith.constant dense<0.000000e+00> : vector<9x32xf32>
    %115 = tpu.matmul %106, %114, %cst_35 {dimension_numbers = #tpu.dot_dimension_numbers<[1], [0], [0], [1], [0, 0, 1, 1], [], []>} : vector<9x8xf32>, vector<8x32xf32>, vector<9x32xf32> -> vector<9x32xf32>
    %116 = arith.addf %88, %115 : vector<9x32xf32>
    %c0_36 = arith.constant 0 : index
    %c0_37 = arith.constant 0 : index
    %c0_38 = arith.constant 0 : index
    %117 = vector.load %arg3[%c0_36, %c0_37, %c0_38] : memref<1x9x32xf32, #tpu.memory_space<vmem>>, vector<1x9x32xf32>
    %118 = vector.shape_cast %117 : vector<1x9x32xf32> to vector<9x32xf32>
    %119 = vector.shape_cast %116 : vector<9x32xf32> to vector<1x9x32xf32>
    tpu.vector_store %arg3[%c0_36, %c0_37, %c0_38], %119 {strides = array<i32>} : memref<1x9x32xf32, #tpu.memory_space<vmem>>, vector<1x9x32xf32>,
    return
  }
  func.func @transform_0(%arg0: i32) -> (i32, i32, i32) {
    %c0_i32 = arith.constant 0 : i32
    %c0_i32_0 = arith.constant 0 : i32
    %c0_i32_1 = arith.constant 0 : i32
    return %arg0, %c0_i32, %c0_i32_0 : i32, i32, i32
  }
  func.func @transform_1(%arg0: i32) -> (i32, i32, i32) {
    %c0_i32 = arith.constant 0 : i32
    %c0_i32_0 = arith.constant 0 : i32
    %c0_i32_1 = arith.constant 0 : i32
    return %arg0, %c0_i32, %c0_i32_0 : i32, i32, i32
  }
  func.func @transform_2(%arg0: i32) -> (i32, i32, i32) {
    %c0_i32 = arith.constant 0 : i32
    %c0_i32_0 = arith.constant 0 : i32
    %c0_i32_1 = arith.constant 0 : i32
    return %arg0, %c0_i32, %c0_i32_0 : i32, i32, i32
  }
}

module attributes {stable_mosaic.version = 11 : i64} {
  func.func @_proj_res_ln_kernel(%arg0: i32, %arg1: memref<1x16x32xf32, #tpu.memory_space<vmem>>, %arg2: memref<1x16x32xf32, #tpu.memory_space<vmem>>, %arg3: memref<32x32xf32, #tpu.memory_space<vmem>>, %arg4: memref<1x32xf32, #tpu.memory_space<vmem>>, %arg5: memref<1x32xf32, #tpu.memory_space<vmem>>, %arg6: memref<1x32xf32, #tpu.memory_space<vmem>>, %arg7: memref<1x16x32xf32, #tpu.memory_space<vmem>>) attributes {dimension_semantics = [#tpu.dimension_semantics<parallel>], iteration_bounds = array<i64: 2>, scalar_prefetch = 0 : i64, scratch_operands = 0 : i64, tpu.core_type = #tpu.core_type<tc>, window_params = [{transform_indices = @transform_0, window_bounds = array<i64: 1, 16, 32>}, {transform_indices = @transform_1, window_bounds = array<i64: 1, 16, 32>}, {pipeline_mode = #tpu.pipeline_mode<synchronous>, transform_indices = @transform_2, window_bounds = array<i64: 32, 32>}, {pipeline_mode = #tpu.pipeline_mode<synchronous>, transform_indices = @transform_3, window_bounds = array<i64: 1, 32>}, {pipeline_mode = #tpu.pipeline_mode<synchronous>, transform_indices = @transform_4, window_bounds = array<i64: 1, 32>}, {pipeline_mode = #tpu.pipeline_mode<synchronous>, transform_indices = @transform_5, window_bounds = array<i64: 1, 32>}, {transform_indices = @transform_6, window_bounds = array<i64: 1, 16, 32>}]} {
    %c0 = arith.constant 0 : index
    %c0_0 = arith.constant 0 : index
    %c0_1 = arith.constant 0 : index
    %0 = vector.load %arg1[%c0, %c0_0, %c0_1] : memref<1x16x32xf32, #tpu.memory_space<vmem>>, vector<1x16x32xf32>
    %1 = vector.shape_cast %0 : vector<1x16x32xf32> to vector<16x32xf32>
    %c0_2 = arith.constant 0 : index
    %c0_3 = arith.constant 0 : index
    %c0_4 = arith.constant 0 : index
    %2 = vector.load %arg2[%c0_2, %c0_3, %c0_4] : memref<1x16x32xf32, #tpu.memory_space<vmem>>, vector<1x16x32xf32>
    %3 = vector.shape_cast %2 : vector<1x16x32xf32> to vector<16x32xf32>
    %c0_5 = arith.constant 0 : index
    %c0_6 = arith.constant 0 : index
    %4 = vector.load %arg3[%c0_5, %c0_6] : memref<32x32xf32, #tpu.memory_space<vmem>>, vector<32x32xf32>
    %cst = arith.constant dense<0.000000e+00> : vector<16x32xf32>
    %5 = tpu.matmul %3, %4, %cst {dimension_numbers = #tpu.dot_dimension_numbers<[1], [0], [0], [1], [0, 0, 1, 1], [], []>} : vector<16x32xf32>, vector<32x32xf32>, vector<16x32xf32> -> vector<16x32xf32>
    %6 = arith.addf %1, %5 : vector<16x32xf32>
    %c0_7 = arith.constant 0 : index
    %c0_8 = arith.constant 0 : index
    %7 = vector.load %arg4[%c0_7, %c0_8] : memref<1x32xf32, #tpu.memory_space<vmem>>, vector<1x32xf32>
    %8 = vector.broadcast %7 : vector<1x32xf32> to vector<16x32xf32>
    %9 = arith.addf %6, %8 : vector<16x32xf32>
    %c0_9 = arith.constant 0 : index
    %c0_10 = arith.constant 0 : index
    %10 = vector.load %arg5[%c0_9, %c0_10] : memref<1x32xf32, #tpu.memory_space<vmem>>, vector<1x32xf32>
    %c0_11 = arith.constant 0 : index
    %c0_12 = arith.constant 0 : index
    %11 = vector.load %arg6[%c0_11, %c0_12] : memref<1x32xf32, #tpu.memory_space<vmem>>, vector<1x32xf32>
    %cst_13 = arith.constant dense<0.000000e+00> : vector<16xf32>
    %12 = vector.multi_reduction <add>, %9, %cst_13 [1] : vector<16x32xf32> to vector<16xf32>
    %13 = vector.shape_cast %12 : vector<16xf32> to vector<16x1xf32>
    %cst_14 = arith.constant 3.200000e+01 : f32
    %14 = vector.broadcast %cst_14 : f32 to vector<16x1xf32>
    %15 = arith.divf %13, %14 : vector<16x1xf32>
    %16 = vector.broadcast %15 : vector<16x1xf32> to vector<16x32xf32>
    %17 = arith.subf %9, %16 : vector<16x32xf32>
    %18 = arith.mulf %17, %17 : vector<16x32xf32>
    %cst_15 = arith.constant dense<0.000000e+00> : vector<16xf32>
    %19 = vector.multi_reduction <add>, %18, %cst_15 [1] : vector<16x32xf32> to vector<16xf32>
    %20 = vector.shape_cast %19 : vector<16xf32> to vector<16x1xf32>
    %cst_16 = arith.constant 3.200000e+01 : f32
    %21 = vector.broadcast %cst_16 : f32 to vector<16x1xf32>
    %22 = arith.divf %20, %21 : vector<16x1xf32>
    %23 = vector.broadcast %15 : vector<16x1xf32> to vector<16x32xf32>
    %24 = arith.subf %9, %23 : vector<16x32xf32>
    %cst_17 = arith.constant 9.99999974E-6 : f32
    %25 = vector.broadcast %cst_17 : f32 to vector<16x1xf32>
    %26 = arith.addf %22, %25 : vector<16x1xf32>
    %27 = math.rsqrt %26 : vector<16x1xf32>
    %28 = vector.broadcast %27 : vector<16x1xf32> to vector<16x32xf32>
    %29 = arith.mulf %24, %28 : vector<16x32xf32>
    %30 = vector.broadcast %10 : vector<1x32xf32> to vector<16x32xf32>
    %31 = arith.mulf %29, %30 : vector<16x32xf32>
    %32 = vector.broadcast %11 : vector<1x32xf32> to vector<16x32xf32>
    %33 = arith.addf %31, %32 : vector<16x32xf32>
    %c0_18 = arith.constant 0 : index
    %c0_19 = arith.constant 0 : index
    %c0_20 = arith.constant 0 : index
    %34 = vector.load %arg7[%c0_18, %c0_19, %c0_20] : memref<1x16x32xf32, #tpu.memory_space<vmem>>, vector<1x16x32xf32>
    %35 = vector.shape_cast %34 : vector<1x16x32xf32> to vector<16x32xf32>
    %36 = vector.shape_cast %33 : vector<16x32xf32> to vector<1x16x32xf32>
    tpu.vector_store %arg7[%c0_18, %c0_19, %c0_20], %36 {strides = array<i32>} : memref<1x16x32xf32, #tpu.memory_space<vmem>>, vector<1x16x32xf32>,
    return
  }
  func.func @transform_0(%arg0: i32) -> (i32, i32, i32) {
    %c0_i32 = arith.constant 0 : i32
    %c0_i32_0 = arith.constant 0 : i32
    %c0_i32_1 = arith.constant 0 : i32
    return %arg0, %c0_i32, %c0_i32_0 : i32, i32, i32
  }
  func.func @transform_1(%arg0: i32) -> (i32, i32, i32) {
    %c0_i32 = arith.constant 0 : i32
    %c0_i32_0 = arith.constant 0 : i32
    %c0_i32_1 = arith.constant 0 : i32
    return %arg0, %c0_i32, %c0_i32_0 : i32, i32, i32
  }
  func.func @transform_2(%arg0: i32) -> (i32, i32) {
    %c0_i32 = arith.constant 0 : i32
    %c0_i32_0 = arith.constant 0 : i32
    %c0_i32_1 = arith.constant 0 : i32
    return %c0_i32, %c0_i32_0 : i32, i32
  }
  func.func @transform_3(%arg0: i32) -> (i32, i32) {
    %c0_i32 = arith.constant 0 : i32
    %c0_i32_0 = arith.constant 0 : i32
    %c0_i32_1 = arith.constant 0 : i32
    return %c0_i32, %c0_i32_0 : i32, i32
  }
  func.func @transform_4(%arg0: i32) -> (i32, i32) {
    %c0_i32 = arith.constant 0 : i32
    %c0_i32_0 = arith.constant 0 : i32
    %c0_i32_1 = arith.constant 0 : i32
    return %c0_i32, %c0_i32_0 : i32, i32
  }
  func.func @transform_5(%arg0: i32) -> (i32, i32) {
    %c0_i32 = arith.constant 0 : i32
    %c0_i32_0 = arith.constant 0 : i32
    %c0_i32_1 = arith.constant 0 : i32
    return %c0_i32, %c0_i32_0 : i32, i32
  }
  func.func @transform_6(%arg0: i32) -> (i32, i32, i32) {
    %c0_i32 = arith.constant 0 : i32
    %c0_i32_0 = arith.constant 0 : i32
    %c0_i32_1 = arith.constant 0 : i32
    return %arg0, %c0_i32, %c0_i32_0 : i32, i32, i32
  }
}

module attributes {stable_mosaic.version = 11 : i64} {
  func.func @_ffn_res_ln_kernel(%arg0: i32, %arg1: memref<1x32x32xf32, #tpu.memory_space<vmem>>, %arg2: memref<1x32x64xf32, #tpu.memory_space<vmem>>, %arg3: memref<1x1x64xf32, #tpu.memory_space<vmem>>, %arg4: memref<1x64x32xf32, #tpu.memory_space<vmem>>, %arg5: memref<1x1x32xf32, #tpu.memory_space<vmem>>, %arg6: memref<1x1x32xf32, #tpu.memory_space<vmem>>, %arg7: memref<1x1x32xf32, #tpu.memory_space<vmem>>, %arg8: memref<1x32x32xf32, #tpu.memory_space<vmem>>) attributes {dimension_semantics = [#tpu.dimension_semantics<parallel>], iteration_bounds = array<i64: 2>, scalar_prefetch = 0 : i64, scratch_operands = 0 : i64, tpu.core_type = #tpu.core_type<tc>, window_params = [{transform_indices = @transform_0, window_bounds = array<i64: 1, 32, 32>}, {transform_indices = @transform_1, window_bounds = array<i64: 1, 32, 64>}, {transform_indices = @transform_2, window_bounds = array<i64: 1, 1, 64>}, {transform_indices = @transform_3, window_bounds = array<i64: 1, 64, 32>}, {transform_indices = @transform_4, window_bounds = array<i64: 1, 1, 32>}, {transform_indices = @transform_5, window_bounds = array<i64: 1, 1, 32>}, {transform_indices = @transform_6, window_bounds = array<i64: 1, 1, 32>}, {transform_indices = @transform_7, window_bounds = array<i64: 1, 32, 32>}]} {
    %c0 = arith.constant 0 : index
    %c0_0 = arith.constant 0 : index
    %c0_1 = arith.constant 0 : index
    %0 = vector.load %arg1[%c0, %c0_0, %c0_1] : memref<1x32x32xf32, #tpu.memory_space<vmem>>, vector<1x32x32xf32>
    %1 = vector.shape_cast %0 : vector<1x32x32xf32> to vector<32x32xf32>
    %c0_2 = arith.constant 0 : index
    %c0_3 = arith.constant 0 : index
    %c0_4 = arith.constant 0 : index
    %2 = vector.load %arg2[%c0_2, %c0_3, %c0_4] : memref<1x32x64xf32, #tpu.memory_space<vmem>>, vector<1x32x64xf32>
    %3 = vector.shape_cast %2 : vector<1x32x64xf32> to vector<32x64xf32>
    %cst = arith.constant dense<0.000000e+00> : vector<32x64xf32>
    %4 = tpu.matmul %1, %3, %cst {dimension_numbers = #tpu.dot_dimension_numbers<[1], [0], [0], [1], [0, 0, 1, 1], [], []>} : vector<32x32xf32>, vector<32x64xf32>, vector<32x64xf32> -> vector<32x64xf32>
    %c0_5 = arith.constant 0 : index
    %c0_6 = arith.constant 0 : index
    %c0_7 = arith.constant 0 : index
    %5 = vector.load %arg3[%c0_5, %c0_6, %c0_7] : memref<1x1x64xf32, #tpu.memory_space<vmem>>, vector<1x1x64xf32>
    %6 = vector.shape_cast %5 : vector<1x1x64xf32> to vector<1x64xf32>
    %7 = vector.broadcast %6 : vector<1x64xf32> to vector<32x64xf32>
    %8 = arith.addf %4, %7 : vector<32x64xf32>
    %9 = arith.mulf %8, %8 : vector<32x64xf32>
    %10 = arith.mulf %8, %9 : vector<32x64xf32>
    %cst_8 = arith.constant 4.471500e-02 : f32
    %11 = vector.broadcast %cst_8 : f32 to vector<32x64xf32>
    %12 = arith.mulf %11, %10 : vector<32x64xf32>
    %13 = arith.addf %8, %12 : vector<32x64xf32>
    %cst_9 = arith.constant 0.797884583 : f32
    %14 = vector.broadcast %cst_9 : f32 to vector<32x64xf32>
    %15 = arith.mulf %14, %13 : vector<32x64xf32>
    %16 = math.tanh %15 : vector<32x64xf32>
    %cst_10 = arith.constant 1.000000e+00 : f32
    %17 = vector.broadcast %cst_10 : f32 to vector<32x64xf32>
    %18 = arith.addf %17, %16 : vector<32x64xf32>
    %cst_11 = arith.constant 5.000000e-01 : f32
    %19 = vector.broadcast %cst_11 : f32 to vector<32x64xf32>
    %20 = arith.mulf %19, %18 : vector<32x64xf32>
    %21 = arith.mulf %8, %20 : vector<32x64xf32>
    %c0_12 = arith.constant 0 : index
    %c0_13 = arith.constant 0 : index
    %c0_14 = arith.constant 0 : index
    %22 = vector.load %arg4[%c0_12, %c0_13, %c0_14] : memref<1x64x32xf32, #tpu.memory_space<vmem>>, vector<1x64x32xf32>
    %23 = vector.shape_cast %22 : vector<1x64x32xf32> to vector<64x32xf32>
    %cst_15 = arith.constant dense<0.000000e+00> : vector<32x32xf32>
    %24 = tpu.matmul %21, %23, %cst_15 {dimension_numbers = #tpu.dot_dimension_numbers<[1], [0], [0], [1], [0, 0, 1, 1], [], []>} : vector<32x64xf32>, vector<64x32xf32>, vector<32x32xf32> -> vector<32x32xf32>
    %25 = arith.addf %1, %24 : vector<32x32xf32>
    %c0_16 = arith.constant 0 : index
    %c0_17 = arith.constant 0 : index
    %c0_18 = arith.constant 0 : index
    %26 = vector.load %arg5[%c0_16, %c0_17, %c0_18] : memref<1x1x32xf32, #tpu.memory_space<vmem>>, vector<1x1x32xf32>
    %27 = vector.shape_cast %26 : vector<1x1x32xf32> to vector<1x32xf32>
    %28 = vector.broadcast %27 : vector<1x32xf32> to vector<32x32xf32>
    %29 = arith.addf %25, %28 : vector<32x32xf32>
    %c0_19 = arith.constant 0 : index
    %c0_20 = arith.constant 0 : index
    %c0_21 = arith.constant 0 : index
    %30 = vector.load %arg6[%c0_19, %c0_20, %c0_21] : memref<1x1x32xf32, #tpu.memory_space<vmem>>, vector<1x1x32xf32>
    %31 = vector.shape_cast %30 : vector<1x1x32xf32> to vector<1x32xf32>
    %c0_22 = arith.constant 0 : index
    %c0_23 = arith.constant 0 : index
    %c0_24 = arith.constant 0 : index
    %32 = vector.load %arg7[%c0_22, %c0_23, %c0_24] : memref<1x1x32xf32, #tpu.memory_space<vmem>>, vector<1x1x32xf32>
    %33 = vector.shape_cast %32 : vector<1x1x32xf32> to vector<1x32xf32>
    %cst_25 = arith.constant dense<0.000000e+00> : vector<32xf32>
    %34 = vector.multi_reduction <add>, %29, %cst_25 [1] : vector<32x32xf32> to vector<32xf32>
    %35 = vector.shape_cast %34 : vector<32xf32> to vector<32x1xf32>
    %cst_26 = arith.constant 3.200000e+01 : f32
    %36 = vector.broadcast %cst_26 : f32 to vector<32x1xf32>
    %37 = arith.divf %35, %36 : vector<32x1xf32>
    %38 = vector.broadcast %37 : vector<32x1xf32> to vector<32x32xf32>
    %39 = arith.subf %29, %38 : vector<32x32xf32>
    %40 = arith.mulf %39, %39 : vector<32x32xf32>
    %cst_27 = arith.constant dense<0.000000e+00> : vector<32xf32>
    %41 = vector.multi_reduction <add>, %40, %cst_27 [1] : vector<32x32xf32> to vector<32xf32>
    %42 = vector.shape_cast %41 : vector<32xf32> to vector<32x1xf32>
    %cst_28 = arith.constant 3.200000e+01 : f32
    %43 = vector.broadcast %cst_28 : f32 to vector<32x1xf32>
    %44 = arith.divf %42, %43 : vector<32x1xf32>
    %45 = vector.broadcast %37 : vector<32x1xf32> to vector<32x32xf32>
    %46 = arith.subf %29, %45 : vector<32x32xf32>
    %cst_29 = arith.constant 9.99999974E-6 : f32
    %47 = vector.broadcast %cst_29 : f32 to vector<32x1xf32>
    %48 = arith.addf %44, %47 : vector<32x1xf32>
    %49 = math.rsqrt %48 : vector<32x1xf32>
    %50 = vector.broadcast %49 : vector<32x1xf32> to vector<32x32xf32>
    %51 = arith.mulf %46, %50 : vector<32x32xf32>
    %52 = vector.broadcast %31 : vector<1x32xf32> to vector<32x32xf32>
    %53 = arith.mulf %51, %52 : vector<32x32xf32>
    %54 = vector.broadcast %33 : vector<1x32xf32> to vector<32x32xf32>
    %55 = arith.addf %53, %54 : vector<32x32xf32>
    %c0_30 = arith.constant 0 : index
    %c0_31 = arith.constant 0 : index
    %c0_32 = arith.constant 0 : index
    %56 = vector.load %arg8[%c0_30, %c0_31, %c0_32] : memref<1x32x32xf32, #tpu.memory_space<vmem>>, vector<1x32x32xf32>
    %57 = vector.shape_cast %56 : vector<1x32x32xf32> to vector<32x32xf32>
    %58 = vector.shape_cast %55 : vector<32x32xf32> to vector<1x32x32xf32>
    tpu.vector_store %arg8[%c0_30, %c0_31, %c0_32], %58 {strides = array<i32>} : memref<1x32x32xf32, #tpu.memory_space<vmem>>, vector<1x32x32xf32>,
    return
  }
  func.func @transform_0(%arg0: i32) -> (i32, i32, i32) {
    %c0_i32 = arith.constant 0 : i32
    %c0_i32_0 = arith.constant 0 : i32
    %c0_i32_1 = arith.constant 0 : i32
    return %arg0, %c0_i32, %c0_i32_0 : i32, i32, i32
  }
  func.func @transform_1(%arg0: i32) -> (i32, i32, i32) {
    %c0_i32 = arith.constant 0 : i32
    %c0_i32_0 = arith.constant 0 : i32
    %c0_i32_1 = arith.constant 0 : i32
    return %arg0, %c0_i32, %c0_i32_0 : i32, i32, i32
  }
  func.func @transform_2(%arg0: i32) -> (i32, i32, i32) {
    %c0_i32 = arith.constant 0 : i32
    %c0_i32_0 = arith.constant 0 : i32
    %c0_i32_1 = arith.constant 0 : i32
    return %arg0, %c0_i32, %c0_i32_0 : i32, i32, i32
  }
  func.func @transform_3(%arg0: i32) -> (i32, i32, i32) {
    %c0_i32 = arith.constant 0 : i32
    %c0_i32_0 = arith.constant 0 : i32
    %c0_i32_1 = arith.constant 0 : i32
    return %arg0, %c0_i32, %c0_i32_0 : i32, i32, i32
  }
  func.func @transform_4(%arg0: i32) -> (i32, i32, i32) {
    %c0_i32 = arith.constant 0 : i32
    %c0_i32_0 = arith.constant 0 : i32
    %c0_i32_1 = arith.constant 0 : i32
    return %arg0, %c0_i32, %c0_i32_0 : i32, i32, i32
  }
  func.func @transform_5(%arg0: i32) -> (i32, i32, i32) {
    %c0_i32 = arith.constant 0 : i32
    %c0_i32_0 = arith.constant 0 : i32
    %c0_i32_1 = arith.constant 0 : i32
    return %arg0, %c0_i32, %c0_i32_0 : i32, i32, i32
  }
  func.func @transform_6(%arg0: i32) -> (i32, i32, i32) {
    %c0_i32 = arith.constant 0 : i32
    %c0_i32_0 = arith.constant 0 : i32
    %c0_i32_1 = arith.constant 0 : i32
    return %arg0, %c0_i32, %c0_i32_0 : i32, i32, i32
  }
  func.func @transform_7(%arg0: i32) -> (i32, i32, i32) {
    %c0_i32 = arith.constant 0 : i32
    %c0_i32_0 = arith.constant 0 : i32
    %c0_i32_1 = arith.constant 0 : i32
    return %arg0, %c0_i32, %c0_i32_0 : i32, i32, i32
  }
}

module attributes {stable_mosaic.version = 11 : i64} {
  func.func @_ln_stream_kernel(%arg0: i32, %arg1: memref<1x32x32xf32, #tpu.memory_space<vmem>>, %arg2: memref<1x1x32xf32, #tpu.memory_space<vmem>>, %arg3: memref<1x1x32xf32, #tpu.memory_space<vmem>>, %arg4: memref<1x32x32xf32, #tpu.memory_space<vmem>>) attributes {dimension_semantics = [#tpu.dimension_semantics<parallel>], iteration_bounds = array<i64: 2>, scalar_prefetch = 0 : i64, scratch_operands = 0 : i64, tpu.core_type = #tpu.core_type<tc>, window_params = [{transform_indices = @transform_0, window_bounds = array<i64: 1, 32, 32>}, {transform_indices = @transform_1, window_bounds = array<i64: 1, 1, 32>}, {transform_indices = @transform_2, window_bounds = array<i64: 1, 1, 32>}, {transform_indices = @transform_3, window_bounds = array<i64: 1, 32, 32>}]} {
    %c0 = arith.constant 0 : index
    %c0_0 = arith.constant 0 : index
    %c0_1 = arith.constant 0 : index
    %0 = vector.load %arg1[%c0, %c0_0, %c0_1] : memref<1x32x32xf32, #tpu.memory_space<vmem>>, vector<1x32x32xf32>
    %1 = vector.shape_cast %0 : vector<1x32x32xf32> to vector<32x32xf32>
    %c0_2 = arith.constant 0 : index
    %c0_3 = arith.constant 0 : index
    %c0_4 = arith.constant 0 : index
    %2 = vector.load %arg2[%c0_2, %c0_3, %c0_4] : memref<1x1x32xf32, #tpu.memory_space<vmem>>, vector<1x1x32xf32>
    %3 = vector.shape_cast %2 : vector<1x1x32xf32> to vector<1x32xf32>
    %c0_5 = arith.constant 0 : index
    %c0_6 = arith.constant 0 : index
    %c0_7 = arith.constant 0 : index
    %4 = vector.load %arg3[%c0_5, %c0_6, %c0_7] : memref<1x1x32xf32, #tpu.memory_space<vmem>>, vector<1x1x32xf32>
    %5 = vector.shape_cast %4 : vector<1x1x32xf32> to vector<1x32xf32>
    %cst = arith.constant dense<0.000000e+00> : vector<32xf32>
    %6 = vector.multi_reduction <add>, %1, %cst [1] : vector<32x32xf32> to vector<32xf32>
    %7 = vector.shape_cast %6 : vector<32xf32> to vector<32x1xf32>
    %cst_8 = arith.constant 3.200000e+01 : f32
    %8 = vector.broadcast %cst_8 : f32 to vector<32x1xf32>
    %9 = arith.divf %7, %8 : vector<32x1xf32>
    %10 = vector.broadcast %9 : vector<32x1xf32> to vector<32x32xf32>
    %11 = arith.subf %1, %10 : vector<32x32xf32>
    %12 = arith.mulf %11, %11 : vector<32x32xf32>
    %cst_9 = arith.constant dense<0.000000e+00> : vector<32xf32>
    %13 = vector.multi_reduction <add>, %12, %cst_9 [1] : vector<32x32xf32> to vector<32xf32>
    %14 = vector.shape_cast %13 : vector<32xf32> to vector<32x1xf32>
    %cst_10 = arith.constant 3.200000e+01 : f32
    %15 = vector.broadcast %cst_10 : f32 to vector<32x1xf32>
    %16 = arith.divf %14, %15 : vector<32x1xf32>
    %17 = vector.broadcast %9 : vector<32x1xf32> to vector<32x32xf32>
    %18 = arith.subf %1, %17 : vector<32x32xf32>
    %cst_11 = arith.constant 9.99999974E-6 : f32
    %19 = vector.broadcast %cst_11 : f32 to vector<32x1xf32>
    %20 = arith.addf %16, %19 : vector<32x1xf32>
    %21 = math.rsqrt %20 : vector<32x1xf32>
    %22 = vector.broadcast %21 : vector<32x1xf32> to vector<32x32xf32>
    %23 = arith.mulf %18, %22 : vector<32x32xf32>
    %24 = vector.broadcast %3 : vector<1x32xf32> to vector<32x32xf32>
    %25 = arith.mulf %23, %24 : vector<32x32xf32>
    %26 = vector.broadcast %5 : vector<1x32xf32> to vector<32x32xf32>
    %27 = arith.addf %25, %26 : vector<32x32xf32>
    %c0_12 = arith.constant 0 : index
    %c0_13 = arith.constant 0 : index
    %c0_14 = arith.constant 0 : index
    %28 = vector.load %arg4[%c0_12, %c0_13, %c0_14] : memref<1x32x32xf32, #tpu.memory_space<vmem>>, vector<1x32x32xf32>
    %29 = vector.shape_cast %28 : vector<1x32x32xf32> to vector<32x32xf32>
    %30 = vector.shape_cast %27 : vector<32x32xf32> to vector<1x32x32xf32>
    tpu.vector_store %arg4[%c0_12, %c0_13, %c0_14], %30 {strides = array<i32>} : memref<1x32x32xf32, #tpu.memory_space<vmem>>, vector<1x32x32xf32>,
    return
  }
  func.func @transform_0(%arg0: i32) -> (i32, i32, i32) {
    %c0_i32 = arith.constant 0 : i32
    %c0_i32_0 = arith.constant 0 : i32
    %c0_i32_1 = arith.constant 0 : i32
    return %arg0, %c0_i32, %c0_i32_0 : i32, i32, i32
  }
  func.func @transform_1(%arg0: i32) -> (i32, i32, i32) {
    %c0_i32 = arith.constant 0 : i32
    %c0_i32_0 = arith.constant 0 : i32
    %c0_i32_1 = arith.constant 0 : i32
    return %arg0, %c0_i32, %c0_i32_0 : i32, i32, i32
  }
  func.func @transform_2(%arg0: i32) -> (i32, i32, i32) {
    %c0_i32 = arith.constant 0 : i32
    %c0_i32_0 = arith.constant 0 : i32
    %c0_i32_1 = arith.constant 0 : i32
    return %arg0, %c0_i32, %c0_i32_0 : i32, i32, i32
  }
  func.func @transform_3(%arg0: i32) -> (i32, i32, i32) {
    %c0_i32 = arith.constant 0 : i32
    %c0_i32_0 = arith.constant 0 : i32
    %c0_i32_1 = arith.constant 0 : i32
    return %arg0, %c0_i32, %c0_i32_0 : i32, i32, i32
  }
}

module attributes {stable_mosaic.version = 11 : i64} {
  func.func @_head_kernel(%arg0: i32, %arg1: memref<1x16x32xf32, #tpu.memory_space<vmem>>, %arg2: memref<1x16x32xf32, #tpu.memory_space<vmem>>, %arg3: memref<1x32xf32, #tpu.memory_space<vmem>>, %arg4: memref<1x32xf32, #tpu.memory_space<vmem>>, %arg5: memref<1x32xf32, #tpu.memory_space<vmem>>, %arg6: memref<1x32xf32, #tpu.memory_space<vmem>>, %arg7: memref<32x64xf32, #tpu.memory_space<vmem>>, %arg8: memref<1x64xf32, #tpu.memory_space<vmem>>, %arg9: memref<64x32xf32, #tpu.memory_space<vmem>>, %arg10: memref<1x32xf32, #tpu.memory_space<vmem>>, %arg11: memref<32x4xf32, #tpu.memory_space<vmem>>, %arg12: memref<1x4xf32, #tpu.memory_space<vmem>>, %arg13: memref<1x16x4xf32, #tpu.memory_space<vmem>>) attributes {dimension_semantics = [#tpu.dimension_semantics<parallel>], iteration_bounds = array<i64: 2>, scalar_prefetch = 0 : i64, scratch_operands = 0 : i64, tpu.core_type = #tpu.core_type<tc>, window_params = [{transform_indices = @transform_0, window_bounds = array<i64: 1, 16, 32>}, {transform_indices = @transform_1, window_bounds = array<i64: 1, 16, 32>}, {pipeline_mode = #tpu.pipeline_mode<synchronous>, transform_indices = @transform_2, window_bounds = array<i64: 1, 32>}, {pipeline_mode = #tpu.pipeline_mode<synchronous>, transform_indices = @transform_3, window_bounds = array<i64: 1, 32>}, {pipeline_mode = #tpu.pipeline_mode<synchronous>, transform_indices = @transform_4, window_bounds = array<i64: 1, 32>}, {pipeline_mode = #tpu.pipeline_mode<synchronous>, transform_indices = @transform_5, window_bounds = array<i64: 1, 32>}, {pipeline_mode = #tpu.pipeline_mode<synchronous>, transform_indices = @transform_6, window_bounds = array<i64: 32, 64>}, {pipeline_mode = #tpu.pipeline_mode<synchronous>, transform_indices = @transform_7, window_bounds = array<i64: 1, 64>}, {pipeline_mode = #tpu.pipeline_mode<synchronous>, transform_indices = @transform_8, window_bounds = array<i64: 64, 32>}, {pipeline_mode = #tpu.pipeline_mode<synchronous>, transform_indices = @transform_9, window_bounds = array<i64: 1, 32>}, {pipeline_mode = #tpu.pipeline_mode<synchronous>, transform_indices = @transform_10, window_bounds = array<i64: 32, 4>}, {pipeline_mode = #tpu.pipeline_mode<synchronous>, transform_indices = @transform_11, window_bounds = array<i64: 1, 4>}, {transform_indices = @transform_12, window_bounds = array<i64: 1, 16, 4>}]} {
    %c0 = arith.constant 0 : index
    %c0_0 = arith.constant 0 : index
    %c0_1 = arith.constant 0 : index
    %0 = vector.load %arg1[%c0, %c0_0, %c0_1] : memref<1x16x32xf32, #tpu.memory_space<vmem>>, vector<1x16x32xf32>
    %1 = vector.shape_cast %0 : vector<1x16x32xf32> to vector<16x32xf32>
    %c0_2 = arith.constant 0 : index
    %c0_3 = arith.constant 0 : index
    %2 = vector.load %arg3[%c0_2, %c0_3] : memref<1x32xf32, #tpu.memory_space<vmem>>, vector<1x32xf32>
    %c0_4 = arith.constant 0 : index
    %c0_5 = arith.constant 0 : index
    %3 = vector.load %arg4[%c0_4, %c0_5] : memref<1x32xf32, #tpu.memory_space<vmem>>, vector<1x32xf32>
    %cst = arith.constant dense<0.000000e+00> : vector<16xf32>
    %4 = vector.multi_reduction <add>, %1, %cst [1] : vector<16x32xf32> to vector<16xf32>
    %5 = vector.shape_cast %4 : vector<16xf32> to vector<16x1xf32>
    %cst_6 = arith.constant 3.200000e+01 : f32
    %6 = vector.broadcast %cst_6 : f32 to vector<16x1xf32>
    %7 = arith.divf %5, %6 : vector<16x1xf32>
    %8 = vector.broadcast %7 : vector<16x1xf32> to vector<16x32xf32>
    %9 = arith.subf %1, %8 : vector<16x32xf32>
    %10 = arith.mulf %9, %9 : vector<16x32xf32>
    %cst_7 = arith.constant dense<0.000000e+00> : vector<16xf32>
    %11 = vector.multi_reduction <add>, %10, %cst_7 [1] : vector<16x32xf32> to vector<16xf32>
    %12 = vector.shape_cast %11 : vector<16xf32> to vector<16x1xf32>
    %cst_8 = arith.constant 3.200000e+01 : f32
    %13 = vector.broadcast %cst_8 : f32 to vector<16x1xf32>
    %14 = arith.divf %12, %13 : vector<16x1xf32>
    %15 = vector.broadcast %7 : vector<16x1xf32> to vector<16x32xf32>
    %16 = arith.subf %1, %15 : vector<16x32xf32>
    %cst_9 = arith.constant 9.99999974E-6 : f32
    %17 = vector.broadcast %cst_9 : f32 to vector<16x1xf32>
    %18 = arith.addf %14, %17 : vector<16x1xf32>
    %19 = math.rsqrt %18 : vector<16x1xf32>
    %20 = vector.broadcast %19 : vector<16x1xf32> to vector<16x32xf32>
    %21 = arith.mulf %16, %20 : vector<16x32xf32>
    %22 = vector.broadcast %2 : vector<1x32xf32> to vector<16x32xf32>
    %23 = arith.mulf %21, %22 : vector<16x32xf32>
    %24 = vector.broadcast %3 : vector<1x32xf32> to vector<16x32xf32>
    %25 = arith.addf %23, %24 : vector<16x32xf32>
    %c0_10 = arith.constant 0 : index
    %c0_11 = arith.constant 0 : index
    %c0_12 = arith.constant 0 : index
    %26 = vector.load %arg2[%c0_10, %c0_11, %c0_12] : memref<1x16x32xf32, #tpu.memory_space<vmem>>, vector<1x16x32xf32>
    %27 = vector.shape_cast %26 : vector<1x16x32xf32> to vector<16x32xf32>
    %c0_13 = arith.constant 0 : index
    %c0_14 = arith.constant 0 : index
    %28 = vector.load %arg5[%c0_13, %c0_14] : memref<1x32xf32, #tpu.memory_space<vmem>>, vector<1x32xf32>
    %c0_15 = arith.constant 0 : index
    %c0_16 = arith.constant 0 : index
    %29 = vector.load %arg6[%c0_15, %c0_16] : memref<1x32xf32, #tpu.memory_space<vmem>>, vector<1x32xf32>
    %cst_17 = arith.constant dense<0.000000e+00> : vector<16xf32>
    %30 = vector.multi_reduction <add>, %27, %cst_17 [1] : vector<16x32xf32> to vector<16xf32>
    %31 = vector.shape_cast %30 : vector<16xf32> to vector<16x1xf32>
    %cst_18 = arith.constant 3.200000e+01 : f32
    %32 = vector.broadcast %cst_18 : f32 to vector<16x1xf32>
    %33 = arith.divf %31, %32 : vector<16x1xf32>
    %34 = vector.broadcast %33 : vector<16x1xf32> to vector<16x32xf32>
    %35 = arith.subf %27, %34 : vector<16x32xf32>
    %36 = arith.mulf %35, %35 : vector<16x32xf32>
    %cst_19 = arith.constant dense<0.000000e+00> : vector<16xf32>
    %37 = vector.multi_reduction <add>, %36, %cst_19 [1] : vector<16x32xf32> to vector<16xf32>
    %38 = vector.shape_cast %37 : vector<16xf32> to vector<16x1xf32>
    %cst_20 = arith.constant 3.200000e+01 : f32
    %39 = vector.broadcast %cst_20 : f32 to vector<16x1xf32>
    %40 = arith.divf %38, %39 : vector<16x1xf32>
    %41 = vector.broadcast %33 : vector<16x1xf32> to vector<16x32xf32>
    %42 = arith.subf %27, %41 : vector<16x32xf32>
    %cst_21 = arith.constant 9.99999974E-6 : f32
    %43 = vector.broadcast %cst_21 : f32 to vector<16x1xf32>
    %44 = arith.addf %40, %43 : vector<16x1xf32>
    %45 = math.rsqrt %44 : vector<16x1xf32>
    %46 = vector.broadcast %45 : vector<16x1xf32> to vector<16x32xf32>
    %47 = arith.mulf %42, %46 : vector<16x32xf32>
    %48 = vector.broadcast %28 : vector<1x32xf32> to vector<16x32xf32>
    %49 = arith.mulf %47, %48 : vector<16x32xf32>
    %50 = vector.broadcast %29 : vector<1x32xf32> to vector<16x32xf32>
    %51 = arith.addf %49, %50 : vector<16x32xf32>
    %52 = arith.addf %25, %51 : vector<16x32xf32>
    %c0_22 = arith.constant 0 : index
    %c0_23 = arith.constant 0 : index
    %53 = vector.load %arg7[%c0_22, %c0_23] : memref<32x64xf32, #tpu.memory_space<vmem>>, vector<32x64xf32>
    %cst_24 = arith.constant dense<0.000000e+00> : vector<16x64xf32>
    %54 = tpu.matmul %52, %53, %cst_24 {dimension_numbers = #tpu.dot_dimension_numbers<[1], [0], [0], [1], [0, 0, 1, 1], [], []>} : vector<16x32xf32>, vector<32x64xf32>, vector<16x64xf32> -> vector<16x64xf32>
    %c0_25 = arith.constant 0 : index
    %c0_26 = arith.constant 0 : index
    %55 = vector.load %arg8[%c0_25, %c0_26] : memref<1x64xf32, #tpu.memory_space<vmem>>, vector<1x64xf32>
    %56 = vector.broadcast %55 : vector<1x64xf32> to vector<16x64xf32>
    %57 = arith.addf %54, %56 : vector<16x64xf32>
    %58 = arith.mulf %57, %57 : vector<16x64xf32>
    %59 = arith.mulf %57, %58 : vector<16x64xf32>
    %cst_27 = arith.constant 4.471500e-02 : f32
    %60 = vector.broadcast %cst_27 : f32 to vector<16x64xf32>
    %61 = arith.mulf %60, %59 : vector<16x64xf32>
    %62 = arith.addf %57, %61 : vector<16x64xf32>
    %cst_28 = arith.constant 0.797884583 : f32
    %63 = vector.broadcast %cst_28 : f32 to vector<16x64xf32>
    %64 = arith.mulf %63, %62 : vector<16x64xf32>
    %65 = math.tanh %64 : vector<16x64xf32>
    %cst_29 = arith.constant 1.000000e+00 : f32
    %66 = vector.broadcast %cst_29 : f32 to vector<16x64xf32>
    %67 = arith.addf %66, %65 : vector<16x64xf32>
    %cst_30 = arith.constant 5.000000e-01 : f32
    %68 = vector.broadcast %cst_30 : f32 to vector<16x64xf32>
    %69 = arith.mulf %68, %67 : vector<16x64xf32>
    %70 = arith.mulf %57, %69 : vector<16x64xf32>
    %c0_31 = arith.constant 0 : index
    %c0_32 = arith.constant 0 : index
    %71 = vector.load %arg9[%c0_31, %c0_32] : memref<64x32xf32, #tpu.memory_space<vmem>>, vector<64x32xf32>
    %cst_33 = arith.constant dense<0.000000e+00> : vector<16x32xf32>
    %72 = tpu.matmul %70, %71, %cst_33 {dimension_numbers = #tpu.dot_dimension_numbers<[1], [0], [0], [1], [0, 0, 1, 1], [], []>} : vector<16x64xf32>, vector<64x32xf32>, vector<16x32xf32> -> vector<16x32xf32>
    %73 = arith.addf %52, %72 : vector<16x32xf32>
    %c0_34 = arith.constant 0 : index
    %c0_35 = arith.constant 0 : index
    %74 = vector.load %arg10[%c0_34, %c0_35] : memref<1x32xf32, #tpu.memory_space<vmem>>, vector<1x32xf32>
    %75 = vector.broadcast %74 : vector<1x32xf32> to vector<16x32xf32>
    %76 = arith.addf %73, %75 : vector<16x32xf32>
    %c0_36 = arith.constant 0 : index
    %c0_37 = arith.constant 0 : index
    %77 = vector.load %arg11[%c0_36, %c0_37] : memref<32x4xf32, #tpu.memory_space<vmem>>, vector<32x4xf32>
    %cst_38 = arith.constant dense<0.000000e+00> : vector<16x4xf32>
    %78 = tpu.matmul %76, %77, %cst_38 {dimension_numbers = #tpu.dot_dimension_numbers<[1], [0], [0], [1], [0, 0, 1, 1], [], []>} : vector<16x32xf32>, vector<32x4xf32>, vector<16x4xf32> -> vector<16x4xf32>
    %c0_39 = arith.constant 0 : index
    %c0_40 = arith.constant 0 : index
    %79 = vector.load %arg12[%c0_39, %c0_40] : memref<1x4xf32, #tpu.memory_space<vmem>>, vector<1x4xf32>
    %80 = vector.broadcast %79 : vector<1x4xf32> to vector<16x4xf32>
    %81 = arith.addf %78, %80 : vector<16x4xf32>
    %c0_41 = arith.constant 0 : index
    %c0_42 = arith.constant 0 : index
    %c0_43 = arith.constant 0 : index
    %82 = vector.load %arg13[%c0_41, %c0_42, %c0_43] : memref<1x16x4xf32, #tpu.memory_space<vmem>>, vector<1x16x4xf32>
    %83 = vector.shape_cast %82 : vector<1x16x4xf32> to vector<16x4xf32>
    %84 = vector.shape_cast %81 : vector<16x4xf32> to vector<1x16x4xf32>
    tpu.vector_store %arg13[%c0_41, %c0_42, %c0_43], %84 {strides = array<i32>} : memref<1x16x4xf32, #tpu.memory_space<vmem>>, vector<1x16x4xf32>,
    return
  }
  func.func @transform_0(%arg0: i32) -> (i32, i32, i32) {
    %c0_i32 = arith.constant 0 : i32
    %c0_i32_0 = arith.constant 0 : i32
    %c0_i32_1 = arith.constant 0 : i32
    return %arg0, %c0_i32, %c0_i32_0 : i32, i32, i32
  }
  func.func @transform_1(%arg0: i32) -> (i32, i32, i32) {
    %c0_i32 = arith.constant 0 : i32
    %c0_i32_0 = arith.constant 0 : i32
    %c0_i32_1 = arith.constant 0 : i32
    return %arg0, %c0_i32, %c0_i32_0 : i32, i32, i32
  }
  func.func @transform_2(%arg0: i32) -> (i32, i32) {
    %c0_i32 = arith.constant 0 : i32
    %c0_i32_0 = arith.constant 0 : i32
    %c0_i32_1 = arith.constant 0 : i32
    return %c0_i32, %c0_i32_0 : i32, i32
  }
  func.func @transform_3(%arg0: i32) -> (i32, i32) {
    %c0_i32 = arith.constant 0 : i32
    %c0_i32_0 = arith.constant 0 : i32
    %c0_i32_1 = arith.constant 0 : i32
    return %c0_i32, %c0_i32_0 : i32, i32
  }
  func.func @transform_4(%arg0: i32) -> (i32, i32) {
    %c0_i32 = arith.constant 0 : i32
    %c0_i32_0 = arith.constant 0 : i32
    %c0_i32_1 = arith.constant 0 : i32
    return %c0_i32, %c0_i32_0 : i32, i32
  }
  func.func @transform_5(%arg0: i32) -> (i32, i32) {
    %c0_i32 = arith.constant 0 : i32
    %c0_i32_0 = arith.constant 0 : i32
    %c0_i32_1 = arith.constant 0 : i32
    return %c0_i32, %c0_i32_0 : i32, i32
  }
  func.func @transform_6(%arg0: i32) -> (i32, i32) {
    %c0_i32 = arith.constant 0 : i32
    %c0_i32_0 = arith.constant 0 : i32
    %c0_i32_1 = arith.constant 0 : i32
    return %c0_i32, %c0_i32_0 : i32, i32
  }
  func.func @transform_7(%arg0: i32) -> (i32, i32) {
    %c0_i32 = arith.constant 0 : i32
    %c0_i32_0 = arith.constant 0 : i32
    %c0_i32_1 = arith.constant 0 : i32
    return %c0_i32, %c0_i32_0 : i32, i32
  }
  func.func @transform_8(%arg0: i32) -> (i32, i32) {
    %c0_i32 = arith.constant 0 : i32
    %c0_i32_0 = arith.constant 0 : i32
    %c0_i32_1 = arith.constant 0 : i32
    return %c0_i32, %c0_i32_0 : i32, i32
  }
  func.func @transform_9(%arg0: i32) -> (i32, i32) {
    %c0_i32 = arith.constant 0 : i32
    %c0_i32_0 = arith.constant 0 : i32
    %c0_i32_1 = arith.constant 0 : i32
    return %c0_i32, %c0_i32_0 : i32, i32
  }
  func.func @transform_10(%arg0: i32) -> (i32, i32) {
    %c0_i32 = arith.constant 0 : i32
    %c0_i32_0 = arith.constant 0 : i32
    %c0_i32_1 = arith.constant 0 : i32
    return %c0_i32, %c0_i32_0 : i32, i32
  }
  func.func @transform_11(%arg0: i32) -> (i32, i32) {
    %c0_i32 = arith.constant 0 : i32
    %c0_i32_0 = arith.constant 0 : i32
    %c0_i32_1 = arith.constant 0 : i32
    return %c0_i32, %c0_i32_0 : i32, i32
  }
  func.func @transform_12(%arg0: i32) -> (i32, i32, i32) {
    %c0_i32 = arith.constant 0 : i32
    %c0_i32_0 = arith.constant 0 : i32
    %c0_i32_1 = arith.constant 0 : i32
    return %arg0, %c0_i32, %c0_i32_0 : i32, i32, i32
  }
}

</mosaic_0001>

<bundles_post_ra>
// kernel: _lambda_.35
= control target key start
LH: loop header
LB: loop body
LE: loop exit
PB: predicated region body
PF: predicated region fallthrough
CT: control target
= control target key end

     0   :  { %s1050_s18 = smov 0   ;;  %s1113_s0 = inlined_call_operand.vmem [shape: f32[2,16,4], index: 0, kind: input, shape index: {}]   ;;  %s1114_s1 = inlined_call_operand.vmem [shape: f32[2,16,4], index: 1, kind: input, shape index: {}]   ;;  %s1115_s2 = inlined_call_operand.vmem [shape: f32[3,4,32], index: 2, kind: input, shape index: {}]   ;;  %s1116_s3 = inlined_call_operand.vmem [shape: f32[4,32], index: 3, kind: input, shape index: {}]   ;;  %s1117_s4 = inlined_call_operand.vmem [shape: f32[16,32], index: 4, kind: input, shape index: {}]   ;;  %s1118_s5 = inlined_call_operand.vmem [shape: f32[2,16,32], index: 5, kind: output, shape index: {}]  }
   0x1 LB: > { %s897_s19 = sadd.s32 4294967295, %s1017_s18   ;;  %p901_p0 = scmp.ge.s32.totalorder %s1017_s18, 1  ;;  %s1017_s18 = sphi %s1050_s18, %s15_s18  }
   0x2   : > { %p197_p1 = scmp.lt.s32.totalorder %s1017_s18, 3 }
   0x4   : > { %p198_p2 = pnand %p901_p0, %p197_p1 }
   0x5   : > { %p230_p3 = scmp.lt.s32.totalorder (!%p198_p2), %s897_s19, 1  ;;  %v250_v0 = vlaneseq (!%p198_p2)  ;;  %v248_v10 = vld [vmem:[%s1115_s2 + $0x4] sm:$0xf] (!%p198_p2)  ;;  %vm374_vm0 = vcmask (!%p198_p2), 1043456   ;;  %vm285_vm6 = vcmask (!%p198_p2), 130048   ;;  %v1019_v21 = vmov (!%p198_p2), 0.0  }
   0x6   : > { %201 = sbr.rel (%p198_p2) target bundleno = 474 (0x1da), region = 40  ;;  %vm367_vm8 = vcmask (!%p198_p2), 31744   ;;  %v247_v27 = vld [vmem:[%s1115_s2] sm:$0xf] (!%p198_p2)  ;;  %v249_v28 = vld [vmem:[%s1115_s2 + $0x8] sm:$0xf] (!%p198_p2) }
   0x7   : > { %v251_v1 = vshrl.u32 (!%p198_p2), %v250_v0, 7  ;;  %v254_v12 = vand.u32 (!%p198_p2), 127, %v250_v0  ;;  %966 = vmatprep.subr.msk.mxu1 (!%p198_p2), %vm374_vm0, %v247_v27  ;;  %v736_v31 = vld [vmem:[%s1116_s3] sm:$0xf] (!%p198_p2)  ;;  %v824_v39 = vld [vmem:[%s1117_s4 + $0x8] sm:$0xff] (!%p198_p2)  ;;  %vm827_vm11 = vcmask (!%p198_p2), 261120  }
   0x8   : > { %967 = vmatpush3.msk.msra.mxu1 (!%p198_p2), %vm374_vm0, %v247_v27  ;;  %v823_v42 = vld [vmem:[%s1117_s4] sm:$0xff] (!%p198_p2) }
   0x9   : > { %v908_v2 = vadd.s32 (!%p198_p2), 4294967295, %v251_v1  ;;  %v252_v3 = vadd.s32 (!%p198_p2), 8, %v251_v1  ;;  %v919_v15 = vadd.s32 (!%p198_p2), 1, %v251_v1  ;;  %978 = vmatprep.subr.msk.mxu1 (!%p198_p2), %vm374_vm0, %v249_v28 }
   0xb   : > { %v258_v6 = vsub.s32 (!%p198_p2), 0, %v908_v2  ;;  %v909_v8 = vadd.s32 (!%p198_p2), 4294967295, %v252_v3  ;;  %vm257_vm1 = vcmp.lt.s32.totalorder (!%p198_p2), %v908_v2, 0  ;;  %v920_v17 = vadd.s32 (!%p198_p2), 1, %v252_v3 }
   0xc   : > { %v543_v19 = vand.u32 (!%p198_p2), 15, %v919_v15 }
   0xd   : > { %s1120_s19 = smov (!%p230_p3, %s897_s19), 1  ;;  %v910_v9 = vmin.u32 %v908_v2, %v258_v6  ;;  %v268_v13 = vand.u32 15, %v909_v8  ;;  %v550_v24 = vand.u32 15, %v920_v17 }
   0xe   : > { %s1058_s20 = sshll.u32 %s1120_s19, 4  ;;  %vm563_vm9 = vcmp.eq.s32.totalorder %v254_v12, %v543_v19 }
   0xf   : > { %s234_s23 = scalar_lea.vmem %s1113_s0, %s1058_s20  ;;  %v261_v11 = vand.u32 15, %v910_v9  ;;  %vm282_vm4 = vcmp.eq.s32.totalorder %v254_v12, %v268_v13  ;;  %v565_v25 = vsel %vm563_vm9, 1.0, %v1019_v21  ;;  %vm564_vm10 = vcmp.eq.s32.totalorder %v254_v12, %v550_v24  ;;  %s239_s9 = scalar_lea.vmem %s1114_s1, %s1058_s20 }
  0x10   : > { %v245_v4 = vld [vmem:[%s234_s23] sm:$0xff]  ;;  %v246_v5 = vld [vmem:[%s234_s23 + $0x8] sm:$0xff]  ;;  %v284_v22 = vsel %vm282_vm4, 1.0, %v1019_v21  ;;  %v566_v26 = vsel %vm564_vm10, 1.0, %v1019_v21  ;;  %s244_s16 = scalar_lea.vmem %s1118_s5, %s1058_s20 }
  0x11   : > { %v988_v7 = vpack.c.bf16 %v246_v5, %v245_v4  ;;  %v262_v14 = vsub.s32 0, %v261_v11  ;;  %v734_v36 = vld [vmem:[%s239_s9] sm:$0xff]  ;;  %v735_v37 = vld [vmem:[%s239_s9 + $0x8] sm:$0xff] }
  0x13   : > { %989 = vmatprep.subr.bf16.mxu0 %v988_v7  ;;  %v263_v16 = vsel %vm257_vm1, %v262_v14, %v261_v11 }
  0x14   : > { %991 = vmatpush3.bf16.msra.mxu0 %v988_v7  ;;  %vm271_vm2 = vcmp.ne.s32.totalorder %v263_v16, 0  ;;  %vm273_vm3 = vcmp.lt.s32.totalorder %v263_v16, 0  ;;  %v277_v18 = vadd.s32 16, %v263_v16 }
  0x15   : > { %961 = vmatprep.subr.msk.mxu0 %vm374_vm0, %v248_v10  ;;  %vm275_vm5 = vmand %vm273_vm3, %vm271_vm2 }
  0x16   : > { %v279_v20 = vsel %vm275_vm5, %v277_v18, %v263_v16 }
  0x17   : > { %vm281_vm7 = vcmp.eq.s32.totalorder %v254_v12, %v279_v20 }
  0x18   : > { %v283_v23 = vsel %vm281_vm7, 1.0, %v1019_v21 }
  0x19   : > { %958 = vmatprep.mubr.msk.f32.mxu0 %vm285_vm6, %v283_v23 }
  0x1a   : > { %959 = vmatmul.mubr.msk.f32.vlgmr.msra.gmra.mrb[0].mxu0 %vm285_vm6, %v284_v22 }
  0x1b   : > { %962 = vmatpush3.msk.msra.mxu0 %vm374_vm0, %v248_v10  ;;  %963 = vmatprep.mubr.msk.f32.mxu0 %vm367_vm8, %v245_v4 }
  0x1c   : > { %993 = vmatprep.subr.bf16.mxu0 %v988_v7 }
  0x1e   : > { %964 = vmatmul.mubr.msk.f32.vlgmr.msra.gmra.mrb[2].mxu0 %vm367_vm8, %v246_v5 }
  0x1f   : > { %995 = vmatpush3.bf16.msra.mxu0 %v988_v7  ;;  %975 = vmatprep.mubr.msk.f32.mxu0 %vm285_vm6, %v565_v25 }
  0x22   : > { %976 = vmatmul.mubr.msk.f32.vlgmr.msra.gmra.mrb[4].mxu0 %vm285_vm6, %v566_v26 }
  0xed   : > { %v960_v29 = vpop.f32.mrb[0].mxu0 }
  0xee   : > { %v358_v30 = vpop.f32.mrb[1].mxu0 }
  0xef   : > { %968 = vmatprep.mubr.msk.f32.mxu1 %vm367_vm8, %v358_v30 }
  0xf0   : > { %969 = vmatmul.mubr.msk.f32.vlgmr.msra.gmra.mrb[0].mxu1 %vm367_vm8, %v960_v29 }
  0xf1   : > { %979 = vmatpush3.msk.msra.mxu1 %vm374_vm0, %v249_v28  ;;  %v965_v32 = vpop.f32.mrb[2].mxu0 }
  0xf2   : > { %v444_v33 = vpop.f32.mrb[3].mxu0  ;;  %983 = vmatprep.subr.msk.mxu1 %vm374_vm0, %v736_v31 }
  0xf5   : > { %v977_v34 = vpop.f32.mrb[4].mxu0 }
  0xf6   : > { %v639_v35 = vpop.f32.mrb[5].mxu0 }
  0xf7   : > { %980 = vmatprep.mubr.msk.f32.mxu1 %vm367_vm8, %v639_v35 }
  0xf8   : > { %981 = vmatmul.mubr.msk.f32.vlgmr.msra.gmra.mrb[0].mxu1 %vm367_vm8, %v977_v34 }
  0xf9   : > { %984 = vmatpush3.msk.msra.mxu1 %vm374_vm0, %v736_v31  ;;  %985 = vmatprep.mubr.msk.f32.mxu1 %vm367_vm8, %v734_v36 }
 0x100   : > { %986 = vmatmul.mubr.msk.f32.vlgmr.msra.gmra.mrb[0].mxu1 %vm367_vm8, %v735_v37 }
 0x1d3   : > { %v987_v38 = vpop.f32.mrb[0].mxu1 }
 0x1d4   : > { %v996_v40 = vadd.f32 %v987_v38, %v965_v32  ;;  %v812_v41 = vpop.f32.mrb[1].mxu1 }
 0x1d5   : > { %v997_v43 = vadd.f32 %v812_v41, %v444_v33 }
 0x1d6   : > { %v826_v44 = vadd.f32 %v996_v40, %v824_v39 }
 0x1d7   : > { %v825_v45 = vadd.f32 %v997_v43, %v823_v42 }
 0x1d8   : > { %829 = vst.msk [vmem:[%s244_s16 + $0x8] sm:$0xff] %vm827_vm11, %v826_v44 }
 0x1d9   : > { %828 = vst.msk [vmem:[%s244_s16] sm:$0xff] %vm827_vm11, %v825_v45 }
 0x1da PF: > { %s15_s18 = sadd.s32 1, %s1017_s18  }
 0x1db   : > { %p12_p4 = scmp.ge.s32.totalorder %s15_s18, 4  }
 0x1dd   :  { %14 = sbr.rel (!%p12_p4) target bundleno = 1 (0x1), region = 73 }

// kernel: _lambda_.24
= control target key start
LH: loop header
LB: loop body
LE: loop exit
PB: predicated region body
PF: predicated region fallthrough
CT: control target
= control target key end

     0   :  { %s1039_s18 = smov 0   ;;  %s1092_s0 = inlined_call_operand.vmem [shape: f32[2,16,8], index: 0, kind: input, shape index: {}]   ;;  %s1093_s1 = inlined_call_operand.vmem [shape: f32[2,16,4], index: 1, kind: input, shape index: {}]   ;;  %s1094_s2 = inlined_call_operand.vmem [shape: f32[3,8,32], index: 2, kind: input, shape index: {}]   ;;  %s1095_s3 = inlined_call_operand.vmem [shape: f32[4,32], index: 3, kind: input, shape index: {}]   ;;  %s1096_s4 = inlined_call_operand.vmem [shape: f32[16,32], index: 4, kind: input, shape index: {}]   ;;  %s1097_s5 = inlined_call_operand.vmem [shape: f32[2,16,32], index: 5, kind: output, shape index: {}]  }
   0x1 LB: > { %s889_s19 = sadd.s32 4294967295, %s1006_s18   ;;  %p893_p0 = scmp.ge.s32.totalorder %s1006_s18, 1  ;;  %s1006_s18 = sphi %s1039_s18, %s15_s18  }
   0x2   : > { %p197_p1 = scmp.lt.s32.totalorder %s1006_s18, 3 }
   0x4   : > { %p198_p2 = pnand %p893_p0, %p197_p1 }
   0x5   : > { %p230_p3 = scmp.lt.s32.totalorder (!%p198_p2), %s889_s19, 1  ;;  %v250_v0 = vlaneseq (!%p198_p2)  ;;  %v248_v10 = vld [vmem:[%s1094_s2 + $0x8] sm:$0xff] (!%p198_p2)  ;;  %vm285_vm5 = vcmask (!%p198_p2), 130048   ;;  %v1008_v21 = vmov (!%p198_p2), 0.0   ;;  %vm367_vm7 = vcmask (!%p198_p2), 64512   ;;  %v247_v27 = vld [vmem:[%s1094_s2] sm:$0xff] (!%p198_p2) }
   0x6   : > { %201 = sbr.rel (%p198_p2) target bundleno = 474 (0x1da), region = 40  ;;  %955 = vmatprep.subr.mxu1 (!%p198_p2), %v247_v27  ;;  %v249_v28 = vld [vmem:[%s1094_s2 + $0x10] sm:$0xff] (!%p198_p2)  ;;  %v726_v31 = vld [vmem:[%s1095_s3] sm:$0xf] (!%p198_p2)  ;;  %vm734_vm10 = vcmask (!%p198_p2), 1043456   ;;  %vm727_vm11 = vcmask (!%p198_p2), 31744  }
   0x7   : > { %v251_v1 = vshrl.u32 (!%p198_p2), %v250_v0, 7  ;;  %v254_v12 = vand.u32 (!%p198_p2), 127, %v250_v0  ;;  %956 = vmatpush3.msra.mxu1 (!%p198_p2), %v247_v27  ;;  %v816_v39 = vld [vmem:[%s1096_s4 + $0x8] sm:$0xff] (!%p198_p2)  ;;  %v815_v42 = vld [vmem:[%s1096_s4] sm:$0xff] (!%p198_p2)  ;;  %vm819_vm12 = vcmask (!%p198_p2), 261120  }
   0x8   : > { %967 = vmatprep.subr.mxu1 (!%p198_p2), %v249_v28 }
   0x9   : > { %v900_v2 = vadd.s32 (!%p198_p2), 4294967295, %v251_v1  ;;  %v252_v3 = vadd.s32 (!%p198_p2), 8, %v251_v1  ;;  %v909_v15 = vadd.s32 (!%p198_p2), 1, %v251_v1 }
   0xb   : > { %v258_v6 = vsub.s32 (!%p198_p2), 0, %v900_v2  ;;  %v901_v8 = vadd.s32 (!%p198_p2), 4294967295, %v252_v3  ;;  %vm257_vm0 = vcmp.lt.s32.totalorder (!%p198_p2), %v900_v2, 0  ;;  %v910_v17 = vadd.s32 (!%p198_p2), 1, %v252_v3 }
   0xc   : > { %v536_v19 = vand.u32 (!%p198_p2), 15, %v909_v15 }
   0xd   : > { %s1099_s19 = smov (!%p230_p3, %s889_s19), 1  ;;  %v902_v9 = vmin.u32 %v900_v2, %v258_v6  ;;  %v268_v13 = vand.u32 15, %v901_v8  ;;  %v543_v24 = vand.u32 15, %v910_v17 }
   0xe   : > { %s1047_s20 = sshll.u32 %s1099_s19, 4  ;;  %vm556_vm8 = vcmp.eq.s32.totalorder %v254_v12, %v536_v19 }
   0xf   : > { %s234_s23 = scalar_lea.vmem %s1092_s0, %s1047_s20  ;;  %v261_v11 = vand.u32 15, %v902_v9  ;;  %vm282_vm3 = vcmp.eq.s32.totalorder %v254_v12, %v268_v13  ;;  %v558_v25 = vsel %vm556_vm8, 1.0, %v1008_v21  ;;  %vm557_vm9 = vcmp.eq.s32.totalorder %v254_v12, %v543_v24  ;;  %s239_s9 = scalar_lea.vmem %s1093_s1, %s1047_s20 }
  0x10   : > { %v245_v4 = vld [vmem:[%s234_s23] sm:$0xff]  ;;  %v246_v5 = vld [vmem:[%s234_s23 + $0x8] sm:$0xff]  ;;  %v284_v22 = vsel %vm282_vm3, 1.0, %v1008_v21  ;;  %v559_v26 = vsel %vm557_vm9, 1.0, %v1008_v21  ;;  %s244_s16 = scalar_lea.vmem %s1097_s5, %s1047_s20 }
  0x11   : > { %v977_v7 = vpack.c.bf16 %v246_v5, %v245_v4  ;;  %v262_v14 = vsub.s32 0, %v261_v11  ;;  %v724_v36 = vld [vmem:[%s239_s9] sm:$0xff]  ;;  %v725_v37 = vld [vmem:[%s239_s9 + $0x8] sm:$0xff] }
  0x13   : > { %978 = vmatprep.subr.bf16.mxu0 %v977_v7  ;;  %v263_v16 = vsel %vm257_vm0, %v262_v14, %v261_v11 }
  0x14   : > { %980 = vmatpush3.bf16.msra.mxu0 %v977_v7  ;;  %vm271_vm1 = vcmp.ne.s32.totalorder %v263_v16, 0  ;;  %vm273_vm2 = vcmp.lt.s32.totalorder %v263_v16, 0  ;;  %v277_v18 = vadd.s32 16, %v263_v16 }
  0x15   : > { %950 = vmatprep.subr.mxu0 %v248_v10  ;;  %vm275_vm4 = vmand %vm273_vm2, %vm271_vm1 }
  0x16   : > { %v279_v20 = vsel %vm275_vm4, %v277_v18, %v263_v16 }
  0x17   : > { %vm281_vm6 = vcmp.eq.s32.totalorder %v254_v12, %v279_v20 }
  0x18   : > { %v283_v23 = vsel %vm281_vm6, 1.0, %v1008_v21 }
  0x19   : > { %947 = vmatprep.mubr.msk.f32.mxu0 %vm285_vm5, %v283_v23 }
  0x1a   : > { %948 = vmatmul.mubr.msk.f32.vlgmr.msra.gmra.mrb[0].mxu0 %vm285_vm5, %v284_v22 }
  0x1b   : > { %951 = vmatpush3.msra.mxu0 %v248_v10  ;;  %952 = vmatprep.mubr.msk.f32.mxu0 %vm367_vm7, %v245_v4 }
  0x1c   : > { %982 = vmatprep.subr.bf16.mxu0 %v977_v7 }
  0x1e   : > { %953 = vmatmul.mubr.msk.f32.vlgmr.msra.gmra.mrb[2].mxu0 %vm367_vm7, %v246_v5 }
  0x1f   : > { %984 = vmatpush3.bf16.msra.mxu0 %v977_v7  ;;  %964 = vmatprep.mubr.msk.f32.mxu0 %vm285_vm5, %v558_v25 }
  0x22   : > { %965 = vmatmul.mubr.msk.f32.vlgmr.msra.gmra.mrb[4].mxu0 %vm285_vm5, %v559_v26 }
  0xed   : > { %v949_v29 = vpop.f32.mrb[0].mxu0 }
  0xee   : > { %v358_v30 = vpop.f32.mrb[1].mxu0 }
  0xef   : > { %957 = vmatprep.mubr.msk.f32.mxu1 %vm367_vm7, %v358_v30 }
  0xf0   : > { %958 = vmatmul.mubr.msk.f32.vlgmr.msra.gmra.mrb[0].mxu1 %vm367_vm7, %v949_v29 }
  0xf1   : > { %968 = vmatpush3.msra.mxu1 %v249_v28  ;;  %v954_v32 = vpop.f32.mrb[2].mxu0 }
  0xf2   : > { %v440_v33 = vpop.f32.mrb[3].mxu0  ;;  %972 = vmatprep.subr.msk.mxu1 %vm734_vm10, %v726_v31 }
  0xf5   : > { %v966_v34 = vpop.f32.mrb[4].mxu0 }
  0xf6   : > { %v632_v35 = vpop.f32.mrb[5].mxu0 }
  0xf7   : > { %969 = vmatprep.mubr.msk.f32.mxu1 %vm367_vm7, %v632_v35 }
  0xf8   : > { %970 = vmatmul.mubr.msk.f32.vlgmr.msra.gmra.mrb[0].mxu1 %vm367_vm7, %v966_v34 }
  0xf9   : > { %973 = vmatpush3.msk.msra.mxu1 %vm734_vm10, %v726_v31  ;;  %974 = vmatprep.mubr.msk.f32.mxu1 %vm727_vm11, %v724_v36 }
 0x100   : > { %975 = vmatmul.mubr.msk.f32.vlgmr.msra.gmra.mrb[0].mxu1 %vm727_vm11, %v725_v37 }
 0x1d3   : > { %v976_v38 = vpop.f32.mrb[0].mxu1 }
 0x1d4   : > { %v985_v40 = vadd.f32 %v976_v38, %v954_v32  ;;  %v804_v41 = vpop.f32.mrb[1].mxu1 }
 0x1d5   : > { %v986_v43 = vadd.f32 %v804_v41, %v440_v33 }
 0x1d6   : > { %v818_v44 = vadd.f32 %v985_v40, %v816_v39 }
 0x1d7   : > { %v817_v45 = vadd.f32 %v986_v43, %v815_v42 }
 0x1d8   : > { %821 = vst.msk [vmem:[%s244_s16 + $0x8] sm:$0xff] %vm819_vm12, %v818_v44 }
 0x1d9   : > { %820 = vst.msk [vmem:[%s244_s16] sm:$0xff] %vm819_vm12, %v817_v45 }
 0x1da PF: > { %s15_s18 = sadd.s32 1, %s1006_s18  }
 0x1db   : > { %p12_p4 = scmp.ge.s32.totalorder %s15_s18, 4  }
 0x1dd   :  { %14 = sbr.rel (!%p12_p4) target bundleno = 1 (0x1), region = 73 }

// kernel: _lambda_.29
= control target key start
LH: loop header
LB: loop body
LE: loop exit
PB: predicated region body
PF: predicated region fallthrough
CT: control target
= control target key end

     0   :  { %s3329_s13 = smov 0   ;;  %s3663_s0 = inlined_call_operand.vmem [shape: f32[2,16,32], index: 0, kind: input, shape index: {}, may-alias: {0,1}]   ;;  %s3664_s1 = inlined_call_operand.vmem [shape: f32[2,16,32], index: 1, kind: input, shape index: {}, may-alias: {0,1}]   ;;  %s3665_s2 = inlined_call_operand.vmem [shape: f32[3,32,32], index: 2, kind: input, shape index: {}]   ;;  %s3666_s3 = inlined_call_operand.vmem [shape: f32[3,32,32], index: 3, kind: input, shape index: {}]   ;;  %s3667_s4 = inlined_call_operand.vmem [shape: f32[32,32], index: 4, kind: input, shape index: {}]   ;;  %s3668_s5 = inlined_call_operand.vmem [shape: f32[1,32], index: 5, kind: input, shape index: {}, may-alias: {5,7,9}]   ;;  %s3669_s6 = inlined_call_operand.vmem [shape: f32[32,32], index: 6, kind: input, shape index: {}]   ;;  %s3670_s7 = inlined_call_operand.vmem [shape: f32[1,32], index: 7, kind: input, shape index: {}, may-alias: {5,7,9}]   ;;  %s3671_s8 = inlined_call_operand.vmem [shape: f32[1,32], index: 8, kind: input, shape index: {}]   ;;  %s3672_s9 = inlined_call_operand.vmem [shape: f32[1,32], index: 9, kind: input, shape index: {}, may-alias: {5,7,9}]   ;;  %s3673_s10 = inlined_call_operand.vmem [shape: f32[2,16,32], index: 10, kind: output, shape index: {}]  }
   0x1 LB: > { %s2664_s14 = sadd.s32 4294967295, %s3267_s13   ;;  %p2668_p0 = scmp.ge.s32.totalorder %s3267_s13, 1  ;;  %s3267_s13 = sphi %s3329_s13, %s20_s13  }
   0x2   : > { %p322_p1 = scmp.lt.s32.totalorder %s3267_s13, 3 }
   0x4   : > { %p323_p2 = pnand %p2668_p0, %p322_p1 }
   0x5   : > { %p365_p3 = scmp.lt.s32.totalorder (!%p323_p2), %s2664_s14, 1  ;;  %v396_v0 = vlaneseq (!%p323_p2)  ;;  %v388_v1 = vld [vmem:[%s3665_s2 + $0x20] sm:$0xff] (!%p323_p2)  ;;  %v389_v2 = vld [vmem:[%s3665_s2 + $0x28] sm:$0xff] (!%p323_p2)  ;;  %v390_v3 = vld [vmem:[%s3665_s2 + $0x30] sm:$0xff] (!%p323_p2)  ;;  %vm407_vm0 = vcmask (!%p323_p2), 130048   ;;  %v3269_v16 = vmov (!%p323_p2), 0.0  }
   0x6   : > { %326 = sbr.rel (%p323_p2) target bundleno = 3180 (0xc6c), region = 60  ;;  %v3052_v4 = vpack.c.bf16 (!%p323_p2), %v389_v2, %v388_v1  ;;  %v391_v5 = vld [vmem:[%s3665_s2 + $0x38] sm:$0xff] (!%p323_p2)  ;;  %v392_v25 = vld [vmem:[%s3665_s2 + $0x40] sm:$0xff] (!%p323_p2)  ;;  %v393_v26 = vld [vmem:[%s3665_s2 + $0x48] sm:$0xff] (!%p323_p2)  ;;  %vm489_vm5 = vcmask (!%p323_p2), 261120   ;;  %s3270_s15 = smov (!%p323_p2), 120  }
   0x7   : > { %v3349_v6 = vshrl.u32 (!%p323_p2), %v396_v0, 7  ;;  %v3351_v7 = vand.u32 (!%p323_p2), 127, %v396_v0  ;;  %v3056_v8 = vpack.c.bf16 (!%p323_p2), %v391_v5, %v390_v3  ;;  %v3060_v27 = vpack.c.bf16 (!%p323_p2), %v393_v26, %v392_v25  ;;  %v826_v28 = vld [vmem:[%s3666_s3 + $0x20] sm:$0xff] (!%p323_p2)  ;;  %v827_v29 = vld [vmem:[%s3666_s3 + $0x28] sm:$0xff] (!%p323_p2)  ;;  %v828_v30 = vld [vmem:[%s3666_s3 + $0x30] sm:$0xff] (!%p323_p2)  ;;  %s3271_s27 = smov (!%p323_p2), 112  }
   0x8   : > { %3053 = vmatprep.subr.bf16.mxu1 (!%p323_p2), %v3052_v4  ;;  %v3084_v31 = vpack.c.bf16 (!%p323_p2), %v827_v29, %v826_v28  ;;  %v829_v32 = vld [vmem:[%s3666_s3 + $0x38] sm:$0xff] (!%p323_p2)  ;;  %v830_v34 = vld [vmem:[%s3666_s3 + $0x40] sm:$0xff] (!%p323_p2)  ;;  %v831_v35 = vld [vmem:[%s3666_s3 + $0x48] sm:$0xff] (!%p323_p2)  ;;  %vm1315_vm6 = vcmask (!%p323_p2), 64512   ;;  %s3272_s28 = smov (!%p323_p2), 104  }
   0x9   : > { %v2675_v9 = vadd.s32 (!%p323_p2), 4294967295, %v3349_v6  ;;  %v3357_v10 = vadd.s32 (!%p323_p2), 8, %v3349_v6  ;;  %v2683_v11 = vadd.s32 (!%p323_p2), 4294967294, %v3349_v6  ;;  %3055 = vmatpush3.bf16.msra.mxu1 (!%p323_p2), %v3052_v4  ;;  %v3088_v33 = vpack.c.bf16 (!%p323_p2), %v829_v32, %v828_v30  ;;  %v394_v37 = vld [vmem:[%s3665_s2 + $0x50] sm:$0xff] (!%p323_p2)  ;;  %v395_v38 = vld [vmem:[%s3665_s2 + $0x58] sm:$0xff] (!%p323_p2)  ;;  %v384_v42 = vld [vmem:[%s3665_s2] sm:$0xff] (!%p323_p2) }
   0xa   : > { %3057 = vmatprep.subr.bf16.mxu1 (!%p323_p2), %v3056_v8  ;;  %v3092_v36 = vpack.c.bf16 (!%p323_p2), %v831_v35, %v830_v34  ;;  %v3064_v41 = vpack.c.bf16 (!%p323_p2), %v395_v38, %v394_v37  ;;  %v385_v43 = vld [vmem:[%s3665_s2 + $0x8] sm:$0xff] (!%p323_p2)  ;;  %v386_v47 = vld [vmem:[%s3665_s2 + $0x10] sm:$0xff] (!%p323_p2)  ;;  %v387_v48 = vld [vmem:[%s3665_s2 + $0x18] sm:$0xff] (!%p323_p2)  ;;  %vm1508_vm9 = vcmp.eq.s32.totalorder (!%p323_p2), %v3351_v7, %v3349_v6 }
   0xb   : > { %vm403_vm1 = vcmp.eq.s32.totalorder (!%p323_p2), %v3351_v7, %v2675_v9  ;;  %v2676_v14 = vadd.s32 (!%p323_p2), 4294967295, %v3357_v10  ;;  %v2684_v18 = vadd.s32 (!%p323_p2), 4294967294, %v3357_v10  ;;  %vm654_vm3 = vcmp.eq.s32.totalorder (!%p323_p2), %v3351_v7, %v2683_v11  ;;  %v832_v50 = vld [vmem:[%s3666_s3 + $0x50] sm:$0xff] (!%p323_p2)  ;;  %v833_v51 = vld [vmem:[%s3666_s3 + $0x58] sm:$0xff] (!%p323_p2)  ;;  %v822_v55 = vld [vmem:[%s3666_s3] sm:$0xff] (!%p323_p2) }
   0xc   : > { %v405_v17 = vsel (!%p323_p2), %vm403_vm1, 1.0, %v3269_v16  ;;  %v656_v20 = vsel (!%p323_p2), %vm654_vm3, 1.0, %v3269_v16  ;;  %v3072_v45 = vpack.c.bf16 (!%p323_p2), %v385_v43, %v384_v42  ;;  %v3076_v49 = vpack.c.bf16 (!%p323_p2), %v387_v48, %v386_v47  ;;  %v823_v56 = vld [vmem:[%s3666_s3 + $0x8] sm:$0xff] (!%p323_p2)  ;;  %v824_v58 = vld [vmem:[%s3666_s3 + $0x10] sm:$0xff] (!%p323_p2)  ;;  %v825_v59 = vld [vmem:[%s3666_s3 + $0x18] sm:$0xff] (!%p323_p2) }
   0xd   : > { %s3677_s14 = smov (!%p365_p3, %s2664_s14), 1  ;;  %2860 = vmatprep.mubr.msk.f32.mxu0 %vm407_vm0, %v405_v17  ;;  %vm404_vm2 = vcmp.eq.s32.totalorder %v3351_v7, %v2676_v14  ;;  %3059 = vmatpush3.bf16.msra.mxu1 %v3056_v8  ;;  %vm655_vm4 = vcmp.eq.s32.totalorder %v3351_v7, %v2684_v18  ;;  %v3096_v54 = vpack.c.bf16 %v833_v51, %v832_v50  ;;  %v1229_v1 = vld [vmem:[%s3667_s4] sm:$0xff]  ;;  %v1230_v2 = vld [vmem:[%s3667_s4 + $0x8] sm:$0xff]  ;;  %v1231_v3 = vld [vmem:[%s3667_s4 + $0x10] sm:$0xff] }
   0xe   : > { %s3353_s23 = sshll.u32 %s3677_s14, 4  ;;  %v406_v19 = vsel %vm404_vm2, 1.0, %v3269_v16  ;;  %v657_v21 = vsel %vm655_vm4, 1.0, %v3269_v16  ;;  %3061 = vmatprep.subr.bf16.mxu1 %v3060_v27  ;;  %v3104_v57 = vpack.c.bf16 %v823_v56, %v822_v55  ;;  %v3108_v60 = vpack.c.bf16 %v825_v59, %v824_v58  ;;  %v1232_v5 = vld [vmem:[%s3667_s4 + $0x18] sm:$0xff]  ;;  %vm3496_vm7 = vmpackc.low %vm1315_vm6, %vm1315_vm6 }
   0xf   : > { %s369_s26 = scalar_lea.vmem %s3663_s0, %s3353_s23  ;;  %s374_s29 = scalar_lea.vmem %s3664_s1, %s3353_s23  ;;  %v3112_v4 = vpack.c.bf16 %v1230_v2, %v1229_v1  ;;  %v3116_v8 = vpack.c.bf16 %v1232_v5, %v1231_v3  ;;  %vm1714_vm8 = vcmp.eq.s32.totalorder %v3351_v7, %v3357_v10 }
  0x10   : > { %v3364_v12 = vld [vmem:[%s369_s26] sm:$0xff]  ;;  %v3366_v13 = vld [vmem:[%s369_s26 + $0x8] sm:$0xff] }
  0x11   : > { %v3048_v15 = vpack.c.bf16 %v3366_v13, %v3364_v12  ;;  %v3385_v22 = vld [vmem:[%s374_s29] sm:$0xff]  ;;  %v3387_v23 = vld [vmem:[%s374_s29 + $0x8] sm:$0xff] }
  0x12   : > { %v3080_v24 = vpack.c.bf16 %v3387_v23, %v3385_v22 }
  0x13   : > { %3049 = vmatprep.subr.bf16.mxu0 %v3048_v15 }
  0x14   : > { %3051 = vmatpush3.bf16.msra.mxu0 %v3048_v15 }
  0x15   : > { %3069 = vmatprep.subr.bf16.mxu0 %v3048_v15 }
  0x17   : > { %2861 = vmatmul.mubr.msk.f32.vlgmr.msra.gmra.mrb[0].mxu0 %vm407_vm0, %v406_v19 }
  0x18   : > { %3071 = vmatpush3.bf16.msra.mxu0 %v3048_v15  ;;  %2889 = vmatprep.mubr.msk.f32.mxu0 %vm407_vm0, %v656_v20 }
  0x19   : > { %3081 = vmatprep.subr.bf16.mxu0 %v3080_v24 }
  0x1b   : > { %2890 = vmatmul.mubr.msk.f32.vlgmr.msra.gmra.mrb[2].mxu0 %vm407_vm0, %v657_v21 }
  0x1c   : > { %2907 = vmatprep.mubr.msk.f32.mxu0 %vm407_vm0, %v405_v17  ;;  %3083 = vmatpush3.bf16.msra.mxu0 %v3080_v24 }
  0x1d   : > { %3085 = vmatprep.subr.bf16.mxu0 %v3084_v31 }
  0x1f   : > { %2908 = vmatmul.mubr.msk.f32.vlgmr.msra.gmra.mrb[4].mxu0 %vm407_vm0, %v406_v19 }
  0x20   : > { %3087 = vmatpush3.bf16.msra.mxu0 %v3084_v31 }
  0x21   : > { %3089 = vmatprep.subr.bf16.mxu0 %v3088_v33 }
  0x24   : > { %3091 = vmatpush3.bf16.msra.mxu0 %v3088_v33 }
  0x25   : > { %3093 = vmatprep.subr.bf16.mxu0 %v3092_v36 }
  0xea   : > { %v2862_v39 = vpop.f32.mrb[0].mxu0 }
  0xeb   : > { %v480_v40 = vpop.f32.mrb[1].mxu0 }
  0xec   : > { %2871 = vmatprep.mubr.msk.f32.mxu1 %vm489_vm5, %v480_v40 }
  0xed   : > { %2872 = vmatmul.mubr.msk.f32.vlgmr.msra.gmra.mrb[0].mxu1 %vm489_vm5, %v2862_v39 }
  0xee   : > { %3063 = vmatpush3.bf16.msra.mxu1 %v3060_v27  ;;  %2882 = vmatprep.mubr.msk.f32.mxu1 %vm489_vm5, %v3364_v12  ;;  %v2891_v44 = vpop.f32.mrb[2].mxu0 }
  0xef   : > { %3065 = vmatprep.subr.bf16.mxu1 %v3064_v41  ;;  %v730_v46 = vpop.f32.mrb[3].mxu0 }
  0xf2   : > { %3067 = vmatpush3.bf16.msra.mxu1 %v3064_v41  ;;  %v2909_v52 = vpop.f32.mrb[4].mxu0 }
  0xf3   : > { %3073 = vmatprep.subr.bf16.mxu1 %v3072_v45  ;;  %v900_v53 = vpop.f32.mrb[5].mxu0 }
  0xf4   : > { %2918 = vmatprep.mubr.msk.f32.mxu0 %vm489_vm5, %v900_v53 }
  0xf5   : > { %2883 = vmatmul.mubr.msk.f32.vlgmr.msra.gmra.mrb[0].mxu1 %vm489_vm5, %v3366_v13  ;;  %2919 = vmatmul.mubr.msk.f32.vlgmr.msra.gmra.mrb[6].mxu0 %vm489_vm5, %v2909_v52 }
  0xf6   : > { %3075 = vmatpush3.bf16.msra.mxu1 %v3072_v45  ;;  %2900 = vmatprep.mubr.msk.f32.mxu1 %vm489_vm5, %v730_v46 }
  0xf7   : > { %3077 = vmatprep.subr.bf16.mxu1 %v3076_v49  ;;  %3095 = vmatpush3.bf16.msra.mxu0 %v3092_v36 }
  0xf8   : > { %2929 = vmatprep.mubr.msk.f32.mxu0 %vm489_vm5, %v3385_v22  ;;  %3097 = vmatprep.subr.bf16.mxu0 %v3096_v54 }
  0xfa   : > { %3079 = vmatpush3.bf16.msra.mxu1 %v3076_v49 }
  0xfb   : > { %3101 = vmatprep.subr.bf16.mxu1 %v3080_v24  ;;  %3099 = vmatpush3.bf16.msra.mxu0 %v3096_v54 }
  0xfc   : > { %3105 = vmatprep.subr.bf16.mxu0 %v3104_v57 }
  0xfd   : > { %2901 = vmatmul.mubr.msk.f32.vlgmr.msra.gmra.mrb[0].mxu1 %vm489_vm5, %v2891_v44 }
  0xfe   : > { %3103 = vmatpush3.bf16.msra.mxu1 %v3080_v24  ;;  %2936 = vmatprep.mubr.msk.f32.mxu1 %vm407_vm0, %v656_v20  ;;  %v2699_v24 = vld [vmem:[%s3668_s5] ss:$0 sm:$0xff] }
  0xff   : > { %2930 = vmatmul.mubr.msk.f32.vlgmr.msra.gmra.mrb[6].mxu0 %vm489_vm5, %v3387_v23  ;;  %3113 = vmatprep.subr.bf16.mxu1 %v3112_v4 }
 0x100   : > { %3107 = vmatpush3.bf16.msra.mxu0 %v3104_v57 }
 0x101   : > { %2937 = vmatmul.mubr.msk.f32.vlgmr.msra.gmra.mrb[2].mxu1 %vm407_vm0, %v657_v21  ;;  %3109 = vmatprep.subr.bf16.mxu0 %v3108_v60 }
 0x102   : > { %2958 = vmatprep.mubr.msk.f32.mxu1 %vm489_vm5, %v3385_v22  ;;  %3115 = vmatpush3.bf16.msra.mxu1 %v3112_v4 }
 0x103   : > { %3117 = vmatprep.subr.bf16.mxu1 %v3116_v8 }
 0x104   : > { %3111 = vmatpush3.bf16.msra.mxu0 %v3108_v60 }
 0x106   : > { %3119 = vmatpush3.bf16.msra.mxu1 %v3116_v8 }
 0x109   : > { %2959 = vmatmul.mubr.msk.f32.vlgmr.msra.gmra.mrb[4].mxu1 %vm489_vm5, %v3387_v23 }
 0x1d0   : > { %v3470_v61 = vpop.f32.mrb[0].mxu1 }
 0x1d1   : > { %v3472_v62 = vpop.f32.mrb[1].mxu1 }
 0x1d2   : > { %1510 = vrot.lane.b32.xlu1 %v3472_v62, %s3270_s15 }
 0x1d4   : > { %v2938_v63 = vpop.f32.mrb[2].mxu1 }
 0x1d5   : > { %v1137_v0 = vpop.f32.mrb[3].mxu1 }
 0x1d6   : > { %2947 = vmatprep.mubr.msk.f32.mxu0 %vm489_vm5, %v1137_v0 }
 0x1d7   : > { %2948 = vmatmul.mubr.msk.f32.vlgmr.msra.gmra.mrb[6].mxu0 %vm489_vm5, %v2938_v63 }
 0x1d8   : > { %2965 = vmatprep.mubr.msk.f32.mxu0 %vm1315_vm6, %v3472_v62 }
 0x1dc   : > { %v2960_v23 = vpop.f32.mrb[4].mxu1 }
 0x1dd   : > { %v1306_v25 = vpop.f32.mrb[5].mxu1  ;;  %v3513_v26 = vadd.f32 %v2960_v23, %v2699_v24 }
 0x1de   : > { %v3515_v27 = vadd.f32 %v2699_v24, %v1306_v25 }
 0x1e0   : > { %v3126_v28 = vpack.c.bf16 %v3513_v26, %v3515_v27 }
 0x1e2   : > { %3127 = vmatprep.subr.bf16.mxu1 %v3126_v28 }
 0x1e3   : > { %3129 = vmatpush3.bf16.msra.mxu1 %v3126_v28 }
 0x244   : > { %v1511_v43 = vpop.permute.xlu1 %1510 }
 0x2aa   : > { %v2949_v9 = vpop.f32.mrb[6].mxu0 }
 0x2ab   : > { %v1218_v11 = vpop.f32.mrb[7].mxu0 }
 0x2ac   : > { %v3120_v15 = vpack.c.bf16 %v2949_v9, %v1218_v11  ;;  %v3500_v16 = vpack.i.bf16 %v2949_v9, %v1218_v11 }
 0x2ae   : > { %3122 = vmatprep.subr.msk.bf16.mxu0 %vm3496_vm7, %v3120_v15 }
 0x2af   : > { %3125 = vmatpush3.bf16.xpose.msk.msra.mxu0 %vm3496_vm7, %v3120_v15 }
 0x2b6   : > { %2966 = vmatmul.mubr.msk.f32.vlgmr.msra.gmra.mrb[8].mxu0 %vm1315_vm6, %v3470_v61 }
 0x389   : > { %v2967_v17 = vpop.f32.mrb[8].mxu0 }
 0x38a   : > { %v1394_v18 = vpop.f32.mrb[9].mxu0  ;;  %v1404_v20 = vmul.f32 0.35355338, %v2967_v17 }
 0x38b   : > { %v1403_v19 = vmul.f32 0.35355338, %v1394_v18 }
 0x38c   : > { %v1408_v22 = vsel %vm407_vm0, %v1404_v20, -inf }
 0x38d   : > { %v1405_v21 = vsel %vm407_vm0, %v1403_v19, -inf }
 0x38e   : > { %1406 = vmax.xlane.f32.xlu0 %v1405_v21 }
 0x392   : > { %1409 = vmax.xlane.f32.xlu0 %v1408_v22 }
 0x3a8   : > { %3196 = vrot.lane.b32.xlu0 %v3500_v16, %s3270_s15 }
 0x3ac   : > { %1878 = vrot.lane.b32.xlu0 %v3472_v62, %s3271_s27 }
 0x41b   : > { %v1407_v29 = vpop.xlane.xlu0 %1406 }
 0x41c   : > { %v1411_v30 = vsub.f32 %v1403_v19, %v1407_v29  ;;  %v3568_v29 = vpack.i.bf16 %v3513_v26, %v3515_v27 }
 0x41e   : > { %v1413_v33 = vmul.f32 1.442695, %v1411_v30 }
 0x41f   : > { %v1410_v31 = vpop.xlane.xlu0 %1409 }
 0x420   : > { %v1412_v32 = vsub.f32 %v1404_v20, %v1410_v31 }
 0x422   : > { %v1415_v34 = vmul.f32 1.442695, %v1412_v32 }
 0x423   : > { %v3197_v35 = vpop.permute.xlu0 %3196 }
 0x424   : > { %3225 = vpow2.f32 %v1415_v34  ;;  %v3199_v36 = vunpack.i.h.bf16 %v3197_v35  ;;  %v3198_v37 = vunpack.i.l.bf16 %v3197_v35 }
 0x425   : > { %3227 = vpow2.f32 %v1413_v33 }
 0x426   : > { %v3130_v38 = vpack.c.bf16 %v3199_v36, %v3198_v37 }
 0x427   : > { %v1879_v55 = vpop.permute.xlu0 %1878 }
 0x428   : > { %3132 = vmatprep.subr.msk.bf16.mxu1 %vm3496_vm7, %v3130_v38 }
 0x42e   : > { %v3226_v39 = vpop.eup %3225 }
 0x42f   : > { %v1420_v40 = vsel %vm407_vm0, %v3226_v39, 0.0  ;;  %v3228_v41 = vpop.eup %3227 }
 0x430   : > { %1421 = vadd.xlane.f32.xlu1 %v1420_v40  ;;  %v1417_v42 = vsel %vm407_vm0, %v3228_v41, 0.0 }
 0x434   : > { %1418 = vadd.xlane.f32.xlu1 %v1417_v42 }
 0x445   : > { %1512 = vrot.lane.b32.xlu1 %v3470_v61, %s3270_s15 }
 0x449   : > { %3201 = vrot.lane.b32.xlu1 %v3500_v16, %s3271_s27 }
 0x44d   : > { %1880 = vrot.lane.b32.xlu1 %v3470_v61, %s3271_s27 }
 0x4bd   : > { %v1422_v44 = vpop.xlane.xlu1 %1421 }
 0x4be   : > { %3229 = vrcp.f32 %v1422_v44 }
 0x4c1   : > { %v1419_v45 = vpop.xlane.xlu1 %1418 }
 0x4c2   : > { %3231 = vrcp.f32 %v1419_v45 }
 0x4c5   : > { %v1513_v46 = vpop.permute.xlu1 %1512 }
 0x4c8   : > { %v3230_v48 = vpop.eup %3229 }
 0x4c9   : > { %v3202_v47 = vpop.permute.xlu1 %3201  ;;  %v1426_v53 = vmul.f32 %v3230_v48, %v3226_v39 }
 0x4ca   : > { %v3204_v50 = vunpack.i.h.bf16 %v3202_v47  ;;  %v3203_v51 = vunpack.i.l.bf16 %v3202_v47 }
 0x4cc   : > { %v3232_v49 = vpop.eup %3231  ;;  %v3140_v54 = vpack.c.bf16 %v3204_v50, %v3203_v51 }
 0x4cd   : > { %v1425_v52 = vmul.f32 %v3232_v49, %v3228_v41  ;;  %v1881_v56 = vpop.permute.xlu1 %1880 }
 0x4cf   : > { %2972 = vmatprep.mubr.msk.f32.mxu1 %vm407_vm0, %v1425_v52 }
 0x4d0   : > { %2973 = vmatmul.mubr.msk.f32.vlgmr.msra.gmra.mrb[6].mxu1 %vm407_vm0, %v1426_v53 }
 0x4d1   : > { %3135 = vmatpush3.bf16.xpose.msk.msra.mxu1 %vm3496_vm7, %v3130_v38  ;;  %2979 = vmatprep.mubr.msk.f32.mxu1 %vm1315_vm6, %v1511_v43 }
 0x4d2   : > { %3142 = vmatprep.subr.msk.bf16.mxu1 %vm3496_vm7, %v3140_v54 }
 0x4d8   : > { %2980 = vmatmul.mubr.msk.f32.vlgmr.msra.gmra.mrb[8].mxu1 %vm1315_vm6, %v1513_v46 }
 0x4d9   : > { %3145 = vmatpush3.bf16.xpose.msk.msra.mxu1 %vm3496_vm7, %v3140_v54  ;;  %3003 = vmatprep.mubr.msk.f32.mxu1 %vm1315_vm6, %v1879_v55  ;;  %v3273_v55 = vmov 1.0  }
 0x4e0   : > { %3004 = vmatmul.mubr.msk.f32.vlgmr.msra.gmra.mrb[10].mxu1 %vm1315_vm6, %v1881_v56 }
 0x5a3   : > { %v3545_v57 = vpop.f32.mrb[6].mxu1 }
 0x5a4   : > { %v3547_v58 = vpop.f32.mrb[7].mxu1 }
 0x5ab   : > { %v2981_v59 = vpop.f32.mrb[8].mxu1 }
 0x5ac   : > { %v1602_v60 = vmul.f32 0.35355338, %v2981_v59  ;;  %v1592_v63 = vpop.f32.mrb[9].mxu1 }
 0x5ad   : > { %v1601_v0 = vmul.f32 0.35355338, %v1592_v63 }
 0x5ae   : > { %v1606_v1 = vsel %vm407_vm0, %v1602_v60, -inf }
 0x5af   : > { %1607 = vmax.xlane.f32.xlu1 %v1606_v1  ;;  %v1603_v2 = vsel %vm407_vm0, %v1601_v0, -inf }
 0x5b0   : > { %1604 = vmax.xlane.f32.xlu0 %v1603_v2 }
 0x5b3   : > { %v3005_v3 = vpop.f32.mrb[10].mxu1 }
 0x5b4   : > { %v1960_v4 = vpop.f32.mrb[11].mxu1  ;;  %v1970_v5 = vmul.f32 0.35355338, %v3005_v3 }
 0x5b5   : > { %v1969_v32 = vmul.f32 0.35355338, %v1960_v4 }
 0x5b6   : > { %v1974_v8 = vsel %vm407_vm0, %v1970_v5, -inf }
 0x5b7   : > { %v1971_v33 = vsel %vm407_vm0, %v1969_v32, -inf }
 0x5c0   : > { %3211 = vrot.lane.b32.xlu1 %v3500_v16, %s3272_s28 }
 0x5c4   : > { %2166 = vrot.lane.b32.xlu1 %v3472_v62, %s3272_s28 }
 0x5c8   : > { %2168 = vrot.lane.b32.xlu1 %v3470_v61, %s3272_s28 }
 0x5ec   : > { %1975 = vmax.xlane.f32.xlu1 %v1974_v8 }
 0x63c   : > { %v1608_v9 = vpop.xlane.xlu1 %1607 }
 0x63d   : > { %v1610_v11 = vsub.f32 %v1602_v60, %v1608_v9  ;;  %v1605_v15 = vpop.xlane.xlu0 %1604 }
 0x63e   : > { %v1609_v17 = vsub.f32 %v1601_v0, %v1605_v15 }
 0x63f   : > { %v1613_v18 = vmul.f32 1.442695, %v1610_v11 }
 0x640   : > { %v1611_v19 = vmul.f32 1.442695, %v1609_v17  ;;  %v3212_v20 = vpop.permute.xlu1 %3211 }
 0x641   : > { %3233 = vpow2.f32 %v1613_v18  ;;  %v3214_v21 = vunpack.i.h.bf16 %v3212_v20  ;;  %v3213_v16 = vunpack.i.l.bf16 %v3212_v20 }
 0x642   : > { %3235 = vpow2.f32 %v1611_v19 }
 0x643   : > { %v3150_v22 = vpack.c.bf16 %v3214_v21, %v3213_v16 }
 0x644   : > { %v2167_v62 = vpop.permute.xlu1 %2166 }
 0x645   : > { %3152 = vmatprep.subr.msk.bf16.mxu1 %vm3496_vm7, %v3150_v22  ;;  %3022 = vmatprep.mubr.msk.f32.mxu1 %vm1315_vm6, %v2167_v62 }
 0x646   : > { %3155 = vmatpush3.bf16.xpose.msk.msra.mxu1 %vm3496_vm7, %v3150_v22  ;;  %v2080_v22 = vadd.s32 16, %v3349_v6 }
 0x648   : > { %v2169_v23 = vpop.permute.xlu1 %2168  ;;  %vm2081_vm10 = vcmp.eq.s32.totalorder %v3351_v7, %v2080_v22 }
 0x64b   : > { %v3234_v61 = vpop.eup %3233 }
 0x64c   : > { %v1618_v24 = vsel %vm407_vm0, %v3234_v61, 0.0  ;;  %v3236_v25 = vpop.eup %3235 }
 0x64d   : > { %3023 = vmatmul.mubr.msk.f32.vlgmr.msra.gmra.mrb[12].mxu1 %vm1315_vm6, %v2169_v23  ;;  %1619 = vadd.xlane.f32.xlu0 %v1618_v24  ;;  %v1615_v28 = vsel %vm407_vm0, %v3236_v25, 0.0 }
 0x651   : > { %1616 = vadd.xlane.f32.xlu0 %v1615_v28  ;;  %v2368_v28 = vadd.s32 24, %v3349_v6  ;;  %v2454_v6 = vld [vmem:[%s3669_s6] sm:$0xff] }
 0x653   : > { %vm2369_vm11 = vcmp.eq.s32.totalorder %v3351_v7, %v2368_v28  ;;  %v2455_v7 = vld [vmem:[%s3669_s6 + $0x8] sm:$0xff] }
 0x667   : > { %3206 = vrot.lane.b32.xlu0 %v3568_v29, %s3270_s15 }
 0x679   : > { %v1976_v14 = vpop.xlane.xlu1 %1975 }
 0x67a   : > { %v1978_v30 = vsub.f32 %v1970_v5, %v1976_v14 }
 0x67c   : > { %v1981_v31 = vmul.f32 1.442695, %v1978_v30 }
 0x67e   : > { %3237 = vpow2.f32 %v1981_v31 }
 0x686   : > { %1972 = vmax.xlane.f32.xlu0 %v1971_v33 }
 0x688   : > { %v3573_v34 = vpop.eup %3237 }
 0x689   : > { %v1986_v35 = vsel %vm407_vm0, %v3573_v34, 0.0 }
 0x68a   : > { %1987 = vadd.xlane.f32.xlu0 %v1986_v35  ;;  %v3160_v35 = vpack.c.bf16 %v2455_v7, %v2454_v6 }
 0x68c   : > { %3161 = vmatprep.subr.bf16.mxu1 %v3160_v35 }
 0x68d   : > { %3163 = vmatpush3.bf16.msra.mxu1 %v3160_v35 }
 0x6da   : > { %v1620_v36 = vpop.xlane.xlu0 %1619 }
 0x6db   : > { %3239 = vrcp.f32 %v1620_v36  ;;  %v2457_v36 = vld [vmem:[%s3669_s6 + $0x18] sm:$0xff] }
 0x6de   : > { %v1617_v26 = vpop.xlane.xlu0 %1616 }
 0x6df   : > { %3241 = vrcp.f32 %v1617_v26 }
 0x6e2   : > { %v3207_v27 = vpop.permute.xlu0 %3206 }
 0x6e3   : > { %v3209_v37 = vunpack.i.h.bf16 %v3207_v27  ;;  %v3208_v38 = vunpack.i.l.bf16 %v3207_v27 }
 0x6e5   : > { %v3136_v39 = vpack.c.bf16 %v3209_v37, %v3208_v38  ;;  %v3240_v40 = vpop.eup %3239 }
 0x6e6   : > { %v1624_v43 = vmul.f32 %v3240_v40, %v3234_v61 }
 0x6e7   : > { %3137 = vmatprep.subr.bf16.mxu0 %v3136_v39 }
 0x6e8   : > { %3139 = vmatpush3.bf16.msra.mxu0 %v3136_v39 }
 0x6e9   : > { %v3242_v41 = vpop.eup %3241  ;;  %2989 = vmatprep.subr.msk.mxu0 %vm1714_vm8, %v3273_v55 }
 0x6ea   : > { %v1623_v42 = vmul.f32 %v3242_v41, %v3236_v25  ;;  %v2740_v41 = vld [vmem:[%s3670_s7] ss:$0 sm:$0xff] }
 0x6ec   : > { %2986 = vmatprep.mubr.msk.f32.mxu0 %vm407_vm0, %v1623_v42 }
 0x6ed   : > { %2987 = vmatmul.mubr.msk.f32.vlgmr.msra.gmra.mrb[10].mxu0 %vm407_vm0, %v1624_v43 }
 0x6ee   : > { %2990 = vmatpush3.msk.msra.mxu0 %vm1714_vm8, %v3273_v55 }
 0x6ef   : > { %2994 = vmatprep.subr.msk.mxu0 %vm1508_vm9, %v3273_v55 }
 0x713   : > { %v1973_v44 = vpop.xlane.xlu0 %1972 }
 0x714   : > { %v1977_v45 = vsub.f32 %v1969_v32, %v1973_v44 }
 0x716   : > { %v1979_v46 = vmul.f32 1.442695, %v1977_v45 }
 0x717   : > { %v1988_v56 = vpop.xlane.xlu0 %1987 }
 0x718   : > { %3243 = vpow2.f32 %v1979_v46 }
 0x720   : > { %v3024_v47 = vpop.f32.mrb[12].mxu1 }
 0x721   : > { %v2248_v48 = vpop.f32.mrb[13].mxu1  ;;  %v2258_v52 = vmul.f32 0.35355338, %v3024_v47 }
 0x722   : > { %v3244_v49 = vpop.eup %3243  ;;  %v2257_v50 = vmul.f32 0.35355338, %v2248_v48 }
 0x723   : > { %v1983_v51 = vsel %vm407_vm0, %v3244_v49, 0.0  ;;  %v2262_v54 = vsel %vm407_vm0, %v2258_v52, -inf }
 0x724   : > { %1984 = vadd.xlane.f32.xlu0 %v1983_v51  ;;  %v2259_v53 = vsel %vm407_vm0, %v2257_v50, -inf }
 0x725   : > { %2260 = vmax.xlane.f32.xlu1 %v2259_v53 }
 0x729   : > { %2263 = vmax.xlane.f32.xlu1 %v2262_v54 }
 0x73a   : > { %3216 = vrot.lane.b32.xlu0 %v3568_v29, %s3271_s27  ;;  %s379_s27 = scalar_lea.vmem %s3673_s10, %s3353_s23 }
 0x7b1   : > { %v1985_v63 = vpop.xlane.xlu0 %1984 }
 0x7b2   : > { %v2261_v59 = vpop.xlane.xlu1 %2260 }
 0x7b3   : > { %v2265_v60 = vsub.f32 %v2257_v50, %v2261_v59 }
 0x7b5   : > { %v2267_v10 = vmul.f32 1.442695, %v2265_v60  ;;  %v3217_v3 = vpop.permute.xlu0 %3216 }
 0x7b6   : > { %v2264_v0 = vpop.xlane.xlu1 %2263  ;;  %v3219_v4 = vunpack.i.h.bf16 %v3217_v3  ;;  %v3218_v5 = vunpack.i.l.bf16 %v3217_v3  ;;  %v2741_v3 = vld [vmem:[%s3671_s8] ss:$0 sm:$0xff] }
 0x7b7   : > { %v2266_v1 = vsub.f32 %v2258_v52, %v2264_v0 }
 0x7b8   : > { %v3146_v11 = vpack.c.bf16 %v3219_v4, %v3218_v5  ;;  %v2742_v5 = vld [vmem:[%s3672_s9] ss:$0 sm:$0xff] }
 0x7b9   : > { %v2269_v2 = vmul.f32 1.442695, %v2266_v1 }
 0x7bb   : > { %3245 = vpow2.f32 %v2269_v2 }
 0x7bc   : > { %3247 = vrcp.f32 %v1985_v63 }
 0x7bd   : > { %3249 = vpow2.f32 %v2267_v10 }
 0x7be   : > { %3251 = vrcp.f32 %v1988_v56 }
 0x7c0   : > { %v2988_v8 = vpop.f32.mrb[10].mxu0 }
 0x7c1   : > { %v1705_v9 = vpop.f32.mrb[11].mxu0 }
 0x7c2   : > { %2991 = vmatprep.mubr.msk.f32.mxu0 %vm1315_vm6, %v1705_v9 }
 0x7c3   : > { %2992 = vmatmul.mubr.msk.f32.vlgmr.msra.gmra.mrb[12].mxu0 %vm1315_vm6, %v2988_v8 }
 0x7c4   : > { %2995 = vmatpush3.msk.msra.mxu0 %vm1508_vm9, %v3273_v55  ;;  %2996 = vmatprep.mubr.msk.f32.mxu0 %vm1315_vm6, %v3547_v58 }
 0x7c5   : > { %v3246_v15 = vpop.eup %3245  ;;  %3147 = vmatprep.subr.bf16.mxu0 %v3146_v11 }
 0x7c6   : > { %v3248_v17 = vpop.eup %3247  ;;  %v2274_v18 = vsel %vm407_vm0, %v3246_v15, 0.0 }
 0x7c7   : > { %v3250_v19 = vpop.eup %3249  ;;  %2275 = vadd.xlane.f32.xlu1 %v2274_v18  ;;  %v1991_v16 = vmul.f32 %v3248_v17, %v3244_v49 }
 0x7c8   : > { %v3252_v20 = vpop.eup %3251  ;;  %v2271_v21 = vsel %vm407_vm0, %v3250_v19, 0.0 }
 0x7c9   : > { %v1992_v58 = vmul.f32 %v3252_v20, %v3573_v34  ;;  %v2456_v34 = vld [vmem:[%s3669_s6 + $0x10] sm:$0xff] }
 0x7ca   : > { %v3164_v26 = vpack.c.bf16 %v2457_v36, %v2456_v34 }
 0x7cb   : > { %2272 = vadd.xlane.f32.xlu1 %v2271_v21  ;;  %2997 = vmatmul.mubr.msk.f32.vlgmr.msra.gmra.mrb[12].mxu0 %vm1315_vm6, %v3545_v57 }
 0x7cc   : > { %3149 = vmatpush3.bf16.msra.mxu0 %v3146_v11  ;;  %3010 = vmatprep.mubr.msk.f32.mxu0 %vm407_vm0, %v1991_v16 }
 0x7cd   : > { %3013 = vmatprep.subr.msk.mxu0 %vm2081_vm10, %v3273_v55  ;;  %3165 = vmatprep.subr.bf16.mxu1 %v3164_v26 }
 0x7ce   : > { %3167 = vmatpush3.bf16.msra.mxu1 %v3164_v26 }
 0x7cf   : > { %3011 = vmatmul.mubr.msk.f32.vlgmr.msra.gmra.mrb[14].mxu0 %vm407_vm0, %v1992_v58 }
 0x7d0   : > { %3014 = vmatpush3.msk.msra.mxu0 %vm2081_vm10, %v3273_v55 }
 0x7dc   : > { %3221 = vrot.lane.b32.xlu1 %v3568_v29, %s3272_s28 }
 0x854   : > { %v2276_v62 = vpop.xlane.xlu1 %2275 }
 0x858   : > { %v2273_v57 = vpop.xlane.xlu1 %2272 }
 0x859   : > { %3253 = vrcp.f32 %v2273_v57 }
 0x85a   : > { %3255 = vrcp.f32 %v2276_v62 }
 0x85c   : > { %v3222_v61 = vpop.permute.xlu1 %3221 }
 0x85d   : > { %v3224_v23 = vunpack.i.h.bf16 %v3222_v61  ;;  %v3223_v24 = vunpack.i.l.bf16 %v3222_v61 }
 0x85f   : > { %v3156_v25 = vpack.c.bf16 %v3224_v23, %v3223_v24 }
 0x861   : > { %3157 = vmatprep.subr.bf16.mxu0 %v3156_v25 }
 0x863   : > { %v3254_v29 = vpop.eup %3253 }
 0x864   : > { %v3256_v31 = vpop.eup %3255  ;;  %v2279_v32 = vmul.f32 %v3254_v29, %v3250_v19 }
 0x865   : > { %v2280_v33 = vmul.f32 %v3256_v31, %v3246_v15 }
 0x8a2   : > { %v3012_v14 = vpop.f32.mrb[14].mxu0 }
 0x8a3   : > { %v2071_v30 = vpop.f32.mrb[15].mxu0 }
 0x8a4   : > { %3015 = vmatprep.mubr.msk.f32.mxu0 %vm1315_vm6, %v2071_v30 }
 0x8a5   : > { %3016 = vmatmul.mubr.msk.f32.vlgmr.msra.gmra.mrb[12].mxu0 %vm1315_vm6, %v3012_v14 }
 0x8a6   : > { %3159 = vmatpush3.bf16.msra.mxu0 %v3156_v25  ;;  %3029 = vmatprep.mubr.msk.f32.mxu0 %vm407_vm0, %v2279_v32 }
 0x8a7   : > { %3032 = vmatprep.subr.msk.mxu0 %vm2369_vm11, %v3273_v55 }
 0x8a9   : > { %3030 = vmatmul.mubr.msk.f32.vlgmr.msra.gmra.mrb[16].mxu0 %vm407_vm0, %v2280_v33 }
 0x8aa   : > { %3033 = vmatpush3.msk.msra.mxu0 %vm2369_vm11, %v3273_v55 }
 0x97c   : > { %v3031_v27 = vpop.f32.mrb[16].mxu0 }
 0x97d   : > { %v2359_v37 = vpop.f32.mrb[17].mxu0 }
 0x97e   : > { %3034 = vmatprep.mubr.msk.f32.mxu0 %vm1315_vm6, %v2359_v37 }
 0x97f   : > { %3035 = vmatmul.mubr.msk.f32.vlgmr.msra.gmra.mrb[12].mxu0 %vm1315_vm6, %v3031_v27 }
 0xa52   : > { %v3036_v38 = vpop.f32.mrb[12].mxu0 }
 0xa53   : > { %v2443_v39 = vpop.f32.mrb[13].mxu0 }
 0xa54   : > { %3045 = vmatprep.mubr.msk.f32.mxu1 %vm489_vm5, %v2443_v39 }
 0xa55   : > { %3046 = vmatmul.mubr.msk.f32.vlgmr.msra.gmra.mrb[14].mxu1 %vm489_vm5, %v3036_v38 }
 0xb28   : > { %v3047_v40 = vpop.f32.mrb[14].mxu1 }
 0xb29   : > { %v2540_v42 = vadd.f32 %v3047_v40, %v3366_v13  ;;  %v2530_v43 = vpop.f32.mrb[15].mxu1 }
 0xb2a   : > { %v2539_v44 = vadd.f32 %v2530_v43, %v3364_v12 }
 0xb2b   : > { %v2549_v45 = vadd.f32 %v2740_v41, %v2540_v42 }
 0xb2c   : > { %v2548_v46 = vadd.f32 %v2740_v41, %v2539_v44 }
 0xb2d   : > { %v2555_v47 = vsel %vm489_vm5, %v2549_v45, 0.0 }
 0xb2e   : > { %2556 = vadd.xlane.f32.xlu1 %v2555_v47  ;;  %v2552_v48 = vsel %vm489_vm5, %v2548_v46, 0.0 }
 0xb2f   : > { %2553 = vadd.xlane.f32.xlu0 %v2552_v48 }
 0xbbb   : > { %v2557_v49 = vpop.xlane.xlu1 %2556 }
 0xbbc   : > { %v2560_v50 = vmul.f32 0.03125, %v2557_v49  ;;  %v2554_v51 = vpop.xlane.xlu0 %2553 }
 0xbbd   : > { %v2559_v52 = vmul.f32 0.03125, %v2554_v51 }
 0xbbe   : > { %v2562_v53 = vsub.f32 %v2549_v45, %v2560_v50 }
 0xbbf   : > { %v2561_v54 = vsub.f32 %v2548_v46, %v2559_v52 }
 0xbc0   : > { %v2564_v56 = vmul.f32 %v2562_v53, %v2562_v53 }
 0xbc1   : > { %v2563_v55 = vmul.f32 %v2561_v54, %v2561_v54 }
 0xbc2   : > { %v2568_v12 = vsel %vm489_vm5, %v2564_v56, 0.0 }
 0xbc3   : > { %v2565_v13 = vsel %vm489_vm5, %v2563_v55, 0.0 }
 0xbc4   : > { %2566 = vadd.xlane.f32.xlu0 %v2565_v13 }
 0xbc8   : > { %2569 = vadd.xlane.f32.xlu0 %v2568_v12 }
 0xc51   : > { %v2567_v59 = vpop.xlane.xlu0 %2566 }
 0xc52   : > { %v2571_v60 = vmul.f32 0.03125, %v2567_v59 }
 0xc54   : > { %v2573_v63 = vadd.f32 1e-05, %v2571_v60 }
 0xc55   : > { %v2570_v0 = vpop.xlane.xlu0 %2569 }
 0xc56   : > { %3257 = vrsqrt.f32 %v2573_v63  ;;  %v2572_v1 = vmul.f32 0.03125, %v2570_v0 }
 0xc58   : > { %v2574_v10 = vadd.f32 1e-05, %v2572_v1 }
 0xc5a   : > { %3259 = vrsqrt.f32 %v2574_v10 }
 0xc60   : > { %v3258_v2 = vpop.eup %3257 }
 0xc61   : > { %v2577_v4 = vmul.f32 %v3258_v2, %v2561_v54 }
 0xc63   : > { %v2585_v8 = vmul.f32 %v2741_v3, %v2577_v4 }
 0xc64   : > { %v3260_v9 = vpop.eup %3259 }
 0xc65   : > { %v2593_v11 = vadd.f32 %v2742_v5, %v2585_v8  ;;  %v2578_v15 = vmul.f32 %v3260_v9, %v2562_v53 }
 0xc67   : > { %2595 = vst.msk [vmem:[%s379_s27] sm:$0xff] %vm489_vm5, %v2593_v11  ;;  %v2586_v17 = vmul.f32 %v2741_v3, %v2578_v15 }
 0xc69   : > { %v2594_v18 = vadd.f32 %v2742_v5, %v2586_v17 }
 0xc6b   : > { %2596 = vst.msk [vmem:[%s379_s27 + $0x8] sm:$0xff] %vm489_vm5, %v2594_v18 }
 0xc6c PF: > { %s20_s13 = sadd.s32 1, %s3267_s13  }
 0xc6d   : > { %p17_p4 = scmp.ge.s32.totalorder %s20_s13, 4  }
 0xc6f   :  { %19 = sbr.rel (!%p17_p4) target bundleno = 1 (0x1), region = 93 }

// kernel: _lambda_.36
= control target key start
LH: loop header
LB: loop body
LE: loop exit
PB: predicated region body
PF: predicated region fallthrough
CT: control target
= control target key end

     0   :  { %s3339_s13 = smov 0   ;;  %s3701_s0 = inlined_call_operand.vmem [shape: f32[2,16,32], index: 0, kind: input, shape index: {}, may-alias: {0,1}]   ;;  %s3702_s1 = inlined_call_operand.vmem [shape: f32[2,16,32], index: 1, kind: input, shape index: {}, may-alias: {0,1}]   ;;  %s3703_s2 = inlined_call_operand.vmem [shape: f32[3,32,32], index: 2, kind: input, shape index: {}]   ;;  %s3704_s3 = inlined_call_operand.vmem [shape: f32[3,32,32], index: 3, kind: input, shape index: {}]   ;;  %s3705_s4 = inlined_call_operand.vmem [shape: f32[32,32], index: 4, kind: input, shape index: {}]   ;;  %s3706_s5 = inlined_call_operand.vmem [shape: f32[1,32], index: 5, kind: input, shape index: {}, may-alias: {5,7,9}]   ;;  %s3707_s6 = inlined_call_operand.vmem [shape: f32[32,32], index: 6, kind: input, shape index: {}]   ;;  %s3708_s7 = inlined_call_operand.vmem [shape: f32[1,32], index: 7, kind: input, shape index: {}, may-alias: {5,7,9}]   ;;  %s3709_s8 = inlined_call_operand.vmem [shape: f32[1,32], index: 8, kind: input, shape index: {}]   ;;  %s3710_s9 = inlined_call_operand.vmem [shape: f32[1,32], index: 9, kind: input, shape index: {}, may-alias: {5,7,9}]   ;;  %s3711_s10 = inlined_call_operand.vmem [shape: f32[2,16,32], index: 10, kind: output, shape index: {}]  }
   0x1 LB: > { %s2674_s14 = sadd.s32 4294967295, %s3277_s13   ;;  %p2678_p0 = scmp.ge.s32.totalorder %s3277_s13, 1  ;;  %s3277_s13 = sphi %s3339_s13, %s20_s13  }
   0x2   : > { %p322_p1 = scmp.lt.s32.totalorder %s3277_s13, 3 }
   0x4   : > { %p323_p2 = pnand %p2678_p0, %p322_p1 }
   0x5   : > { %p365_p3 = scmp.lt.s32.totalorder (!%p323_p2), %s2674_s14, 1  ;;  %v396_v0 = vlaneseq (!%p323_p2)  ;;  %v388_v1 = vld [vmem:[%s3703_s2 + $0x20] sm:$0xff] (!%p323_p2)  ;;  %v389_v2 = vld [vmem:[%s3703_s2 + $0x28] sm:$0xff] (!%p323_p2)  ;;  %v390_v3 = vld [vmem:[%s3703_s2 + $0x30] sm:$0xff] (!%p323_p2)  ;;  %vm407_vm0 = vcmask (!%p323_p2), 130048   ;;  %v3279_v16 = vmov (!%p323_p2), 0.0  }
   0x6   : > { %326 = sbr.rel (%p323_p2) target bundleno = 3182 (0xc6e), region = 60  ;;  %v3062_v4 = vpack.c.bf16 (!%p323_p2), %v389_v2, %v388_v1  ;;  %v391_v5 = vld [vmem:[%s3703_s2 + $0x38] sm:$0xff] (!%p323_p2)  ;;  %v392_v25 = vld [vmem:[%s3703_s2 + $0x40] sm:$0xff] (!%p323_p2)  ;;  %v393_v26 = vld [vmem:[%s3703_s2 + $0x48] sm:$0xff] (!%p323_p2)  ;;  %vm489_vm5 = vcmask (!%p323_p2), 261120   ;;  %s3280_s15 = smov (!%p323_p2), 120  }
   0x7   : > { %v3359_v6 = vshrl.u32 (!%p323_p2), %v396_v0, 7  ;;  %v3361_v7 = vand.u32 (!%p323_p2), 127, %v396_v0  ;;  %v3066_v8 = vpack.c.bf16 (!%p323_p2), %v391_v5, %v390_v3  ;;  %v3070_v27 = vpack.c.bf16 (!%p323_p2), %v393_v26, %v392_v25  ;;  %v826_v28 = vld [vmem:[%s3704_s3 + $0x20] sm:$0xff] (!%p323_p2)  ;;  %v827_v29 = vld [vmem:[%s3704_s3 + $0x28] sm:$0xff] (!%p323_p2)  ;;  %v828_v30 = vld [vmem:[%s3704_s3 + $0x30] sm:$0xff] (!%p323_p2)  ;;  %s3281_s27 = smov (!%p323_p2), 112  }
   0x8   : > { %3063 = vmatprep.subr.bf16.mxu1 (!%p323_p2), %v3062_v4  ;;  %v3094_v31 = vpack.c.bf16 (!%p323_p2), %v827_v29, %v826_v28  ;;  %v829_v32 = vld [vmem:[%s3704_s3 + $0x38] sm:$0xff] (!%p323_p2)  ;;  %v830_v34 = vld [vmem:[%s3704_s3 + $0x40] sm:$0xff] (!%p323_p2)  ;;  %v831_v35 = vld [vmem:[%s3704_s3 + $0x48] sm:$0xff] (!%p323_p2)  ;;  %vm1317_vm6 = vcmask (!%p323_p2), 64512   ;;  %s3282_s28 = smov (!%p323_p2), 104  }
   0x9   : > { %v2685_v9 = vadd.s32 (!%p323_p2), 4294967295, %v3359_v6  ;;  %v3367_v10 = vadd.s32 (!%p323_p2), 8, %v3359_v6  ;;  %v2693_v11 = vadd.s32 (!%p323_p2), 4294967294, %v3359_v6  ;;  %3065 = vmatpush3.bf16.msra.mxu1 (!%p323_p2), %v3062_v4  ;;  %v3098_v33 = vpack.c.bf16 (!%p323_p2), %v829_v32, %v828_v30  ;;  %v394_v37 = vld [vmem:[%s3703_s2 + $0x50] sm:$0xff] (!%p323_p2)  ;;  %v395_v38 = vld [vmem:[%s3703_s2 + $0x58] sm:$0xff] (!%p323_p2)  ;;  %v384_v42 = vld [vmem:[%s3703_s2] sm:$0xff] (!%p323_p2) }
   0xa   : > { %3067 = vmatprep.subr.bf16.mxu1 (!%p323_p2), %v3066_v8  ;;  %v3102_v36 = vpack.c.bf16 (!%p323_p2), %v831_v35, %v830_v34  ;;  %v3074_v41 = vpack.c.bf16 (!%p323_p2), %v395_v38, %v394_v37  ;;  %v385_v43 = vld [vmem:[%s3703_s2 + $0x8] sm:$0xff] (!%p323_p2)  ;;  %v386_v47 = vld [vmem:[%s3703_s2 + $0x10] sm:$0xff] (!%p323_p2)  ;;  %v387_v48 = vld [vmem:[%s3703_s2 + $0x18] sm:$0xff] (!%p323_p2)  ;;  %vm1315_vm8 = vcmp.le.s32.totalorder (!%p323_p2), %v3361_v7, %v3359_v6  ;;  %vm1512_vm11 = vcmp.eq.s32.totalorder (!%p323_p2), %v3361_v7, %v3359_v6 }
   0xb   : > { %vm403_vm1 = vcmp.eq.s32.totalorder (!%p323_p2), %v3361_v7, %v2685_v9  ;;  %v2686_v14 = vadd.s32 (!%p323_p2), 4294967295, %v3367_v10  ;;  %v2694_v18 = vadd.s32 (!%p323_p2), 4294967294, %v3367_v10  ;;  %vm654_vm3 = vcmp.eq.s32.totalorder (!%p323_p2), %v3361_v7, %v2693_v11  ;;  %v832_v50 = vld [vmem:[%s3704_s3 + $0x50] sm:$0xff] (!%p323_p2)  ;;  %v833_v51 = vld [vmem:[%s3704_s3 + $0x58] sm:$0xff] (!%p323_p2)  ;;  %v822_v55 = vld [vmem:[%s3704_s3] sm:$0xff] (!%p323_p2) }
   0xc   : > { %v405_v17 = vsel (!%p323_p2), %vm403_vm1, 1.0, %v3279_v16  ;;  %v656_v20 = vsel (!%p323_p2), %vm654_vm3, 1.0, %v3279_v16  ;;  %v3082_v45 = vpack.c.bf16 (!%p323_p2), %v385_v43, %v384_v42  ;;  %v3086_v49 = vpack.c.bf16 (!%p323_p2), %v387_v48, %v386_v47  ;;  %v823_v56 = vld [vmem:[%s3704_s3 + $0x8] sm:$0xff] (!%p323_p2)  ;;  %v824_v58 = vld [vmem:[%s3704_s3 + $0x10] sm:$0xff] (!%p323_p2)  ;;  %v825_v59 = vld [vmem:[%s3704_s3 + $0x18] sm:$0xff] (!%p323_p2) }
   0xd   : > { %s3715_s14 = smov (!%p365_p3, %s2674_s14), 1  ;;  %2870 = vmatprep.mubr.msk.f32.mxu0 %vm407_vm0, %v405_v17  ;;  %vm404_vm2 = vcmp.eq.s32.totalorder %v3361_v7, %v2686_v14  ;;  %3069 = vmatpush3.bf16.msra.mxu1 %v3066_v8  ;;  %vm655_vm4 = vcmp.eq.s32.totalorder %v3361_v7, %v2694_v18  ;;  %v3106_v54 = vpack.c.bf16 %v833_v51, %v832_v50  ;;  %v1229_v1 = vld [vmem:[%s3705_s4] sm:$0xff]  ;;  %v1230_v2 = vld [vmem:[%s3705_s4 + $0x8] sm:$0xff]  ;;  %v1231_v3 = vld [vmem:[%s3705_s4 + $0x10] sm:$0xff] }
   0xe   : > { %s3363_s23 = sshll.u32 %s3715_s14, 4  ;;  %v406_v19 = vsel %vm404_vm2, 1.0, %v3279_v16  ;;  %v657_v21 = vsel %vm655_vm4, 1.0, %v3279_v16  ;;  %3071 = vmatprep.subr.bf16.mxu1 %v3070_v27  ;;  %v3114_v57 = vpack.c.bf16 %v823_v56, %v822_v55  ;;  %v3118_v60 = vpack.c.bf16 %v825_v59, %v824_v58  ;;  %v1232_v5 = vld [vmem:[%s3705_s4 + $0x18] sm:$0xff]  ;;  %vm3506_vm7 = vmpackc.low %vm1317_vm6, %vm1317_vm6  ;;  %v2709_v26 = vld [vmem:[%s3706_s5] ss:$0 sm:$0xff] }
   0xf   : > { %s369_s26 = scalar_lea.vmem %s3701_s0, %s3363_s23  ;;  %s374_s29 = scalar_lea.vmem %s3702_s1, %s3363_s23  ;;  %v3122_v4 = vpack.c.bf16 %v1230_v2, %v1229_v1  ;;  %v3126_v8 = vpack.c.bf16 %v1232_v5, %v1231_v3  ;;  %vm1316_vm9 = vcmp.le.s32.totalorder %v3361_v7, %v3367_v10  ;;  %vm1720_vm10 = vcmp.eq.s32.totalorder %v3361_v7, %v3367_v10 }
  0x10   : > { %v3374_v12 = vld [vmem:[%s369_s26] sm:$0xff]  ;;  %v3376_v13 = vld [vmem:[%s369_s26 + $0x8] sm:$0xff] }
  0x11   : > { %v3058_v15 = vpack.c.bf16 %v3376_v13, %v3374_v12  ;;  %v3395_v22 = vld [vmem:[%s374_s29] sm:$0xff]  ;;  %v3397_v23 = vld [vmem:[%s374_s29 + $0x8] sm:$0xff] }
  0x12   : > { %v3090_v24 = vpack.c.bf16 %v3397_v23, %v3395_v22 }
  0x13   : > { %3059 = vmatprep.subr.bf16.mxu0 %v3058_v15 }
  0x14   : > { %3061 = vmatpush3.bf16.msra.mxu0 %v3058_v15 }
  0x15   : > { %3079 = vmatprep.subr.bf16.mxu0 %v3058_v15 }
  0x17   : > { %2871 = vmatmul.mubr.msk.f32.vlgmr.msra.gmra.mrb[0].mxu0 %vm407_vm0, %v406_v19 }
  0x18   : > { %3081 = vmatpush3.bf16.msra.mxu0 %v3058_v15  ;;  %2899 = vmatprep.mubr.msk.f32.mxu0 %vm407_vm0, %v656_v20 }
  0x19   : > { %3091 = vmatprep.subr.bf16.mxu0 %v3090_v24 }
  0x1b   : > { %2900 = vmatmul.mubr.msk.f32.vlgmr.msra.gmra.mrb[2].mxu0 %vm407_vm0, %v657_v21 }
  0x1c   : > { %2917 = vmatprep.mubr.msk.f32.mxu0 %vm407_vm0, %v405_v17  ;;  %3093 = vmatpush3.bf16.msra.mxu0 %v3090_v24 }
  0x1d   : > { %3095 = vmatprep.subr.bf16.mxu0 %v3094_v31 }
  0x1f   : > { %2918 = vmatmul.mubr.msk.f32.vlgmr.msra.gmra.mrb[4].mxu0 %vm407_vm0, %v406_v19 }
  0x20   : > { %3097 = vmatpush3.bf16.msra.mxu0 %v3094_v31 }
  0x21   : > { %3099 = vmatprep.subr.bf16.mxu0 %v3098_v33 }
  0x24   : > { %3101 = vmatpush3.bf16.msra.mxu0 %v3098_v33 }
  0x25   : > { %3103 = vmatprep.subr.bf16.mxu0 %v3102_v36 }
  0xea   : > { %v2872_v39 = vpop.f32.mrb[0].mxu0 }
  0xeb   : > { %v480_v40 = vpop.f32.mrb[1].mxu0 }
  0xec   : > { %2881 = vmatprep.mubr.msk.f32.mxu1 %vm489_vm5, %v480_v40 }
  0xed   : > { %2882 = vmatmul.mubr.msk.f32.vlgmr.msra.gmra.mrb[0].mxu1 %vm489_vm5, %v2872_v39 }
  0xee   : > { %3073 = vmatpush3.bf16.msra.mxu1 %v3070_v27  ;;  %2892 = vmatprep.mubr.msk.f32.mxu1 %vm489_vm5, %v3374_v12  ;;  %v2901_v44 = vpop.f32.mrb[2].mxu0 }
  0xef   : > { %3075 = vmatprep.subr.bf16.mxu1 %v3074_v41  ;;  %v730_v46 = vpop.f32.mrb[3].mxu0 }
  0xf2   : > { %3077 = vmatpush3.bf16.msra.mxu1 %v3074_v41  ;;  %v2919_v52 = vpop.f32.mrb[4].mxu0 }
  0xf3   : > { %3083 = vmatprep.subr.bf16.mxu1 %v3082_v45  ;;  %v900_v53 = vpop.f32.mrb[5].mxu0 }
  0xf4   : > { %2928 = vmatprep.mubr.msk.f32.mxu0 %vm489_vm5, %v900_v53 }
  0xf5   : > { %2893 = vmatmul.mubr.msk.f32.vlgmr.msra.gmra.mrb[0].mxu1 %vm489_vm5, %v3376_v13  ;;  %2929 = vmatmul.mubr.msk.f32.vlgmr.msra.gmra.mrb[6].mxu0 %vm489_vm5, %v2919_v52 }
  0xf6   : > { %3085 = vmatpush3.bf16.msra.mxu1 %v3082_v45  ;;  %2910 = vmatprep.mubr.msk.f32.mxu1 %vm489_vm5, %v730_v46 }
  0xf7   : > { %3087 = vmatprep.subr.bf16.mxu1 %v3086_v49  ;;  %3105 = vmatpush3.bf16.msra.mxu0 %v3102_v36 }
  0xf8   : > { %2939 = vmatprep.mubr.msk.f32.mxu0 %vm489_vm5, %v3395_v22  ;;  %3107 = vmatprep.subr.bf16.mxu0 %v3106_v54 }
  0xfa   : > { %3089 = vmatpush3.bf16.msra.mxu1 %v3086_v49 }
  0xfb   : > { %3111 = vmatprep.subr.bf16.mxu1 %v3090_v24  ;;  %3109 = vmatpush3.bf16.msra.mxu0 %v3106_v54 }
  0xfc   : > { %3115 = vmatprep.subr.bf16.mxu0 %v3114_v57 }
  0xfd   : > { %2911 = vmatmul.mubr.msk.f32.vlgmr.msra.gmra.mrb[0].mxu1 %vm489_vm5, %v2901_v44 }
  0xfe   : > { %3113 = vmatpush3.bf16.msra.mxu1 %v3090_v24  ;;  %2946 = vmatprep.mubr.msk.f32.mxu1 %vm407_vm0, %v656_v20 }
  0xff   : > { %2940 = vmatmul.mubr.msk.f32.vlgmr.msra.gmra.mrb[6].mxu0 %vm489_vm5, %v3397_v23  ;;  %3123 = vmatprep.subr.bf16.mxu1 %v3122_v4 }
 0x100   : > { %3117 = vmatpush3.bf16.msra.mxu0 %v3114_v57 }
 0x101   : > { %2947 = vmatmul.mubr.msk.f32.vlgmr.msra.gmra.mrb[2].mxu1 %vm407_vm0, %v657_v21  ;;  %3119 = vmatprep.subr.bf16.mxu0 %v3118_v60 }
 0x102   : > { %2968 = vmatprep.mubr.msk.f32.mxu1 %vm489_vm5, %v3395_v22  ;;  %3125 = vmatpush3.bf16.msra.mxu1 %v3122_v4 }
 0x103   : > { %3127 = vmatprep.subr.bf16.mxu1 %v3126_v8 }
 0x104   : > { %3121 = vmatpush3.bf16.msra.mxu0 %v3118_v60 }
 0x106   : > { %3129 = vmatpush3.bf16.msra.mxu1 %v3126_v8 }
 0x109   : > { %2969 = vmatmul.mubr.msk.f32.vlgmr.msra.gmra.mrb[4].mxu1 %vm489_vm5, %v3397_v23 }
 0x1d0   : > { %v3480_v61 = vpop.f32.mrb[0].mxu1 }
 0x1d1   : > { %v3482_v62 = vpop.f32.mrb[1].mxu1 }
 0x1d2   : > { %1514 = vrot.lane.b32.xlu1 %v3482_v62, %s3280_s15 }
 0x1d4   : > { %v2948_v63 = vpop.f32.mrb[2].mxu1 }
 0x1d5   : > { %v1137_v0 = vpop.f32.mrb[3].mxu1 }
 0x1d6   : > { %2957 = vmatprep.mubr.msk.f32.mxu0 %vm489_vm5, %v1137_v0 }
 0x1d7   : > { %2958 = vmatmul.mubr.msk.f32.vlgmr.msra.gmra.mrb[6].mxu0 %vm489_vm5, %v2948_v63 }
 0x1d8   : > { %2975 = vmatprep.mubr.msk.f32.mxu0 %vm1317_vm6, %v3482_v62 }
 0x1dc   : > { %v2970_v25 = vpop.f32.mrb[4].mxu1 }
 0x1dd   : > { %v1306_v27 = vpop.f32.mrb[5].mxu1  ;;  %v3533_v28 = vadd.f32 %v2970_v25, %v2709_v26 }
 0x1de   : > { %v3535_v29 = vadd.f32 %v2709_v26, %v1306_v27 }
 0x1e0   : > { %v3136_v30 = vpack.c.bf16 %v3533_v28, %v3535_v29 }
 0x1e2   : > { %3137 = vmatprep.subr.bf16.mxu1 %v3136_v30 }
 0x1e3   : > { %3139 = vmatpush3.bf16.msra.mxu1 %v3136_v30 }
 0x244   : > { %v1515_v45 = vpop.permute.xlu1 %1514 }
 0x2aa   : > { %v2959_v9 = vpop.f32.mrb[6].mxu0 }
 0x2ab   : > { %v1218_v11 = vpop.f32.mrb[7].mxu0 }
 0x2ac   : > { %v3130_v15 = vpack.c.bf16 %v2959_v9, %v1218_v11  ;;  %v3510_v16 = vpack.i.bf16 %v2959_v9, %v1218_v11 }
 0x2ae   : > { %3132 = vmatprep.subr.msk.bf16.mxu0 %vm3506_vm7, %v3130_v15 }
 0x2af   : > { %3135 = vmatpush3.bf16.xpose.msk.msra.mxu0 %vm3506_vm7, %v3130_v15 }
 0x2b6   : > { %2976 = vmatmul.mubr.msk.f32.vlgmr.msra.gmra.mrb[8].mxu0 %vm1317_vm6, %v3480_v61 }
 0x389   : > { %v2977_v17 = vpop.f32.mrb[8].mxu0 }
 0x38a   : > { %v1396_v18 = vpop.f32.mrb[9].mxu0  ;;  %v1406_v19 = vmul.f32 0.35355338, %v2977_v17 }
 0x38b   : > { %v1405_v20 = vmul.f32 0.35355338, %v1396_v18 }
 0x38c   : > { %v1408_v23 = vsel %vm1316_vm9, %v1406_v19, -1e+30 }
 0x38d   : > { %v1407_v21 = vsel %vm1315_vm8, %v1405_v20, -1e+30  ;;  %v1412_v24 = vsel %vm407_vm0, %v1408_v23, -inf }
 0x38e   : > { %v1409_v22 = vsel %vm407_vm0, %v1407_v21, -inf }
 0x38f   : > { %1410 = vmax.xlane.f32.xlu0 %v1409_v22 }
 0x393   : > { %1413 = vmax.xlane.f32.xlu0 %v1412_v24 }
 0x3a9   : > { %3206 = vrot.lane.b32.xlu0 %v3510_v16, %s3280_s15 }
 0x3ad   : > { %1884 = vrot.lane.b32.xlu0 %v3482_v62, %s3281_s27 }
 0x41c   : > { %v1411_v31 = vpop.xlane.xlu0 %1410 }
 0x41d   : > { %v1415_v32 = vsub.f32 %v1407_v21, %v1411_v31 }
 0x41f   : > { %v1417_v35 = vmul.f32 1.442695, %v1415_v32 }
 0x420   : > { %v1414_v33 = vpop.xlane.xlu0 %1413 }
 0x421   : > { %v1416_v34 = vsub.f32 %v1408_v23, %v1414_v33 }
 0x423   : > { %v1419_v36 = vmul.f32 1.442695, %v1416_v34  ;;  %v3597_v34 = vpack.i.bf16 %v3533_v28, %v3535_v29 }
 0x424   : > { %v3207_v37 = vpop.permute.xlu0 %3206 }
 0x425   : > { %3235 = vpow2.f32 %v1419_v36  ;;  %v3209_v38 = vunpack.i.h.bf16 %v3207_v37  ;;  %v3208_v39 = vunpack.i.l.bf16 %v3207_v37 }
 0x426   : > { %3237 = vpow2.f32 %v1417_v35 }
 0x427   : > { %v3140_v40 = vpack.c.bf16 %v3209_v38, %v3208_v39 }
 0x428   : > { %v1885_v57 = vpop.permute.xlu0 %1884 }
 0x429   : > { %3142 = vmatprep.subr.msk.bf16.mxu1 %vm3506_vm7, %v3140_v40 }
 0x42f   : > { %v3236_v41 = vpop.eup %3235 }
 0x430   : > { %v1424_v42 = vsel %vm407_vm0, %v3236_v41, 0.0  ;;  %v3238_v43 = vpop.eup %3237 }
 0x431   : > { %1425 = vadd.xlane.f32.xlu1 %v1424_v42  ;;  %v1421_v44 = vsel %vm407_vm0, %v3238_v43, 0.0 }
 0x435   : > { %1422 = vadd.xlane.f32.xlu1 %v1421_v44 }
 0x446   : > { %1516 = vrot.lane.b32.xlu1 %v3480_v61, %s3280_s15 }
 0x44a   : > { %3211 = vrot.lane.b32.xlu1 %v3510_v16, %s3281_s27 }
 0x44e   : > { %1886 = vrot.lane.b32.xlu1 %v3480_v61, %s3281_s27 }
 0x4be   : > { %v1426_v46 = vpop.xlane.xlu1 %1425 }
 0x4bf   : > { %3239 = vrcp.f32 %v1426_v46 }
 0x4c2   : > { %v1423_v47 = vpop.xlane.xlu1 %1422 }
 0x4c3   : > { %3241 = vrcp.f32 %v1423_v47 }
 0x4c6   : > { %v1517_v48 = vpop.permute.xlu1 %1516 }
 0x4c9   : > { %v3240_v50 = vpop.eup %3239 }
 0x4ca   : > { %v3212_v49 = vpop.permute.xlu1 %3211  ;;  %v1430_v55 = vmul.f32 %v3240_v50, %v3236_v41 }
 0x4cb   : > { %v3214_v52 = vunpack.i.h.bf16 %v3212_v49  ;;  %v3213_v53 = vunpack.i.l.bf16 %v3212_v49 }
 0x4cd   : > { %v3242_v51 = vpop.eup %3241  ;;  %v3150_v56 = vpack.c.bf16 %v3214_v52, %v3213_v53 }
 0x4ce   : > { %v1429_v54 = vmul.f32 %v3242_v51, %v3238_v43  ;;  %v1887_v58 = vpop.permute.xlu1 %1886 }
 0x4d0   : > { %2982 = vmatprep.mubr.msk.f32.mxu1 %vm407_vm0, %v1429_v54 }
 0x4d1   : > { %2983 = vmatmul.mubr.msk.f32.vlgmr.msra.gmra.mrb[6].mxu1 %vm407_vm0, %v1430_v55 }
 0x4d2   : > { %3145 = vmatpush3.bf16.xpose.msk.msra.mxu1 %vm3506_vm7, %v3140_v40  ;;  %2989 = vmatprep.mubr.msk.f32.mxu1 %vm1317_vm6, %v1515_v45 }
 0x4d3   : > { %3152 = vmatprep.subr.msk.bf16.mxu1 %vm3506_vm7, %v3150_v56 }
 0x4d9   : > { %2990 = vmatmul.mubr.msk.f32.vlgmr.msra.gmra.mrb[8].mxu1 %vm1317_vm6, %v1517_v48 }
 0x4da   : > { %3155 = vmatpush3.bf16.xpose.msk.msra.mxu1 %vm3506_vm7, %v3150_v56  ;;  %3013 = vmatprep.mubr.msk.f32.mxu1 %vm1317_vm6, %v1885_v57 }
 0x4e1   : > { %3014 = vmatmul.mubr.msk.f32.vlgmr.msra.gmra.mrb[10].mxu1 %vm1317_vm6, %v1887_v58 }
 0x5a4   : > { %v3565_v59 = vpop.f32.mrb[6].mxu1 }
 0x5a5   : > { %v3567_v60 = vpop.f32.mrb[7].mxu1 }
 0x5ac   : > { %v2991_v63 = vpop.f32.mrb[8].mxu1 }
 0x5ad   : > { %v1606_v0 = vmul.f32 0.35355338, %v2991_v63  ;;  %v1596_v1 = vpop.f32.mrb[9].mxu1 }
 0x5ae   : > { %v1605_v2 = vmul.f32 0.35355338, %v1596_v1 }
 0x5af   : > { %v1608_v3 = vsel %vm1316_vm9, %v1606_v0, -1e+30 }
 0x5b0   : > { %v1612_v4 = vsel %vm407_vm0, %v1608_v3, -inf  ;;  %v1607_v5 = vsel %vm1315_vm8, %v1605_v2, -1e+30 }
 0x5b1   : > { %1613 = vmax.xlane.f32.xlu1 %v1612_v4  ;;  %v1609_v8 = vsel %vm407_vm0, %v1607_v5, -inf }
 0x5b2   : > { %1610 = vmax.xlane.f32.xlu0 %v1609_v8 }
 0x5b4   : > { %v3015_v9 = vpop.f32.mrb[10].mxu1 }
 0x5b5   : > { %v1966_v11 = vpop.f32.mrb[11].mxu1  ;;  %v1976_v15 = vmul.f32 0.35355338, %v3015_v9 }
 0x5b6   : > { %v1975_v37 = vmul.f32 0.35355338, %v1966_v11 }
 0x5b7   : > { %v1978_v17 = vsel %vm1316_vm9, %v1976_v15, -1e+30 }
 0x5b8   : > { %v1982_v18 = vsel %vm407_vm0, %v1978_v17, -inf  ;;  %v1977_v38 = vsel %vm1315_vm8, %v1975_v37, -1e+30 }
 0x5b9   : > { %v1979_v39 = vsel %vm407_vm0, %v1977_v38, -inf }
 0x5c2   : > { %3221 = vrot.lane.b32.xlu1 %v3510_v16, %s3282_s28 }
 0x5c6   : > { %2174 = vrot.lane.b32.xlu1 %v3482_v62, %s3282_s28 }
 0x5ca   : > { %2176 = vrot.lane.b32.xlu1 %v3480_v61, %s3282_s28 }
 0x5ee   : > { %1983 = vmax.xlane.f32.xlu1 %v1982_v18 }
 0x63e   : > { %v1614_v19 = vpop.xlane.xlu1 %1613 }
 0x63f   : > { %v1616_v20 = vsub.f32 %v1608_v3, %v1614_v19  ;;  %v1611_v21 = vpop.xlane.xlu0 %1610  ;;  %v3283_v3 = vmov 1.0  }
 0x640   : > { %v1615_v22 = vsub.f32 %v1607_v5, %v1611_v21 }
 0x641   : > { %v1619_v23 = vmul.f32 1.442695, %v1616_v20 }
 0x642   : > { %v1617_v16 = vmul.f32 1.442695, %v1615_v22  ;;  %v3222_v24 = vpop.permute.xlu1 %3221 }
 0x643   : > { %3243 = vpow2.f32 %v1619_v23  ;;  %v3224_v62 = vunpack.i.h.bf16 %v3222_v24  ;;  %v3223_v25 = vunpack.i.l.bf16 %v3222_v24 }
 0x644   : > { %3245 = vpow2.f32 %v1617_v16 }
 0x645   : > { %v3160_v61 = vpack.c.bf16 %v3224_v62, %v3223_v25 }
 0x646   : > { %v2175_v26 = vpop.permute.xlu1 %2174 }
 0x647   : > { %3162 = vmatprep.subr.msk.bf16.mxu1 %vm3506_vm7, %v3160_v61  ;;  %3032 = vmatprep.mubr.msk.f32.mxu1 %vm1317_vm6, %v2175_v26 }
 0x648   : > { %3165 = vmatpush3.bf16.xpose.msk.msra.mxu1 %vm3506_vm7, %v3160_v61 }
 0x64a   : > { %v2177_v30 = vpop.permute.xlu1 %2176 }
 0x64d   : > { %v3244_v27 = vpop.eup %3243 }
 0x64e   : > { %v1624_v31 = vsel %vm407_vm0, %v3244_v27, 0.0  ;;  %v3246_v32 = vpop.eup %3245 }
 0x64f   : > { %3033 = vmatmul.mubr.msk.f32.vlgmr.msra.gmra.mrb[12].mxu1 %vm1317_vm6, %v2177_v30  ;;  %1625 = vadd.xlane.f32.xlu0 %v1624_v31  ;;  %v1621_v33 = vsel %vm407_vm0, %v3246_v32, 0.0 }
 0x653   : > { %1622 = vadd.xlane.f32.xlu0 %v1621_v33 }
 0x669   : > { %3216 = vrot.lane.b32.xlu0 %v3597_v34, %s3280_s15 }
 0x67b   : > { %v1984_v14 = vpop.xlane.xlu1 %1983 }
 0x67c   : > { %v1986_v35 = vsub.f32 %v1978_v17, %v1984_v14 }
 0x67e   : > { %v1989_v36 = vmul.f32 1.442695, %v1986_v35 }
 0x680   : > { %3247 = vpow2.f32 %v1989_v36  ;;  %v2378_v36 = vadd.s32 24, %v3359_v6 }
 0x682   : > { %vm2379_vm13 = vcmp.eq.s32.totalorder %v3361_v7, %v2378_v36 }
 0x688   : > { %1980 = vmax.xlane.f32.xlu0 %v1979_v39 }
 0x68a   : > { %v3605_v40 = vpop.eup %3247 }
 0x68b   : > { %v1994_v28 = vsel %vm407_vm0, %v3605_v40, 0.0 }
 0x68c   : > { %1995 = vadd.xlane.f32.xlu0 %v1994_v28 }
 0x6dc   : > { %v1626_v29 = vpop.xlane.xlu0 %1625 }
 0x6dd   : > { %3249 = vrcp.f32 %v1626_v29  ;;  %v2466_v29 = vld [vmem:[%s3707_s6 + $0x10] sm:$0xff] }
 0x6e0   : > { %v1623_v41 = vpop.xlane.xlu0 %1622 }
 0x6e1   : > { %3251 = vrcp.f32 %v1623_v41 }
 0x6e4   : > { %v3217_v42 = vpop.permute.xlu0 %3216 }
 0x6e5   : > { %v3219_v43 = vunpack.i.h.bf16 %v3217_v42  ;;  %v3218_v44 = vunpack.i.l.bf16 %v3217_v42  ;;  %v2467_v42 = vld [vmem:[%s3707_s6 + $0x18] sm:$0xff] }
 0x6e7   : > { %v3146_v45 = vpack.c.bf16 %v3219_v43, %v3218_v44  ;;  %v3250_v46 = vpop.eup %3249  ;;  %v3174_v43 = vpack.c.bf16 %v2467_v42, %v2466_v29 }
 0x6e8   : > { %v1630_v49 = vmul.f32 %v3250_v46, %v3244_v27 }
 0x6e9   : > { %3147 = vmatprep.subr.bf16.mxu0 %v3146_v45 }
 0x6ea   : > { %3149 = vmatpush3.bf16.msra.mxu0 %v3146_v45 }
 0x6eb   : > { %v3252_v47 = vpop.eup %3251  ;;  %2999 = vmatprep.subr.msk.mxu0 %vm1720_vm10, %v3283_v3 }
 0x6ec   : > { %v1629_v48 = vmul.f32 %v3252_v47, %v3246_v32 }
 0x6ee   : > { %2996 = vmatprep.mubr.msk.f32.mxu0 %vm407_vm0, %v1629_v48 }
 0x6ef   : > { %2997 = vmatmul.mubr.msk.f32.vlgmr.msra.gmra.mrb[10].mxu0 %vm407_vm0, %v1630_v49  ;;  %v2750_v49 = vld [vmem:[%s3708_s7] ss:$0 sm:$0xff] }
 0x6f0   : > { %3000 = vmatpush3.msk.msra.mxu0 %vm1720_vm10, %v3283_v3 }
 0x6f1   : > { %3004 = vmatprep.subr.msk.mxu0 %vm1512_vm11, %v3283_v3 }
 0x715   : > { %v1981_v50 = vpop.xlane.xlu0 %1980 }
 0x716   : > { %v1985_v51 = vsub.f32 %v1977_v38, %v1981_v50 }
 0x718   : > { %v1987_v52 = vmul.f32 1.442695, %v1985_v51 }
 0x719   : > { %v1996_v4 = vpop.xlane.xlu0 %1995 }
 0x71a   : > { %3253 = vpow2.f32 %v1987_v52 }
 0x722   : > { %v3034_v53 = vpop.f32.mrb[12].mxu1 }
 0x723   : > { %v2256_v54 = vpop.f32.mrb[13].mxu1  ;;  %v2266_v56 = vmul.f32 0.35355338, %v3034_v53 }
 0x724   : > { %v3254_v55 = vpop.eup %3253  ;;  %v2265_v57 = vmul.f32 0.35355338, %v2256_v54 }
 0x725   : > { %v1991_v58 = vsel %vm407_vm0, %v3254_v55, 0.0  ;;  %v2268_v1 = vsel %vm1316_vm9, %v2266_v56, -1e+30 }
 0x726   : > { %1992 = vadd.xlane.f32.xlu0 %v1991_v58  ;;  %v2267_v63 = vsel %vm1315_vm8, %v2265_v57, -1e+30  ;;  %v2272_v2 = vsel %vm407_vm0, %v2268_v1, -inf }
 0x727   : > { %v2269_v0 = vsel %vm407_vm0, %v2267_v63, -inf }
 0x728   : > { %2270 = vmax.xlane.f32.xlu1 %v2269_v0 }
 0x72c   : > { %2273 = vmax.xlane.f32.xlu1 %v2272_v2 }
 0x73c   : > { %3226 = vrot.lane.b32.xlu0 %v3597_v34, %s3281_s27  ;;  %s379_s27 = scalar_lea.vmem %s3711_s10, %s3363_s23 }
 0x7b3   : > { %v1993_v8 = vpop.xlane.xlu0 %1992 }
 0x7b5   : > { %v2271_v5 = vpop.xlane.xlu1 %2270 }
 0x7b6   : > { %v2275_v9 = vsub.f32 %v2267_v63, %v2271_v5 }
 0x7b7   : > { %v3227_v18 = vpop.permute.xlu0 %3226 }
 0x7b8   : > { %v2277_v10 = vmul.f32 1.442695, %v2275_v9  ;;  %v3229_v19 = vunpack.i.h.bf16 %v3227_v18  ;;  %v3228_v20 = vunpack.i.l.bf16 %v3227_v18  ;;  %v2751_v18 = vld [vmem:[%s3709_s8] ss:$0 sm:$0xff] }
 0x7b9   : > { %v2274_v11 = vpop.xlane.xlu1 %2273 }
 0x7ba   : > { %v2276_v15 = vsub.f32 %v2268_v1, %v2274_v11  ;;  %v3156_v23 = vpack.c.bf16 %v3229_v19, %v3228_v20  ;;  %v2752_v20 = vld [vmem:[%s3710_s9] ss:$0 sm:$0xff] }
 0x7bc   : > { %v2279_v17 = vmul.f32 1.442695, %v2276_v15 }
 0x7be   : > { %3255 = vpow2.f32 %v2279_v17 }
 0x7bf   : > { %3257 = vrcp.f32 %v1993_v8 }
 0x7c0   : > { %3259 = vpow2.f32 %v2277_v10 }
 0x7c1   : > { %3261 = vrcp.f32 %v1996_v4 }
 0x7c2   : > { %v2998_v21 = vpop.f32.mrb[10].mxu0 }
 0x7c3   : > { %v1711_v22 = vpop.f32.mrb[11].mxu0 }
 0x7c4   : > { %3001 = vmatprep.mubr.msk.f32.mxu0 %vm1317_vm6, %v1711_v22 }
 0x7c5   : > { %3002 = vmatmul.mubr.msk.f32.vlgmr.msra.gmra.mrb[12].mxu0 %vm1317_vm6, %v2998_v21 }
 0x7c6   : > { %3005 = vmatpush3.msk.msra.mxu0 %vm1512_vm11, %v3283_v3  ;;  %3006 = vmatprep.mubr.msk.f32.mxu0 %vm1317_vm6, %v3567_v60  ;;  %v2088_v60 = vadd.s32 16, %v3359_v6  ;;  %v2464_v6 = vld [vmem:[%s3707_s6] sm:$0xff] }
 0x7c7   : > { %3157 = vmatprep.subr.bf16.mxu0 %v3156_v23 }
 0x7c8   : > { %v3256_v16 = vpop.eup %3255  ;;  %vm2089_vm12 = vcmp.eq.s32.totalorder %v3361_v7, %v2088_v60  ;;  %v2465_v7 = vld [vmem:[%s3707_s6 + $0x8] sm:$0xff] }
 0x7c9   : > { %v3258_v24 = vpop.eup %3257  ;;  %v2284_v62 = vsel %vm407_vm0, %v3256_v16, 0.0  ;;  %v3170_v41 = vpack.c.bf16 %v2465_v7, %v2464_v6 }
 0x7ca   : > { %v3260_v25 = vpop.eup %3259  ;;  %2285 = vadd.xlane.f32.xlu1 %v2284_v62  ;;  %v1999_v27 = vmul.f32 %v3258_v24, %v3254_v55 }
 0x7cb   : > { %v3262_v61 = vpop.eup %3261  ;;  %v2281_v26 = vsel %vm407_vm0, %v3260_v25, 0.0  ;;  %3171 = vmatprep.subr.bf16.mxu1 %v3170_v41 }
 0x7cc   : > { %v2000_v30 = vmul.f32 %v3262_v61, %v3605_v40  ;;  %3173 = vmatpush3.bf16.msra.mxu1 %v3170_v41 }
 0x7cd   : > { %3007 = vmatmul.mubr.msk.f32.vlgmr.msra.gmra.mrb[12].mxu0 %vm1317_vm6, %v3565_v59  ;;  %3175 = vmatprep.subr.bf16.mxu1 %v3174_v43 }
 0x7ce   : > { %3159 = vmatpush3.bf16.msra.mxu0 %v3156_v23  ;;  %2282 = vadd.xlane.f32.xlu1 %v2281_v26 }
 0x7cf   : > { %3020 = vmatprep.mubr.msk.f32.mxu0 %vm407_vm0, %v1999_v27  ;;  %3023 = vmatprep.subr.msk.mxu0 %vm2089_vm12, %v3283_v3 }
 0x7d0   : > { %3177 = vmatpush3.bf16.msra.mxu1 %v3174_v43 }
 0x7d1   : > { %3021 = vmatmul.mubr.msk.f32.vlgmr.msra.gmra.mrb[14].mxu0 %vm407_vm0, %v2000_v30 }
 0x7d2   : > { %3024 = vmatpush3.msk.msra.mxu0 %vm2089_vm12, %v3283_v3 }
 0x7df   : > { %3231 = vrot.lane.b32.xlu1 %v3597_v34, %s3282_s28 }
 0x857   : > { %v2286_v59 = vpop.xlane.xlu1 %2285 }
 0x85b   : > { %v2283_v31 = vpop.xlane.xlu1 %2282 }
 0x85c   : > { %3263 = vrcp.f32 %v2283_v31 }
 0x85d   : > { %3265 = vrcp.f32 %v2286_v59 }
 0x85f   : > { %v3232_v32 = vpop.permute.xlu1 %3231 }
 0x860   : > { %v3234_v33 = vunpack.i.h.bf16 %v3232_v32  ;;  %v3233_v14 = vunpack.i.l.bf16 %v3232_v32 }
 0x862   : > { %v3166_v35 = vpack.c.bf16 %v3234_v33, %v3233_v14 }
 0x864   : > { %3167 = vmatprep.subr.bf16.mxu0 %v3166_v35 }
 0x866   : > { %v3264_v34 = vpop.eup %3263 }
 0x867   : > { %v3266_v39 = vpop.eup %3265  ;;  %v2289_v40 = vmul.f32 %v3264_v34, %v3260_v25 }
 0x868   : > { %v2290_v28 = vmul.f32 %v3266_v39, %v3256_v16 }
 0x8a4   : > { %v3022_v37 = vpop.f32.mrb[14].mxu0 }
 0x8a5   : > { %v2079_v38 = vpop.f32.mrb[15].mxu0 }
 0x8a6   : > { %3025 = vmatprep.mubr.msk.f32.mxu0 %vm1317_vm6, %v2079_v38 }
 0x8a7   : > { %3026 = vmatmul.mubr.msk.f32.vlgmr.msra.gmra.mrb[12].mxu0 %vm1317_vm6, %v3022_v37 }
 0x8a8   : > { %3169 = vmatpush3.bf16.msra.mxu0 %v3166_v35  ;;  %3039 = vmatprep.mubr.msk.f32.mxu0 %vm407_vm0, %v2289_v40 }
 0x8a9   : > { %3042 = vmatprep.subr.msk.mxu0 %vm2379_vm13, %v3283_v3 }
 0x8ab   : > { %3040 = vmatmul.mubr.msk.f32.vlgmr.msra.gmra.mrb[16].mxu0 %vm407_vm0, %v2290_v28 }
 0x8ac   : > { %3043 = vmatpush3.msk.msra.mxu0 %vm2379_vm13, %v3283_v3 }
 0x97e   : > { %v3041_v44 = vpop.f32.mrb[16].mxu0 }
 0x97f   : > { %v2369_v45 = vpop.f32.mrb[17].mxu0 }
 0x980   : > { %3044 = vmatprep.mubr.msk.f32.mxu0 %vm1317_vm6, %v2369_v45 }
 0x981   : > { %3045 = vmatmul.mubr.msk.f32.vlgmr.msra.gmra.mrb[12].mxu0 %vm1317_vm6, %v3041_v44 }
 0xa54   : > { %v3046_v46 = vpop.f32.mrb[12].mxu0 }
 0xa55   : > { %v2453_v47 = vpop.f32.mrb[13].mxu0 }
 0xa56   : > { %3055 = vmatprep.mubr.msk.f32.mxu1 %vm489_vm5, %v2453_v47 }
 0xa57   : > { %3056 = vmatmul.mubr.msk.f32.vlgmr.msra.gmra.mrb[14].mxu1 %vm489_vm5, %v3046_v46 }
 0xb2a   : > { %v3057_v48 = vpop.f32.mrb[14].mxu1 }
 0xb2b   : > { %v2550_v50 = vadd.f32 %v3057_v48, %v3376_v13  ;;  %v2540_v51 = vpop.f32.mrb[15].mxu1 }
 0xb2c   : > { %v2549_v52 = vadd.f32 %v2540_v51, %v3374_v12 }
 0xb2d   : > { %v2559_v53 = vadd.f32 %v2750_v49, %v2550_v50 }
 0xb2e   : > { %v2558_v54 = vadd.f32 %v2750_v49, %v2549_v52 }
 0xb2f   : > { %v2565_v55 = vsel %vm489_vm5, %v2559_v53, 0.0 }
 0xb30   : > { %2566 = vadd.xlane.f32.xlu1 %v2565_v55  ;;  %v2562_v56 = vsel %vm489_vm5, %v2558_v54, 0.0 }
 0xb31   : > { %2563 = vadd.xlane.f32.xlu0 %v2562_v56 }
 0xbbd   : > { %v2567_v57 = vpop.xlane.xlu1 %2566 }
 0xbbe   : > { %v2570_v58 = vmul.f32 0.03125, %v2567_v57  ;;  %v2564_v63 = vpop.xlane.xlu0 %2563 }
 0xbbf   : > { %v2569_v0 = vmul.f32 0.03125, %v2564_v63 }
 0xbc0   : > { %v2572_v1 = vsub.f32 %v2559_v53, %v2570_v58 }
 0xbc1   : > { %v2571_v2 = vsub.f32 %v2558_v54, %v2569_v0 }
 0xbc2   : > { %v2574_v4 = vmul.f32 %v2572_v1, %v2572_v1 }
 0xbc3   : > { %v2573_v3 = vmul.f32 %v2571_v2, %v2571_v2 }
 0xbc4   : > { %v2578_v12 = vsel %vm489_vm5, %v2574_v4, 0.0 }
 0xbc5   : > { %v2575_v13 = vsel %vm489_vm5, %v2573_v3, 0.0 }
 0xbc6   : > { %2576 = vadd.xlane.f32.xlu0 %v2575_v13 }
 0xbca   : > { %2579 = vadd.xlane.f32.xlu0 %v2578_v12 }
 0xc53   : > { %v2577_v5 = vpop.xlane.xlu0 %2576 }
 0xc54   : > { %v2581_v8 = vmul.f32 0.03125, %v2577_v5 }
 0xc56   : > { %v2583_v9 = vadd.f32 1e-05, %v2581_v8 }
 0xc57   : > { %v2580_v11 = vpop.xlane.xlu0 %2579 }
 0xc58   : > { %3267 = vrsqrt.f32 %v2583_v9  ;;  %v2582_v15 = vmul.f32 0.03125, %v2580_v11 }
 0xc5a   : > { %v2584_v10 = vadd.f32 1e-05, %v2582_v15 }
 0xc5c   : > { %3269 = vrsqrt.f32 %v2584_v10 }
 0xc62   : > { %v3268_v17 = vpop.eup %3267 }
 0xc63   : > { %v2587_v19 = vmul.f32 %v3268_v17, %v2571_v2 }
 0xc65   : > { %v2595_v21 = vmul.f32 %v2751_v18, %v2587_v19 }
 0xc66   : > { %v3270_v22 = vpop.eup %3269 }
 0xc67   : > { %v2603_v23 = vadd.f32 %v2752_v20, %v2595_v21  ;;  %v2588_v16 = vmul.f32 %v3270_v22, %v2572_v1 }
 0xc69   : > { %2605 = vst.msk [vmem:[%s379_s27] sm:$0xff] %vm489_vm5, %v2603_v23  ;;  %v2596_v24 = vmul.f32 %v2751_v18, %v2588_v16 }
 0xc6b   : > { %v2604_v62 = vadd.f32 %v2752_v20, %v2596_v24 }
 0xc6d   : > { %2606 = vst.msk [vmem:[%s379_s27 + $0x8] sm:$0xff] %vm489_vm5, %v2604_v62 }
 0xc6e PF: > { %s20_s13 = sadd.s32 1, %s3277_s13  }
 0xc6f   : > { %p17_p4 = scmp.ge.s32.totalorder %s20_s13, 4  }
 0xc71   :  { %19 = sbr.rel (!%p17_p4) target bundleno = 1 (0x1), region = 93 }

// kernel: _lambda_.21
= control target key start
LH: loop header
LB: loop body
LE: loop exit
PB: predicated region body
PF: predicated region fallthrough
CT: control target
= control target key end

     0   :  { %s737_s24 = smov 0   ;;  %s796_s0 = inlined_call_operand.vmem [shape: f32[2,16,32], index: 0, kind: input, shape index: {}, may-alias: {0,1}]   ;;  %s797_s1 = inlined_call_operand.vmem [shape: f32[2,16,32], index: 1, kind: input, shape index: {}, may-alias: {0,1}]   ;;  %s798_s2 = inlined_call_operand.vmem [shape: f32[32,32], index: 2, kind: input, shape index: {}]   ;;  %s799_s3 = inlined_call_operand.vmem [shape: f32[1,32], index: 3, kind: input, shape index: {}]   ;;  %s800_s4 = inlined_call_operand.vmem [shape: f32[32,64], index: 4, kind: input, shape index: {}]   ;;  %s801_s5 = inlined_call_operand.vmem [shape: f32[1,64], index: 5, kind: input, shape index: {}]   ;;  %s802_s6 = inlined_call_operand.vmem [shape: f32[2,16,32], index: 6, kind: output, shape index: {0}]   ;;  %s803_s7 = inlined_call_operand.vmem [shape: f32[2,16,64], index: 7, kind: output, shape index: {1}]  }
   0x1 LB: > { %s606_s25 = sadd.s32 4294967295, %s695_s24   ;;  %p610_p0 = scmp.ge.s32.totalorder %s695_s24, 1  ;;  %s695_s24 = sphi %s737_s24, %s18_s24  }
   0x2   : > { %p250_p1 = scmp.lt.s32.totalorder %s695_s24, 3 }
   0x4   : > { %p251_p2 = pnand %p610_p0, %p250_p1 }
   0x5   : > { %v314_v0 = vld [vmem:[%s798_s2] sm:$0xff] (!%p251_p2)  ;;  %v315_v1 = vld [vmem:[%s798_s2 + $0x8] sm:$0xff] (!%p251_p2)  ;;  %p292_p3 = scmp.lt.s32.totalorder (!%p251_p2), %s606_s25, 1  ;;  %v316_v5 = vld [vmem:[%s798_s2 + $0x10] sm:$0xff] (!%p251_p2)  ;;  %vm325_vm0 = vcmask (!%p251_p2), 261120   ;;  %vm503_vm1 = vcmask (!%p251_p2), 523264  }
   0x6   : > { %254 = sbr.rel (%p251_p2) target bundleno = 236 (0xec), region = 44  ;;  %v411_v2 = vld [vmem:[%s800_s4] sm:$0xff] (!%p251_p2)  ;;  %v665_v3 = vpack.c.bf16 (!%p251_p2), %v315_v1, %v314_v0  ;;  %v412_v4 = vld [vmem:[%s800_s4 + $0x8] sm:$0xff] (!%p251_p2)  ;;  %v317_v6 = vld [vmem:[%s798_s2 + $0x18] sm:$0xff] (!%p251_p2) }
   0x7   : > { %v673_v7 = vpack.c.bf16 (!%p251_p2), %v412_v4, %v411_v2  ;;  %v669_v8 = vpack.c.bf16 (!%p251_p2), %v317_v6, %v316_v5  ;;  %v413_v9 = vld [vmem:[%s800_s4 + $0x10] sm:$0xff] (!%p251_p2)  ;;  %v414_v10 = vld [vmem:[%s800_s4 + $0x18] sm:$0xff] (!%p251_p2)  ;;  %v619_v16 = vld [vmem:[%s799_s3] ss:$0 sm:$0xff] (!%p251_p2) }
   0x8   : > { %666 = vmatprep.subr.bf16.mxu0 (!%p251_p2), %v665_v3  ;;  %v677_v11 = vpack.c.bf16 (!%p251_p2), %v414_v10, %v413_v9  ;;  %v622_v17 = vld [vmem:[%s801_s5] ss:$0 sm:$0xff] (!%p251_p2) }
   0x9   : > { %674 = vmatprep.subr.bf16.mxu1 (!%p251_p2), %v673_v7  ;;  %668 = vmatpush3.bf16.msra.mxu0 (!%p251_p2), %v665_v3 }
   0xa   : > { %676 = vmatpush3.bf16.msra.mxu1 (!%p251_p2), %v673_v7  ;;  %670 = vmatprep.subr.bf16.mxu0 (!%p251_p2), %v669_v8 }
   0xb   : > { %678 = vmatprep.subr.bf16.mxu1 (!%p251_p2), %v677_v11 }
   0xd   : > { %s805_s25 = smov (!%p292_p3, %s606_s25), 1  ;;  %672 = vmatpush3.bf16.msra.mxu0 %v669_v8 }
   0xe   : > { %s627_s19 = sshll.u32 %s805_s25, 4  ;;  %680 = vmatpush3.bf16.msra.mxu1 %v677_v11 }
   0xf   : > { %s296_s22 = scalar_lea.vmem %s796_s0, %s627_s19  ;;  %s301_s27 = scalar_lea.vmem %s797_s1, %s627_s19 }
  0x10   : > { %v312_v12 = vld [vmem:[%s296_s22] sm:$0xff]  ;;  %v313_v14 = vld [vmem:[%s296_s22 + $0x8] sm:$0xff]  ;;  %s306_s10 = scalar_lea.vmem %s802_s6, %s627_s19  ;;  %s311_s13 = scalar_lea.vmem %s803_s7, %s627_s19 }
  0x11   : > { %v409_v13 = vld [vmem:[%s301_s27] sm:$0xff]  ;;  %651 = vmatprep.mubr.msk.f32.mxu0 %vm325_vm0, %v312_v12  ;;  %v410_v15 = vld [vmem:[%s301_s27 + $0x8] sm:$0xff] }
  0x12   : > { %662 = vmatprep.mubr.msk.f32.mxu1 %vm325_vm0, %v409_v13  ;;  %652 = vmatmul.mubr.msk.f32.vlgmr.msra.gmra.mrb[0].mxu0 %vm325_vm0, %v313_v14 }
  0x13   : > { %663 = vmatmul.mubr.msk.f32.vlgmr.msra.gmra.mrb[0].mxu1 %vm325_vm0, %v410_v15 }
  0xe5   : > { %v653_v18 = vpop.f32.mrb[0].mxu0 }
  0xe6   : > { %v404_v19 = vadd.f32 %v653_v18, %v619_v16  ;;  %v664_v20 = vpop.f32.mrb[0].mxu1  ;;  %v398_v21 = vpop.f32.mrb[1].mxu0 }
  0xe7   : > { %v500_v22 = vadd.f32 %v664_v20, %v622_v17  ;;  %v399_v23 = vadd.f32 %v619_v16, %v398_v21  ;;  %v494_v24 = vpop.f32.mrb[1].mxu1 }
  0xe8   : > { %408 = vst.msk [vmem:[%s306_s10 + $0x8] sm:$0xff] %vm325_vm0, %v404_v19  ;;  %v495_v25 = vadd.f32 %v622_v17, %v494_v24 }
  0xe9   : > { %505 = vst.msk [vmem:[%s311_s13 + $0x8] sm:$0xff] %vm503_vm1, %v500_v22 }
  0xea   : > { %407 = vst.msk [vmem:[%s306_s10] sm:$0xff] %vm325_vm0, %v399_v23 }
  0xeb   : > { %504 = vst.msk [vmem:[%s311_s13] sm:$0xff] %vm503_vm1, %v495_v25 }
  0xec PF: > { %s18_s24 = sadd.s32 1, %s695_s24  }
  0xed   : > { %p15_p4 = scmp.ge.s32.totalorder %s18_s24, 4  }
  0xef   :  { %17 = sbr.rel (!%p15_p4) target bundleno = 1 (0x1), region = 89 }

// kernel: reverse.9
= control target key start
LH: loop header
LB: loop body
LE: loop exit
PB: predicated region body
PF: predicated region fallthrough
CT: control target
= control target key end

     0   :  { %v40_v2 = vld [vmem:[#allocation0 + $0x7] ss:$-1 sm:$0xff]  ;;  %v47_v3 = vlaneseq  ;;  %v54_v5 = vld [vmem:[#allocation0 + $0x17] ss:$-1 sm:$0xff]  ;;  %s135_s0 = inlined_call_operand.vmem [shape: f32[2,32,7], index: 0, kind: input, shape index: {}]   ;;  %s136_s1 = inlined_call_operand.vmem [shape: f32[2,32,7], index: 1, kind: output, shape index: {}]  }
   0x1   :  { %v32_v0 = vld [vmem:[%s135_s0] sm:$0xff]  ;;  %v34_v1 = vld [vmem:[%s135_s0 + $0x8] sm:$0xff]  ;;  %v41_v4 = vrot.slane %v40_v2, 1  ;;  %v55_v6 = vrot.slane %v54_v5, 1 }
   0x2   :  { %33 = vst [vmem:[#allocation0 + $0x8] sm:$0xff] %v32_v0  ;;  %35 = vst [vmem:[#allocation0 + $0x18] sm:$0xff] %v34_v1  ;;  %v48_v7 = vshrl.u32 %v47_v3, 7 }
   0x3   :  { %42 = vst [vmem:[#allocation1] sm:$0xff] %v41_v4  ;;  %56 = vst [vmem:[#allocation1 + $0x8] sm:$0xff] %v55_v6 }
   0x4   :  { %vm49_vm0 = vcmp.lt.s32.totalorder %v48_v7, 7 }
   0x9   :  { %v45_v8 = vld [vmem:[#allocation0 + $0xf] ss:$-1 sm:$0xff]  ;;  %v59_v9 = vld [vmem:[#allocation0 + $0x1f] ss:$-1 sm:$0xff] }
   0xa   :  { %v46_v10 = vrot.slane %v45_v8, 1  ;;  %v60_v11 = vrot.slane %v59_v9, 1 }
   0xc   :  { %50 = vst.msk [vmem:[#allocation1] sm:$0xff] %vm49_vm0, %v46_v10  ;;  %64 = vst.msk [vmem:[#allocation1 + $0x8] sm:$0xff] %vm49_vm0, %v60_v11 }
  0x13   :  { %v94_v12 = vld [vmem:[#allocation1] sm:$0xff]  ;;  %v96_v13 = vld [vmem:[#allocation1 + $0x8] sm:$0xff] }
  0x14   :  { %95 = vst [vmem:[%s136_s1] sm:$0xff] %v94_v12  ;;  %97 = vst [vmem:[%s136_s1 + $0x8] sm:$0xff] %v96_v13 }

// kernel: _lambda_.27
= control target key start
LH: loop header
LB: loop body
LE: loop exit
PB: predicated region body
PF: predicated region fallthrough
CT: control target
= control target key end

     0   :  { %s588_s21 = smov 0   ;;  %s642_s0 = inlined_call_operand.vmem [shape: f32[2,16,32], index: 0, kind: input, shape index: {}]   ;;  %s643_s1 = inlined_call_operand.vmem [shape: f32[2,16,32], index: 1, kind: input, shape index: {}]   ;;  %s644_s2 = inlined_call_operand.vmem [shape: f32[32,32], index: 2, kind: input, shape index: {}]   ;;  %s645_s3 = inlined_call_operand.vmem [shape: f32[1,32], index: 3, kind: input, shape index: {}, may-alias: {3,5}]   ;;  %s646_s4 = inlined_call_operand.vmem [shape: f32[1,32], index: 4, kind: input, shape index: {}]   ;;  %s647_s5 = inlined_call_operand.vmem [shape: f32[1,32], index: 5, kind: input, shape index: {}, may-alias: {3,5}]   ;;  %s648_s6 = inlined_call_operand.vmem [shape: f32[2,16,32], index: 6, kind: output, shape index: {}]  }
   0x1 LB: > { %s487_s22 = sadd.s32 4294967295, %s551_s21   ;;  %p491_p0 = scmp.ge.s32.totalorder %s551_s21, 1  ;;  %s551_s21 = sphi %s588_s21, %s16_s21  }
   0x2   : > { %p222_p1 = scmp.lt.s32.totalorder %s551_s21, 3 }
   0x4   : > { %p223_p2 = pnand %p491_p0, %p222_p1 }
   0x5   : > { %v276_v0 = vld [vmem:[%s644_s2] sm:$0xff] (!%p223_p2)  ;;  %v277_v1 = vld [vmem:[%s644_s2 + $0x8] sm:$0xff] (!%p223_p2)  ;;  %v278_v2 = vld [vmem:[%s644_s2 + $0x10] sm:$0xff] (!%p223_p2)  ;;  %p257_p3 = scmp.lt.s32.totalorder (!%p223_p2), %s487_s22, 1  ;;  %vm280_vm0 = vcmask (!%p223_p2), 261120  }
   0x6   : > { %226 = sbr.rel (%p223_p2) target bundleno = 553 (0x229), region = 44  ;;  %v525_v3 = vpack.c.bf16 (!%p223_p2), %v277_v1, %v276_v0  ;;  %v279_v4 = vld [vmem:[%s644_s2 + $0x18] sm:$0xff] (!%p223_p2)  ;;  %v500_v13 = vld [vmem:[%s645_s3] ss:$0 sm:$0xff] (!%p223_p2) }
   0x7   : > { %v529_v5 = vpack.c.bf16 (!%p223_p2), %v279_v4, %v278_v2  ;;  %v501_v36 = vld [vmem:[%s646_s4] ss:$0 sm:$0xff] (!%p223_p2) }
   0x8   : > { %526 = vmatprep.subr.bf16.mxu0 (!%p223_p2), %v525_v3  ;;  %v502_v38 = vld [vmem:[%s647_s5] ss:$0 sm:$0xff] (!%p223_p2) }
   0x9   : > { %528 = vmatpush3.bf16.msra.mxu0 (!%p223_p2), %v525_v3 }
   0xa   : > { %530 = vmatprep.subr.bf16.mxu0 (!%p223_p2), %v529_v5 }
   0xd   : > { %s650_s22 = smov (!%p257_p3, %s487_s22), 1  ;;  %532 = vmatpush3.bf16.msra.mxu0 %v529_v5 }
   0xe   : > { %s608_s7 = sshll.u32 %s650_s22, 4 }
   0xf   : > { %s266_s10 = scalar_lea.vmem %s643_s1, %s608_s7  ;;  %s261_s13 = scalar_lea.vmem %s642_s0, %s608_s7 }
  0x10   : > { %v274_v6 = vld [vmem:[%s266_s10] sm:$0xff]  ;;  %v275_v7 = vld [vmem:[%s266_s10 + $0x8] sm:$0xff]  ;;  %s271_s23 = scalar_lea.vmem %s648_s6, %s608_s7 }
  0x11   : > { %522 = vmatprep.mubr.msk.f32.mxu0 %vm280_vm0, %v274_v6  ;;  %v273_v8 = vld [vmem:[%s261_s13 + $0x8] sm:$0xff]  ;;  %v272_v9 = vld [vmem:[%s261_s13] sm:$0xff] }
  0x12   : > { %523 = vmatmul.mubr.msk.f32.vlgmr.msra.gmra.mrb[0].mxu0 %vm280_vm0, %v275_v7 }
  0xe5   : > { %v524_v10 = vpop.f32.mrb[0].mxu0 }
  0xe6   : > { %v363_v11 = vadd.f32 %v524_v10, %v273_v8  ;;  %v353_v12 = vpop.f32.mrb[1].mxu0 }
  0xe7   : > { %v362_v14 = vadd.f32 %v353_v12, %v272_v9 }
  0xe8   : > { %v372_v17 = vadd.f32 %v500_v13, %v363_v11 }
  0xe9   : > { %v371_v15 = vadd.f32 %v500_v13, %v362_v14 }
  0xea   : > { %v378_v18 = vsel %vm280_vm0, %v372_v17, 0.0 }
  0xeb   : > { %v375_v16 = vsel %vm280_vm0, %v371_v15, 0.0 }
  0xec   : > { %376 = vadd.xlane.f32.xlu0 %v375_v16 }
  0xf0   : > { %379 = vadd.xlane.f32.xlu0 %v378_v18 }
 0x179   : > { %v377_v19 = vpop.xlane.xlu0 %376 }
 0x17a   : > { %v382_v20 = vmul.f32 0.03125, %v377_v19 }
 0x17c   : > { %v384_v21 = vsub.f32 %v371_v15, %v382_v20 }
 0x17d   : > { %v380_v22 = vpop.xlane.xlu0 %379 }
 0x17e   : > { %v383_v23 = vmul.f32 0.03125, %v380_v22  ;;  %v386_v24 = vmul.f32 %v384_v21, %v384_v21 }
 0x180   : > { %v385_v25 = vsub.f32 %v372_v17, %v383_v23  ;;  %v388_v26 = vsel %vm280_vm0, %v386_v24, 0.0 }
 0x181   : > { %389 = vadd.xlane.f32.xlu1 %v388_v26 }
 0x182   : > { %v387_v27 = vmul.f32 %v385_v25, %v385_v25 }
 0x184   : > { %v391_v28 = vsel %vm280_vm0, %v387_v27, 0.0 }
 0x185   : > { %392 = vadd.xlane.f32.xlu1 %v391_v28 }
 0x20e   : > { %v390_v29 = vpop.xlane.xlu1 %389 }
 0x20f   : > { %v394_v30 = vmul.f32 0.03125, %v390_v29 }
 0x211   : > { %v396_v31 = vadd.f32 1e-05, %v394_v30 }
 0x212   : > { %v393_v32 = vpop.xlane.xlu1 %392 }
 0x213   : > { %541 = vrsqrt.f32 %v396_v31  ;;  %v395_v33 = vmul.f32 0.03125, %v393_v32 }
 0x215   : > { %v397_v34 = vadd.f32 1e-05, %v395_v33 }
 0x217   : > { %543 = vrsqrt.f32 %v397_v34 }
 0x21d   : > { %v542_v35 = vpop.eup %541 }
 0x21e   : > { %v400_v37 = vmul.f32 %v542_v35, %v384_v21 }
 0x220   : > { %v408_v39 = vmul.f32 %v501_v36, %v400_v37 }
 0x221   : > { %v544_v40 = vpop.eup %543 }
 0x222   : > { %v416_v41 = vadd.f32 %v502_v38, %v408_v39  ;;  %v401_v42 = vmul.f32 %v544_v40, %v385_v25 }
 0x224   : > { %418 = vst.msk [vmem:[%s271_s23] sm:$0xff] %vm280_vm0, %v416_v41  ;;  %v409_v43 = vmul.f32 %v501_v36, %v401_v42 }
 0x226   : > { %v417_v44 = vadd.f32 %v502_v38, %v409_v43 }
 0x228   : > { %419 = vst.msk [vmem:[%s271_s23 + $0x8] sm:$0xff] %vm280_vm0, %v417_v44 }
 0x229 PF: > { %s16_s21 = sadd.s32 1, %s551_s21  }
 0x22a   : > { %p13_p4 = scmp.ge.s32.totalorder %s16_s21, 4  }
 0x22c   :  { %15 = sbr.rel (!%p13_p4) target bundleno = 1 (0x1), region = 77 }

// kernel: _lambda_.26
= control target key start
LH: loop header
LB: loop body
LE: loop exit
PB: predicated region body
PF: predicated region fallthrough
CT: control target
= control target key end

     0   :  { %s1740_s9 = smov 0   ;;  %s1897_s0 = inlined_call_operand.vmem [shape: f32[4,9,32], index: 0, kind: input, shape index: {}]   ;;  %s1898_s1 = inlined_call_operand.vmem [shape: f32[4,9,64], index: 1, kind: input, shape index: {}]   ;;  %s1899_s2 = inlined_call_operand.vmem [shape: f32[4,9,32], index: 2, kind: output, shape index: {}]  }
   0x1 LB: > { %s1394_s10 = sadd.s32 4294967295, %s1714_s9   ;;  %p1398_p0 = scmp.ge.s32.totalorder %s1714_s9, 1  ;;  %s1714_s9 = sphi %s1740_s9, %s12_s9  }
   0x2   : > { %p122_p1 = scmp.lt.s32.totalorder %s1714_s9, 5 }
   0x4   : > { %p123_p2 = pnand %p1398_p0, %p122_p1 }
   0x5   : > { %p149_p3 = scmp.lt.s32.totalorder (!%p123_p2), %s1394_s10, 3  ;;  %vm168_vm0 = vcmask (!%p123_p2), 64512   ;;  %s1716_s18 = smov (!%p123_p2), 120   ;;  %vm258_vm2 = vcmask (!%p123_p2), 72704   ;;  %vm262_vm3 = vcmask (!%p123_p2), 65536   ;;  %vm293_vm4 = vcmask (!%p123_p2), 1040384  }
   0x6   : > { %126 = sbr.rel (%p123_p2) target bundleno = 2296 (0x8f8), region = 28  ;;  %vm1756_vm1 = vmpackc.low (!%p123_p2), %vm168_vm0, %vm168_vm0  ;;  %s1717_s19 = smov (!%p123_p2), 96   ;;  %vm1718_vm5 = vmmov (!%p123_p2), 1   ;;  %vm1325_vm11 = vcmask (!%p123_p2), 253952   ;;  %vm1323_vm12 = vcmask (!%p123_p2), 261120  }
   0x7   : > { %vm1785_vm6 = vmpackc.low (!%p123_p2), %vm293_vm4, %vm1718_vm5  ;;  %s1719_s20 = smov (!%p123_p2), 112   ;;  %s1720_s21 = smov (!%p123_p2), 88  }
   0x8   : > { %s1721_s22 = smov (!%p123_p2), 104   ;;  %s1723_s23 = smov (!%p123_p2), 80  }
   0x9   : > { %s1724_s24 = smov (!%p123_p2), 72  }
   0xd   : > { %s1905_s10 = smov (!%p149_p3, %s1394_s10), 3 }
   0xe   : > { %s1748_s11 = sshll.u32 %s1905_s10, 4 }
   0xf   : > { %s158_s14 = scalar_lea.vmem %s1898_s1, %s1748_s11  ;;  %s153_s17 = scalar_lea.vmem %s1897_s0, %s1748_s11 }
  0x10   : > { %v166_v1 = vld [vmem:[%s158_s14] sm:$0xff]  ;;  %v167_v2 = vld [vmem:[%s158_s14 + $0x8] sm:$0x1]  ;;  %s163_s27 = scalar_lea.vmem %s1899_s2, %s1748_s11 }
  0x11   : > { %v1764_v3 = vld [vmem:[%s153_s17] sm:$0xff]  ;;  %v1570_v4 = vpack.c.bf16 %v167_v2, %v166_v1  ;;  %v1772_v5 = vld [vmem:[%s153_s17 + $0x8] sm:$0x1]  ;;  %v1776_v6 = vpack.i.bf16 %v167_v2, %v166_v1 }
  0x12   : > { %1498 = vmatprep.mubr.msk.f32.mxu0 %vm168_vm0, %v1764_v3 }
  0x13   : > { %1572 = vmatprep.subr.msk.bf16.mxu0 %vm1756_vm1, %v1570_v4  ;;  %1647 = vrot.lane.b32.xlu1 %v1776_v6, %s1716_s18 }
  0x14   : > { %1575 = vmatpush3.bf16.xpose.msk.msra.mxu0 %vm1756_vm1, %v1570_v4 }
  0x17   : > { %377 = vrot.lane.b32.xlu1 %v1764_v3, %s1716_s18 }
  0x1b   : > { %1499 = vmatmul.mubr.msk.f32.vlgmr.msra.gmra.mrb[0].mxu0 %vm168_vm0, %v1772_v5 }
  0x85   : > { %v1648_v16 = vpop.permute.xlu1 %1647 }
  0x86   : > { %v1650_v20 = vunpack.i.h.bf16 %v1648_v16  ;;  %v1649_v21 = vunpack.i.l.bf16 %v1648_v16 }
  0x88   : > { %v1582_v26 = vpack.c.bf16 %v1650_v20, %v1649_v21 }
  0x89   : > { %v378_v32 = vpop.permute.xlu1 %377 }
  0xee   : > { %v1500_v7 = vpop.f32.mrb[0].mxu0 }
  0xef   : > { %v247_v8 = vpop.f32.mrb[1].mxu0  ;;  %v257_v10 = vmul.f32 0.35355338, %v1500_v7 }
  0xf0   : > { %v256_v9 = vmul.f32 0.35355338, %v247_v8 }
  0xf1   : > { %v263_v12 = vsel %vm262_vm3, %v257_v10, -inf }
  0xf2   : > { %v259_v11 = vsel %vm258_vm2, %v256_v9, -inf }
  0xf3   : > { %260 = vmax.xlane.f32.xlu0 %v259_v11 }
  0xf7   : > { %264 = vmax.xlane.f32.xlu0 %v263_v12 }
 0x10d   : > { %1642 = vrot.lane.b32.xlu0 %v1776_v6, %s1717_s19 }
 0x180   : > { %v261_v13 = vpop.xlane.xlu0 %260 }
 0x181   : > { %v266_v14 = vsub.f32 %v256_v9, %v261_v13 }
 0x183   : > { %v268_v18 = vmul.f32 1.442695, %v266_v14 }
 0x184   : > { %v265_v15 = vpop.xlane.xlu0 %264 }
 0x185   : > { %v267_v17 = vsub.f32 %v257_v10, %v265_v15 }
 0x187   : > { %v270_v19 = vmul.f32 1.442695, %v267_v17 }
 0x188   : > { %v1643_v22 = vpop.permute.xlu0 %1642 }
 0x189   : > { %1676 = vpow2.f32 %v270_v19  ;;  %v1645_v23 = vunpack.i.h.bf16 %v1643_v22  ;;  %v1644_v24 = vunpack.i.l.bf16 %v1643_v22  ;;  %v1722_v22 = vmov 1.0  }
 0x18a   : > { %1678 = vpow2.f32 %v268_v18  ;;  %v371_v18 = vlaneseq }
 0x18b   : > { %v1576_v27 = vpack.c.bf16 %v1645_v23, %v1644_v24 }
 0x18c   : > { %v1838_v19 = vshrl.u32 %v371_v18, 7  ;;  %v1840_v20 = vand.u32 127, %v371_v18 }
 0x18d   : > { %1578 = vmatprep.subr.msk.bf16.mxu1 %vm1785_vm6, %v1576_v27 }
 0x18e   : > { %1581 = vmatpush3.bf16.msk.msra.mxu1 %vm1785_vm6, %v1576_v27  ;;  %v580_v21 = vadd.s32 8, %v1838_v19  ;;  %vm375_vm8 = vcmp.eq.s32.totalorder %v1840_v20, %v1838_v19 }
 0x18f   : > { %1584 = vmatprep.subr.msk.bf16.mxu1 %vm1756_vm1, %v1582_v26 }
 0x190   : > { %vm581_vm7 = vcmp.eq.s32.totalorder %v1840_v20, %v580_v21 }
 0x191   : > { %1522 = vmatprep.subr.msk.mxu0 %vm581_vm7, %v1722_v22 }
 0x192   : > { %1523 = vmatpush3.msk.msra.mxu0 %vm581_vm7, %v1722_v22 }
 0x193   : > { %v1677_v28 = vpop.eup %1676  ;;  %1527 = vmatprep.subr.msk.mxu0 %vm375_vm8, %v1722_v22 }
 0x194   : > { %v275_v29 = vsel %vm262_vm3, %v1677_v28, 0.0  ;;  %v1679_v30 = vpop.eup %1678 }
 0x195   : > { %276 = vadd.xlane.f32.xlu1 %v275_v29  ;;  %v272_v31 = vsel %vm258_vm2, %v1679_v30, 0.0 }
 0x199   : > { %273 = vadd.xlane.f32.xlu1 %v272_v31 }
 0x1aa   : > { %379 = vrot.lane.b32.xlu1 %v1772_v5, %s1716_s18 }
 0x222   : > { %v277_v33 = vpop.xlane.xlu1 %276 }
 0x223   : > { %1680 = vrcp.f32 %v277_v33 }
 0x226   : > { %v274_v34 = vpop.xlane.xlu1 %273 }
 0x227   : > { %1682 = vrcp.f32 %v274_v34 }
 0x22a   : > { %v380_v39 = vpop.permute.xlu1 %379 }
 0x22d   : > { %v1681_v35 = vpop.eup %1680 }
 0x22e   : > { %v281_v38 = vmul.f32 %v1681_v35, %v1677_v28 }
 0x231   : > { %v1683_v36 = vpop.eup %1682 }
 0x232   : > { %v280_v37 = vmul.f32 %v1683_v36, %v1679_v30 }
 0x234   : > { %1505 = vmatprep.mubr.msk.f32.mxu1 %vm258_vm2, %v280_v37 }
 0x235   : > { %1506 = vmatmul.mubr.msk.f32.vlgmr.msra.gmra.mrb[0].mxu1 %vm258_vm2, %v281_v38 }
 0x236   : > { %1587 = vmatpush3.bf16.xpose.msk.msra.mxu1 %vm1756_vm1, %v1582_v26  ;;  %1512 = vmatprep.mubr.msk.f32.mxu1 %vm168_vm0, %v378_v32 }
 0x23d   : > { %1513 = vmatmul.mubr.msk.f32.vlgmr.msra.gmra.mrb[2].mxu1 %vm168_vm0, %v380_v39 }
 0x308   : > { %v1805_v40 = vpop.f32.mrb[0].mxu1 }
 0x309   : > { %v1807_v41 = vpop.f32.mrb[1].mxu1 }
 0x310   : > { %v1514_v42 = vpop.f32.mrb[2].mxu1 }
 0x311   : > { %v469_v43 = vmul.f32 0.35355338, %v1514_v42  ;;  %v459_v44 = vpop.f32.mrb[3].mxu1 }
 0x312   : > { %v468_v45 = vmul.f32 0.35355338, %v459_v44 }
 0x313   : > { %v473_v46 = vsel %vm262_vm3, %v469_v43, -inf }
 0x314   : > { %474 = vmax.xlane.f32.xlu1 %v473_v46  ;;  %v470_v47 = vsel %vm258_vm2, %v468_v45, -inf }
 0x315   : > { %471 = vmax.xlane.f32.xlu0 %v470_v47 }
 0x325   : > { %1657 = vrot.lane.b32.xlu1 %v1776_v6, %s1719_s20 }
 0x329   : > { %745 = vrot.lane.b32.xlu1 %v1764_v3, %s1719_s20 }
 0x32d   : > { %747 = vrot.lane.b32.xlu1 %v1772_v5, %s1719_s20 }
 0x331   : > { %1034 = vrot.lane.b32.xlu1 %v1764_v3, %s1721_s22 }
 0x3a1   : > { %v475_v48 = vpop.xlane.xlu1 %474 }
 0x3a2   : > { %v477_v49 = vsub.f32 %v469_v43, %v475_v48  ;;  %v472_v50 = vpop.xlane.xlu0 %471 }
 0x3a3   : > { %v476_v51 = vsub.f32 %v468_v45, %v472_v50 }
 0x3a4   : > { %v480_v52 = vmul.f32 1.442695, %v477_v49 }
 0x3a5   : > { %v478_v53 = vmul.f32 1.442695, %v476_v51  ;;  %v1658_v60 = vpop.permute.xlu1 %1657 }
 0x3a6   : > { %1684 = vpow2.f32 %v480_v52  ;;  %v1660_v61 = vunpack.i.h.bf16 %v1658_v60  ;;  %v1659_v62 = vunpack.i.l.bf16 %v1658_v60 }
 0x3a7   : > { %1686 = vpow2.f32 %v478_v53 }
 0x3a8   : > { %v1594_v7 = vpack.c.bf16 %v1660_v61, %v1659_v62 }
 0x3a9   : > { %v746_v10 = vpop.permute.xlu1 %745 }
 0x3ad   : > { %v748_v15 = vpop.permute.xlu1 %747 }
 0x3b0   : > { %v1685_v54 = vpop.eup %1684 }
 0x3b1   : > { %v485_v55 = vsel %vm262_vm3, %v1685_v54, 0.0  ;;  %v1687_v56 = vpop.eup %1686  ;;  %v1035_v16 = vpop.permute.xlu1 %1034 }
 0x3b2   : > { %486 = vadd.xlane.f32.xlu0 %v485_v55  ;;  %v482_v57 = vsel %vm258_vm2, %v1687_v56, 0.0 }
 0x3b6   : > { %483 = vadd.xlane.f32.xlu0 %v482_v57 }
 0x3cc   : > { %1652 = vrot.lane.b32.xlu0 %v1776_v6, %s1720_s21 }
 0x3d0   : > { %1662 = vrot.lane.b32.xlu0 %v1776_v6, %s1721_s22 }
 0x3d4   : > { %1036 = vrot.lane.b32.xlu0 %v1772_v5, %s1721_s22 }
 0x43f   : > { %v487_v58 = vpop.xlane.xlu0 %486 }
 0x440   : > { %1688 = vrcp.f32 %v487_v58 }
 0x443   : > { %v484_v59 = vpop.xlane.xlu0 %483 }
 0x444   : > { %1690 = vrcp.f32 %v484_v59 }
 0x447   : > { %v1653_v63 = vpop.permute.xlu0 %1652 }
 0x448   : > { %v1655_v1 = vunpack.i.h.bf16 %v1653_v63  ;;  %v1654_v2 = vunpack.i.l.bf16 %v1653_v63 }
 0x44a   : > { %v1588_v4 = vpack.c.bf16 %v1655_v1, %v1654_v2  ;;  %v1689_v3 = vpop.eup %1688 }
 0x44b   : > { %v491_v9 = vmul.f32 %v1689_v3, %v1685_v54  ;;  %v1663_v11 = vpop.permute.xlu0 %1662 }
 0x44c   : > { %1590 = vmatprep.subr.msk.bf16.mxu1 %vm1785_vm6, %v1588_v4  ;;  %v1665_v12 = vunpack.i.h.bf16 %v1663_v11  ;;  %v1664_v13 = vunpack.i.l.bf16 %v1663_v11  ;;  %v1237_v11 = vadd.s32 24, %v1838_v19 }
 0x44d   : > { %1593 = vmatpush3.bf16.msk.msra.mxu1 %vm1785_vm6, %v1588_v4 }
 0x44e   : > { %v1691_v5 = vpop.eup %1690  ;;  %1596 = vmatprep.subr.msk.bf16.mxu1 %vm1756_vm1, %v1594_v7  ;;  %v1606_v14 = vpack.c.bf16 %v1665_v12, %v1664_v13  ;;  %vm1238_vm10 = vcmp.eq.s32.totalorder %v1840_v20, %v1237_v11 }
 0x44f   : > { %v490_v8 = vmul.f32 %v1691_v5, %v1687_v56  ;;  %v1037_v17 = vpop.permute.xlu0 %1036 }
 0x451   : > { %1519 = vmatprep.mubr.msk.f32.mxu1 %vm258_vm2, %v490_v8 }
 0x452   : > { %1520 = vmatmul.mubr.msk.f32.vlgmr.msra.gmra.mrb[4].mxu1 %vm258_vm2, %v491_v9 }
 0x453   : > { %1536 = vmatprep.mubr.msk.f32.mxu1 %vm168_vm0, %v746_v10 }
 0x456   : > { %1599 = vmatpush3.bf16.xpose.msk.msra.mxu1 %vm1756_vm1, %v1594_v7  ;;  %v948_v7 = vadd.s32 16, %v1838_v19 }
 0x457   : > { %1608 = vmatprep.subr.msk.bf16.mxu1 %vm1756_vm1, %v1606_v14 }
 0x458   : > { %vm949_vm9 = vcmp.eq.s32.totalorder %v1840_v20, %v948_v7 }
 0x45d   : > { %1537 = vmatmul.mubr.msk.f32.vlgmr.msra.gmra.mrb[6].mxu1 %vm168_vm0, %v748_v15 }
 0x45e   : > { %1611 = vmatpush3.bf16.xpose.msk.msra.mxu1 %vm1756_vm1, %v1606_v14  ;;  %1555 = vmatprep.mubr.msk.f32.mxu1 %vm168_vm0, %v1035_v16 }
 0x465   : > { %1556 = vmatmul.mubr.msk.f32.vlgmr.msra.gmra.mrb[8].mxu1 %vm168_vm0, %v1037_v17 }
 0x525   : > { %v1521_v0 = vpop.f32.mrb[4].mxu1 }
 0x526   : > { %v571_v23 = vpop.f32.mrb[5].mxu1 }
 0x527   : > { %1524 = vmatprep.mubr.msk.f32.mxu0 %vm168_vm0, %v571_v23 }
 0x528   : > { %1525 = vmatmul.mubr.msk.f32.vlgmr.msra.gmra.mrb[2].mxu0 %vm168_vm0, %v1521_v0 }
 0x529   : > { %1529 = vmatprep.mubr.msk.f32.mxu0 %vm168_vm0, %v1807_v41  ;;  %1528 = vmatpush3.msk.msra.mxu0 %vm375_vm8, %v1722_v22 }
 0x530   : > { %1530 = vmatmul.mubr.msk.f32.vlgmr.msra.gmra.mrb[2].mxu0 %vm168_vm0, %v1805_v40  ;;  %v1538_v24 = vpop.f32.mrb[6].mxu1 }
 0x531   : > { %v837_v26 = vmul.f32 0.35355338, %v1538_v24  ;;  %v827_v27 = vpop.f32.mrb[7].mxu1 }
 0x532   : > { %v836_v28 = vmul.f32 0.35355338, %v827_v27 }
 0x533   : > { %v841_v29 = vsel %vm262_vm3, %v837_v26, -inf }
 0x534   : > { %842 = vmax.xlane.f32.xlu0 %v841_v29  ;;  %v838_v30 = vsel %vm258_vm2, %v836_v28, -inf }
 0x535   : > { %839 = vmax.xlane.f32.xlu1 %v838_v30 }
 0x538   : > { %v1557_v31 = vpop.f32.mrb[8].mxu1 }
 0x539   : > { %v1116_v32 = vpop.f32.mrb[9].mxu1  ;;  %v1126_v44 = vmul.f32 0.35355338, %v1557_v31 }
 0x53a   : > { %v1125_v42 = vmul.f32 0.35355338, %v1116_v32 }
 0x53b   : > { %v1130_v46 = vsel %vm262_vm3, %v1126_v44, -inf }
 0x53c   : > { %v1127_v45 = vsel %vm258_vm2, %v1125_v42, -inf }
 0x546   : > { %1667 = vrot.lane.b32.xlu1 %v1776_v6, %s1723_s23 }
 0x54a   : > { %1672 = vrot.lane.b32.xlu1 %v1776_v6, %s1724_s24 }
 0x5c1   : > { %v843_v33 = vpop.xlane.xlu0 %842 }
 0x5c2   : > { %v845_v34 = vsub.f32 %v837_v26, %v843_v33  ;;  %v840_v35 = vpop.xlane.xlu1 %839 }
 0x5c3   : > { %v844_v36 = vsub.f32 %v836_v28, %v840_v35 }
 0x5c4   : > { %v848_v37 = vmul.f32 1.442695, %v845_v34 }
 0x5c5   : > { %v846_v38 = vmul.f32 1.442695, %v844_v36 }
 0x5c6   : > { %v1668_v47 = vpop.permute.xlu1 %1667 }
 0x5c7   : > { %1692 = vpow2.f32 %v846_v38  ;;  %v1670_v48 = vunpack.i.h.bf16 %v1668_v47  ;;  %v1669_v49 = vunpack.i.l.bf16 %v1668_v47 }
 0x5c8   : > { %1694 = vpow2.f32 %v848_v37 }
 0x5c9   : > { %v1600_v50 = vpack.c.bf16 %v1670_v48, %v1669_v49 }
 0x5ca   : > { %v1673_v4 = vpop.permute.xlu1 %1672 }
 0x5cb   : > { %1602 = vmatprep.subr.msk.bf16.mxu0 %vm1785_vm6, %v1600_v50  ;;  %v1675_v3 = vunpack.i.h.bf16 %v1673_v4  ;;  %v1674_v5 = vunpack.i.l.bf16 %v1673_v4 }
 0x5cc   : > { %1605 = vmatpush3.bf16.msk.msra.mxu0 %vm1785_vm6, %v1600_v50 }
 0x5cd   : > { %v1612_v8 = vpack.c.bf16 %v1675_v3, %v1674_v5  ;;  %1546 = vmatprep.subr.msk.mxu0 %vm949_vm9, %v1722_v22 }
 0x5d1   : > { %v1693_v39 = vpop.eup %1692 }
 0x5d2   : > { %v850_v40 = vsel %vm258_vm2, %v1693_v39, 0.0  ;;  %v1695_v41 = vpop.eup %1694 }
 0x5d3   : > { %851 = vadd.xlane.f32.xlu0 %v850_v40  ;;  %v853_v43 = vsel %vm262_vm3, %v1695_v41, 0.0 }
 0x5d7   : > { %854 = vadd.xlane.f32.xlu0 %v853_v43 }
 0x5db   : > { %1128 = vmax.xlane.f32.xlu0 %v1127_v45 }
 0x5df   : > { %1131 = vmax.xlane.f32.xlu0 %v1130_v46 }
 0x660   : > { %v852_v51 = vpop.xlane.xlu0 %851 }
 0x661   : > { %1696 = vrcp.f32 %v852_v51 }
 0x664   : > { %v855_v52 = vpop.xlane.xlu0 %854 }
 0x665   : > { %1698 = vrcp.f32 %v855_v52 }
 0x668   : > { %v1129_v53 = vpop.xlane.xlu0 %1128 }
 0x669   : > { %v1133_v54 = vsub.f32 %v1125_v42, %v1129_v53 }
 0x66b   : > { %v1697_v55 = vpop.eup %1696  ;;  %v1135_v56 = vmul.f32 1.442695, %v1133_v54 }
 0x66c   : > { %v1132_v57 = vpop.xlane.xlu0 %1131  ;;  %v858_v58 = vmul.f32 %v1697_v55, %v1693_v39 }
 0x66d   : > { %1700 = vpow2.f32 %v1135_v56  ;;  %v1134_v59 = vsub.f32 %v1126_v44, %v1132_v57 }
 0x66e   : > { %1543 = vmatprep.mubr.msk.f32.mxu0 %vm258_vm2, %v858_v58 }
 0x66f   : > { %v1699_v60 = vpop.eup %1698  ;;  %v1137_v61 = vmul.f32 1.442695, %v1134_v59 }
 0x670   : > { %v859_v62 = vmul.f32 %v1699_v60, %v1695_v41 }
 0x671   : > { %1702 = vpow2.f32 %v1137_v61 }
 0x672   : > { %1544 = vmatmul.mubr.msk.f32.vlgmr.msra.gmra.mrb[4].mxu0 %vm258_vm2, %v859_v62 }
 0x673   : > { %1547 = vmatpush3.msk.msra.mxu0 %vm949_vm9, %v1722_v22 }
 0x674   : > { %1614 = vmatprep.subr.msk.bf16.mxu0 %vm1785_vm6, %v1612_v8 }
 0x677   : > { %v1701_v6 = vpop.eup %1700 }
 0x678   : > { %v1139_v63 = vsel %vm258_vm2, %v1701_v6, 0.0 }
 0x679   : > { %1140 = vadd.xlane.f32.xlu0 %v1139_v63 }
 0x67b   : > { %v1703_v1 = vpop.eup %1702 }
 0x67c   : > { %v1142_v2 = vsel %vm262_vm3, %v1703_v1, 0.0 }
 0x67d   : > { %1143 = vadd.xlane.f32.xlu0 %v1142_v2 }
 0x706   : > { %v1141_v9 = vpop.xlane.xlu0 %1140 }
 0x707   : > { %1704 = vrcp.f32 %v1141_v9 }
 0x70a   : > { %v1144_v10 = vpop.xlane.xlu0 %1143 }
 0x70b   : > { %1706 = vrcp.f32 %v1144_v10 }
 0x711   : > { %v1705_v12 = vpop.eup %1704 }
 0x712   : > { %v1147_v16 = vmul.f32 %v1705_v12, %v1701_v6 }
 0x715   : > { %v1707_v15 = vpop.eup %1706 }
 0x716   : > { %v1148_v17 = vmul.f32 %v1707_v15, %v1703_v1 }
 0x745   : > { %v1545_v13 = vpop.f32.mrb[4].mxu0 }
 0x746   : > { %v939_v14 = vpop.f32.mrb[5].mxu0 }
 0x747   : > { %1548 = vmatprep.mubr.msk.f32.mxu0 %vm168_vm0, %v939_v14 }
 0x748   : > { %1549 = vmatmul.mubr.msk.f32.vlgmr.msra.gmra.mrb[2].mxu0 %vm168_vm0, %v1545_v13 }
 0x749   : > { %1617 = vmatpush3.bf16.msk.msra.mxu0 %vm1785_vm6, %v1612_v8  ;;  %1562 = vmatprep.mubr.msk.f32.mxu0 %vm258_vm2, %v1147_v16 }
 0x74a   : > { %1565 = vmatprep.subr.msk.mxu0 %vm1238_vm10, %v1722_v22 }
 0x74c   : > { %1563 = vmatmul.mubr.msk.f32.vlgmr.msra.gmra.mrb[6].mxu0 %vm258_vm2, %v1148_v17 }
 0x74d   : > { %1566 = vmatpush3.msk.msra.mxu0 %vm1238_vm10, %v1722_v22 }
 0x81f   : > { %v1564_v18 = vpop.f32.mrb[6].mxu0 }
 0x820   : > { %v1228_v19 = vpop.f32.mrb[7].mxu0 }
 0x821   : > { %1567 = vmatprep.mubr.msk.f32.mxu0 %vm168_vm0, %v1228_v19 }
 0x822   : > { %1568 = vmatmul.mubr.msk.f32.vlgmr.msra.gmra.mrb[2].mxu0 %vm168_vm0, %v1564_v18 }
 0x8f5   : > { %v1569_v25 = vpop.f32.mrb[2].mxu0 }
 0x8f6   : > { %1326 = vst.msk [vmem:[%s163_s27 + $0x8] sm:$0x1] %vm1325_vm11, %v1569_v25  ;;  %v1312_v20 = vpop.f32.mrb[3].mxu0 }
 0x8f7   : > { %1324 = vst.msk [vmem:[%s163_s27] sm:$0xff] %vm1323_vm12, %v1312_v20 }
 0x8f8 PF: > { %s12_s9 = sadd.s32 1, %s1714_s9  }
 0x8f9   : > { %p9_p4 = scmp.ge.s32.totalorder %s12_s9, 6  }
 0x8fb   :  { %11 = sbr.rel (!%p9_p4) target bundleno = 1 (0x1), region = 61 }

// kernel: _lambda_.30
= control target key start
LH: loop header
LB: loop body
LE: loop exit
PB: predicated region body
PF: predicated region fallthrough
CT: control target
= control target key end

     0   :  { %s1022_s24 = smov 0   ;;  %s1102_s0 = inlined_call_operand.vmem [shape: f32[2,32,32], index: 0, kind: input, shape index: {}]   ;;  %s1103_s1 = inlined_call_operand.vmem [shape: f32[2,32,64], index: 1, kind: input, shape index: {}]   ;;  %s1104_s2 = inlined_call_operand.vmem [shape: f32[2,1,64], index: 2, kind: input, shape index: {}]   ;;  %s1105_s3 = inlined_call_operand.vmem [shape: f32[2,64,32], index: 3, kind: input, shape index: {}]   ;;  %s1106_s4 = inlined_call_operand.vmem [shape: f32[2,1,32], index: 4, kind: input, shape index: {}, may-alias: {4,6}]   ;;  %s1107_s5 = inlined_call_operand.vmem [shape: f32[2,1,32], index: 5, kind: input, shape index: {}]   ;;  %s1108_s6 = inlined_call_operand.vmem [shape: f32[2,1,32], index: 6, kind: input, shape index: {}, may-alias: {4,6}]   ;;  %s1109_s7 = inlined_call_operand.vmem [shape: f32[2,32,32], index: 7, kind: output, shape index: {}]  }
   0x1 LB: > { %s839_s25 = sadd.s32 4294967295, %s980_s24   ;;  %p843_p0 = scmp.ge.s32.totalorder %s980_s24, 1  ;;  %s980_s24 = sphi %s1022_s24, %s17_s24  }
   0x2   : > { %p289_p1 = scmp.lt.s32.totalorder %s980_s24, 3 }
   0x4   : > { %p290_p2 = pnand %p843_p0, %p289_p1 }
   0x5   : > { %p343_p3 = scmp.lt.s32.totalorder (!%p290_p2), %s839_s25, 1  ;;  %vm390_vm0 = vcmask (!%p290_p2), 261120   ;;  %vm532_vm1 = vcmask (!%p290_p2), 523264  }
   0x6   : > { %293 = sbr.rel (%p290_p2) target bundleno = 809 (0x329), region = 48 }
   0xd   : > { %s1111_s25 = smov (!%p343_p3, %s839_s25), 1 }
   0xe   : > { %s1033_s26 = sshll.u32 %s1111_s25, 5  ;;  %s868_s10 = sshll.u32 %s1111_s25, 6 }
   0xf   : > { %s352_s29 = scalar_lea.vmem %s1103_s1, %s1033_s26  ;;  %s347_s9 = scalar_lea.vmem %s1102_s0, %s1033_s26 }
  0x10   : > { %v379_v0 = vld [vmem:[%s352_s29] sm:$0xff]  ;;  %v380_v1 = vld [vmem:[%s352_s29 + $0x8] sm:$0xff]  ;;  %v381_v2 = vld [vmem:[%s352_s29 + $0x10] sm:$0xff]  ;;  %s360_s13 = scalar_lea.vmem %s1105_s3, %s868_s10  ;;  %s355_s16 = scalar_lea.vmem %s1104_s2, %s1111_s25 }
  0x11   : > { %v926_v3 = vpack.c.bf16 %v380_v1, %v379_v0  ;;  %v382_v4 = vld [vmem:[%s352_s29 + $0x18] sm:$0xff]  ;;  %v1043_v5 = vld [vmem:[%s347_s9] sm:$0xff]  ;;  %v1047_v7 = vld [vmem:[%s347_s9 + $0x8] sm:$0xff]  ;;  %s363_s19 = scalar_lea.vmem %s1106_s4, %s1111_s25  ;;  %s366_s22 = scalar_lea.vmem %s1107_s5, %s1111_s25 }
  0x12   : > { %v930_v6 = vpack.c.bf16 %v382_v4, %v381_v2  ;;  %898 = vmatprep.mubr.msk.f32.mxu0 %vm390_vm0, %v1043_v5  ;;  %v1049_v8 = vld [vmem:[%s347_s9 + $0x10] sm:$0xff]  ;;  %v1055_v9 = vld [vmem:[%s347_s9 + $0x18] sm:$0xff]  ;;  %v524_v10 = vld [vmem:[%s360_s13] sm:$0xff]  ;;  %s369_s28 = scalar_lea.vmem %s1108_s6, %s1111_s25  ;;  %s374_s8 = scalar_lea.vmem %s1109_s7, %s1033_s26 }
  0x13   : > { %927 = vmatprep.subr.bf16.mxu0 %v926_v3  ;;  %v525_v11 = vld [vmem:[%s360_s13 + $0x8] sm:$0xff]  ;;  %v526_v13 = vld [vmem:[%s360_s13 + $0x10] sm:$0xff]  ;;  %v527_v14 = vld [vmem:[%s360_s13 + $0x18] sm:$0xff] }
  0x14   : > { %929 = vmatpush3.bf16.msra.mxu0 %v926_v3  ;;  %v934_v12 = vpack.c.bf16 %v525_v11, %v524_v10  ;;  %v938_v15 = vpack.c.bf16 %v527_v14, %v526_v13  ;;  %v528_v16 = vld [vmem:[%s360_s13 + $0x20] sm:$0xff]  ;;  %v529_v17 = vld [vmem:[%s360_s13 + $0x28] sm:$0xff]  ;;  %v530_v19 = vld [vmem:[%s360_s13 + $0x30] sm:$0xff] }
  0x15   : > { %931 = vmatprep.subr.bf16.mxu0 %v930_v6  ;;  %v942_v18 = vpack.c.bf16 %v529_v17, %v528_v16  ;;  %v531_v20 = vld [vmem:[%s360_s13 + $0x38] sm:$0xff]  ;;  %v852_v22 = vld [vmem:[%s355_s16] ss:$0 sm:$0xff] }
  0x16   : > { %935 = vmatprep.subr.bf16.mxu1 %v934_v12  ;;  %v946_v21 = vpack.c.bf16 %v531_v20, %v530_v19 }
  0x17   : > { %937 = vmatpush3.bf16.msra.mxu1 %v934_v12 }
  0x18   : > { %933 = vmatpush3.bf16.msra.mxu0 %v930_v6  ;;  %939 = vmatprep.subr.bf16.mxu1 %v938_v15  ;;  %v861_v6 = vld [vmem:[%s363_s19] ss:$0 sm:$0xff] }
  0x1b   : > { %899 = vmatmul.mubr.msk.f32.vlgmr.msra.gmra.mrb[0].mxu0 %vm390_vm0, %v1047_v7  ;;  %941 = vmatpush3.bf16.msra.mxu1 %v938_v15 }
  0x1c   : > { %901 = vmatprep.mubr.msk.f32.mxu0 %vm390_vm0, %v1049_v8  ;;  %943 = vmatprep.subr.bf16.mxu1 %v942_v18 }
  0x1f   : > { %902 = vmatmul.mubr.msk.f32.gmra.mrb[2].mxu0 %vm390_vm0, %v1055_v9  ;;  %945 = vmatpush3.bf16.msra.mxu1 %v942_v18 }
  0x20   : > { %947 = vmatprep.subr.bf16.mxu1 %v946_v21 }
  0x23   : > { %949 = vmatpush3.bf16.msra.mxu1 %v946_v21 }
  0xee   : > { %v900_v23 = vpop.f32.mrb[0].mxu0 }
  0xef   : > { %v475_v24 = vadd.f32 %v900_v23, %v852_v22  ;;  %v469_v25 = vpop.f32.mrb[1].mxu0 }
  0xf0   : > { %v470_v26 = vadd.f32 %v852_v22, %v469_v25 }
  0xf1   : > { %v489_v27 = vmul.f32 %v475_v24, %v475_v24 }
  0xf2   : > { %v488_v28 = vmul.f32 %v470_v26, %v470_v26  ;;  %v903_v29 = vpop.f32.mrb[2].mxu0 }
  0xf3   : > { %v493_v30 = vmul.f32 %v489_v27, %v475_v24  ;;  %v485_v31 = vadd.f32 %v903_v29, %v852_v22  ;;  %v479_v32 = vpop.f32.mrb[3].mxu0 }
  0xf4   : > { %v492_v33 = vmul.f32 %v488_v28, %v470_v26  ;;  %v480_v34 = vadd.f32 %v852_v22, %v479_v32 }
  0xf5   : > { %v497_v35 = vmul.f32 0.044715, %v493_v30  ;;  %v491_v36 = vmul.f32 %v485_v31, %v485_v31 }
  0xf6   : > { %v496_v37 = vmul.f32 0.044715, %v492_v33  ;;  %v490_v38 = vmul.f32 %v480_v34, %v480_v34 }
  0xf7   : > { %v501_v39 = vadd.f32 %v497_v35, %v475_v24  ;;  %v495_v40 = vmul.f32 %v491_v36, %v485_v31 }
  0xf8   : > { %v494_v41 = vmul.f32 %v490_v38, %v480_v34  ;;  %v500_v42 = vadd.f32 %v496_v37, %v470_v26 }
  0xf9   : > { %v505_v43 = vmul.f32 0.7978846, %v501_v39  ;;  %v499_v44 = vmul.f32 0.044715, %v495_v40 }
  0xfa   : > { %v498_v45 = vmul.f32 0.044715, %v494_v41  ;;  %v504_v46 = vmul.f32 0.7978846, %v500_v42 }
  0xfb   : > { %958 = vtanh.f32 %v505_v43  ;;  %v503_v47 = vadd.f32 %v499_v44, %v485_v31 }
  0xfc   : > { %v502_v48 = vadd.f32 %v498_v45, %v480_v34  ;;  %960 = vtanh.f32 %v504_v46 }
  0xfd   : > { %v507_v49 = vmul.f32 0.7978846, %v503_v47 }
  0xfe   : > { %v506_v50 = vmul.f32 0.7978846, %v502_v48 }
  0xff   : > { %962 = vtanh.f32 %v507_v49 }
 0x100   : > { %964 = vtanh.f32 %v506_v50 }
 0x105   : > { %v959_v51 = vpop.eup %958 }
 0x106   : > { %v961_v52 = vpop.eup %960  ;;  %v513_v53 = vadd.f32 1.0, %v959_v51 }
 0x107   : > { %v512_v54 = vadd.f32 1.0, %v961_v52 }
 0x108   : > { %v517_v55 = vmul.f32 0.5, %v513_v53  ;;  %v862_v53 = vld [vmem:[%s366_s22] ss:$0 sm:$0xff] }
 0x109   : > { %v963_v56 = vpop.eup %962  ;;  %v516_v57 = vmul.f32 0.5, %v512_v54 }
 0x10a   : > { %v965_v58 = vpop.eup %964  ;;  %v515_v59 = vadd.f32 1.0, %v963_v56  ;;  %v521_v62 = vmul.f32 %v517_v55, %v475_v24  ;;  %v863_v55 = vld [vmem:[%s369_s28] ss:$0 sm:$0xff] }
 0x10b   : > { %v520_v60 = vmul.f32 %v516_v57, %v470_v26  ;;  %v514_v61 = vadd.f32 1.0, %v965_v58 }
 0x10c   : > { %v519_v63 = vmul.f32 0.5, %v515_v59 }
 0x10d   : > { %920 = vmatprep.mubr.msk.f32.mxu1 %vm532_vm1, %v520_v60  ;;  %v518_v0 = vmul.f32 0.5, %v514_v61 }
 0x10e   : > { %921 = vmatmul.mubr.msk.f32.vlgmr.msra.gmra.mrb[0].mxu1 %vm532_vm1, %v521_v62  ;;  %v523_v2 = vmul.f32 %v519_v63, %v485_v31 }
 0x10f   : > { %v522_v1 = vmul.f32 %v518_v0, %v480_v34 }
 0x111   : > { %923 = vmatprep.mubr.msk.f32.mxu1 %vm532_vm1, %v522_v1 }
 0x112   : > { %924 = vmatmul.mubr.msk.f32.gmra.mrb[2].mxu1 %vm532_vm1, %v523_v2 }
 0x1e1   : > { %v922_v3 = vpop.f32.mrb[0].mxu1 }
 0x1e2   : > { %v611_v4 = vpop.f32.mrb[1].mxu1  ;;  %v631_v10 = vadd.f32 %v922_v3, %v1047_v7 }
 0x1e3   : > { %v630_v11 = vadd.f32 %v611_v4, %v1043_v5 }
 0x1e4   : > { %v642_v18 = vadd.f32 %v861_v6, %v631_v10 }
 0x1e5   : > { %v925_v12 = vpop.f32.mrb[2].mxu1  ;;  %v641_v13 = vadd.f32 %v861_v6, %v630_v11 }
 0x1e6   : > { %v621_v14 = vpop.f32.mrb[3].mxu1  ;;  %v633_v15 = vadd.f32 %v925_v12, %v1055_v9  ;;  %v650_v20 = vsel %vm390_vm0, %v642_v18, 0.0 }
 0x1e7   : > { %v632_v16 = vadd.f32 %v621_v14, %v1049_v8  ;;  %v647_v17 = vsel %vm390_vm0, %v641_v13, 0.0 }
 0x1e8   : > { %648 = vadd.xlane.f32.xlu0 %v647_v17  ;;  %v644_v22 = vadd.f32 %v861_v6, %v633_v15 }
 0x1e9   : > { %v643_v19 = vadd.f32 %v861_v6, %v632_v16 }
 0x1ea   : > { %v656_v5 = vsel %vm390_vm0, %v644_v22, 0.0 }
 0x1eb   : > { %v653_v21 = vsel %vm390_vm0, %v643_v19, 0.0 }
 0x1ec   : > { %651 = vadd.xlane.f32.xlu0 %v650_v20  ;;  %654 = vadd.xlane.f32.xlu1 %v653_v21 }
 0x1f0   : > { %657 = vadd.xlane.f32.xlu1 %v656_v5 }
 0x275   : > { %v649_v7 = vpop.xlane.xlu0 %648 }
 0x276   : > { %v660_v23 = vmul.f32 0.03125, %v649_v7 }
 0x278   : > { %v664_v9 = vsub.f32 %v641_v13, %v660_v23 }
 0x279   : > { %v652_v24 = vpop.xlane.xlu0 %651  ;;  %v655_v8 = vpop.xlane.xlu1 %654 }
 0x27a   : > { %v661_v25 = vmul.f32 0.03125, %v652_v24  ;;  %v662_v26 = vmul.f32 0.03125, %v655_v8  ;;  %v668_v27 = vmul.f32 %v664_v9, %v664_v9 }
 0x27c   : > { %v665_v28 = vsub.f32 %v642_v18, %v661_v25  ;;  %v666_v29 = vsub.f32 %v643_v19, %v662_v26  ;;  %v672_v30 = vsel %vm390_vm0, %v668_v27, 0.0 }
 0x27d   : > { %673 = vadd.xlane.f32.xlu0 %v672_v30  ;;  %v658_v31 = vpop.xlane.xlu1 %657 }
 0x27e   : > { %v663_v32 = vmul.f32 0.03125, %v658_v31  ;;  %v669_v33 = vmul.f32 %v665_v28, %v665_v28  ;;  %v670_v34 = vmul.f32 %v666_v29, %v666_v29 }
 0x280   : > { %v667_v35 = vsub.f32 %v644_v22, %v663_v32  ;;  %v675_v36 = vsel %vm390_vm0, %v669_v33, 0.0  ;;  %v678_v37 = vsel %vm390_vm0, %v670_v34, 0.0 }
 0x281   : > { %676 = vadd.xlane.f32.xlu1 %v675_v36  ;;  %679 = vadd.xlane.f32.xlu0 %v678_v37 }
 0x282   : > { %v671_v38 = vmul.f32 %v667_v35, %v667_v35 }
 0x284   : > { %v681_v39 = vsel %vm390_vm0, %v671_v38, 0.0 }
 0x285   : > { %682 = vadd.xlane.f32.xlu1 %v681_v39 }
 0x30a   : > { %v674_v40 = vpop.xlane.xlu0 %673 }
 0x30b   : > { %v684_v41 = vmul.f32 0.03125, %v674_v40 }
 0x30d   : > { %v688_v42 = vadd.f32 1e-05, %v684_v41 }
 0x30e   : > { %v680_v43 = vpop.xlane.xlu0 %679  ;;  %v677_v44 = vpop.xlane.xlu1 %676 }
 0x30f   : > { %966 = vrsqrt.f32 %v688_v42  ;;  %v686_v45 = vmul.f32 0.03125, %v680_v43  ;;  %v685_v46 = vmul.f32 0.03125, %v677_v44 }
 0x311   : > { %v690_v47 = vadd.f32 1e-05, %v686_v45  ;;  %v689_v48 = vadd.f32 1e-05, %v685_v46 }
 0x312   : > { %v683_v49 = vpop.xlane.xlu1 %682 }
 0x313   : > { %968 = vrsqrt.f32 %v690_v47  ;;  %v687_v50 = vmul.f32 0.03125, %v683_v49 }
 0x314   : > { %970 = vrsqrt.f32 %v689_v48 }
 0x315   : > { %v691_v51 = vadd.f32 1e-05, %v687_v50 }
 0x317   : > { %972 = vrsqrt.f32 %v691_v51 }
 0x319   : > { %v967_v52 = vpop.eup %966 }
 0x31a   : > { %v696_v54 = vmul.f32 %v967_v52, %v664_v9 }
 0x31c   : > { %v706_v56 = vmul.f32 %v862_v53, %v696_v54 }
 0x31d   : > { %v969_v57 = vpop.eup %968 }
 0x31e   : > { %v971_v58 = vpop.eup %970  ;;  %v716_v59 = vadd.f32 %v863_v55, %v706_v56  ;;  %v698_v60 = vmul.f32 %v969_v57, %v666_v29 }
 0x31f   : > { %v697_v61 = vmul.f32 %v971_v58, %v665_v28 }
 0x320   : > { %720 = vst.msk [vmem:[%s374_s8] sm:$0xff] %vm390_vm0, %v716_v59  ;;  %v708_v62 = vmul.f32 %v862_v53, %v698_v60 }
 0x321   : > { %v973_v63 = vpop.eup %972  ;;  %v707_v0 = vmul.f32 %v862_v53, %v697_v61 }
 0x322   : > { %v718_v1 = vadd.f32 %v863_v55, %v708_v62  ;;  %v699_v2 = vmul.f32 %v973_v63, %v667_v35 }
 0x323   : > { %v717_v3 = vadd.f32 %v863_v55, %v707_v0 }
 0x324   : > { %722 = vst.msk [vmem:[%s374_s8 + $0x10] sm:$0xff] %vm390_vm0, %v718_v1  ;;  %v709_v4 = vmul.f32 %v862_v53, %v699_v2 }
 0x325   : > { %721 = vst.msk [vmem:[%s374_s8 + $0x8] sm:$0xff] %vm390_vm0, %v717_v3 }
 0x326   : > { %v719_v6 = vadd.f32 %v863_v55, %v709_v4 }
 0x328   : > { %723 = vst.msk [vmem:[%s374_s8 + $0x18] sm:$0xff] %vm390_vm0, %v719_v6 }
 0x329 PF: > { %s17_s24 = sadd.s32 1, %s980_s24  }
 0x32a   : > { %p14_p4 = scmp.ge.s32.totalorder %s17_s24, 4  }
 0x32c   :  { %16 = sbr.rel (!%p14_p4) target bundleno = 1 (0x1), region = 96 }

// kernel: _lambda_.31
= control target key start
LH: loop header
LB: loop body
LE: loop exit
PB: predicated region body
PF: predicated region fallthrough
CT: control target
= control target key end

     0   :  { %s415_s12 = smov 0   ;;  %s459_s0 = inlined_call_operand.vmem [shape: f32[2,32,32], index: 0, kind: input, shape index: {}]   ;;  %s460_s1 = inlined_call_operand.vmem [shape: f32[2,1,32], index: 1, kind: input, shape index: {}]   ;;  %s461_s2 = inlined_call_operand.vmem [shape: f32[2,1,32], index: 2, kind: input, shape index: {}]   ;;  %s462_s3 = inlined_call_operand.vmem [shape: f32[2,32,32], index: 3, kind: output, shape index: {}]  }
   0x1 LB: > { %s356_s13 = sadd.s32 4294967295, %s393_s12   ;;  %p360_p0 = scmp.ge.s32.totalorder %s393_s12, 1  ;;  %s393_s12 = sphi %s415_s12, %s13_s12  }
   0x2   : > { %p153_p1 = scmp.lt.s32.totalorder %s393_s12, 3 }
   0x4   : > { %p154_p2 = pnand %p360_p0, %p153_p1 }
   0x5   : > { %p183_p3 = scmp.lt.s32.totalorder (!%p154_p2), %s356_s13, 1  ;;  %vm205_vm0 = vcmask (!%p154_p2), 261120  }
   0x6   : > { %157 = sbr.rel (%p154_p2) target bundleno = 339 (0x153), region = 32 }
   0xd   : > { %s464_s13 = smov (!%p183_p3, %s356_s13), 1 }
   0xe   : > { %s369_s14 = sshll.u32 %s464_s13, 5  ;;  %s190_s20 = scalar_lea.vmem %s460_s1, %s464_s13 }
   0xf   : > { %s187_s17 = scalar_lea.vmem %s459_s0, %s369_s14  ;;  %s193_s23 = scalar_lea.vmem %s461_s2, %s464_s13  ;;  %v365_v41 = vld [vmem:[%s190_s20] ss:$0 sm:$0xff] }
  0x10   : > { %v199_v0 = vld [vmem:[%s187_s17] sm:$0xff]  ;;  %v201_v1 = vld [vmem:[%s187_s17 + $0x10] sm:$0xff]  ;;  %v200_v4 = vld [vmem:[%s187_s17 + $0x8] sm:$0xff]  ;;  %s198_s26 = scalar_lea.vmem %s462_s3, %s369_s14 }
  0x11   : > { %v206_v2 = vsel %vm205_vm0, %v199_v0, 0.0  ;;  %v212_v3 = vsel %vm205_vm0, %v201_v1, 0.0  ;;  %v202_v5 = vld [vmem:[%s187_s17 + $0x18] sm:$0xff]  ;;  %v209_v6 = vsel %vm205_vm0, %v200_v4, 0.0  ;;  %v366_v43 = vld [vmem:[%s193_s23] ss:$0 sm:$0xff] }
  0x12   : > { %207 = vadd.xlane.f32.xlu0 %v206_v2  ;;  %213 = vadd.xlane.f32.xlu1 %v212_v3  ;;  %v215_v7 = vsel %vm205_vm0, %v202_v5, 0.0 }
  0x16   : > { %210 = vadd.xlane.f32.xlu0 %v209_v6  ;;  %216 = vadd.xlane.f32.xlu1 %v215_v7 }
  0x9f   : > { %v208_v8 = vpop.xlane.xlu0 %207  ;;  %v214_v9 = vpop.xlane.xlu1 %213 }
  0xa0   : > { %v219_v10 = vmul.f32 0.03125, %v208_v8  ;;  %v221_v11 = vmul.f32 0.03125, %v214_v9 }
  0xa2   : > { %v223_v12 = vsub.f32 %v199_v0, %v219_v10  ;;  %v225_v13 = vsub.f32 %v201_v1, %v221_v11 }
  0xa3   : > { %v211_v14 = vpop.xlane.xlu0 %210  ;;  %v217_v15 = vpop.xlane.xlu1 %216 }
  0xa4   : > { %v220_v16 = vmul.f32 0.03125, %v211_v14  ;;  %v222_v17 = vmul.f32 0.03125, %v217_v15  ;;  %v227_v18 = vmul.f32 %v223_v12, %v223_v12  ;;  %v229_v19 = vmul.f32 %v225_v13, %v225_v13 }
  0xa6   : > { %v224_v20 = vsub.f32 %v200_v4, %v220_v16  ;;  %v226_v21 = vsub.f32 %v202_v5, %v222_v17  ;;  %v231_v22 = vsel %vm205_vm0, %v227_v18, 0.0  ;;  %v237_v23 = vsel %vm205_vm0, %v229_v19, 0.0 }
  0xa7   : > { %232 = vadd.xlane.f32.xlu0 %v231_v22 }
  0xa8   : > { %v228_v24 = vmul.f32 %v224_v20, %v224_v20  ;;  %v230_v25 = vmul.f32 %v226_v21, %v226_v21 }
  0xaa   : > { %v234_v26 = vsel %vm205_vm0, %v228_v24, 0.0  ;;  %v240_v27 = vsel %vm205_vm0, %v230_v25, 0.0 }
  0xab   : > { %238 = vadd.xlane.f32.xlu0 %v237_v23  ;;  %235 = vadd.xlane.f32.xlu1 %v234_v26 }
  0xaf   : > { %241 = vadd.xlane.f32.xlu1 %v240_v27 }
 0x134   : > { %v233_v28 = vpop.xlane.xlu0 %232 }
 0x135   : > { %v243_v29 = vmul.f32 0.03125, %v233_v28 }
 0x137   : > { %v247_v30 = vadd.f32 1e-05, %v243_v29 }
 0x138   : > { %v236_v31 = vpop.xlane.xlu1 %235  ;;  %v239_v32 = vpop.xlane.xlu0 %238 }
 0x139   : > { %379 = vrsqrt.f32 %v247_v30  ;;  %v244_v33 = vmul.f32 0.03125, %v236_v31  ;;  %v245_v34 = vmul.f32 0.03125, %v239_v32 }
 0x13b   : > { %v248_v35 = vadd.f32 1e-05, %v244_v33  ;;  %v249_v36 = vadd.f32 1e-05, %v245_v34 }
 0x13c   : > { %v242_v37 = vpop.xlane.xlu1 %241 }
 0x13d   : > { %381 = vrsqrt.f32 %v248_v35  ;;  %v246_v38 = vmul.f32 0.03125, %v242_v37 }
 0x13e   : > { %383 = vrsqrt.f32 %v249_v36 }
 0x13f   : > { %v250_v39 = vadd.f32 1e-05, %v246_v38 }
 0x141   : > { %385 = vrsqrt.f32 %v250_v39 }
 0x143   : > { %v380_v40 = vpop.eup %379 }
 0x144   : > { %v255_v42 = vmul.f32 %v380_v40, %v223_v12 }
 0x146   : > { %v265_v44 = vmul.f32 %v365_v41, %v255_v42 }
 0x147   : > { %v382_v45 = vpop.eup %381 }
 0x148   : > { %v384_v46 = vpop.eup %383  ;;  %v275_v47 = vadd.f32 %v366_v43, %v265_v44  ;;  %v256_v48 = vmul.f32 %v382_v45, %v224_v20 }
 0x149   : > { %v257_v49 = vmul.f32 %v384_v46, %v225_v13 }
 0x14a   : > { %279 = vst.msk [vmem:[%s198_s26] sm:$0xff] %vm205_vm0, %v275_v47  ;;  %v266_v50 = vmul.f32 %v365_v41, %v256_v48 }
 0x14b   : > { %v386_v51 = vpop.eup %385  ;;  %v267_v52 = vmul.f32 %v365_v41, %v257_v49 }
 0x14c   : > { %v276_v53 = vadd.f32 %v366_v43, %v266_v50  ;;  %v258_v54 = vmul.f32 %v386_v51, %v226_v21 }
 0x14d   : > { %v277_v55 = vadd.f32 %v366_v43, %v267_v52 }
 0x14e   : > { %280 = vst.msk [vmem:[%s198_s26 + $0x8] sm:$0xff] %vm205_vm0, %v276_v53  ;;  %v268_v56 = vmul.f32 %v365_v41, %v258_v54 }
 0x14f   : > { %281 = vst.msk [vmem:[%s198_s26 + $0x10] sm:$0xff] %vm205_vm0, %v277_v55 }
 0x150   : > { %v278_v57 = vadd.f32 %v366_v43, %v268_v56 }
 0x152   : > { %282 = vst.msk [vmem:[%s198_s26 + $0x18] sm:$0xff] %vm205_vm0, %v278_v57 }
 0x153 PF: > { %s13_s12 = sadd.s32 1, %s393_s12  }
 0x154   : > { %p10_p4 = scmp.ge.s32.totalorder %s13_s12, 4  }
 0x156   :  { %12 = sbr.rel (!%p10_p4) target bundleno = 1 (0x1), region = 68 }

// kernel: _lambda_.39
= control target key start
LH: loop header
LB: loop body
LE: loop exit
PB: predicated region body
PF: predicated region fallthrough
CT: control target
= control target key end

     0   :  { %s1120_s21 = smov 0   ;;  %s1230_s0 = inlined_call_operand.vmem [shape: f32[2,16,32], index: 0, kind: input, shape index: {}]   ;;  %s1231_s1 = inlined_call_operand.vmem [shape: f32[2,16,32], index: 1, kind: input, shape index: {}]   ;;  %s1232_s2 = inlined_call_operand.vmem [shape: f32[1,32], index: 2, kind: input, shape index: {}, may-alias: {2,4}]   ;;  %s1233_s3 = inlined_call_operand.vmem [shape: f32[1,32], index: 3, kind: input, shape index: {}, may-alias: {3,5,9}]   ;;  %s1234_s4 = inlined_call_operand.vmem [shape: f32[1,32], index: 4, kind: input, shape index: {}, may-alias: {2,4}]   ;;  %s1235_s5 = inlined_call_operand.vmem [shape: f32[1,32], index: 5, kind: input, shape index: {}, may-alias: {3,5,9}]   ;;  %s1236_s6 = inlined_call_operand.vmem [shape: f32[32,64], index: 6, kind: input, shape index: {}]   ;;  %s1237_s7 = inlined_call_operand.vmem [shape: f32[1,64], index: 7, kind: input, shape index: {}]   ;;  %s1238_s8 = inlined_call_operand.vmem [shape: f32[64,32], index: 8, kind: input, shape index: {}]   ;;  %s1239_s9 = inlined_call_operand.vmem [shape: f32[1,32], index: 9, kind: input, shape index: {}, may-alias: {3,5,9}]   ;;  %s1240_s10 = inlined_call_operand.vmem [shape: f32[32,4], index: 10, kind: input, shape index: {}]   ;;  %s1241_s11 = inlined_call_operand.vmem [shape: f32[1,4], index: 11, kind: input, shape index: {}]   ;;  %s1242_s12 = inlined_call_operand.vmem [shape: f32[2,16,4], index: 12, kind: output, shape index: {}]  }
   0x1 LB: > { %s903_s22 = sadd.s32 4294967295, %s1053_s21   ;;  %p907_p0 = scmp.ge.s32.totalorder %s1053_s21, 1  ;;  %s1053_s21 = sphi %s1120_s21, %s22_s21  }
   0x2   : > { %p372_p1 = scmp.lt.s32.totalorder %s1053_s21, 3 }
   0x4   : > { %p373_p2 = pnand %p907_p0, %p372_p1 }
   0x5   : > { %p419_p3 = scmp.lt.s32.totalorder (!%p373_p2), %s903_s22, 1  ;;  %vm438_vm0 = vcmask (!%p373_p2), 261120   ;;  %v530_v28 = vld [vmem:[%s1236_s6] sm:$0xff] (!%p373_p2)  ;;  %v531_v29 = vld [vmem:[%s1236_s6 + $0x8] sm:$0xff] (!%p373_p2)  ;;  %v532_v30 = vld [vmem:[%s1236_s6 + $0x10] sm:$0xff] (!%p373_p2)  ;;  %vm648_vm1 = vcmask (!%p373_p2), 523264  }
   0x6   : > { %376 = sbr.rel (%p373_p2) target bundleno = 1017 (0x3f9), region = 68  ;;  %v995_v31 = vpack.c.bf16 (!%p373_p2), %v531_v29, %v530_v28  ;;  %v533_v32 = vld [vmem:[%s1236_s6 + $0x18] sm:$0xff] (!%p373_p2)  ;;  %v914_v48 = vld [vmem:[%s1232_s2] ss:$0 sm:$0xff] (!%p373_p2)  ;;  %vm833_vm2 = vcmask (!%p373_p2), 31744  }
   0x7   : > { %v999_v33 = vpack.c.bf16 (!%p373_p2), %v533_v32, %v532_v30  ;;  %v916_v50 = vld [vmem:[%s1234_s4] ss:$0 sm:$0xff] (!%p373_p2) }
   0x8   : > { %996 = vmatprep.subr.bf16.mxu0 (!%p373_p2), %v995_v31  ;;  %v915_v54 = vld [vmem:[%s1233_s3] ss:$0 sm:$0xff] (!%p373_p2) }
   0x9   : > { %998 = vmatpush3.bf16.msra.mxu0 (!%p373_p2), %v995_v31  ;;  %v917_v56 = vld [vmem:[%s1235_s5] ss:$0 sm:$0xff] (!%p373_p2) }
   0xa   : > { %1000 = vmatprep.subr.bf16.mxu0 (!%p373_p2), %v999_v33 }
   0xd   : > { %s1244_s22 = smov (!%p419_p3, %s903_s22), 1  ;;  %1002 = vmatpush3.bf16.msra.mxu0 %v999_v33 }
   0xe   : > { %s1128_s23 = sshll.u32 %s1244_s22, 4 }
   0xf   : > { %s423_s26 = scalar_lea.vmem %s1230_s0, %s1128_s23  ;;  %s428_s29 = scalar_lea.vmem %s1231_s1, %s1128_s23 }
  0x10   : > { %v434_v0 = vld [vmem:[%s423_s26] sm:$0xff]  ;;  %v435_v1 = vld [vmem:[%s423_s26 + $0x8] sm:$0xff]  ;;  %s433_s30 = scalar_lea.vmem %s1242_s12, %s1128_s23 }
  0x11   : > { %v439_v2 = vsel %vm438_vm0, %v434_v0, 0.0  ;;  %v442_v3 = vsel %vm438_vm0, %v435_v1, 0.0  ;;  %v482_v4 = vld [vmem:[%s428_s29] sm:$0xff]  ;;  %v483_v5 = vld [vmem:[%s428_s29 + $0x8] sm:$0xff] }
  0x12   : > { %440 = vadd.xlane.f32.xlu0 %v439_v2  ;;  %443 = vadd.xlane.f32.xlu1 %v442_v3  ;;  %v486_v6 = vsel %vm438_vm0, %v482_v4, 0.0  ;;  %v489_v7 = vsel %vm438_vm0, %v483_v5, 0.0 }
  0x16   : > { %487 = vadd.xlane.f32.xlu0 %v486_v6  ;;  %490 = vadd.xlane.f32.xlu1 %v489_v7  ;;  %v642_v6 = vld [vmem:[%s1238_s8 + $0x10] sm:$0xff] }
  0x9f   : > { %v441_v8 = vpop.xlane.xlu0 %440  ;;  %v444_v9 = vpop.xlane.xlu1 %443 }
  0xa0   : > { %v446_v10 = vmul.f32 0.03125, %v441_v8  ;;  %v447_v11 = vmul.f32 0.03125, %v444_v9  ;;  %v643_v8 = vld [vmem:[%s1238_s8 + $0x18] sm:$0xff] }
  0xa1   : > { %v1007_v9 = vpack.c.bf16 %v643_v8, %v642_v6 }
  0xa2   : > { %v448_v12 = vsub.f32 %v434_v0, %v446_v10  ;;  %v449_v13 = vsub.f32 %v435_v1, %v447_v11  ;;  %v644_v10 = vld [vmem:[%s1238_s8 + $0x20] sm:$0xff]  ;;  %v645_v11 = vld [vmem:[%s1238_s8 + $0x28] sm:$0xff] }
  0xa3   : > { %v488_v14 = vpop.xlane.xlu0 %487  ;;  %v491_v15 = vpop.xlane.xlu1 %490 }
  0xa4   : > { %v492_v16 = vmul.f32 0.03125, %v488_v14  ;;  %v493_v17 = vmul.f32 0.03125, %v491_v15  ;;  %v450_v18 = vmul.f32 %v448_v12, %v448_v12  ;;  %v451_v19 = vmul.f32 %v449_v13, %v449_v13  ;;  %v647_v14 = vld [vmem:[%s1238_s8 + $0x38] sm:$0xff] }
  0xa6   : > { %v494_v20 = vsub.f32 %v482_v4, %v492_v16  ;;  %v495_v21 = vsub.f32 %v483_v5, %v493_v17  ;;  %v452_v22 = vsel %vm438_vm0, %v450_v18, 0.0  ;;  %v455_v23 = vsel %vm438_vm0, %v451_v19, 0.0  ;;  %v640_v4 = vld [vmem:[%s1238_s8] sm:$0xff]  ;;  %v641_v5 = vld [vmem:[%s1238_s8 + $0x8] sm:$0xff] }
  0xa7   : > { %453 = vadd.xlane.f32.xlu0 %v452_v22  ;;  %v1003_v7 = vpack.c.bf16 %v641_v5, %v640_v4  ;;  %v741_v16 = vld [vmem:[%s1240_s10] sm:$0xff]  ;;  %v742_v17 = vld [vmem:[%s1240_s10 + $0x8] sm:$0xff] }
  0xa8   : > { %v496_v24 = vmul.f32 %v494_v20, %v494_v20  ;;  %v497_v25 = vmul.f32 %v495_v21, %v495_v21  ;;  %v1019_v18 = vpack.c.bf16 %v742_v17, %v741_v16  ;;  %v918_v19 = vld [vmem:[%s1237_s7] ss:$0 sm:$0xff] }
  0xa9   : > { %1004 = vmatprep.subr.bf16.mxu1 %v1003_v7 }
  0xaa   : > { %v498_v26 = vsel %vm438_vm0, %v496_v24, 0.0  ;;  %v501_v27 = vsel %vm438_vm0, %v497_v25, 0.0  ;;  %1006 = vmatpush3.bf16.msra.mxu1 %v1003_v7  ;;  %1020 = vmatprep.subr.bf16.mxu0 %v1019_v18 }
  0xab   : > { %456 = vadd.xlane.f32.xlu0 %v455_v23  ;;  %499 = vadd.xlane.f32.xlu1 %v498_v26 }
  0xac   : > { %1008 = vmatprep.subr.bf16.mxu1 %v1007_v9 }
  0xae   : > { %1010 = vmatpush3.bf16.msra.mxu1 %v1007_v9 }
  0xaf   : > { %502 = vadd.xlane.f32.xlu1 %v501_v27 }
 0x134   : > { %v454_v34 = vpop.xlane.xlu0 %453 }
 0x135   : > { %v458_v35 = vmul.f32 0.03125, %v454_v34 }
 0x137   : > { %v460_v36 = vadd.f32 1e-05, %v458_v35 }
 0x138   : > { %v500_v37 = vpop.xlane.xlu1 %499  ;;  %v457_v38 = vpop.xlane.xlu0 %456 }
 0x139   : > { %1035 = vrsqrt.f32 %v460_v36  ;;  %v504_v39 = vmul.f32 0.03125, %v500_v37  ;;  %v459_v40 = vmul.f32 0.03125, %v457_v38 }
 0x13b   : > { %v506_v41 = vadd.f32 1e-05, %v504_v39  ;;  %v461_v42 = vadd.f32 1e-05, %v459_v40 }
 0x13c   : > { %v503_v43 = vpop.xlane.xlu1 %502 }
 0x13d   : > { %1037 = vrsqrt.f32 %v506_v41  ;;  %v505_v44 = vmul.f32 0.03125, %v503_v43  ;;  %v744_v43 = vld [vmem:[%s1240_s10 + $0x18] sm:$0xff] }
 0x13e   : > { %1039 = vrsqrt.f32 %v461_v42  ;;  %v743_v42 = vld [vmem:[%s1240_s10 + $0x10] sm:$0xff] }
 0x13f   : > { %v507_v45 = vadd.f32 1e-05, %v505_v44  ;;  %v1023_v44 = vpack.c.bf16 %v744_v43, %v743_v42 }
 0x141   : > { %1041 = vrsqrt.f32 %v507_v45 }
 0x143   : > { %v1036_v46 = vpop.eup %1035 }
 0x144   : > { %v464_v47 = vmul.f32 %v1036_v46, %v448_v12  ;;  %v1011_v12 = vpack.c.bf16 %v645_v11, %v644_v10 }
 0x146   : > { %v472_v52 = vmul.f32 %v914_v48, %v464_v47  ;;  %1012 = vmatprep.subr.bf16.mxu1 %v1011_v12  ;;  %v923_v47 = vld [vmem:[%s1239_s9] ss:$0 sm:$0xff] }
 0x147   : > { %v1038_v49 = vpop.eup %1037  ;;  %1014 = vmatpush3.bf16.msra.mxu1 %v1011_v12 }
 0x148   : > { %v1040_v51 = vpop.eup %1039  ;;  %v510_v53 = vmul.f32 %v1038_v49, %v494_v20  ;;  %v480_v60 = vadd.f32 %v915_v54, %v472_v52  ;;  %v924_v52 = vld [vmem:[%s1241_s11] ss:$0 sm:$0xff] }
 0x149   : > { %v465_v55 = vmul.f32 %v1040_v51, %v449_v13  ;;  %v646_v13 = vld [vmem:[%s1238_s8 + $0x30] sm:$0xff] }
 0x14a   : > { %v518_v57 = vmul.f32 %v916_v50, %v510_v53  ;;  %v1015_v15 = vpack.c.bf16 %v647_v14, %v646_v13 }
 0x14b   : > { %v1042_v58 = vpop.eup %1041  ;;  %v473_v59 = vmul.f32 %v914_v48, %v465_v55 }
 0x14c   : > { %v511_v61 = vmul.f32 %v1042_v58, %v495_v21  ;;  %v526_v62 = vadd.f32 %v917_v56, %v518_v57  ;;  %1016 = vmatprep.subr.bf16.mxu1 %v1015_v15 }
 0x14d   : > { %v481_v1 = vadd.f32 %v915_v54, %v473_v59  ;;  %1018 = vmatpush3.bf16.msra.mxu1 %v1015_v15 }
 0x14e   : > { %v519_v63 = vmul.f32 %v916_v50, %v511_v61  ;;  %v1170_v0 = vadd.f32 %v526_v62, %v480_v60 }
 0x150   : > { %v527_v2 = vadd.f32 %v917_v56, %v519_v63  ;;  %962 = vmatprep.mubr.msk.f32.mxu0 %vm438_vm0, %v1170_v0 }
 0x152   : > { %v529_v3 = vadd.f32 %v527_v2, %v481_v1 }
 0x154   : > { %963 = vmatmul.mubr.msk.f32.vlgmr.msra.gmra.mrb[0].mxu0 %vm438_vm0, %v529_v3 }
 0x155   : > { %1022 = vmatpush3.bf16.msra.mxu0 %v1019_v18 }
 0x156   : > { %1024 = vmatprep.subr.bf16.mxu0 %v1023_v44 }
 0x159   : > { %1026 = vmatpush3.bf16.msra.mxu0 %v1023_v44 }
 0x227   : > { %v964_v20 = vpop.f32.mrb[0].mxu0 }
 0x228   : > { %v619_v21 = vadd.f32 %v964_v20, %v918_v19  ;;  %v613_v22 = vpop.f32.mrb[1].mxu0 }
 0x229   : > { %v614_v23 = vadd.f32 %v918_v19, %v613_v22 }
 0x22a   : > { %v623_v24 = vmul.f32 %v619_v21, %v619_v21 }
 0x22b   : > { %v622_v25 = vmul.f32 %v614_v23, %v614_v23 }
 0x22c   : > { %v625_v26 = vmul.f32 %v623_v24, %v619_v21 }
 0x22d   : > { %v624_v27 = vmul.f32 %v622_v25, %v614_v23 }
 0x22e   : > { %v627_v28 = vmul.f32 0.044715, %v625_v26 }
 0x22f   : > { %v626_v29 = vmul.f32 0.044715, %v624_v27 }
 0x230   : > { %v629_v30 = vadd.f32 %v627_v28, %v619_v21 }
 0x231   : > { %v628_v31 = vadd.f32 %v626_v29, %v614_v23 }
 0x232   : > { %v631_v32 = vmul.f32 0.7978846, %v629_v30 }
 0x233   : > { %v630_v33 = vmul.f32 0.7978846, %v628_v31 }
 0x234   : > { %1043 = vtanh.f32 %v631_v32 }
 0x235   : > { %1045 = vtanh.f32 %v630_v33 }
 0x23e   : > { %v1044_v34 = vpop.eup %1043 }
 0x23f   : > { %v1046_v35 = vpop.eup %1045  ;;  %v635_v36 = vadd.f32 1.0, %v1044_v34 }
 0x240   : > { %v634_v37 = vadd.f32 1.0, %v1046_v35 }
 0x241   : > { %v637_v38 = vmul.f32 0.5, %v635_v36 }
 0x242   : > { %v636_v39 = vmul.f32 0.5, %v634_v37 }
 0x243   : > { %v639_v41 = vmul.f32 %v637_v38, %v619_v21 }
 0x244   : > { %v638_v40 = vmul.f32 %v636_v39, %v614_v23 }
 0x246   : > { %981 = vmatprep.mubr.msk.f32.mxu1 %vm648_vm1, %v638_v40 }
 0x247   : > { %982 = vmatmul.mubr.msk.f32.vlgmr.msra.gmra.mrb[0].mxu1 %vm648_vm1, %v639_v41 }
 0x31a   : > { %v983_v45 = vpop.f32.mrb[0].mxu1 }
 0x31b   : > { %v731_v46 = vadd.f32 %v983_v45, %v529_v3  ;;  %v721_v48 = vpop.f32.mrb[1].mxu1 }
 0x31c   : > { %v730_v49 = vadd.f32 %v721_v48, %v1170_v0 }
 0x31d   : > { %v740_v51 = vadd.f32 %v923_v47, %v731_v46 }
 0x31e   : > { %v739_v50 = vadd.f32 %v923_v47, %v730_v49 }
 0x320   : > { %992 = vmatprep.mubr.msk.f32.mxu0 %vm438_vm0, %v739_v50 }
 0x321   : > { %993 = vmatmul.mubr.msk.f32.vlgmr.msra.gmra.mrb[2].mxu0 %vm438_vm0, %v740_v51 }
 0x3f4   : > { %v994_v53 = vpop.f32.mrb[2].mxu0 }
 0x3f5   : > { %v830_v54 = vadd.f32 %v994_v53, %v924_v52  ;;  %v824_v55 = vpop.f32.mrb[3].mxu0 }
 0x3f6   : > { %v825_v56 = vadd.f32 %v924_v52, %v824_v55 }
 0x3f7   : > { %835 = vst.msk [vmem:[%s433_s30 + $0x8] sm:$0xff] %vm833_vm2, %v830_v54 }
 0x3f8   : > { %834 = vst.msk [vmem:[%s433_s30] sm:$0xff] %vm833_vm2, %v825_v56 }
 0x3f9 PF: > { %s22_s21 = sadd.s32 1, %s1053_s21  }
 0x3fa   : > { %p19_p4 = scmp.ge.s32.totalorder %s22_s21, 4  }
 0x3fc   :  { %21 = sbr.rel (!%p19_p4) target bundleno = 1 (0x1), region = 101 }

</bundles_post_ra>
